<compile_context>
chip_gen: v7x
topology: tpu7x:2x2x1
jax: 0.10.0
libtpu: 0.0.40
codegen_flags: <defaults>
</compile_context>

<pallas_src>
import math

import jax
import jax.numpy as jnp
from jax import lax
from jax.experimental import pallas as pl
from jax.experimental.pallas import tpu as pltpu


def _sigmoid(x):
    # One EUP op (tanh) instead of exp + f32 divide.
    return 0.5 * jnp.tanh(0.5 * x) + 0.5


def _round_up(x, m):
    return (x + m - 1) // m * m


def _pick_time_chunk(T, cap=32):
    """Largest divisor of T that is <= cap (keeps the per-chunk gx scratch small)."""
    best = 1
    for tc in range(1, min(T, cap) + 1):
        if T % tc == 0:
            best = tc
    return best


# ------------------------------ fused layer kernel --------------------------

def _make_layer_kernel(n_parts, Tc, Bp, H):
    G = 4 * H

    def kernel(*args):
        i0 = 0
        xf = args[i0:i0 + n_parts]; i0 += n_parts       # fwd x chunk parts
        xb = args[i0:i0 + n_parts]; i0 += n_parts       # bwd x chunk parts
        wf = args[i0:i0 + n_parts]; i0 += n_parts       # W_ih fwd parts (bf16)
        wb = args[i0:i0 + n_parts]; i0 += n_parts       # W_ih bwd parts (bf16)
        whh_f_ref, whh_b_ref, b_f_ref, b_b_ref = args[i0:i0 + 4]; i0 += 4
        out_f_ref, out_b_ref = args[i0:i0 + 2]; i0 += 2
        gxf_sc, gxb_sc, hf_sc, cf_sc, hb_sc, cb_sc = args[i0:i0 + 6]

        ci = pl.program_id(0)

        @pl.when(ci == 0)
        def _():
            hf_sc[...] = jnp.zeros_like(hf_sc)
            cf_sc[...] = jnp.zeros_like(cf_sc)
            hb_sc[...] = jnp.zeros_like(hb_sc)
            cb_sc[...] = jnp.zeros_like(cb_sc)

        # ---- chunk-level input projection: one wide MXU pass per direction,
        # bf16 operands, f32 accumulation, bias folded in. --------------------
        def proj(x_refs, w_refs, b_ref):
            acc = jnp.dot(x_refs[0][...].astype(jnp.bfloat16), w_refs[0][...],
                          preferred_element_type=jnp.float32)
            for p in range(1, n_parts):
                acc = acc + jnp.dot(x_refs[p][...].astype(jnp.bfloat16),
                                    w_refs[p][...],
                                    preferred_element_type=jnp.float32)
            return acc + b_ref[...]

        # (Tc*Bp, G) -> (Tc, Bp, G) is layout-preserving because Bp % 8 == 0.
        gxf_sc[...] = proj(xf, wf, b_f_ref).reshape(Tc, Bp, G)
        gxb_sc[...] = proj(xb, wb, b_b_ref).reshape(Tc, Bp, G)

        # ---- sequential recurrence over the Tc timesteps of this chunk ------
        def cell(gates, c_prev):
            i = _sigmoid(gates[:, 0 * H:1 * H])
            f = _sigmoid(gates[:, 1 * H:2 * H])
            g = jnp.tanh(gates[:, 2 * H:3 * H])
            o = _sigmoid(gates[:, 3 * H:4 * H])
            c_new = f * c_prev + i * g
            h_new = o * jnp.tanh(c_new)
            return h_new, c_new

        def step(j, carry):
            h_f, c_f, h_b, c_b = carry
            r = Tc - 1 - j          # backward direction walks the chunk reversed
            g_f = gxf_sc[j] + jnp.dot(h_f.astype(jnp.bfloat16), whh_f_ref[...],
                                      preferred_element_type=jnp.float32)
            g_b = gxb_sc[r] + jnp.dot(h_b.astype(jnp.bfloat16), whh_b_ref[...],
                                      preferred_element_type=jnp.float32)
            h_f, c_f = cell(g_f, c_f)
            h_b, c_b = cell(g_b, c_b)
            out_f_ref[j] = h_f
            out_b_ref[r] = h_b
            return h_f, c_f, h_b, c_b

        carry0 = (hf_sc[...], cf_sc[...], hb_sc[...], cb_sc[...])
        unroll = True if Tc <= 8 else 4
        h_f, c_f, h_b, c_b = lax.fori_loop(0, Tc, step, carry0, unroll=unroll)

        # carry the recurrent state to the next chunk (stays in VMEM)
        hf_sc[...] = h_f
        cf_sc[...] = c_f
        hb_sc[...] = h_b
        cb_sc[...] = c_b

    return kernel


def _fused_bilstm_layer(x_parts, wih_f_parts, wih_b_parts,
                        whh_f, whh_b, b_f, b_b, *, T, Bp, H, Tc):
    """One bidirectional LSTM layer in a single pallas_call.

    x_parts: list of 2D (T*Bp, Din_p) feature parts of the layer input.
    Returns (h_fwd, h_bwd), each (T, Bp, H) float32 in natural time order.
    """
    nc = T // Tc
    n_parts = len(x_parts)
    G = 4 * H
    kernel = _make_layer_kernel(n_parts, Tc, Bp, H)

    fwd_chunk = lambda c: (c, 0)
    bwd_chunk = lambda c: (nc - 1 - c, 0)
    const2 = lambda c: (0, 0)

    in_specs = []
    for xp in x_parts:                                     # forward-time chunks
        in_specs.append(pl.BlockSpec((Tc * Bp, xp.shape[1]), fwd_chunk))
    for xp in x_parts:                                     # backward-time chunks
        in_specs.append(pl.BlockSpec((Tc * Bp, xp.shape[1]), bwd_chunk))
    for w in list(wih_f_parts) + list(wih_b_parts):        # resident weights
        in_specs.append(pl.BlockSpec(w.shape, const2))
    in_specs += [pl.BlockSpec(whh_f.shape, const2),
                 pl.BlockSpec(whh_b.shape, const2),
                 pl.BlockSpec(b_f.shape, const2),
                 pl.BlockSpec(b_b.shape, const2)]

    out_specs = (pl.BlockSpec((Tc, Bp, H), lambda c: (c, 0, 0)),
                 pl.BlockSpec((Tc, Bp, H), lambda c: (nc - 1 - c, 0, 0)))
    out_shape = (jax.ShapeDtypeStruct((T, Bp, H), jnp.float32),
                 jax.ShapeDtypeStruct((T, Bp, H), jnp.float32))

    scratch_shapes = [
        pltpu.VMEM((Tc, Bp, G), jnp.float32),   # gx fwd for this chunk
        pltpu.VMEM((Tc, Bp, G), jnp.float32),   # gx bwd for this chunk
        pltpu.VMEM((Bp, H), jnp.float32),       # h fwd
        pltpu.VMEM((Bp, H), jnp.float32),       # c fwd
        pltpu.VMEM((Bp, H), jnp.float32),       # h bwd
        pltpu.VMEM((Bp, H), jnp.float32),       # c bwd
    ]

    h_f, h_b = pl.pallas_call(
        kernel,
        out_shape=out_shape,
        grid=(nc,),
        in_specs=in_specs,
        out_specs=out_specs,
        scratch_shapes=scratch_shapes,
        compiler_params=pltpu.CompilerParams(
            dimension_semantics=("arbitrary",)),    # sequential recurrence
    )(*x_parts, *x_parts, *wih_f_parts, *wih_b_parts, whh_f, whh_b, b_f, b_b)
    return h_f, h_b


# --------------------------------- forward ----------------------------------

def bidirectional_lstm_forward(x, params):
    """x: (T, B, vector_dim) f32 -> (T, B, 2*hidden), like nn.LSTM output."""
    T, B, D = x.shape
    Bp = _round_up(B, 8)                    # pad batch to full sublanes
    if Bp != B:
        x = jnp.pad(x, ((0, 0), (0, Bp - B), (0, 0)))
    Tc = _pick_time_chunk(T)

    x_parts = [x.reshape(T * Bp, D)]        # 2D (T*Bp, Din_p) feature parts
    h_f = h_b = None
    for layer in params:
        H = layer['whh_f'].shape[0]
        # Split W_ih rows to match the input feature parts; this is what lets
        # the next layer consume (h_fwd, h_bwd) without a concatenate.
        sizes = [p.shape[1] for p in x_parts]
        wf_parts, wb_parts, off = [], [], 0
        for s in sizes:
            wf_parts.append(layer['wih_f'][off:off + s])
            wb_parts.append(layer['wih_b'][off:off + s])
            off += s
        h_f, h_b = _fused_bilstm_layer(
            x_parts, wf_parts, wb_parts,
            layer['whh_f'], layer['whh_b'], layer['b_f'], layer['b_b'],
            T=T, Bp=Bp, H=H, Tc=Tc)
        x_parts = [h_f.reshape(T * Bp, H), h_b.reshape(T * Bp, H)]

    out = jnp.concatenate([h_f, h_b], axis=-1)   # single concat, last layer only
    return out[:, :B, :]


# ---------------------------- pure-JAX reference ----------------------------

def _ref_scan(gx_seq, whh, H):
    def step(carry, gx):
        h, c = carry
        gates = gx + jnp.dot(h.astype(jnp.bfloat16), whh,
                             preferred_element_type=jnp.float32)
        i = _sigmoid(gates[:, 0 * H:1 * H])
        f = _sigmoid(gates[:, 1 * H:2 * H])
        g = jnp.tanh(gates[:, 2 * H:3 * H])
        o = _sigmoid(gates[:, 3 * H:4 * H])
        c = f * c + i * g
        h = o * jnp.tanh(c)
        return (h, c), h
    B = gx_seq.shape[1]
    init = (jnp.zeros((B, H), jnp.float32), jnp.zeros((B, H), jnp.float32))
    _, hs = lax.scan(step, init, gx_seq)
    return hs


def ref_bidirectional_lstm(x, params):
    out = x
    for layer in params:
        H = layer['whh_f'].shape[0]
        xb = out.astype(jnp.bfloat16)
        gx_f = jnp.dot(xb, layer['wih_f'],
                       preferred_element_type=jnp.float32) + layer['b_f']
        gx_b = jnp.dot(xb, layer['wih_b'],
                       preferred_element_type=jnp.float32) + layer['b_b']
        h_f = _ref_scan(gx_f, layer['whh_f'], H)
        h_b = _ref_scan(gx_b[::-1], layer['whh_b'], H)[::-1]
        out = jnp.concatenate([h_f, h_b], axis=-1)
    return out


# ----------------------------------- main ------------------------------------

if __name__ == "__main__":
    key = jax.random.PRNGKey(0)

    # layer_size=[128, 128] -> num_layers=2, hidden=128 (lane-aligned gates),
    # batch=4, vector_dim=32, seq_len=8.  Input layout (seq, batch, feature),
    # matching nn.LSTM's default batch_first=False.
    T, B, D = 8, 4, 32
    layer_size = [128, 128]
    H = layer_size[0]
    num_layers = len(layer_size)

    keys = jax.random.split(key, 1 + 8 * num_layers)
    inputs = jax.random.normal(keys[0], (T, B, D), jnp.float32)

    params = []
    kidx = 1
    din = D
    bound = 1.0 / math.sqrt(H)
    for _ in range(num_layers):
        def u(k, shape):
            return jax.random.uniform(k, shape, jnp.float32, -bound, bound)
        layer = {
            # PyTorch stores (4H, in); we use the transposed (in, 4H) layout,
            # gate order [i, f, g, o].  Bias = b_ih + b_hh folded, kept f32.
            # Matmul weights are stored bf16 (MXU-native on v5e/v6e/v7x).
            'wih_f': u(keys[kidx + 0], (din, 4 * H)).astype(jnp.bfloat16),
            'whh_f': u(keys[kidx + 1], (H, 4 * H)).astype(jnp.bfloat16),
            'b_f': u(keys[kidx + 2], (1, 4 * H)) + u(keys[kidx + 3], (1, 4 * H)),
            'wih_b': u(keys[kidx + 4], (din, 4 * H)).astype(jnp.bfloat16),
            'whh_b': u(keys[kidx + 5], (H, 4 * H)).astype(jnp.bfloat16),
            'b_b': u(keys[kidx + 6], (1, 4 * H)) + u(keys[kidx + 7], (1, 4 * H)),
        }
        kidx += 8
        params.append(layer)
        din = 2 * H

    fwd = jax.jit(bidirectional_lstm_forward)
    out = fwd(inputs, params)
    jax.block_until_ready(out)

    assert out.shape == (T, B, 2 * H), out.shape

    ref = ref_bidirectional_lstm(inputs, params)
    err = float(jnp.max(jnp.abs(out - ref)))
    assert err < 1e-2, f"max abs err {err}"

    print("KERNEL_OK")
</pallas_src>

<mosaic_0001>
module attributes {stable_mosaic.version = 11 : i64} {
  func.func @kernel(%arg0: i32, %arg1: memref<64x128xf32, #tpu.memory_space<vmem>>, %arg2: memref<64x128xf32, #tpu.memory_space<vmem>>, %arg3: memref<64x128xf32, #tpu.memory_space<vmem>>, %arg4: memref<64x128xf32, #tpu.memory_space<vmem>>, %arg5: memref<128x512xbf16, #tpu.memory_space<vmem>>, %arg6: memref<128x512xbf16, #tpu.memory_space<vmem>>, %arg7: memref<128x512xbf16, #tpu.memory_space<vmem>>, %arg8: memref<128x512xbf16, #tpu.memory_space<vmem>>, %arg9: memref<128x512xbf16, #tpu.memory_space<vmem>>, %arg10: memref<128x512xbf16, #tpu.memory_space<vmem>>, %arg11: memref<1x512xf32, #tpu.memory_space<vmem>>, %arg12: memref<1x512xf32, #tpu.memory_space<vmem>>, %arg13: memref<8x8x128xf32, #tpu.memory_space<vmem>>, %arg14: memref<8x8x128xf32, #tpu.memory_space<vmem>>, %arg15: memref<8x8x512xf32, #tpu.memory_space<vmem>>, %arg16: memref<8x8x512xf32, #tpu.memory_space<vmem>>, %arg17: memref<8x128xf32, #tpu.memory_space<vmem>>, %arg18: memref<8x128xf32, #tpu.memory_space<vmem>>, %arg19: memref<8x128xf32, #tpu.memory_space<vmem>>, %arg20: memref<8x128xf32, #tpu.memory_space<vmem>>) attributes {dimension_semantics = [#tpu.dimension_semantics<arbitrary>], iteration_bounds = array<i64: 1>, scalar_prefetch = 0 : i64, scratch_operands = 6 : i64, tpu.core_type = #tpu.core_type<tc>, window_params = [{transform_indices = @transform_0, window_bounds = array<i64: 64, 128>}, {transform_indices = @transform_1, window_bounds = array<i64: 64, 128>}, {transform_indices = @transform_2, window_bounds = array<i64: 64, 128>}, {transform_indices = @transform_3, window_bounds = array<i64: 64, 128>}, {pipeline_mode = #tpu.pipeline_mode<synchronous>, transform_indices = @transform_4, window_bounds = array<i64: 128, 512>}, {pipeline_mode = #tpu.pipeline_mode<synchronous>, transform_indices = @transform_5, window_bounds = array<i64: 128, 512>}, {pipeline_mode = #tpu.pipeline_mode<synchronous>, transform_indices = @transform_6, window_bounds = array<i64: 128, 512>}, {pipeline_mode = #tpu.pipeline_mode<synchronous>, transform_indices = @transform_7, window_bounds = array<i64: 128, 512>}, {pipeline_mode = #tpu.pipeline_mode<synchronous>, transform_indices = @transform_8, window_bounds = array<i64: 128, 512>}, {pipeline_mode = #tpu.pipeline_mode<synchronous>, transform_indices = @transform_9, window_bounds = array<i64: 128, 512>}, {pipeline_mode = #tpu.pipeline_mode<synchronous>, transform_indices = @transform_10, window_bounds = array<i64: 1, 512>}, {pipeline_mode = #tpu.pipeline_mode<synchronous>, transform_indices = @transform_11, window_bounds = array<i64: 1, 512>}, {transform_indices = @transform_12, window_bounds = array<i64: 8, 8, 128>}, {transform_indices = @transform_13, window_bounds = array<i64: 8, 8, 128>}]} {
    %c0_i32 = arith.constant 0 : i32
    %0 = arith.cmpi eq, %arg0, %c0_i32 : i32
    %1 = arith.extui %0 : i1 to i32
    %c0_i32_0 = arith.constant 0 : i32
    %2 = arith.cmpi ne, %1, %c0_i32_0 : i32
    scf.if %2 {
      %cst_310 = arith.constant 0.000000e+00 : f32
      %719 = vector.broadcast %cst_310 : f32 to vector<8x128xf32>
      %c0_311 = arith.constant 0 : index
      %c0_312 = arith.constant 0 : index
      %720 = vector.load %arg17[%c0_311, %c0_312] : memref<8x128xf32, #tpu.memory_space<vmem>>, vector<8x128xf32>
      tpu.vector_store %arg17[%c0_311, %c0_312], %719 {strides = array<i32>} : memref<8x128xf32, #tpu.memory_space<vmem>>, vector<8x128xf32>,
      %cst_313 = arith.constant 0.000000e+00 : f32
      %721 = vector.broadcast %cst_313 : f32 to vector<8x128xf32>
      %c0_314 = arith.constant 0 : index
      %c0_315 = arith.constant 0 : index
      %722 = vector.load %arg18[%c0_314, %c0_315] : memref<8x128xf32, #tpu.memory_space<vmem>>, vector<8x128xf32>
      tpu.vector_store %arg18[%c0_314, %c0_315], %721 {strides = array<i32>} : memref<8x128xf32, #tpu.memory_space<vmem>>, vector<8x128xf32>,
      %cst_316 = arith.constant 0.000000e+00 : f32
      %723 = vector.broadcast %cst_316 : f32 to vector<8x128xf32>
      %c0_317 = arith.constant 0 : index
      %c0_318 = arith.constant 0 : index
      %724 = vector.load %arg19[%c0_317, %c0_318] : memref<8x128xf32, #tpu.memory_space<vmem>>, vector<8x128xf32>
      tpu.vector_store %arg19[%c0_317, %c0_318], %723 {strides = array<i32>} : memref<8x128xf32, #tpu.memory_space<vmem>>, vector<8x128xf32>,
      %cst_319 = arith.constant 0.000000e+00 : f32
      %725 = vector.broadcast %cst_319 : f32 to vector<8x128xf32>
      %c0_320 = arith.constant 0 : index
      %c0_321 = arith.constant 0 : index
      %726 = vector.load %arg20[%c0_320, %c0_321] : memref<8x128xf32, #tpu.memory_space<vmem>>, vector<8x128xf32>
      tpu.vector_store %arg20[%c0_320, %c0_321], %725 {strides = array<i32>} : memref<8x128xf32, #tpu.memory_space<vmem>>, vector<8x128xf32>,
    } else {
    }
    %c0 = arith.constant 0 : index
    %c0_1 = arith.constant 0 : index
    %3 = vector.load %arg1[%c0, %c0_1] : memref<64x128xf32, #tpu.memory_space<vmem>>, vector<64x128xf32>
    %4 = arith.truncf %3 : vector<64x128xf32> to vector<64x128xbf16>
    %c0_2 = arith.constant 0 : index
    %c0_3 = arith.constant 0 : index
    %5 = vector.load %arg5[%c0_2, %c0_3] : memref<128x512xbf16, #tpu.memory_space<vmem>>, vector<128x512xbf16>
    %cst = arith.constant dense<0.000000e+00> : vector<64x512xf32>
    %6 = tpu.matmul %4, %5, %cst {dimension_numbers = #tpu.dot_dimension_numbers<[1], [0], [0], [1], [0, 0, 1, 1], [], []>} : vector<64x128xbf16>, vector<128x512xbf16>, vector<64x512xf32> -> vector<64x512xf32>
    %c0_4 = arith.constant 0 : index
    %c0_5 = arith.constant 0 : index
    %7 = vector.load %arg2[%c0_4, %c0_5] : memref<64x128xf32, #tpu.memory_space<vmem>>, vector<64x128xf32>
    %8 = arith.truncf %7 : vector<64x128xf32> to vector<64x128xbf16>
    %c0_6 = arith.constant 0 : index
    %c0_7 = arith.constant 0 : index
    %9 = vector.load %arg6[%c0_6, %c0_7] : memref<128x512xbf16, #tpu.memory_space<vmem>>, vector<128x512xbf16>
    %cst_8 = arith.constant dense<0.000000e+00> : vector<64x512xf32>
    %10 = tpu.matmul %8, %9, %cst_8 {dimension_numbers = #tpu.dot_dimension_numbers<[1], [0], [0], [1], [0, 0, 1, 1], [], []>} : vector<64x128xbf16>, vector<128x512xbf16>, vector<64x512xf32> -> vector<64x512xf32>
    %11 = arith.addf %6, %10 : vector<64x512xf32>
    %c0_9 = arith.constant 0 : index
    %c0_10 = arith.constant 0 : index
    %12 = vector.load %arg11[%c0_9, %c0_10] : memref<1x512xf32, #tpu.memory_space<vmem>>, vector<1x512xf32>
    %13 = vector.broadcast %12 : vector<1x512xf32> to vector<64x512xf32>
    %14 = arith.addf %11, %13 : vector<64x512xf32>
    %15 = vector.shape_cast %14 : vector<64x512xf32> to vector<8x8x512xf32>
    %c0_11 = arith.constant 0 : index
    %c0_12 = arith.constant 0 : index
    %c0_13 = arith.constant 0 : index
    %16 = vector.load %arg15[%c0_11, %c0_12, %c0_13] : memref<8x8x512xf32, #tpu.memory_space<vmem>>, vector<8x8x512xf32>
    tpu.vector_store %arg15[%c0_11, %c0_12, %c0_13], %15 {strides = array<i32>} : memref<8x8x512xf32, #tpu.memory_space<vmem>>, vector<8x8x512xf32>,
    %c0_14 = arith.constant 0 : index
    %c0_15 = arith.constant 0 : index
    %17 = vector.load %arg3[%c0_14, %c0_15] : memref<64x128xf32, #tpu.memory_space<vmem>>, vector<64x128xf32>
    %18 = arith.truncf %17 : vector<64x128xf32> to vector<64x128xbf16>
    %c0_16 = arith.constant 0 : index
    %c0_17 = arith.constant 0 : index
    %19 = vector.load %arg7[%c0_16, %c0_17] : memref<128x512xbf16, #tpu.memory_space<vmem>>, vector<128x512xbf16>
    %cst_18 = arith.constant dense<0.000000e+00> : vector<64x512xf32>
    %20 = tpu.matmul %18, %19, %cst_18 {dimension_numbers = #tpu.dot_dimension_numbers<[1], [0], [0], [1], [0, 0, 1, 1], [], []>} : vector<64x128xbf16>, vector<128x512xbf16>, vector<64x512xf32> -> vector<64x512xf32>
    %c0_19 = arith.constant 0 : index
    %c0_20 = arith.constant 0 : index
    %21 = vector.load %arg4[%c0_19, %c0_20] : memref<64x128xf32, #tpu.memory_space<vmem>>, vector<64x128xf32>
    %22 = arith.truncf %21 : vector<64x128xf32> to vector<64x128xbf16>
    %c0_21 = arith.constant 0 : index
    %c0_22 = arith.constant 0 : index
    %23 = vector.load %arg8[%c0_21, %c0_22] : memref<128x512xbf16, #tpu.memory_space<vmem>>, vector<128x512xbf16>
    %cst_23 = arith.constant dense<0.000000e+00> : vector<64x512xf32>
    %24 = tpu.matmul %22, %23, %cst_23 {dimension_numbers = #tpu.dot_dimension_numbers<[1], [0], [0], [1], [0, 0, 1, 1], [], []>} : vector<64x128xbf16>, vector<128x512xbf16>, vector<64x512xf32> -> vector<64x512xf32>
    %25 = arith.addf %20, %24 : vector<64x512xf32>
    %c0_24 = arith.constant 0 : index
    %c0_25 = arith.constant 0 : index
    %26 = vector.load %arg12[%c0_24, %c0_25] : memref<1x512xf32, #tpu.memory_space<vmem>>, vector<1x512xf32>
    %27 = vector.broadcast %26 : vector<1x512xf32> to vector<64x512xf32>
    %28 = arith.addf %25, %27 : vector<64x512xf32>
    %29 = vector.shape_cast %28 : vector<64x512xf32> to vector<8x8x512xf32>
    %c0_26 = arith.constant 0 : index
    %c0_27 = arith.constant 0 : index
    %c0_28 = arith.constant 0 : index
    %30 = vector.load %arg16[%c0_26, %c0_27, %c0_28] : memref<8x8x512xf32, #tpu.memory_space<vmem>>, vector<8x8x512xf32>
    tpu.vector_store %arg16[%c0_26, %c0_27, %c0_28], %29 {strides = array<i32>} : memref<8x8x512xf32, #tpu.memory_space<vmem>>, vector<8x8x512xf32>,
    %c0_29 = arith.constant 0 : index
    %c0_30 = arith.constant 0 : index
    %31 = vector.load %arg17[%c0_29, %c0_30] : memref<8x128xf32, #tpu.memory_space<vmem>>, vector<8x128xf32>
    %c0_31 = arith.constant 0 : index
    %c0_32 = arith.constant 0 : index
    %32 = vector.load %arg18[%c0_31, %c0_32] : memref<8x128xf32, #tpu.memory_space<vmem>>, vector<8x128xf32>
    %c0_33 = arith.constant 0 : index
    %c0_34 = arith.constant 0 : index
    %33 = vector.load %arg19[%c0_33, %c0_34] : memref<8x128xf32, #tpu.memory_space<vmem>>, vector<8x128xf32>
    %c0_35 = arith.constant 0 : index
    %c0_36 = arith.constant 0 : index
    %34 = vector.load %arg20[%c0_35, %c0_36] : memref<8x128xf32, #tpu.memory_space<vmem>>, vector<8x128xf32>
    %c0_i32_37 = arith.constant 0 : i32
    %c7_i32 = arith.constant 7 : i32
    %35 = arith.subi %c7_i32, %c0_i32_37 : i32
    %36 = arith.index_cast %c0_i32_37 : i32 to index
    %c0_38 = arith.constant 0 : index
    %c0_39 = arith.constant 0 : index
    %37 = vector.load %arg15[%36, %c0_38, %c0_39] : memref<8x8x512xf32, #tpu.memory_space<vmem>>, vector<1x8x512xf32>
    %38 = vector.shape_cast %37 : vector<1x8x512xf32> to vector<8x512xf32>
    %39 = arith.truncf %31 : vector<8x128xf32> to vector<8x128xbf16>
    %c0_40 = arith.constant 0 : index
    %c0_41 = arith.constant 0 : index
    %40 = vector.load %arg9[%c0_40, %c0_41] : memref<128x512xbf16, #tpu.memory_space<vmem>>, vector<128x512xbf16>
    %cst_42 = arith.constant dense<0.000000e+00> : vector<8x512xf32>
    %41 = tpu.matmul %39, %40, %cst_42 {dimension_numbers = #tpu.dot_dimension_numbers<[1], [0], [0], [1], [0, 0, 1, 1], [], []>} : vector<8x128xbf16>, vector<128x512xbf16>, vector<8x512xf32> -> vector<8x512xf32>
    %42 = arith.addf %38, %41 : vector<8x512xf32>
    %43 = arith.index_cast %35 : i32 to index
    %c0_43 = arith.constant 0 : index
    %c0_44 = arith.constant 0 : index
    %44 = vector.load %arg16[%43, %c0_43, %c0_44] : memref<8x8x512xf32, #tpu.memory_space<vmem>>, vector<1x8x512xf32>
    %45 = vector.shape_cast %44 : vector<1x8x512xf32> to vector<8x512xf32>
    %46 = arith.truncf %33 : vector<8x128xf32> to vector<8x128xbf16>
    %c0_45 = arith.constant 0 : index
    %c0_46 = arith.constant 0 : index
    %47 = vector.load %arg10[%c0_45, %c0_46] : memref<128x512xbf16, #tpu.memory_space<vmem>>, vector<128x512xbf16>
    %cst_47 = arith.constant dense<0.000000e+00> : vector<8x512xf32>
    %48 = tpu.matmul %46, %47, %cst_47 {dimension_numbers = #tpu.dot_dimension_numbers<[1], [0], [0], [1], [0, 0, 1, 1], [], []>} : vector<8x128xbf16>, vector<128x512xbf16>, vector<8x512xf32> -> vector<8x512xf32>
    %49 = arith.addf %45, %48 : vector<8x512xf32>
    %50 = vector.extract_strided_slice %42 {offsets = [0, 0], sizes = [8, 128], strides = [1, 1]} : vector<8x512xf32> to vector<8x128xf32>
    %cst_48 = arith.constant 5.000000e-01 : f32
    %51 = vector.broadcast %cst_48 : f32 to vector<8x128xf32>
    %52 = arith.mulf %51, %50 : vector<8x128xf32>
    %53 = math.tanh %52 : vector<8x128xf32>
    %cst_49 = arith.constant 5.000000e-01 : f32
    %54 = vector.broadcast %cst_49 : f32 to vector<8x128xf32>
    %55 = arith.mulf %54, %53 : vector<8x128xf32>
    %cst_50 = arith.constant 5.000000e-01 : f32
    %56 = vector.broadcast %cst_50 : f32 to vector<8x128xf32>
    %57 = arith.addf %55, %56 : vector<8x128xf32>
    %58 = vector.extract_strided_slice %42 {offsets = [0, 128], sizes = [8, 128], strides = [1, 1]} : vector<8x512xf32> to vector<8x128xf32>
    %cst_51 = arith.constant 5.000000e-01 : f32
    %59 = vector.broadcast %cst_51 : f32 to vector<8x128xf32>
    %60 = arith.mulf %59, %58 : vector<8x128xf32>
    %61 = math.tanh %60 : vector<8x128xf32>
    %cst_52 = arith.constant 5.000000e-01 : f32
    %62 = vector.broadcast %cst_52 : f32 to vector<8x128xf32>
    %63 = arith.mulf %62, %61 : vector<8x128xf32>
    %cst_53 = arith.constant 5.000000e-01 : f32
    %64 = vector.broadcast %cst_53 : f32 to vector<8x128xf32>
    %65 = arith.addf %63, %64 : vector<8x128xf32>
    %66 = vector.extract_strided_slice %42 {offsets = [0, 256], sizes = [8, 128], strides = [1, 1]} : vector<8x512xf32> to vector<8x128xf32>
    %67 = math.tanh %66 : vector<8x128xf32>
    %68 = vector.extract_strided_slice %42 {offsets = [0, 384], sizes = [8, 128], strides = [1, 1]} : vector<8x512xf32> to vector<8x128xf32>
    %cst_54 = arith.constant 5.000000e-01 : f32
    %69 = vector.broadcast %cst_54 : f32 to vector<8x128xf32>
    %70 = arith.mulf %69, %68 : vector<8x128xf32>
    %71 = math.tanh %70 : vector<8x128xf32>
    %cst_55 = arith.constant 5.000000e-01 : f32
    %72 = vector.broadcast %cst_55 : f32 to vector<8x128xf32>
    %73 = arith.mulf %72, %71 : vector<8x128xf32>
    %cst_56 = arith.constant 5.000000e-01 : f32
    %74 = vector.broadcast %cst_56 : f32 to vector<8x128xf32>
    %75 = arith.addf %73, %74 : vector<8x128xf32>
    %76 = arith.mulf %65, %32 : vector<8x128xf32>
    %77 = arith.mulf %57, %67 : vector<8x128xf32>
    %78 = arith.addf %76, %77 : vector<8x128xf32>
    %79 = math.tanh %78 : vector<8x128xf32>
    %80 = arith.mulf %75, %79 : vector<8x128xf32>
    %81 = vector.extract_strided_slice %49 {offsets = [0, 0], sizes = [8, 128], strides = [1, 1]} : vector<8x512xf32> to vector<8x128xf32>
    %cst_57 = arith.constant 5.000000e-01 : f32
    %82 = vector.broadcast %cst_57 : f32 to vector<8x128xf32>
    %83 = arith.mulf %82, %81 : vector<8x128xf32>
    %84 = math.tanh %83 : vector<8x128xf32>
    %cst_58 = arith.constant 5.000000e-01 : f32
    %85 = vector.broadcast %cst_58 : f32 to vector<8x128xf32>
    %86 = arith.mulf %85, %84 : vector<8x128xf32>
    %cst_59 = arith.constant 5.000000e-01 : f32
    %87 = vector.broadcast %cst_59 : f32 to vector<8x128xf32>
    %88 = arith.addf %86, %87 : vector<8x128xf32>
    %89 = vector.extract_strided_slice %49 {offsets = [0, 128], sizes = [8, 128], strides = [1, 1]} : vector<8x512xf32> to vector<8x128xf32>
    %cst_60 = arith.constant 5.000000e-01 : f32
    %90 = vector.broadcast %cst_60 : f32 to vector<8x128xf32>
    %91 = arith.mulf %90, %89 : vector<8x128xf32>
    %92 = math.tanh %91 : vector<8x128xf32>
    %cst_61 = arith.constant 5.000000e-01 : f32
    %93 = vector.broadcast %cst_61 : f32 to vector<8x128xf32>
    %94 = arith.mulf %93, %92 : vector<8x128xf32>
    %cst_62 = arith.constant 5.000000e-01 : f32
    %95 = vector.broadcast %cst_62 : f32 to vector<8x128xf32>
    %96 = arith.addf %94, %95 : vector<8x128xf32>
    %97 = vector.extract_strided_slice %49 {offsets = [0, 256], sizes = [8, 128], strides = [1, 1]} : vector<8x512xf32> to vector<8x128xf32>
    %98 = math.tanh %97 : vector<8x128xf32>
    %99 = vector.extract_strided_slice %49 {offsets = [0, 384], sizes = [8, 128], strides = [1, 1]} : vector<8x512xf32> to vector<8x128xf32>
    %cst_63 = arith.constant 5.000000e-01 : f32
    %100 = vector.broadcast %cst_63 : f32 to vector<8x128xf32>
    %101 = arith.mulf %100, %99 : vector<8x128xf32>
    %102 = math.tanh %101 : vector<8x128xf32>
    %cst_64 = arith.constant 5.000000e-01 : f32
    %103 = vector.broadcast %cst_64 : f32 to vector<8x128xf32>
    %104 = arith.mulf %103, %102 : vector<8x128xf32>
    %cst_65 = arith.constant 5.000000e-01 : f32
    %105 = vector.broadcast %cst_65 : f32 to vector<8x128xf32>
    %106 = arith.addf %104, %105 : vector<8x128xf32>
    %107 = arith.mulf %96, %34 : vector<8x128xf32>
    %108 = arith.mulf %88, %98 : vector<8x128xf32>
    %109 = arith.addf %107, %108 : vector<8x128xf32>
    %110 = math.tanh %109 : vector<8x128xf32>
    %111 = arith.mulf %106, %110 : vector<8x128xf32>
    %112 = arith.index_cast %c0_i32_37 : i32 to index
    %c0_66 = arith.constant 0 : index
    %c0_67 = arith.constant 0 : index
    %113 = vector.load %arg13[%112, %c0_66, %c0_67] : memref<8x8x128xf32, #tpu.memory_space<vmem>>, vector<1x8x128xf32>
    %114 = vector.shape_cast %113 : vector<1x8x128xf32> to vector<8x128xf32>
    %115 = vector.shape_cast %80 : vector<8x128xf32> to vector<1x8x128xf32>
    tpu.vector_store %arg13[%112, %c0_66, %c0_67], %115 {strides = array<i32>} : memref<8x8x128xf32, #tpu.memory_space<vmem>>, vector<1x8x128xf32>,
    %116 = arith.index_cast %35 : i32 to index
    %c0_68 = arith.constant 0 : index
    %c0_69 = arith.constant 0 : index
    %117 = vector.load %arg14[%116, %c0_68, %c0_69] : memref<8x8x128xf32, #tpu.memory_space<vmem>>, vector<1x8x128xf32>
    %118 = vector.shape_cast %117 : vector<1x8x128xf32> to vector<8x128xf32>
    %119 = vector.shape_cast %111 : vector<8x128xf32> to vector<1x8x128xf32>
    tpu.vector_store %arg14[%116, %c0_68, %c0_69], %119 {strides = array<i32>} : memref<8x8x128xf32, #tpu.memory_space<vmem>>, vector<1x8x128xf32>,
    %c1_i32 = arith.constant 1 : i32
    %c7_i32_70 = arith.constant 7 : i32
    %120 = arith.subi %c7_i32_70, %c1_i32 : i32
    %121 = arith.index_cast %c1_i32 : i32 to index
    %c0_71 = arith.constant 0 : index
    %c0_72 = arith.constant 0 : index
    %122 = vector.load %arg15[%121, %c0_71, %c0_72] : memref<8x8x512xf32, #tpu.memory_space<vmem>>, vector<1x8x512xf32>
    %123 = vector.shape_cast %122 : vector<1x8x512xf32> to vector<8x512xf32>
    %124 = arith.truncf %80 : vector<8x128xf32> to vector<8x128xbf16>
    %c0_73 = arith.constant 0 : index
    %c0_74 = arith.constant 0 : index
    %125 = vector.load %arg9[%c0_73, %c0_74] : memref<128x512xbf16, #tpu.memory_space<vmem>>, vector<128x512xbf16>
    %cst_75 = arith.constant dense<0.000000e+00> : vector<8x512xf32>
    %126 = tpu.matmul %124, %125, %cst_75 {dimension_numbers = #tpu.dot_dimension_numbers<[1], [0], [0], [1], [0, 0, 1, 1], [], []>} : vector<8x128xbf16>, vector<128x512xbf16>, vector<8x512xf32> -> vector<8x512xf32>
    %127 = arith.addf %123, %126 : vector<8x512xf32>
    %128 = arith.index_cast %120 : i32 to index
    %c0_76 = arith.constant 0 : index
    %c0_77 = arith.constant 0 : index
    %129 = vector.load %arg16[%128, %c0_76, %c0_77] : memref<8x8x512xf32, #tpu.memory_space<vmem>>, vector<1x8x512xf32>
    %130 = vector.shape_cast %129 : vector<1x8x512xf32> to vector<8x512xf32>
    %131 = arith.truncf %111 : vector<8x128xf32> to vector<8x128xbf16>
    %c0_78 = arith.constant 0 : index
    %c0_79 = arith.constant 0 : index
    %132 = vector.load %arg10[%c0_78, %c0_79] : memref<128x512xbf16, #tpu.memory_space<vmem>>, vector<128x512xbf16>
    %cst_80 = arith.constant dense<0.000000e+00> : vector<8x512xf32>
    %133 = tpu.matmul %131, %132, %cst_80 {dimension_numbers = #tpu.dot_dimension_numbers<[1], [0], [0], [1], [0, 0, 1, 1], [], []>} : vector<8x128xbf16>, vector<128x512xbf16>, vector<8x512xf32> -> vector<8x512xf32>
    %134 = arith.addf %130, %133 : vector<8x512xf32>
    %135 = vector.extract_strided_slice %127 {offsets = [0, 0], sizes = [8, 128], strides = [1, 1]} : vector<8x512xf32> to vector<8x128xf32>
    %cst_81 = arith.constant 5.000000e-01 : f32
    %136 = vector.broadcast %cst_81 : f32 to vector<8x128xf32>
    %137 = arith.mulf %136, %135 : vector<8x128xf32>
    %138 = math.tanh %137 : vector<8x128xf32>
    %cst_82 = arith.constant 5.000000e-01 : f32
    %139 = vector.broadcast %cst_82 : f32 to vector<8x128xf32>
    %140 = arith.mulf %139, %138 : vector<8x128xf32>
    %cst_83 = arith.constant 5.000000e-01 : f32
    %141 = vector.broadcast %cst_83 : f32 to vector<8x128xf32>
    %142 = arith.addf %140, %141 : vector<8x128xf32>
    %143 = vector.extract_strided_slice %127 {offsets = [0, 128], sizes = [8, 128], strides = [1, 1]} : vector<8x512xf32> to vector<8x128xf32>
    %cst_84 = arith.constant 5.000000e-01 : f32
    %144 = vector.broadcast %cst_84 : f32 to vector<8x128xf32>
    %145 = arith.mulf %144, %143 : vector<8x128xf32>
    %146 = math.tanh %145 : vector<8x128xf32>
    %cst_85 = arith.constant 5.000000e-01 : f32
    %147 = vector.broadcast %cst_85 : f32 to vector<8x128xf32>
    %148 = arith.mulf %147, %146 : vector<8x128xf32>
    %cst_86 = arith.constant 5.000000e-01 : f32
    %149 = vector.broadcast %cst_86 : f32 to vector<8x128xf32>
    %150 = arith.addf %148, %149 : vector<8x128xf32>
    %151 = vector.extract_strided_slice %127 {offsets = [0, 256], sizes = [8, 128], strides = [1, 1]} : vector<8x512xf32> to vector<8x128xf32>
    %152 = math.tanh %151 : vector<8x128xf32>
    %153 = vector.extract_strided_slice %127 {offsets = [0, 384], sizes = [8, 128], strides = [1, 1]} : vector<8x512xf32> to vector<8x128xf32>
    %cst_87 = arith.constant 5.000000e-01 : f32
    %154 = vector.broadcast %cst_87 : f32 to vector<8x128xf32>
    %155 = arith.mulf %154, %153 : vector<8x128xf32>
    %156 = math.tanh %155 : vector<8x128xf32>
    %cst_88 = arith.constant 5.000000e-01 : f32
    %157 = vector.broadcast %cst_88 : f32 to vector<8x128xf32>
    %158 = arith.mulf %157, %156 : vector<8x128xf32>
    %cst_89 = arith.constant 5.000000e-01 : f32
    %159 = vector.broadcast %cst_89 : f32 to vector<8x128xf32>
    %160 = arith.addf %158, %159 : vector<8x128xf32>
    %161 = arith.mulf %150, %78 : vector<8x128xf32>
    %162 = arith.mulf %142, %152 : vector<8x128xf32>
    %163 = arith.addf %161, %162 : vector<8x128xf32>
    %164 = math.tanh %163 : vector<8x128xf32>
    %165 = arith.mulf %160, %164 : vector<8x128xf32>
    %166 = vector.extract_strided_slice %134 {offsets = [0, 0], sizes = [8, 128], strides = [1, 1]} : vector<8x512xf32> to vector<8x128xf32>
    %cst_90 = arith.constant 5.000000e-01 : f32
    %167 = vector.broadcast %cst_90 : f32 to vector<8x128xf32>
    %168 = arith.mulf %167, %166 : vector<8x128xf32>
    %169 = math.tanh %168 : vector<8x128xf32>
    %cst_91 = arith.constant 5.000000e-01 : f32
    %170 = vector.broadcast %cst_91 : f32 to vector<8x128xf32>
    %171 = arith.mulf %170, %169 : vector<8x128xf32>
    %cst_92 = arith.constant 5.000000e-01 : f32
    %172 = vector.broadcast %cst_92 : f32 to vector<8x128xf32>
    %173 = arith.addf %171, %172 : vector<8x128xf32>
    %174 = vector.extract_strided_slice %134 {offsets = [0, 128], sizes = [8, 128], strides = [1, 1]} : vector<8x512xf32> to vector<8x128xf32>
    %cst_93 = arith.constant 5.000000e-01 : f32
    %175 = vector.broadcast %cst_93 : f32 to vector<8x128xf32>
    %176 = arith.mulf %175, %174 : vector<8x128xf32>
    %177 = math.tanh %176 : vector<8x128xf32>
    %cst_94 = arith.constant 5.000000e-01 : f32
    %178 = vector.broadcast %cst_94 : f32 to vector<8x128xf32>
    %179 = arith.mulf %178, %177 : vector<8x128xf32>
    %cst_95 = arith.constant 5.000000e-01 : f32
    %180 = vector.broadcast %cst_95 : f32 to vector<8x128xf32>
    %181 = arith.addf %179, %180 : vector<8x128xf32>
    %182 = vector.extract_strided_slice %134 {offsets = [0, 256], sizes = [8, 128], strides = [1, 1]} : vector<8x512xf32> to vector<8x128xf32>
    %183 = math.tanh %182 : vector<8x128xf32>
    %184 = vector.extract_strided_slice %134 {offsets = [0, 384], sizes = [8, 128], strides = [1, 1]} : vector<8x512xf32> to vector<8x128xf32>
    %cst_96 = arith.constant 5.000000e-01 : f32
    %185 = vector.broadcast %cst_96 : f32 to vector<8x128xf32>
    %186 = arith.mulf %185, %184 : vector<8x128xf32>
    %187 = math.tanh %186 : vector<8x128xf32>
    %cst_97 = arith.constant 5.000000e-01 : f32
    %188 = vector.broadcast %cst_97 : f32 to vector<8x128xf32>
    %189 = arith.mulf %188, %187 : vector<8x128xf32>
    %cst_98 = arith.constant 5.000000e-01 : f32
    %190 = vector.broadcast %cst_98 : f32 to vector<8x128xf32>
    %191 = arith.addf %189, %190 : vector<8x128xf32>
    %192 = arith.mulf %181, %109 : vector<8x128xf32>
    %193 = arith.mulf %173, %183 : vector<8x128xf32>
    %194 = arith.addf %192, %193 : vector<8x128xf32>
    %195 = math.tanh %194 : vector<8x128xf32>
    %196 = arith.mulf %191, %195 : vector<8x128xf32>
    %197 = arith.index_cast %c1_i32 : i32 to index
    %c0_99 = arith.constant 0 : index
    %c0_100 = arith.constant 0 : index
    %198 = vector.load %arg13[%197, %c0_99, %c0_100] : memref<8x8x128xf32, #tpu.memory_space<vmem>>, vector<1x8x128xf32>
    %199 = vector.shape_cast %198 : vector<1x8x128xf32> to vector<8x128xf32>
    %200 = vector.shape_cast %165 : vector<8x128xf32> to vector<1x8x128xf32>
    tpu.vector_store %arg13[%197, %c0_99, %c0_100], %200 {strides = array<i32>} : memref<8x8x128xf32, #tpu.memory_space<vmem>>, vector<1x8x128xf32>,
    %201 = arith.index_cast %120 : i32 to index
    %c0_101 = arith.constant 0 : index
    %c0_102 = arith.constant 0 : index
    %202 = vector.load %arg14[%201, %c0_101, %c0_102] : memref<8x8x128xf32, #tpu.memory_space<vmem>>, vector<1x8x128xf32>
    %203 = vector.shape_cast %202 : vector<1x8x128xf32> to vector<8x128xf32>
    %204 = vector.shape_cast %196 : vector<8x128xf32> to vector<1x8x128xf32>
    tpu.vector_store %arg14[%201, %c0_101, %c0_102], %204 {strides = array<i32>} : memref<8x8x128xf32, #tpu.memory_space<vmem>>, vector<1x8x128xf32>,
    %c2_i32 = arith.constant 2 : i32
    %c7_i32_103 = arith.constant 7 : i32
    %205 = arith.subi %c7_i32_103, %c2_i32 : i32
    %206 = arith.index_cast %c2_i32 : i32 to index
    %c0_104 = arith.constant 0 : index
    %c0_105 = arith.constant 0 : index
    %207 = vector.load %arg15[%206, %c0_104, %c0_105] : memref<8x8x512xf32, #tpu.memory_space<vmem>>, vector<1x8x512xf32>
    %208 = vector.shape_cast %207 : vector<1x8x512xf32> to vector<8x512xf32>
    %209 = arith.truncf %165 : vector<8x128xf32> to vector<8x128xbf16>
    %c0_106 = arith.constant 0 : index
    %c0_107 = arith.constant 0 : index
    %210 = vector.load %arg9[%c0_106, %c0_107] : memref<128x512xbf16, #tpu.memory_space<vmem>>, vector<128x512xbf16>
    %cst_108 = arith.constant dense<0.000000e+00> : vector<8x512xf32>
    %211 = tpu.matmul %209, %210, %cst_108 {dimension_numbers = #tpu.dot_dimension_numbers<[1], [0], [0], [1], [0, 0, 1, 1], [], []>} : vector<8x128xbf16>, vector<128x512xbf16>, vector<8x512xf32> -> vector<8x512xf32>
    %212 = arith.addf %208, %211 : vector<8x512xf32>
    %213 = arith.index_cast %205 : i32 to index
    %c0_109 = arith.constant 0 : index
    %c0_110 = arith.constant 0 : index
    %214 = vector.load %arg16[%213, %c0_109, %c0_110] : memref<8x8x512xf32, #tpu.memory_space<vmem>>, vector<1x8x512xf32>
    %215 = vector.shape_cast %214 : vector<1x8x512xf32> to vector<8x512xf32>
    %216 = arith.truncf %196 : vector<8x128xf32> to vector<8x128xbf16>
    %c0_111 = arith.constant 0 : index
    %c0_112 = arith.constant 0 : index
    %217 = vector.load %arg10[%c0_111, %c0_112] : memref<128x512xbf16, #tpu.memory_space<vmem>>, vector<128x512xbf16>
    %cst_113 = arith.constant dense<0.000000e+00> : vector<8x512xf32>
    %218 = tpu.matmul %216, %217, %cst_113 {dimension_numbers = #tpu.dot_dimension_numbers<[1], [0], [0], [1], [0, 0, 1, 1], [], []>} : vector<8x128xbf16>, vector<128x512xbf16>, vector<8x512xf32> -> vector<8x512xf32>
    %219 = arith.addf %215, %218 : vector<8x512xf32>
    %220 = vector.extract_strided_slice %212 {offsets = [0, 0], sizes = [8, 128], strides = [1, 1]} : vector<8x512xf32> to vector<8x128xf32>
    %cst_114 = arith.constant 5.000000e-01 : f32
    %221 = vector.broadcast %cst_114 : f32 to vector<8x128xf32>
    %222 = arith.mulf %221, %220 : vector<8x128xf32>
    %223 = math.tanh %222 : vector<8x128xf32>
    %cst_115 = arith.constant 5.000000e-01 : f32
    %224 = vector.broadcast %cst_115 : f32 to vector<8x128xf32>
    %225 = arith.mulf %224, %223 : vector<8x128xf32>
    %cst_116 = arith.constant 5.000000e-01 : f32
    %226 = vector.broadcast %cst_116 : f32 to vector<8x128xf32>
    %227 = arith.addf %225, %226 : vector<8x128xf32>
    %228 = vector.extract_strided_slice %212 {offsets = [0, 128], sizes = [8, 128], strides = [1, 1]} : vector<8x512xf32> to vector<8x128xf32>
    %cst_117 = arith.constant 5.000000e-01 : f32
    %229 = vector.broadcast %cst_117 : f32 to vector<8x128xf32>
    %230 = arith.mulf %229, %228 : vector<8x128xf32>
    %231 = math.tanh %230 : vector<8x128xf32>
    %cst_118 = arith.constant 5.000000e-01 : f32
    %232 = vector.broadcast %cst_118 : f32 to vector<8x128xf32>
    %233 = arith.mulf %232, %231 : vector<8x128xf32>
    %cst_119 = arith.constant 5.000000e-01 : f32
    %234 = vector.broadcast %cst_119 : f32 to vector<8x128xf32>
    %235 = arith.addf %233, %234 : vector<8x128xf32>
    %236 = vector.extract_strided_slice %212 {offsets = [0, 256], sizes = [8, 128], strides = [1, 1]} : vector<8x512xf32> to vector<8x128xf32>
    %237 = math.tanh %236 : vector<8x128xf32>
    %238 = vector.extract_strided_slice %212 {offsets = [0, 384], sizes = [8, 128], strides = [1, 1]} : vector<8x512xf32> to vector<8x128xf32>
    %cst_120 = arith.constant 5.000000e-01 : f32
    %239 = vector.broadcast %cst_120 : f32 to vector<8x128xf32>
    %240 = arith.mulf %239, %238 : vector<8x128xf32>
    %241 = math.tanh %240 : vector<8x128xf32>
    %cst_121 = arith.constant 5.000000e-01 : f32
    %242 = vector.broadcast %cst_121 : f32 to vector<8x128xf32>
    %243 = arith.mulf %242, %241 : vector<8x128xf32>
    %cst_122 = arith.constant 5.000000e-01 : f32
    %244 = vector.broadcast %cst_122 : f32 to vector<8x128xf32>
    %245 = arith.addf %243, %244 : vector<8x128xf32>
    %246 = arith.mulf %235, %163 : vector<8x128xf32>
    %247 = arith.mulf %227, %237 : vector<8x128xf32>
    %248 = arith.addf %246, %247 : vector<8x128xf32>
    %249 = math.tanh %248 : vector<8x128xf32>
    %250 = arith.mulf %245, %249 : vector<8x128xf32>
    %251 = vector.extract_strided_slice %219 {offsets = [0, 0], sizes = [8, 128], strides = [1, 1]} : vector<8x512xf32> to vector<8x128xf32>
    %cst_123 = arith.constant 5.000000e-01 : f32
    %252 = vector.broadcast %cst_123 : f32 to vector<8x128xf32>
    %253 = arith.mulf %252, %251 : vector<8x128xf32>
    %254 = math.tanh %253 : vector<8x128xf32>
    %cst_124 = arith.constant 5.000000e-01 : f32
    %255 = vector.broadcast %cst_124 : f32 to vector<8x128xf32>
    %256 = arith.mulf %255, %254 : vector<8x128xf32>
    %cst_125 = arith.constant 5.000000e-01 : f32
    %257 = vector.broadcast %cst_125 : f32 to vector<8x128xf32>
    %258 = arith.addf %256, %257 : vector<8x128xf32>
    %259 = vector.extract_strided_slice %219 {offsets = [0, 128], sizes = [8, 128], strides = [1, 1]} : vector<8x512xf32> to vector<8x128xf32>
    %cst_126 = arith.constant 5.000000e-01 : f32
    %260 = vector.broadcast %cst_126 : f32 to vector<8x128xf32>
    %261 = arith.mulf %260, %259 : vector<8x128xf32>
    %262 = math.tanh %261 : vector<8x128xf32>
    %cst_127 = arith.constant 5.000000e-01 : f32
    %263 = vector.broadcast %cst_127 : f32 to vector<8x128xf32>
    %264 = arith.mulf %263, %262 : vector<8x128xf32>
    %cst_128 = arith.constant 5.000000e-01 : f32
    %265 = vector.broadcast %cst_128 : f32 to vector<8x128xf32>
    %266 = arith.addf %264, %265 : vector<8x128xf32>
    %267 = vector.extract_strided_slice %219 {offsets = [0, 256], sizes = [8, 128], strides = [1, 1]} : vector<8x512xf32> to vector<8x128xf32>
    %268 = math.tanh %267 : vector<8x128xf32>
    %269 = vector.extract_strided_slice %219 {offsets = [0, 384], sizes = [8, 128], strides = [1, 1]} : vector<8x512xf32> to vector<8x128xf32>
    %cst_129 = arith.constant 5.000000e-01 : f32
    %270 = vector.broadcast %cst_129 : f32 to vector<8x128xf32>
    %271 = arith.mulf %270, %269 : vector<8x128xf32>
    %272 = math.tanh %271 : vector<8x128xf32>
    %cst_130 = arith.constant 5.000000e-01 : f32
    %273 = vector.broadcast %cst_130 : f32 to vector<8x128xf32>
    %274 = arith.mulf %273, %272 : vector<8x128xf32>
    %cst_131 = arith.constant 5.000000e-01 : f32
    %275 = vector.broadcast %cst_131 : f32 to vector<8x128xf32>
    %276 = arith.addf %274, %275 : vector<8x128xf32>
    %277 = arith.mulf %266, %194 : vector<8x128xf32>
    %278 = arith.mulf %258, %268 : vector<8x128xf32>
    %279 = arith.addf %277, %278 : vector<8x128xf32>
    %280 = math.tanh %279 : vector<8x128xf32>
    %281 = arith.mulf %276, %280 : vector<8x128xf32>
    %282 = arith.index_cast %c2_i32 : i32 to index
    %c0_132 = arith.constant 0 : index
    %c0_133 = arith.constant 0 : index
    %283 = vector.load %arg13[%282, %c0_132, %c0_133] : memref<8x8x128xf32, #tpu.memory_space<vmem>>, vector<1x8x128xf32>
    %284 = vector.shape_cast %283 : vector<1x8x128xf32> to vector<8x128xf32>
    %285 = vector.shape_cast %250 : vector<8x128xf32> to vector<1x8x128xf32>
    tpu.vector_store %arg13[%282, %c0_132, %c0_133], %285 {strides = array<i32>} : memref<8x8x128xf32, #tpu.memory_space<vmem>>, vector<1x8x128xf32>,
    %286 = arith.index_cast %205 : i32 to index
    %c0_134 = arith.constant 0 : index
    %c0_135 = arith.constant 0 : index
    %287 = vector.load %arg14[%286, %c0_134, %c0_135] : memref<8x8x128xf32, #tpu.memory_space<vmem>>, vector<1x8x128xf32>
    %288 = vector.shape_cast %287 : vector<1x8x128xf32> to vector<8x128xf32>
    %289 = vector.shape_cast %281 : vector<8x128xf32> to vector<1x8x128xf32>
    tpu.vector_store %arg14[%286, %c0_134, %c0_135], %289 {strides = array<i32>} : memref<8x8x128xf32, #tpu.memory_space<vmem>>, vector<1x8x128xf32>,
    %c3_i32 = arith.constant 3 : i32
    %c7_i32_136 = arith.constant 7 : i32
    %290 = arith.subi %c7_i32_136, %c3_i32 : i32
    %291 = arith.index_cast %c3_i32 : i32 to index
    %c0_137 = arith.constant 0 : index
    %c0_138 = arith.constant 0 : index
    %292 = vector.load %arg15[%291, %c0_137, %c0_138] : memref<8x8x512xf32, #tpu.memory_space<vmem>>, vector<1x8x512xf32>
    %293 = vector.shape_cast %292 : vector<1x8x512xf32> to vector<8x512xf32>
    %294 = arith.truncf %250 : vector<8x128xf32> to vector<8x128xbf16>
    %c0_139 = arith.constant 0 : index
    %c0_140 = arith.constant 0 : index
    %295 = vector.load %arg9[%c0_139, %c0_140] : memref<128x512xbf16, #tpu.memory_space<vmem>>, vector<128x512xbf16>
    %cst_141 = arith.constant dense<0.000000e+00> : vector<8x512xf32>
    %296 = tpu.matmul %294, %295, %cst_141 {dimension_numbers = #tpu.dot_dimension_numbers<[1], [0], [0], [1], [0, 0, 1, 1], [], []>} : vector<8x128xbf16>, vector<128x512xbf16>, vector<8x512xf32> -> vector<8x512xf32>
    %297 = arith.addf %293, %296 : vector<8x512xf32>
    %298 = arith.index_cast %290 : i32 to index
    %c0_142 = arith.constant 0 : index
    %c0_143 = arith.constant 0 : index
    %299 = vector.load %arg16[%298, %c0_142, %c0_143] : memref<8x8x512xf32, #tpu.memory_space<vmem>>, vector<1x8x512xf32>
    %300 = vector.shape_cast %299 : vector<1x8x512xf32> to vector<8x512xf32>
    %301 = arith.truncf %281 : vector<8x128xf32> to vector<8x128xbf16>
    %c0_144 = arith.constant 0 : index
    %c0_145 = arith.constant 0 : index
    %302 = vector.load %arg10[%c0_144, %c0_145] : memref<128x512xbf16, #tpu.memory_space<vmem>>, vector<128x512xbf16>
    %cst_146 = arith.constant dense<0.000000e+00> : vector<8x512xf32>
    %303 = tpu.matmul %301, %302, %cst_146 {dimension_numbers = #tpu.dot_dimension_numbers<[1], [0], [0], [1], [0, 0, 1, 1], [], []>} : vector<8x128xbf16>, vector<128x512xbf16>, vector<8x512xf32> -> vector<8x512xf32>
    %304 = arith.addf %300, %303 : vector<8x512xf32>
    %305 = vector.extract_strided_slice %297 {offsets = [0, 0], sizes = [8, 128], strides = [1, 1]} : vector<8x512xf32> to vector<8x128xf32>
    %cst_147 = arith.constant 5.000000e-01 : f32
    %306 = vector.broadcast %cst_147 : f32 to vector<8x128xf32>
    %307 = arith.mulf %306, %305 : vector<8x128xf32>
    %308 = math.tanh %307 : vector<8x128xf32>
    %cst_148 = arith.constant 5.000000e-01 : f32
    %309 = vector.broadcast %cst_148 : f32 to vector<8x128xf32>
    %310 = arith.mulf %309, %308 : vector<8x128xf32>
    %cst_149 = arith.constant 5.000000e-01 : f32
    %311 = vector.broadcast %cst_149 : f32 to vector<8x128xf32>
    %312 = arith.addf %310, %311 : vector<8x128xf32>
    %313 = vector.extract_strided_slice %297 {offsets = [0, 128], sizes = [8, 128], strides = [1, 1]} : vector<8x512xf32> to vector<8x128xf32>
    %cst_150 = arith.constant 5.000000e-01 : f32
    %314 = vector.broadcast %cst_150 : f32 to vector<8x128xf32>
    %315 = arith.mulf %314, %313 : vector<8x128xf32>
    %316 = math.tanh %315 : vector<8x128xf32>
    %cst_151 = arith.constant 5.000000e-01 : f32
    %317 = vector.broadcast %cst_151 : f32 to vector<8x128xf32>
    %318 = arith.mulf %317, %316 : vector<8x128xf32>
    %cst_152 = arith.constant 5.000000e-01 : f32
    %319 = vector.broadcast %cst_152 : f32 to vector<8x128xf32>
    %320 = arith.addf %318, %319 : vector<8x128xf32>
    %321 = vector.extract_strided_slice %297 {offsets = [0, 256], sizes = [8, 128], strides = [1, 1]} : vector<8x512xf32> to vector<8x128xf32>
    %322 = math.tanh %321 : vector<8x128xf32>
    %323 = vector.extract_strided_slice %297 {offsets = [0, 384], sizes = [8, 128], strides = [1, 1]} : vector<8x512xf32> to vector<8x128xf32>
    %cst_153 = arith.constant 5.000000e-01 : f32
    %324 = vector.broadcast %cst_153 : f32 to vector<8x128xf32>
    %325 = arith.mulf %324, %323 : vector<8x128xf32>
    %326 = math.tanh %325 : vector<8x128xf32>
    %cst_154 = arith.constant 5.000000e-01 : f32
    %327 = vector.broadcast %cst_154 : f32 to vector<8x128xf32>
    %328 = arith.mulf %327, %326 : vector<8x128xf32>
    %cst_155 = arith.constant 5.000000e-01 : f32
    %329 = vector.broadcast %cst_155 : f32 to vector<8x128xf32>
    %330 = arith.addf %328, %329 : vector<8x128xf32>
    %331 = arith.mulf %320, %248 : vector<8x128xf32>
    %332 = arith.mulf %312, %322 : vector<8x128xf32>
    %333 = arith.addf %331, %332 : vector<8x128xf32>
    %334 = math.tanh %333 : vector<8x128xf32>
    %335 = arith.mulf %330, %334 : vector<8x128xf32>
    %336 = vector.extract_strided_slice %304 {offsets = [0, 0], sizes = [8, 128], strides = [1, 1]} : vector<8x512xf32> to vector<8x128xf32>
    %cst_156 = arith.constant 5.000000e-01 : f32
    %337 = vector.broadcast %cst_156 : f32 to vector<8x128xf32>
    %338 = arith.mulf %337, %336 : vector<8x128xf32>
    %339 = math.tanh %338 : vector<8x128xf32>
    %cst_157 = arith.constant 5.000000e-01 : f32
    %340 = vector.broadcast %cst_157 : f32 to vector<8x128xf32>
    %341 = arith.mulf %340, %339 : vector<8x128xf32>
    %cst_158 = arith.constant 5.000000e-01 : f32
    %342 = vector.broadcast %cst_158 : f32 to vector<8x128xf32>
    %343 = arith.addf %341, %342 : vector<8x128xf32>
    %344 = vector.extract_strided_slice %304 {offsets = [0, 128], sizes = [8, 128], strides = [1, 1]} : vector<8x512xf32> to vector<8x128xf32>
    %cst_159 = arith.constant 5.000000e-01 : f32
    %345 = vector.broadcast %cst_159 : f32 to vector<8x128xf32>
    %346 = arith.mulf %345, %344 : vector<8x128xf32>
    %347 = math.tanh %346 : vector<8x128xf32>
    %cst_160 = arith.constant 5.000000e-01 : f32
    %348 = vector.broadcast %cst_160 : f32 to vector<8x128xf32>
    %349 = arith.mulf %348, %347 : vector<8x128xf32>
    %cst_161 = arith.constant 5.000000e-01 : f32
    %350 = vector.broadcast %cst_161 : f32 to vector<8x128xf32>
    %351 = arith.addf %349, %350 : vector<8x128xf32>
    %352 = vector.extract_strided_slice %304 {offsets = [0, 256], sizes = [8, 128], strides = [1, 1]} : vector<8x512xf32> to vector<8x128xf32>
    %353 = math.tanh %352 : vector<8x128xf32>
    %354 = vector.extract_strided_slice %304 {offsets = [0, 384], sizes = [8, 128], strides = [1, 1]} : vector<8x512xf32> to vector<8x128xf32>
    %cst_162 = arith.constant 5.000000e-01 : f32
    %355 = vector.broadcast %cst_162 : f32 to vector<8x128xf32>
    %356 = arith.mulf %355, %354 : vector<8x128xf32>
    %357 = math.tanh %356 : vector<8x128xf32>
    %cst_163 = arith.constant 5.000000e-01 : f32
    %358 = vector.broadcast %cst_163 : f32 to vector<8x128xf32>
    %359 = arith.mulf %358, %357 : vector<8x128xf32>
    %cst_164 = arith.constant 5.000000e-01 : f32
    %360 = vector.broadcast %cst_164 : f32 to vector<8x128xf32>
    %361 = arith.addf %359, %360 : vector<8x128xf32>
    %362 = arith.mulf %351, %279 : vector<8x128xf32>
    %363 = arith.mulf %343, %353 : vector<8x128xf32>
    %364 = arith.addf %362, %363 : vector<8x128xf32>
    %365 = math.tanh %364 : vector<8x128xf32>
    %366 = arith.mulf %361, %365 : vector<8x128xf32>
    %367 = arith.index_cast %c3_i32 : i32 to index
    %c0_165 = arith.constant 0 : index
    %c0_166 = arith.constant 0 : index
    %368 = vector.load %arg13[%367, %c0_165, %c0_166] : memref<8x8x128xf32, #tpu.memory_space<vmem>>, vector<1x8x128xf32>
    %369 = vector.shape_cast %368 : vector<1x8x128xf32> to vector<8x128xf32>
    %370 = vector.shape_cast %335 : vector<8x128xf32> to vector<1x8x128xf32>
    tpu.vector_store %arg13[%367, %c0_165, %c0_166], %370 {strides = array<i32>} : memref<8x8x128xf32, #tpu.memory_space<vmem>>, vector<1x8x128xf32>,
    %371 = arith.index_cast %290 : i32 to index
    %c0_167 = arith.constant 0 : index
    %c0_168 = arith.constant 0 : index
    %372 = vector.load %arg14[%371, %c0_167, %c0_168] : memref<8x8x128xf32, #tpu.memory_space<vmem>>, vector<1x8x128xf32>
    %373 = vector.shape_cast %372 : vector<1x8x128xf32> to vector<8x128xf32>
    %374 = vector.shape_cast %366 : vector<8x128xf32> to vector<1x8x128xf32>
    tpu.vector_store %arg14[%371, %c0_167, %c0_168], %374 {strides = array<i32>} : memref<8x8x128xf32, #tpu.memory_space<vmem>>, vector<1x8x128xf32>,
    %c4_i32 = arith.constant 4 : i32
    %c7_i32_169 = arith.constant 7 : i32
    %375 = arith.subi %c7_i32_169, %c4_i32 : i32
    %376 = arith.index_cast %c4_i32 : i32 to index
    %c0_170 = arith.constant 0 : index
    %c0_171 = arith.constant 0 : index
    %377 = vector.load %arg15[%376, %c0_170, %c0_171] : memref<8x8x512xf32, #tpu.memory_space<vmem>>, vector<1x8x512xf32>
    %378 = vector.shape_cast %377 : vector<1x8x512xf32> to vector<8x512xf32>
    %379 = arith.truncf %335 : vector<8x128xf32> to vector<8x128xbf16>
    %c0_172 = arith.constant 0 : index
    %c0_173 = arith.constant 0 : index
    %380 = vector.load %arg9[%c0_172, %c0_173] : memref<128x512xbf16, #tpu.memory_space<vmem>>, vector<128x512xbf16>
    %cst_174 = arith.constant dense<0.000000e+00> : vector<8x512xf32>
    %381 = tpu.matmul %379, %380, %cst_174 {dimension_numbers = #tpu.dot_dimension_numbers<[1], [0], [0], [1], [0, 0, 1, 1], [], []>} : vector<8x128xbf16>, vector<128x512xbf16>, vector<8x512xf32> -> vector<8x512xf32>
    %382 = arith.addf %378, %381 : vector<8x512xf32>
    %383 = arith.index_cast %375 : i32 to index
    %c0_175 = arith.constant 0 : index
    %c0_176 = arith.constant 0 : index
    %384 = vector.load %arg16[%383, %c0_175, %c0_176] : memref<8x8x512xf32, #tpu.memory_space<vmem>>, vector<1x8x512xf32>
    %385 = vector.shape_cast %384 : vector<1x8x512xf32> to vector<8x512xf32>
    %386 = arith.truncf %366 : vector<8x128xf32> to vector<8x128xbf16>
    %c0_177 = arith.constant 0 : index
    %c0_178 = arith.constant 0 : index
    %387 = vector.load %arg10[%c0_177, %c0_178] : memref<128x512xbf16, #tpu.memory_space<vmem>>, vector<128x512xbf16>
    %cst_179 = arith.constant dense<0.000000e+00> : vector<8x512xf32>
    %388 = tpu.matmul %386, %387, %cst_179 {dimension_numbers = #tpu.dot_dimension_numbers<[1], [0], [0], [1], [0, 0, 1, 1], [], []>} : vector<8x128xbf16>, vector<128x512xbf16>, vector<8x512xf32> -> vector<8x512xf32>
    %389 = arith.addf %385, %388 : vector<8x512xf32>
    %390 = vector.extract_strided_slice %382 {offsets = [0, 0], sizes = [8, 128], strides = [1, 1]} : vector<8x512xf32> to vector<8x128xf32>
    %cst_180 = arith.constant 5.000000e-01 : f32
    %391 = vector.broadcast %cst_180 : f32 to vector<8x128xf32>
    %392 = arith.mulf %391, %390 : vector<8x128xf32>
    %393 = math.tanh %392 : vector<8x128xf32>
    %cst_181 = arith.constant 5.000000e-01 : f32
    %394 = vector.broadcast %cst_181 : f32 to vector<8x128xf32>
    %395 = arith.mulf %394, %393 : vector<8x128xf32>
    %cst_182 = arith.constant 5.000000e-01 : f32
    %396 = vector.broadcast %cst_182 : f32 to vector<8x128xf32>
    %397 = arith.addf %395, %396 : vector<8x128xf32>
    %398 = vector.extract_strided_slice %382 {offsets = [0, 128], sizes = [8, 128], strides = [1, 1]} : vector<8x512xf32> to vector<8x128xf32>
    %cst_183 = arith.constant 5.000000e-01 : f32
    %399 = vector.broadcast %cst_183 : f32 to vector<8x128xf32>
    %400 = arith.mulf %399, %398 : vector<8x128xf32>
    %401 = math.tanh %400 : vector<8x128xf32>
    %cst_184 = arith.constant 5.000000e-01 : f32
    %402 = vector.broadcast %cst_184 : f32 to vector<8x128xf32>
    %403 = arith.mulf %402, %401 : vector<8x128xf32>
    %cst_185 = arith.constant 5.000000e-01 : f32
    %404 = vector.broadcast %cst_185 : f32 to vector<8x128xf32>
    %405 = arith.addf %403, %404 : vector<8x128xf32>
    %406 = vector.extract_strided_slice %382 {offsets = [0, 256], sizes = [8, 128], strides = [1, 1]} : vector<8x512xf32> to vector<8x128xf32>
    %407 = math.tanh %406 : vector<8x128xf32>
    %408 = vector.extract_strided_slice %382 {offsets = [0, 384], sizes = [8, 128], strides = [1, 1]} : vector<8x512xf32> to vector<8x128xf32>
    %cst_186 = arith.constant 5.000000e-01 : f32
    %409 = vector.broadcast %cst_186 : f32 to vector<8x128xf32>
    %410 = arith.mulf %409, %408 : vector<8x128xf32>
    %411 = math.tanh %410 : vector<8x128xf32>
    %cst_187 = arith.constant 5.000000e-01 : f32
    %412 = vector.broadcast %cst_187 : f32 to vector<8x128xf32>
    %413 = arith.mulf %412, %411 : vector<8x128xf32>
    %cst_188 = arith.constant 5.000000e-01 : f32
    %414 = vector.broadcast %cst_188 : f32 to vector<8x128xf32>
    %415 = arith.addf %413, %414 : vector<8x128xf32>
    %416 = arith.mulf %405, %333 : vector<8x128xf32>
    %417 = arith.mulf %397, %407 : vector<8x128xf32>
    %418 = arith.addf %416, %417 : vector<8x128xf32>
    %419 = math.tanh %418 : vector<8x128xf32>
    %420 = arith.mulf %415, %419 : vector<8x128xf32>
    %421 = vector.extract_strided_slice %389 {offsets = [0, 0], sizes = [8, 128], strides = [1, 1]} : vector<8x512xf32> to vector<8x128xf32>
    %cst_189 = arith.constant 5.000000e-01 : f32
    %422 = vector.broadcast %cst_189 : f32 to vector<8x128xf32>
    %423 = arith.mulf %422, %421 : vector<8x128xf32>
    %424 = math.tanh %423 : vector<8x128xf32>
    %cst_190 = arith.constant 5.000000e-01 : f32
    %425 = vector.broadcast %cst_190 : f32 to vector<8x128xf32>
    %426 = arith.mulf %425, %424 : vector<8x128xf32>
    %cst_191 = arith.constant 5.000000e-01 : f32
    %427 = vector.broadcast %cst_191 : f32 to vector<8x128xf32>
    %428 = arith.addf %426, %427 : vector<8x128xf32>
    %429 = vector.extract_strided_slice %389 {offsets = [0, 128], sizes = [8, 128], strides = [1, 1]} : vector<8x512xf32> to vector<8x128xf32>
    %cst_192 = arith.constant 5.000000e-01 : f32
    %430 = vector.broadcast %cst_192 : f32 to vector<8x128xf32>
    %431 = arith.mulf %430, %429 : vector<8x128xf32>
    %432 = math.tanh %431 : vector<8x128xf32>
    %cst_193 = arith.constant 5.000000e-01 : f32
    %433 = vector.broadcast %cst_193 : f32 to vector<8x128xf32>
    %434 = arith.mulf %433, %432 : vector<8x128xf32>
    %cst_194 = arith.constant 5.000000e-01 : f32
    %435 = vector.broadcast %cst_194 : f32 to vector<8x128xf32>
    %436 = arith.addf %434, %435 : vector<8x128xf32>
    %437 = vector.extract_strided_slice %389 {offsets = [0, 256], sizes = [8, 128], strides = [1, 1]} : vector<8x512xf32> to vector<8x128xf32>
    %438 = math.tanh %437 : vector<8x128xf32>
    %439 = vector.extract_strided_slice %389 {offsets = [0, 384], sizes = [8, 128], strides = [1, 1]} : vector<8x512xf32> to vector<8x128xf32>
    %cst_195 = arith.constant 5.000000e-01 : f32
    %440 = vector.broadcast %cst_195 : f32 to vector<8x128xf32>
    %441 = arith.mulf %440, %439 : vector<8x128xf32>
    %442 = math.tanh %441 : vector<8x128xf32>
    %cst_196 = arith.constant 5.000000e-01 : f32
    %443 = vector.broadcast %cst_196 : f32 to vector<8x128xf32>
    %444 = arith.mulf %443, %442 : vector<8x128xf32>
    %cst_197 = arith.constant 5.000000e-01 : f32
    %445 = vector.broadcast %cst_197 : f32 to vector<8x128xf32>
    %446 = arith.addf %444, %445 : vector<8x128xf32>
    %447 = arith.mulf %436, %364 : vector<8x128xf32>
    %448 = arith.mulf %428, %438 : vector<8x128xf32>
    %449 = arith.addf %447, %448 : vector<8x128xf32>
    %450 = math.tanh %449 : vector<8x128xf32>
    %451 = arith.mulf %446, %450 : vector<8x128xf32>
    %452 = arith.index_cast %c4_i32 : i32 to index
    %c0_198 = arith.constant 0 : index
    %c0_199 = arith.constant 0 : index
    %453 = vector.load %arg13[%452, %c0_198, %c0_199] : memref<8x8x128xf32, #tpu.memory_space<vmem>>, vector<1x8x128xf32>
    %454 = vector.shape_cast %453 : vector<1x8x128xf32> to vector<8x128xf32>
    %455 = vector.shape_cast %420 : vector<8x128xf32> to vector<1x8x128xf32>
    tpu.vector_store %arg13[%452, %c0_198, %c0_199], %455 {strides = array<i32>} : memref<8x8x128xf32, #tpu.memory_space<vmem>>, vector<1x8x128xf32>,
    %456 = arith.index_cast %375 : i32 to index
    %c0_200 = arith.constant 0 : index
    %c0_201 = arith.constant 0 : index
    %457 = vector.load %arg14[%456, %c0_200, %c0_201] : memref<8x8x128xf32, #tpu.memory_space<vmem>>, vector<1x8x128xf32>
    %458 = vector.shape_cast %457 : vector<1x8x128xf32> to vector<8x128xf32>
    %459 = vector.shape_cast %451 : vector<8x128xf32> to vector<1x8x128xf32>
    tpu.vector_store %arg14[%456, %c0_200, %c0_201], %459 {strides = array<i32>} : memref<8x8x128xf32, #tpu.memory_space<vmem>>, vector<1x8x128xf32>,
    %c5_i32 = arith.constant 5 : i32
    %c7_i32_202 = arith.constant 7 : i32
    %460 = arith.subi %c7_i32_202, %c5_i32 : i32
    %461 = arith.index_cast %c5_i32 : i32 to index
    %c0_203 = arith.constant 0 : index
    %c0_204 = arith.constant 0 : index
    %462 = vector.load %arg15[%461, %c0_203, %c0_204] : memref<8x8x512xf32, #tpu.memory_space<vmem>>, vector<1x8x512xf32>
    %463 = vector.shape_cast %462 : vector<1x8x512xf32> to vector<8x512xf32>
    %464 = arith.truncf %420 : vector<8x128xf32> to vector<8x128xbf16>
    %c0_205 = arith.constant 0 : index
    %c0_206 = arith.constant 0 : index
    %465 = vector.load %arg9[%c0_205, %c0_206] : memref<128x512xbf16, #tpu.memory_space<vmem>>, vector<128x512xbf16>
    %cst_207 = arith.constant dense<0.000000e+00> : vector<8x512xf32>
    %466 = tpu.matmul %464, %465, %cst_207 {dimension_numbers = #tpu.dot_dimension_numbers<[1], [0], [0], [1], [0, 0, 1, 1], [], []>} : vector<8x128xbf16>, vector<128x512xbf16>, vector<8x512xf32> -> vector<8x512xf32>
    %467 = arith.addf %463, %466 : vector<8x512xf32>
    %468 = arith.index_cast %460 : i32 to index
    %c0_208 = arith.constant 0 : index
    %c0_209 = arith.constant 0 : index
    %469 = vector.load %arg16[%468, %c0_208, %c0_209] : memref<8x8x512xf32, #tpu.memory_space<vmem>>, vector<1x8x512xf32>
    %470 = vector.shape_cast %469 : vector<1x8x512xf32> to vector<8x512xf32>
    %471 = arith.truncf %451 : vector<8x128xf32> to vector<8x128xbf16>
    %c0_210 = arith.constant 0 : index
    %c0_211 = arith.constant 0 : index
    %472 = vector.load %arg10[%c0_210, %c0_211] : memref<128x512xbf16, #tpu.memory_space<vmem>>, vector<128x512xbf16>
    %cst_212 = arith.constant dense<0.000000e+00> : vector<8x512xf32>
    %473 = tpu.matmul %471, %472, %cst_212 {dimension_numbers = #tpu.dot_dimension_numbers<[1], [0], [0], [1], [0, 0, 1, 1], [], []>} : vector<8x128xbf16>, vector<128x512xbf16>, vector<8x512xf32> -> vector<8x512xf32>
    %474 = arith.addf %470, %473 : vector<8x512xf32>
    %475 = vector.extract_strided_slice %467 {offsets = [0, 0], sizes = [8, 128], strides = [1, 1]} : vector<8x512xf32> to vector<8x128xf32>
    %cst_213 = arith.constant 5.000000e-01 : f32
    %476 = vector.broadcast %cst_213 : f32 to vector<8x128xf32>
    %477 = arith.mulf %476, %475 : vector<8x128xf32>
    %478 = math.tanh %477 : vector<8x128xf32>
    %cst_214 = arith.constant 5.000000e-01 : f32
    %479 = vector.broadcast %cst_214 : f32 to vector<8x128xf32>
    %480 = arith.mulf %479, %478 : vector<8x128xf32>
    %cst_215 = arith.constant 5.000000e-01 : f32
    %481 = vector.broadcast %cst_215 : f32 to vector<8x128xf32>
    %482 = arith.addf %480, %481 : vector<8x128xf32>
    %483 = vector.extract_strided_slice %467 {offsets = [0, 128], sizes = [8, 128], strides = [1, 1]} : vector<8x512xf32> to vector<8x128xf32>
    %cst_216 = arith.constant 5.000000e-01 : f32
    %484 = vector.broadcast %cst_216 : f32 to vector<8x128xf32>
    %485 = arith.mulf %484, %483 : vector<8x128xf32>
    %486 = math.tanh %485 : vector<8x128xf32>
    %cst_217 = arith.constant 5.000000e-01 : f32
    %487 = vector.broadcast %cst_217 : f32 to vector<8x128xf32>
    %488 = arith.mulf %487, %486 : vector<8x128xf32>
    %cst_218 = arith.constant 5.000000e-01 : f32
    %489 = vector.broadcast %cst_218 : f32 to vector<8x128xf32>
    %490 = arith.addf %488, %489 : vector<8x128xf32>
    %491 = vector.extract_strided_slice %467 {offsets = [0, 256], sizes = [8, 128], strides = [1, 1]} : vector<8x512xf32> to vector<8x128xf32>
    %492 = math.tanh %491 : vector<8x128xf32>
    %493 = vector.extract_strided_slice %467 {offsets = [0, 384], sizes = [8, 128], strides = [1, 1]} : vector<8x512xf32> to vector<8x128xf32>
    %cst_219 = arith.constant 5.000000e-01 : f32
    %494 = vector.broadcast %cst_219 : f32 to vector<8x128xf32>
    %495 = arith.mulf %494, %493 : vector<8x128xf32>
    %496 = math.tanh %495 : vector<8x128xf32>
    %cst_220 = arith.constant 5.000000e-01 : f32
    %497 = vector.broadcast %cst_220 : f32 to vector<8x128xf32>
    %498 = arith.mulf %497, %496 : vector<8x128xf32>
    %cst_221 = arith.constant 5.000000e-01 : f32
    %499 = vector.broadcast %cst_221 : f32 to vector<8x128xf32>
    %500 = arith.addf %498, %499 : vector<8x128xf32>
    %501 = arith.mulf %490, %418 : vector<8x128xf32>
    %502 = arith.mulf %482, %492 : vector<8x128xf32>
    %503 = arith.addf %501, %502 : vector<8x128xf32>
    %504 = math.tanh %503 : vector<8x128xf32>
    %505 = arith.mulf %500, %504 : vector<8x128xf32>
    %506 = vector.extract_strided_slice %474 {offsets = [0, 0], sizes = [8, 128], strides = [1, 1]} : vector<8x512xf32> to vector<8x128xf32>
    %cst_222 = arith.constant 5.000000e-01 : f32
    %507 = vector.broadcast %cst_222 : f32 to vector<8x128xf32>
    %508 = arith.mulf %507, %506 : vector<8x128xf32>
    %509 = math.tanh %508 : vector<8x128xf32>
    %cst_223 = arith.constant 5.000000e-01 : f32
    %510 = vector.broadcast %cst_223 : f32 to vector<8x128xf32>
    %511 = arith.mulf %510, %509 : vector<8x128xf32>
    %cst_224 = arith.constant 5.000000e-01 : f32
    %512 = vector.broadcast %cst_224 : f32 to vector<8x128xf32>
    %513 = arith.addf %511, %512 : vector<8x128xf32>
    %514 = vector.extract_strided_slice %474 {offsets = [0, 128], sizes = [8, 128], strides = [1, 1]} : vector<8x512xf32> to vector<8x128xf32>
    %cst_225 = arith.constant 5.000000e-01 : f32
    %515 = vector.broadcast %cst_225 : f32 to vector<8x128xf32>
    %516 = arith.mulf %515, %514 : vector<8x128xf32>
    %517 = math.tanh %516 : vector<8x128xf32>
    %cst_226 = arith.constant 5.000000e-01 : f32
    %518 = vector.broadcast %cst_226 : f32 to vector<8x128xf32>
    %519 = arith.mulf %518, %517 : vector<8x128xf32>
    %cst_227 = arith.constant 5.000000e-01 : f32
    %520 = vector.broadcast %cst_227 : f32 to vector<8x128xf32>
    %521 = arith.addf %519, %520 : vector<8x128xf32>
    %522 = vector.extract_strided_slice %474 {offsets = [0, 256], sizes = [8, 128], strides = [1, 1]} : vector<8x512xf32> to vector<8x128xf32>
    %523 = math.tanh %522 : vector<8x128xf32>
    %524 = vector.extract_strided_slice %474 {offsets = [0, 384], sizes = [8, 128], strides = [1, 1]} : vector<8x512xf32> to vector<8x128xf32>
    %cst_228 = arith.constant 5.000000e-01 : f32
    %525 = vector.broadcast %cst_228 : f32 to vector<8x128xf32>
    %526 = arith.mulf %525, %524 : vector<8x128xf32>
    %527 = math.tanh %526 : vector<8x128xf32>
    %cst_229 = arith.constant 5.000000e-01 : f32
    %528 = vector.broadcast %cst_229 : f32 to vector<8x128xf32>
    %529 = arith.mulf %528, %527 : vector<8x128xf32>
    %cst_230 = arith.constant 5.000000e-01 : f32
    %530 = vector.broadcast %cst_230 : f32 to vector<8x128xf32>
    %531 = arith.addf %529, %530 : vector<8x128xf32>
    %532 = arith.mulf %521, %449 : vector<8x128xf32>
    %533 = arith.mulf %513, %523 : vector<8x128xf32>
    %534 = arith.addf %532, %533 : vector<8x128xf32>
    %535 = math.tanh %534 : vector<8x128xf32>
    %536 = arith.mulf %531, %535 : vector<8x128xf32>
    %537 = arith.index_cast %c5_i32 : i32 to index
    %c0_231 = arith.constant 0 : index
    %c0_232 = arith.constant 0 : index
    %538 = vector.load %arg13[%537, %c0_231, %c0_232] : memref<8x8x128xf32, #tpu.memory_space<vmem>>, vector<1x8x128xf32>
    %539 = vector.shape_cast %538 : vector<1x8x128xf32> to vector<8x128xf32>
    %540 = vector.shape_cast %505 : vector<8x128xf32> to vector<1x8x128xf32>
    tpu.vector_store %arg13[%537, %c0_231, %c0_232], %540 {strides = array<i32>} : memref<8x8x128xf32, #tpu.memory_space<vmem>>, vector<1x8x128xf32>,
    %541 = arith.index_cast %460 : i32 to index
    %c0_233 = arith.constant 0 : index
    %c0_234 = arith.constant 0 : index
    %542 = vector.load %arg14[%541, %c0_233, %c0_234] : memref<8x8x128xf32, #tpu.memory_space<vmem>>, vector<1x8x128xf32>
    %543 = vector.shape_cast %542 : vector<1x8x128xf32> to vector<8x128xf32>
    %544 = vector.shape_cast %536 : vector<8x128xf32> to vector<1x8x128xf32>
    tpu.vector_store %arg14[%541, %c0_233, %c0_234], %544 {strides = array<i32>} : memref<8x8x128xf32, #tpu.memory_space<vmem>>, vector<1x8x128xf32>,
    %c6_i32 = arith.constant 6 : i32
    %c7_i32_235 = arith.constant 7 : i32
    %545 = arith.subi %c7_i32_235, %c6_i32 : i32
    %546 = arith.index_cast %c6_i32 : i32 to index
    %c0_236 = arith.constant 0 : index
    %c0_237 = arith.constant 0 : index
    %547 = vector.load %arg15[%546, %c0_236, %c0_237] : memref<8x8x512xf32, #tpu.memory_space<vmem>>, vector<1x8x512xf32>
    %548 = vector.shape_cast %547 : vector<1x8x512xf32> to vector<8x512xf32>
    %549 = arith.truncf %505 : vector<8x128xf32> to vector<8x128xbf16>
    %c0_238 = arith.constant 0 : index
    %c0_239 = arith.constant 0 : index
    %550 = vector.load %arg9[%c0_238, %c0_239] : memref<128x512xbf16, #tpu.memory_space<vmem>>, vector<128x512xbf16>
    %cst_240 = arith.constant dense<0.000000e+00> : vector<8x512xf32>
    %551 = tpu.matmul %549, %550, %cst_240 {dimension_numbers = #tpu.dot_dimension_numbers<[1], [0], [0], [1], [0, 0, 1, 1], [], []>} : vector<8x128xbf16>, vector<128x512xbf16>, vector<8x512xf32> -> vector<8x512xf32>
    %552 = arith.addf %548, %551 : vector<8x512xf32>
    %553 = arith.index_cast %545 : i32 to index
    %c0_241 = arith.constant 0 : index
    %c0_242 = arith.constant 0 : index
    %554 = vector.load %arg16[%553, %c0_241, %c0_242] : memref<8x8x512xf32, #tpu.memory_space<vmem>>, vector<1x8x512xf32>
    %555 = vector.shape_cast %554 : vector<1x8x512xf32> to vector<8x512xf32>
    %556 = arith.truncf %536 : vector<8x128xf32> to vector<8x128xbf16>
    %c0_243 = arith.constant 0 : index
    %c0_244 = arith.constant 0 : index
    %557 = vector.load %arg10[%c0_243, %c0_244] : memref<128x512xbf16, #tpu.memory_space<vmem>>, vector<128x512xbf16>
    %cst_245 = arith.constant dense<0.000000e+00> : vector<8x512xf32>
    %558 = tpu.matmul %556, %557, %cst_245 {dimension_numbers = #tpu.dot_dimension_numbers<[1], [0], [0], [1], [0, 0, 1, 1], [], []>} : vector<8x128xbf16>, vector<128x512xbf16>, vector<8x512xf32> -> vector<8x512xf32>
    %559 = arith.addf %555, %558 : vector<8x512xf32>
    %560 = vector.extract_strided_slice %552 {offsets = [0, 0], sizes = [8, 128], strides = [1, 1]} : vector<8x512xf32> to vector<8x128xf32>
    %cst_246 = arith.constant 5.000000e-01 : f32
    %561 = vector.broadcast %cst_246 : f32 to vector<8x128xf32>
    %562 = arith.mulf %561, %560 : vector<8x128xf32>
    %563 = math.tanh %562 : vector<8x128xf32>
    %cst_247 = arith.constant 5.000000e-01 : f32
    %564 = vector.broadcast %cst_247 : f32 to vector<8x128xf32>
    %565 = arith.mulf %564, %563 : vector<8x128xf32>
    %cst_248 = arith.constant 5.000000e-01 : f32
    %566 = vector.broadcast %cst_248 : f32 to vector<8x128xf32>
    %567 = arith.addf %565, %566 : vector<8x128xf32>
    %568 = vector.extract_strided_slice %552 {offsets = [0, 128], sizes = [8, 128], strides = [1, 1]} : vector<8x512xf32> to vector<8x128xf32>
    %cst_249 = arith.constant 5.000000e-01 : f32
    %569 = vector.broadcast %cst_249 : f32 to vector<8x128xf32>
    %570 = arith.mulf %569, %568 : vector<8x128xf32>
    %571 = math.tanh %570 : vector<8x128xf32>
    %cst_250 = arith.constant 5.000000e-01 : f32
    %572 = vector.broadcast %cst_250 : f32 to vector<8x128xf32>
    %573 = arith.mulf %572, %571 : vector<8x128xf32>
    %cst_251 = arith.constant 5.000000e-01 : f32
    %574 = vector.broadcast %cst_251 : f32 to vector<8x128xf32>
    %575 = arith.addf %573, %574 : vector<8x128xf32>
    %576 = vector.extract_strided_slice %552 {offsets = [0, 256], sizes = [8, 128], strides = [1, 1]} : vector<8x512xf32> to vector<8x128xf32>
    %577 = math.tanh %576 : vector<8x128xf32>
    %578 = vector.extract_strided_slice %552 {offsets = [0, 384], sizes = [8, 128], strides = [1, 1]} : vector<8x512xf32> to vector<8x128xf32>
    %cst_252 = arith.constant 5.000000e-01 : f32
    %579 = vector.broadcast %cst_252 : f32 to vector<8x128xf32>
    %580 = arith.mulf %579, %578 : vector<8x128xf32>
    %581 = math.tanh %580 : vector<8x128xf32>
    %cst_253 = arith.constant 5.000000e-01 : f32
    %582 = vector.broadcast %cst_253 : f32 to vector<8x128xf32>
    %583 = arith.mulf %582, %581 : vector<8x128xf32>
    %cst_254 = arith.constant 5.000000e-01 : f32
    %584 = vector.broadcast %cst_254 : f32 to vector<8x128xf32>
    %585 = arith.addf %583, %584 : vector<8x128xf32>
    %586 = arith.mulf %575, %503 : vector<8x128xf32>
    %587 = arith.mulf %567, %577 : vector<8x128xf32>
    %588 = arith.addf %586, %587 : vector<8x128xf32>
    %589 = math.tanh %588 : vector<8x128xf32>
    %590 = arith.mulf %585, %589 : vector<8x128xf32>
    %591 = vector.extract_strided_slice %559 {offsets = [0, 0], sizes = [8, 128], strides = [1, 1]} : vector<8x512xf32> to vector<8x128xf32>
    %cst_255 = arith.constant 5.000000e-01 : f32
    %592 = vector.broadcast %cst_255 : f32 to vector<8x128xf32>
    %593 = arith.mulf %592, %591 : vector<8x128xf32>
    %594 = math.tanh %593 : vector<8x128xf32>
    %cst_256 = arith.constant 5.000000e-01 : f32
    %595 = vector.broadcast %cst_256 : f32 to vector<8x128xf32>
    %596 = arith.mulf %595, %594 : vector<8x128xf32>
    %cst_257 = arith.constant 5.000000e-01 : f32
    %597 = vector.broadcast %cst_257 : f32 to vector<8x128xf32>
    %598 = arith.addf %596, %597 : vector<8x128xf32>
    %599 = vector.extract_strided_slice %559 {offsets = [0, 128], sizes = [8, 128], strides = [1, 1]} : vector<8x512xf32> to vector<8x128xf32>
    %cst_258 = arith.constant 5.000000e-01 : f32
    %600 = vector.broadcast %cst_258 : f32 to vector<8x128xf32>
    %601 = arith.mulf %600, %599 : vector<8x128xf32>
    %602 = math.tanh %601 : vector<8x128xf32>
    %cst_259 = arith.constant 5.000000e-01 : f32
    %603 = vector.broadcast %cst_259 : f32 to vector<8x128xf32>
    %604 = arith.mulf %603, %602 : vector<8x128xf32>
    %cst_260 = arith.constant 5.000000e-01 : f32
    %605 = vector.broadcast %cst_260 : f32 to vector<8x128xf32>
    %606 = arith.addf %604, %605 : vector<8x128xf32>
    %607 = vector.extract_strided_slice %559 {offsets = [0, 256], sizes = [8, 128], strides = [1, 1]} : vector<8x512xf32> to vector<8x128xf32>
    %608 = math.tanh %607 : vector<8x128xf32>
    %609 = vector.extract_strided_slice %559 {offsets = [0, 384], sizes = [8, 128], strides = [1, 1]} : vector<8x512xf32> to vector<8x128xf32>
    %cst_261 = arith.constant 5.000000e-01 : f32
    %610 = vector.broadcast %cst_261 : f32 to vector<8x128xf32>
    %611 = arith.mulf %610, %609 : vector<8x128xf32>
    %612 = math.tanh %611 : vector<8x128xf32>
    %cst_262 = arith.constant 5.000000e-01 : f32
    %613 = vector.broadcast %cst_262 : f32 to vector<8x128xf32>
    %614 = arith.mulf %613, %612 : vector<8x128xf32>
    %cst_263 = arith.constant 5.000000e-01 : f32
    %615 = vector.broadcast %cst_263 : f32 to vector<8x128xf32>
    %616 = arith.addf %614, %615 : vector<8x128xf32>
    %617 = arith.mulf %606, %534 : vector<8x128xf32>
    %618 = arith.mulf %598, %608 : vector<8x128xf32>
    %619 = arith.addf %617, %618 : vector<8x128xf32>
    %620 = math.tanh %619 : vector<8x128xf32>
    %621 = arith.mulf %616, %620 : vector<8x128xf32>
    %622 = arith.index_cast %c6_i32 : i32 to index
    %c0_264 = arith.constant 0 : index
    %c0_265 = arith.constant 0 : index
    %623 = vector.load %arg13[%622, %c0_264, %c0_265] : memref<8x8x128xf32, #tpu.memory_space<vmem>>, vector<1x8x128xf32>
    %624 = vector.shape_cast %623 : vector<1x8x128xf32> to vector<8x128xf32>
    %625 = vector.shape_cast %590 : vector<8x128xf32> to vector<1x8x128xf32>
    tpu.vector_store %arg13[%622, %c0_264, %c0_265], %625 {strides = array<i32>} : memref<8x8x128xf32, #tpu.memory_space<vmem>>, vector<1x8x128xf32>,
    %626 = arith.index_cast %545 : i32 to index
    %c0_266 = arith.constant 0 : index
    %c0_267 = arith.constant 0 : index
    %627 = vector.load %arg14[%626, %c0_266, %c0_267] : memref<8x8x128xf32, #tpu.memory_space<vmem>>, vector<1x8x128xf32>
    %628 = vector.shape_cast %627 : vector<1x8x128xf32> to vector<8x128xf32>
    %629 = vector.shape_cast %621 : vector<8x128xf32> to vector<1x8x128xf32>
    tpu.vector_store %arg14[%626, %c0_266, %c0_267], %629 {strides = array<i32>} : memref<8x8x128xf32, #tpu.memory_space<vmem>>, vector<1x8x128xf32>,
    %c7_i32_268 = arith.constant 7 : i32
    %c7_i32_269 = arith.constant 7 : i32
    %630 = arith.subi %c7_i32_269, %c7_i32_268 : i32
    %631 = arith.index_cast %c7_i32_268 : i32 to index
    %c0_270 = arith.constant 0 : index
    %c0_271 = arith.constant 0 : index
    %632 = vector.load %arg15[%631, %c0_270, %c0_271] : memref<8x8x512xf32, #tpu.memory_space<vmem>>, vector<1x8x512xf32>
    %633 = vector.shape_cast %632 : vector<1x8x512xf32> to vector<8x512xf32>
    %634 = arith.truncf %590 : vector<8x128xf32> to vector<8x128xbf16>
    %c0_272 = arith.constant 0 : index
    %c0_273 = arith.constant 0 : index
    %635 = vector.load %arg9[%c0_272, %c0_273] : memref<128x512xbf16, #tpu.memory_space<vmem>>, vector<128x512xbf16>
    %cst_274 = arith.constant dense<0.000000e+00> : vector<8x512xf32>
    %636 = tpu.matmul %634, %635, %cst_274 {dimension_numbers = #tpu.dot_dimension_numbers<[1], [0], [0], [1], [0, 0, 1, 1], [], []>} : vector<8x128xbf16>, vector<128x512xbf16>, vector<8x512xf32> -> vector<8x512xf32>
    %637 = arith.addf %633, %636 : vector<8x512xf32>
    %638 = arith.index_cast %630 : i32 to index
    %c0_275 = arith.constant 0 : index
    %c0_276 = arith.constant 0 : index
    %639 = vector.load %arg16[%638, %c0_275, %c0_276] : memref<8x8x512xf32, #tpu.memory_space<vmem>>, vector<1x8x512xf32>
    %640 = vector.shape_cast %639 : vector<1x8x512xf32> to vector<8x512xf32>
    %641 = arith.truncf %621 : vector<8x128xf32> to vector<8x128xbf16>
    %c0_277 = arith.constant 0 : index
    %c0_278 = arith.constant 0 : index
    %642 = vector.load %arg10[%c0_277, %c0_278] : memref<128x512xbf16, #tpu.memory_space<vmem>>, vector<128x512xbf16>
    %cst_279 = arith.constant dense<0.000000e+00> : vector<8x512xf32>
    %643 = tpu.matmul %641, %642, %cst_279 {dimension_numbers = #tpu.dot_dimension_numbers<[1], [0], [0], [1], [0, 0, 1, 1], [], []>} : vector<8x128xbf16>, vector<128x512xbf16>, vector<8x512xf32> -> vector<8x512xf32>
    %644 = arith.addf %640, %643 : vector<8x512xf32>
    %645 = vector.extract_strided_slice %637 {offsets = [0, 0], sizes = [8, 128], strides = [1, 1]} : vector<8x512xf32> to vector<8x128xf32>
    %cst_280 = arith.constant 5.000000e-01 : f32
    %646 = vector.broadcast %cst_280 : f32 to vector<8x128xf32>
    %647 = arith.mulf %646, %645 : vector<8x128xf32>
    %648 = math.tanh %647 : vector<8x128xf32>
    %cst_281 = arith.constant 5.000000e-01 : f32
    %649 = vector.broadcast %cst_281 : f32 to vector<8x128xf32>
    %650 = arith.mulf %649, %648 : vector<8x128xf32>
    %cst_282 = arith.constant 5.000000e-01 : f32
    %651 = vector.broadcast %cst_282 : f32 to vector<8x128xf32>
    %652 = arith.addf %650, %651 : vector<8x128xf32>
    %653 = vector.extract_strided_slice %637 {offsets = [0, 128], sizes = [8, 128], strides = [1, 1]} : vector<8x512xf32> to vector<8x128xf32>
    %cst_283 = arith.constant 5.000000e-01 : f32
    %654 = vector.broadcast %cst_283 : f32 to vector<8x128xf32>
    %655 = arith.mulf %654, %653 : vector<8x128xf32>
    %656 = math.tanh %655 : vector<8x128xf32>
    %cst_284 = arith.constant 5.000000e-01 : f32
    %657 = vector.broadcast %cst_284 : f32 to vector<8x128xf32>
    %658 = arith.mulf %657, %656 : vector<8x128xf32>
    %cst_285 = arith.constant 5.000000e-01 : f32
    %659 = vector.broadcast %cst_285 : f32 to vector<8x128xf32>
    %660 = arith.addf %658, %659 : vector<8x128xf32>
    %661 = vector.extract_strided_slice %637 {offsets = [0, 256], sizes = [8, 128], strides = [1, 1]} : vector<8x512xf32> to vector<8x128xf32>
    %662 = math.tanh %661 : vector<8x128xf32>
    %663 = vector.extract_strided_slice %637 {offsets = [0, 384], sizes = [8, 128], strides = [1, 1]} : vector<8x512xf32> to vector<8x128xf32>
    %cst_286 = arith.constant 5.000000e-01 : f32
    %664 = vector.broadcast %cst_286 : f32 to vector<8x128xf32>
    %665 = arith.mulf %664, %663 : vector<8x128xf32>
    %666 = math.tanh %665 : vector<8x128xf32>
    %cst_287 = arith.constant 5.000000e-01 : f32
    %667 = vector.broadcast %cst_287 : f32 to vector<8x128xf32>
    %668 = arith.mulf %667, %666 : vector<8x128xf32>
    %cst_288 = arith.constant 5.000000e-01 : f32
    %669 = vector.broadcast %cst_288 : f32 to vector<8x128xf32>
    %670 = arith.addf %668, %669 : vector<8x128xf32>
    %671 = arith.mulf %660, %588 : vector<8x128xf32>
    %672 = arith.mulf %652, %662 : vector<8x128xf32>
    %673 = arith.addf %671, %672 : vector<8x128xf32>
    %674 = math.tanh %673 : vector<8x128xf32>
    %675 = arith.mulf %670, %674 : vector<8x128xf32>
    %676 = vector.extract_strided_slice %644 {offsets = [0, 0], sizes = [8, 128], strides = [1, 1]} : vector<8x512xf32> to vector<8x128xf32>
    %cst_289 = arith.constant 5.000000e-01 : f32
    %677 = vector.broadcast %cst_289 : f32 to vector<8x128xf32>
    %678 = arith.mulf %677, %676 : vector<8x128xf32>
    %679 = math.tanh %678 : vector<8x128xf32>
    %cst_290 = arith.constant 5.000000e-01 : f32
    %680 = vector.broadcast %cst_290 : f32 to vector<8x128xf32>
    %681 = arith.mulf %680, %679 : vector<8x128xf32>
    %cst_291 = arith.constant 5.000000e-01 : f32
    %682 = vector.broadcast %cst_291 : f32 to vector<8x128xf32>
    %683 = arith.addf %681, %682 : vector<8x128xf32>
    %684 = vector.extract_strided_slice %644 {offsets = [0, 128], sizes = [8, 128], strides = [1, 1]} : vector<8x512xf32> to vector<8x128xf32>
    %cst_292 = arith.constant 5.000000e-01 : f32
    %685 = vector.broadcast %cst_292 : f32 to vector<8x128xf32>
    %686 = arith.mulf %685, %684 : vector<8x128xf32>
    %687 = math.tanh %686 : vector<8x128xf32>
    %cst_293 = arith.constant 5.000000e-01 : f32
    %688 = vector.broadcast %cst_293 : f32 to vector<8x128xf32>
    %689 = arith.mulf %688, %687 : vector<8x128xf32>
    %cst_294 = arith.constant 5.000000e-01 : f32
    %690 = vector.broadcast %cst_294 : f32 to vector<8x128xf32>
    %691 = arith.addf %689, %690 : vector<8x128xf32>
    %692 = vector.extract_strided_slice %644 {offsets = [0, 256], sizes = [8, 128], strides = [1, 1]} : vector<8x512xf32> to vector<8x128xf32>
    %693 = math.tanh %692 : vector<8x128xf32>
    %694 = vector.extract_strided_slice %644 {offsets = [0, 384], sizes = [8, 128], strides = [1, 1]} : vector<8x512xf32> to vector<8x128xf32>
    %cst_295 = arith.constant 5.000000e-01 : f32
    %695 = vector.broadcast %cst_295 : f32 to vector<8x128xf32>
    %696 = arith.mulf %695, %694 : vector<8x128xf32>
    %697 = math.tanh %696 : vector<8x128xf32>
    %cst_296 = arith.constant 5.000000e-01 : f32
    %698 = vector.broadcast %cst_296 : f32 to vector<8x128xf32>
    %699 = arith.mulf %698, %697 : vector<8x128xf32>
    %cst_297 = arith.constant 5.000000e-01 : f32
    %700 = vector.broadcast %cst_297 : f32 to vector<8x128xf32>
    %701 = arith.addf %699, %700 : vector<8x128xf32>
    %702 = arith.mulf %691, %619 : vector<8x128xf32>
    %703 = arith.mulf %683, %693 : vector<8x128xf32>
    %704 = arith.addf %702, %703 : vector<8x128xf32>
    %705 = math.tanh %704 : vector<8x128xf32>
    %706 = arith.mulf %701, %705 : vector<8x128xf32>
    %707 = arith.index_cast %c7_i32_268 : i32 to index
    %c0_298 = arith.constant 0 : index
    %c0_299 = arith.constant 0 : index
    %708 = vector.load %arg13[%707, %c0_298, %c0_299] : memref<8x8x128xf32, #tpu.memory_space<vmem>>, vector<1x8x128xf32>
    %709 = vector.shape_cast %708 : vector<1x8x128xf32> to vector<8x128xf32>
    %710 = vector.shape_cast %675 : vector<8x128xf32> to vector<1x8x128xf32>
    tpu.vector_store %arg13[%707, %c0_298, %c0_299], %710 {strides = array<i32>} : memref<8x8x128xf32, #tpu.memory_space<vmem>>, vector<1x8x128xf32>,
    %711 = arith.index_cast %630 : i32 to index
    %c0_300 = arith.constant 0 : index
    %c0_301 = arith.constant 0 : index
    %712 = vector.load %arg14[%711, %c0_300, %c0_301] : memref<8x8x128xf32, #tpu.memory_space<vmem>>, vector<1x8x128xf32>
    %713 = vector.shape_cast %712 : vector<1x8x128xf32> to vector<8x128xf32>
    %714 = vector.shape_cast %706 : vector<8x128xf32> to vector<1x8x128xf32>
    tpu.vector_store %arg14[%711, %c0_300, %c0_301], %714 {strides = array<i32>} : memref<8x8x128xf32, #tpu.memory_space<vmem>>, vector<1x8x128xf32>,
    %c8_i32 = arith.constant 8 : i32
    %c0_302 = arith.constant 0 : index
    %c0_303 = arith.constant 0 : index
    %715 = vector.load %arg17[%c0_302, %c0_303] : memref<8x128xf32, #tpu.memory_space<vmem>>, vector<8x128xf32>
    tpu.vector_store %arg17[%c0_302, %c0_303], %675 {strides = array<i32>} : memref<8x128xf32, #tpu.memory_space<vmem>>, vector<8x128xf32>,
    %c0_304 = arith.constant 0 : index
    %c0_305 = arith.constant 0 : index
    %716 = vector.load %arg18[%c0_304, %c0_305] : memref<8x128xf32, #tpu.memory_space<vmem>>, vector<8x128xf32>
    tpu.vector_store %arg18[%c0_304, %c0_305], %673 {strides = array<i32>} : memref<8x128xf32, #tpu.memory_space<vmem>>, vector<8x128xf32>,
    %c0_306 = arith.constant 0 : index
    %c0_307 = arith.constant 0 : index
    %717 = vector.load %arg19[%c0_306, %c0_307] : memref<8x128xf32, #tpu.memory_space<vmem>>, vector<8x128xf32>
    tpu.vector_store %arg19[%c0_306, %c0_307], %706 {strides = array<i32>} : memref<8x128xf32, #tpu.memory_space<vmem>>, vector<8x128xf32>,
    %c0_308 = arith.constant 0 : index
    %c0_309 = arith.constant 0 : index
    %718 = vector.load %arg20[%c0_308, %c0_309] : memref<8x128xf32, #tpu.memory_space<vmem>>, vector<8x128xf32>
    tpu.vector_store %arg20[%c0_308, %c0_309], %704 {strides = array<i32>} : memref<8x128xf32, #tpu.memory_space<vmem>>, vector<8x128xf32>,
    return
  }
  func.func @transform_0(%arg0: i32) -> (i32, i32) {
    %c0_i32 = arith.constant 0 : i32
    %c0_i32_0 = arith.constant 0 : i32
    return %arg0, %c0_i32 : i32, i32
  }
  func.func @transform_1(%arg0: i32) -> (i32, i32) {
    %c0_i32 = arith.constant 0 : i32
    %c0_i32_0 = arith.constant 0 : i32
    return %arg0, %c0_i32 : i32, i32
  }
  func.func @transform_2(%arg0: i32) -> (i32, i32) {
    %c0_i32 = arith.constant 0 : i32
    %0 = arith.subi %c0_i32, %arg0 : i32
    %c0_i32_0 = arith.constant 0 : i32
    %c0_i32_1 = arith.constant 0 : i32
    return %0, %c0_i32_0 : i32, i32
  }
  func.func @transform_3(%arg0: i32) -> (i32, i32) {
    %c0_i32 = arith.constant 0 : i32
    %0 = arith.subi %c0_i32, %arg0 : i32
    %c0_i32_0 = arith.constant 0 : i32
    %c0_i32_1 = arith.constant 0 : i32
    return %0, %c0_i32_0 : i32, i32
  }
  func.func @transform_4(%arg0: i32) -> (i32, i32) {
    %c0_i32 = arith.constant 0 : i32
    %c0_i32_0 = arith.constant 0 : i32
    %c0_i32_1 = arith.constant 0 : i32
    return %c0_i32, %c0_i32_0 : i32, i32
  }
  func.func @transform_5(%arg0: i32) -> (i32, i32) {
    %c0_i32 = arith.constant 0 : i32
    %c0_i32_0 = arith.constant 0 : i32
    %c0_i32_1 = arith.constant 0 : i32
    return %c0_i32, %c0_i32_0 : i32, i32
  }
  func.func @transform_6(%arg0: i32) -> (i32, i32) {
    %c0_i32 = arith.constant 0 : i32
    %c0_i32_0 = arith.constant 0 : i32
    %c0_i32_1 = arith.constant 0 : i32
    return %c0_i32, %c0_i32_0 : i32, i32
  }
  func.func @transform_7(%arg0: i32) -> (i32, i32) {
    %c0_i32 = arith.constant 0 : i32
    %c0_i32_0 = arith.constant 0 : i32
    %c0_i32_1 = arith.constant 0 : i32
    return %c0_i32, %c0_i32_0 : i32, i32
  }
  func.func @transform_8(%arg0: i32) -> (i32, i32) {
    %c0_i32 = arith.constant 0 : i32
    %c0_i32_0 = arith.constant 0 : i32
    %c0_i32_1 = arith.constant 0 : i32
    return %c0_i32, %c0_i32_0 : i32, i32
  }
  func.func @transform_9(%arg0: i32) -> (i32, i32) {
    %c0_i32 = arith.constant 0 : i32
    %c0_i32_0 = arith.constant 0 : i32
    %c0_i32_1 = arith.constant 0 : i32
    return %c0_i32, %c0_i32_0 : i32, i32
  }
  func.func @transform_10(%arg0: i32) -> (i32, i32) {
    %c0_i32 = arith.constant 0 : i32
    %c0_i32_0 = arith.constant 0 : i32
    %c0_i32_1 = arith.constant 0 : i32
    return %c0_i32, %c0_i32_0 : i32, i32
  }
  func.func @transform_11(%arg0: i32) -> (i32, i32) {
    %c0_i32 = arith.constant 0 : i32
    %c0_i32_0 = arith.constant 0 : i32
    %c0_i32_1 = arith.constant 0 : i32
    return %c0_i32, %c0_i32_0 : i32, i32
  }
  func.func @transform_12(%arg0: i32) -> (i32, i32, i32) {
    %c0_i32 = arith.constant 0 : i32
    %c0_i32_0 = arith.constant 0 : i32
    %c0_i32_1 = arith.constant 0 : i32
    return %arg0, %c0_i32, %c0_i32_0 : i32, i32, i32
  }
  func.func @transform_13(%arg0: i32) -> (i32, i32, i32) {
    %c0_i32 = arith.constant 0 : i32
    %0 = arith.subi %c0_i32, %arg0 : i32
    %c0_i32_0 = arith.constant 0 : i32
    %c0_i32_1 = arith.constant 0 : i32
    %c0_i32_2 = arith.constant 0 : i32
    return %0, %c0_i32_0, %c0_i32_1 : i32, i32, i32
  }
}

module attributes {stable_mosaic.version = 11 : i64} {
  func.func @kernel(%arg0: i32, %arg1: memref<64x32xf32, #tpu.memory_space<vmem>>, %arg2: memref<64x32xf32, #tpu.memory_space<vmem>>, %arg3: memref<32x512xbf16, #tpu.memory_space<vmem>>, %arg4: memref<32x512xbf16, #tpu.memory_space<vmem>>, %arg5: memref<128x512xbf16, #tpu.memory_space<vmem>>, %arg6: memref<128x512xbf16, #tpu.memory_space<vmem>>, %arg7: memref<1x512xf32, #tpu.memory_space<vmem>>, %arg8: memref<1x512xf32, #tpu.memory_space<vmem>>, %arg9: memref<8x8x128xf32, #tpu.memory_space<vmem>>, %arg10: memref<8x8x128xf32, #tpu.memory_space<vmem>>, %arg11: memref<8x8x512xf32, #tpu.memory_space<vmem>>, %arg12: memref<8x8x512xf32, #tpu.memory_space<vmem>>, %arg13: memref<8x128xf32, #tpu.memory_space<vmem>>, %arg14: memref<8x128xf32, #tpu.memory_space<vmem>>, %arg15: memref<8x128xf32, #tpu.memory_space<vmem>>, %arg16: memref<8x128xf32, #tpu.memory_space<vmem>>) attributes {dimension_semantics = [#tpu.dimension_semantics<arbitrary>], iteration_bounds = array<i64: 1>, scalar_prefetch = 0 : i64, scratch_operands = 6 : i64, tpu.core_type = #tpu.core_type<tc>, window_params = [{transform_indices = @transform_0, window_bounds = array<i64: 64, 32>}, {transform_indices = @transform_1, window_bounds = array<i64: 64, 32>}, {pipeline_mode = #tpu.pipeline_mode<synchronous>, transform_indices = @transform_2, window_bounds = array<i64: 32, 512>}, {pipeline_mode = #tpu.pipeline_mode<synchronous>, transform_indices = @transform_3, window_bounds = array<i64: 32, 512>}, {pipeline_mode = #tpu.pipeline_mode<synchronous>, transform_indices = @transform_4, window_bounds = array<i64: 128, 512>}, {pipeline_mode = #tpu.pipeline_mode<synchronous>, transform_indices = @transform_5, window_bounds = array<i64: 128, 512>}, {pipeline_mode = #tpu.pipeline_mode<synchronous>, transform_indices = @transform_6, window_bounds = array<i64: 1, 512>}, {pipeline_mode = #tpu.pipeline_mode<synchronous>, transform_indices = @transform_7, window_bounds = array<i64: 1, 512>}, {transform_indices = @transform_8, window_bounds = array<i64: 8, 8, 128>}, {transform_indices = @transform_9, window_bounds = array<i64: 8, 8, 128>}]} {
    %c0_i32 = arith.constant 0 : i32
    %0 = arith.cmpi eq, %arg0, %c0_i32 : i32
    %1 = arith.extui %0 : i1 to i32
    %c0_i32_0 = arith.constant 0 : i32
    %2 = arith.cmpi ne, %1, %c0_i32_0 : i32
    scf.if %2 {
      %cst_300 = arith.constant 0.000000e+00 : f32
      %709 = vector.broadcast %cst_300 : f32 to vector<8x128xf32>
      %c0_301 = arith.constant 0 : index
      %c0_302 = arith.constant 0 : index
      %710 = vector.load %arg13[%c0_301, %c0_302] : memref<8x128xf32, #tpu.memory_space<vmem>>, vector<8x128xf32>
      tpu.vector_store %arg13[%c0_301, %c0_302], %709 {strides = array<i32>} : memref<8x128xf32, #tpu.memory_space<vmem>>, vector<8x128xf32>,
      %cst_303 = arith.constant 0.000000e+00 : f32
      %711 = vector.broadcast %cst_303 : f32 to vector<8x128xf32>
      %c0_304 = arith.constant 0 : index
      %c0_305 = arith.constant 0 : index
      %712 = vector.load %arg14[%c0_304, %c0_305] : memref<8x128xf32, #tpu.memory_space<vmem>>, vector<8x128xf32>
      tpu.vector_store %arg14[%c0_304, %c0_305], %711 {strides = array<i32>} : memref<8x128xf32, #tpu.memory_space<vmem>>, vector<8x128xf32>,
      %cst_306 = arith.constant 0.000000e+00 : f32
      %713 = vector.broadcast %cst_306 : f32 to vector<8x128xf32>
      %c0_307 = arith.constant 0 : index
      %c0_308 = arith.constant 0 : index
      %714 = vector.load %arg15[%c0_307, %c0_308] : memref<8x128xf32, #tpu.memory_space<vmem>>, vector<8x128xf32>
      tpu.vector_store %arg15[%c0_307, %c0_308], %713 {strides = array<i32>} : memref<8x128xf32, #tpu.memory_space<vmem>>, vector<8x128xf32>,
      %cst_309 = arith.constant 0.000000e+00 : f32
      %715 = vector.broadcast %cst_309 : f32 to vector<8x128xf32>
      %c0_310 = arith.constant 0 : index
      %c0_311 = arith.constant 0 : index
      %716 = vector.load %arg16[%c0_310, %c0_311] : memref<8x128xf32, #tpu.memory_space<vmem>>, vector<8x128xf32>
      tpu.vector_store %arg16[%c0_310, %c0_311], %715 {strides = array<i32>} : memref<8x128xf32, #tpu.memory_space<vmem>>, vector<8x128xf32>,
    } else {
    }
    %c0 = arith.constant 0 : index
    %c0_1 = arith.constant 0 : index
    %3 = vector.load %arg1[%c0, %c0_1] : memref<64x32xf32, #tpu.memory_space<vmem>>, vector<64x32xf32>
    %4 = arith.truncf %3 : vector<64x32xf32> to vector<64x32xbf16>
    %c0_2 = arith.constant 0 : index
    %c0_3 = arith.constant 0 : index
    %5 = vector.load %arg3[%c0_2, %c0_3] : memref<32x512xbf16, #tpu.memory_space<vmem>>, vector<32x512xbf16>
    %cst = arith.constant dense<0.000000e+00> : vector<64x512xf32>
    %6 = tpu.matmul %4, %5, %cst {dimension_numbers = #tpu.dot_dimension_numbers<[1], [0], [0], [1], [0, 0, 1, 1], [], []>} : vector<64x32xbf16>, vector<32x512xbf16>, vector<64x512xf32> -> vector<64x512xf32>
    %c0_4 = arith.constant 0 : index
    %c0_5 = arith.constant 0 : index
    %7 = vector.load %arg7[%c0_4, %c0_5] : memref<1x512xf32, #tpu.memory_space<vmem>>, vector<1x512xf32>
    %8 = vector.broadcast %7 : vector<1x512xf32> to vector<64x512xf32>
    %9 = arith.addf %6, %8 : vector<64x512xf32>
    %10 = vector.shape_cast %9 : vector<64x512xf32> to vector<8x8x512xf32>
    %c0_6 = arith.constant 0 : index
    %c0_7 = arith.constant 0 : index
    %c0_8 = arith.constant 0 : index
    %11 = vector.load %arg11[%c0_6, %c0_7, %c0_8] : memref<8x8x512xf32, #tpu.memory_space<vmem>>, vector<8x8x512xf32>
    tpu.vector_store %arg11[%c0_6, %c0_7, %c0_8], %10 {strides = array<i32>} : memref<8x8x512xf32, #tpu.memory_space<vmem>>, vector<8x8x512xf32>,
    %c0_9 = arith.constant 0 : index
    %c0_10 = arith.constant 0 : index
    %12 = vector.load %arg2[%c0_9, %c0_10] : memref<64x32xf32, #tpu.memory_space<vmem>>, vector<64x32xf32>
    %13 = arith.truncf %12 : vector<64x32xf32> to vector<64x32xbf16>
    %c0_11 = arith.constant 0 : index
    %c0_12 = arith.constant 0 : index
    %14 = vector.load %arg4[%c0_11, %c0_12] : memref<32x512xbf16, #tpu.memory_space<vmem>>, vector<32x512xbf16>
    %cst_13 = arith.constant dense<0.000000e+00> : vector<64x512xf32>
    %15 = tpu.matmul %13, %14, %cst_13 {dimension_numbers = #tpu.dot_dimension_numbers<[1], [0], [0], [1], [0, 0, 1, 1], [], []>} : vector<64x32xbf16>, vector<32x512xbf16>, vector<64x512xf32> -> vector<64x512xf32>
    %c0_14 = arith.constant 0 : index
    %c0_15 = arith.constant 0 : index
    %16 = vector.load %arg8[%c0_14, %c0_15] : memref<1x512xf32, #tpu.memory_space<vmem>>, vector<1x512xf32>
    %17 = vector.broadcast %16 : vector<1x512xf32> to vector<64x512xf32>
    %18 = arith.addf %15, %17 : vector<64x512xf32>
    %19 = vector.shape_cast %18 : vector<64x512xf32> to vector<8x8x512xf32>
    %c0_16 = arith.constant 0 : index
    %c0_17 = arith.constant 0 : index
    %c0_18 = arith.constant 0 : index
    %20 = vector.load %arg12[%c0_16, %c0_17, %c0_18] : memref<8x8x512xf32, #tpu.memory_space<vmem>>, vector<8x8x512xf32>
    tpu.vector_store %arg12[%c0_16, %c0_17, %c0_18], %19 {strides = array<i32>} : memref<8x8x512xf32, #tpu.memory_space<vmem>>, vector<8x8x512xf32>,
    %c0_19 = arith.constant 0 : index
    %c0_20 = arith.constant 0 : index
    %21 = vector.load %arg13[%c0_19, %c0_20] : memref<8x128xf32, #tpu.memory_space<vmem>>, vector<8x128xf32>
    %c0_21 = arith.constant 0 : index
    %c0_22 = arith.constant 0 : index
    %22 = vector.load %arg14[%c0_21, %c0_22] : memref<8x128xf32, #tpu.memory_space<vmem>>, vector<8x128xf32>
    %c0_23 = arith.constant 0 : index
    %c0_24 = arith.constant 0 : index
    %23 = vector.load %arg15[%c0_23, %c0_24] : memref<8x128xf32, #tpu.memory_space<vmem>>, vector<8x128xf32>
    %c0_25 = arith.constant 0 : index
    %c0_26 = arith.constant 0 : index
    %24 = vector.load %arg16[%c0_25, %c0_26] : memref<8x128xf32, #tpu.memory_space<vmem>>, vector<8x128xf32>
    %c0_i32_27 = arith.constant 0 : i32
    %c7_i32 = arith.constant 7 : i32
    %25 = arith.subi %c7_i32, %c0_i32_27 : i32
    %26 = arith.index_cast %c0_i32_27 : i32 to index
    %c0_28 = arith.constant 0 : index
    %c0_29 = arith.constant 0 : index
    %27 = vector.load %arg11[%26, %c0_28, %c0_29] : memref<8x8x512xf32, #tpu.memory_space<vmem>>, vector<1x8x512xf32>
    %28 = vector.shape_cast %27 : vector<1x8x512xf32> to vector<8x512xf32>
    %29 = arith.truncf %21 : vector<8x128xf32> to vector<8x128xbf16>
    %c0_30 = arith.constant 0 : index
    %c0_31 = arith.constant 0 : index
    %30 = vector.load %arg5[%c0_30, %c0_31] : memref<128x512xbf16, #tpu.memory_space<vmem>>, vector<128x512xbf16>
    %cst_32 = arith.constant dense<0.000000e+00> : vector<8x512xf32>
    %31 = tpu.matmul %29, %30, %cst_32 {dimension_numbers = #tpu.dot_dimension_numbers<[1], [0], [0], [1], [0, 0, 1, 1], [], []>} : vector<8x128xbf16>, vector<128x512xbf16>, vector<8x512xf32> -> vector<8x512xf32>
    %32 = arith.addf %28, %31 : vector<8x512xf32>
    %33 = arith.index_cast %25 : i32 to index
    %c0_33 = arith.constant 0 : index
    %c0_34 = arith.constant 0 : index
    %34 = vector.load %arg12[%33, %c0_33, %c0_34] : memref<8x8x512xf32, #tpu.memory_space<vmem>>, vector<1x8x512xf32>
    %35 = vector.shape_cast %34 : vector<1x8x512xf32> to vector<8x512xf32>
    %36 = arith.truncf %23 : vector<8x128xf32> to vector<8x128xbf16>
    %c0_35 = arith.constant 0 : index
    %c0_36 = arith.constant 0 : index
    %37 = vector.load %arg6[%c0_35, %c0_36] : memref<128x512xbf16, #tpu.memory_space<vmem>>, vector<128x512xbf16>
    %cst_37 = arith.constant dense<0.000000e+00> : vector<8x512xf32>
    %38 = tpu.matmul %36, %37, %cst_37 {dimension_numbers = #tpu.dot_dimension_numbers<[1], [0], [0], [1], [0, 0, 1, 1], [], []>} : vector<8x128xbf16>, vector<128x512xbf16>, vector<8x512xf32> -> vector<8x512xf32>
    %39 = arith.addf %35, %38 : vector<8x512xf32>
    %40 = vector.extract_strided_slice %32 {offsets = [0, 0], sizes = [8, 128], strides = [1, 1]} : vector<8x512xf32> to vector<8x128xf32>
    %cst_38 = arith.constant 5.000000e-01 : f32
    %41 = vector.broadcast %cst_38 : f32 to vector<8x128xf32>
    %42 = arith.mulf %41, %40 : vector<8x128xf32>
    %43 = math.tanh %42 : vector<8x128xf32>
    %cst_39 = arith.constant 5.000000e-01 : f32
    %44 = vector.broadcast %cst_39 : f32 to vector<8x128xf32>
    %45 = arith.mulf %44, %43 : vector<8x128xf32>
    %cst_40 = arith.constant 5.000000e-01 : f32
    %46 = vector.broadcast %cst_40 : f32 to vector<8x128xf32>
    %47 = arith.addf %45, %46 : vector<8x128xf32>
    %48 = vector.extract_strided_slice %32 {offsets = [0, 128], sizes = [8, 128], strides = [1, 1]} : vector<8x512xf32> to vector<8x128xf32>
    %cst_41 = arith.constant 5.000000e-01 : f32
    %49 = vector.broadcast %cst_41 : f32 to vector<8x128xf32>
    %50 = arith.mulf %49, %48 : vector<8x128xf32>
    %51 = math.tanh %50 : vector<8x128xf32>
    %cst_42 = arith.constant 5.000000e-01 : f32
    %52 = vector.broadcast %cst_42 : f32 to vector<8x128xf32>
    %53 = arith.mulf %52, %51 : vector<8x128xf32>
    %cst_43 = arith.constant 5.000000e-01 : f32
    %54 = vector.broadcast %cst_43 : f32 to vector<8x128xf32>
    %55 = arith.addf %53, %54 : vector<8x128xf32>
    %56 = vector.extract_strided_slice %32 {offsets = [0, 256], sizes = [8, 128], strides = [1, 1]} : vector<8x512xf32> to vector<8x128xf32>
    %57 = math.tanh %56 : vector<8x128xf32>
    %58 = vector.extract_strided_slice %32 {offsets = [0, 384], sizes = [8, 128], strides = [1, 1]} : vector<8x512xf32> to vector<8x128xf32>
    %cst_44 = arith.constant 5.000000e-01 : f32
    %59 = vector.broadcast %cst_44 : f32 to vector<8x128xf32>
    %60 = arith.mulf %59, %58 : vector<8x128xf32>
    %61 = math.tanh %60 : vector<8x128xf32>
    %cst_45 = arith.constant 5.000000e-01 : f32
    %62 = vector.broadcast %cst_45 : f32 to vector<8x128xf32>
    %63 = arith.mulf %62, %61 : vector<8x128xf32>
    %cst_46 = arith.constant 5.000000e-01 : f32
    %64 = vector.broadcast %cst_46 : f32 to vector<8x128xf32>
    %65 = arith.addf %63, %64 : vector<8x128xf32>
    %66 = arith.mulf %55, %22 : vector<8x128xf32>
    %67 = arith.mulf %47, %57 : vector<8x128xf32>
    %68 = arith.addf %66, %67 : vector<8x128xf32>
    %69 = math.tanh %68 : vector<8x128xf32>
    %70 = arith.mulf %65, %69 : vector<8x128xf32>
    %71 = vector.extract_strided_slice %39 {offsets = [0, 0], sizes = [8, 128], strides = [1, 1]} : vector<8x512xf32> to vector<8x128xf32>
    %cst_47 = arith.constant 5.000000e-01 : f32
    %72 = vector.broadcast %cst_47 : f32 to vector<8x128xf32>
    %73 = arith.mulf %72, %71 : vector<8x128xf32>
    %74 = math.tanh %73 : vector<8x128xf32>
    %cst_48 = arith.constant 5.000000e-01 : f32
    %75 = vector.broadcast %cst_48 : f32 to vector<8x128xf32>
    %76 = arith.mulf %75, %74 : vector<8x128xf32>
    %cst_49 = arith.constant 5.000000e-01 : f32
    %77 = vector.broadcast %cst_49 : f32 to vector<8x128xf32>
    %78 = arith.addf %76, %77 : vector<8x128xf32>
    %79 = vector.extract_strided_slice %39 {offsets = [0, 128], sizes = [8, 128], strides = [1, 1]} : vector<8x512xf32> to vector<8x128xf32>
    %cst_50 = arith.constant 5.000000e-01 : f32
    %80 = vector.broadcast %cst_50 : f32 to vector<8x128xf32>
    %81 = arith.mulf %80, %79 : vector<8x128xf32>
    %82 = math.tanh %81 : vector<8x128xf32>
    %cst_51 = arith.constant 5.000000e-01 : f32
    %83 = vector.broadcast %cst_51 : f32 to vector<8x128xf32>
    %84 = arith.mulf %83, %82 : vector<8x128xf32>
    %cst_52 = arith.constant 5.000000e-01 : f32
    %85 = vector.broadcast %cst_52 : f32 to vector<8x128xf32>
    %86 = arith.addf %84, %85 : vector<8x128xf32>
    %87 = vector.extract_strided_slice %39 {offsets = [0, 256], sizes = [8, 128], strides = [1, 1]} : vector<8x512xf32> to vector<8x128xf32>
    %88 = math.tanh %87 : vector<8x128xf32>
    %89 = vector.extract_strided_slice %39 {offsets = [0, 384], sizes = [8, 128], strides = [1, 1]} : vector<8x512xf32> to vector<8x128xf32>
    %cst_53 = arith.constant 5.000000e-01 : f32
    %90 = vector.broadcast %cst_53 : f32 to vector<8x128xf32>
    %91 = arith.mulf %90, %89 : vector<8x128xf32>
    %92 = math.tanh %91 : vector<8x128xf32>
    %cst_54 = arith.constant 5.000000e-01 : f32
    %93 = vector.broadcast %cst_54 : f32 to vector<8x128xf32>
    %94 = arith.mulf %93, %92 : vector<8x128xf32>
    %cst_55 = arith.constant 5.000000e-01 : f32
    %95 = vector.broadcast %cst_55 : f32 to vector<8x128xf32>
    %96 = arith.addf %94, %95 : vector<8x128xf32>
    %97 = arith.mulf %86, %24 : vector<8x128xf32>
    %98 = arith.mulf %78, %88 : vector<8x128xf32>
    %99 = arith.addf %97, %98 : vector<8x128xf32>
    %100 = math.tanh %99 : vector<8x128xf32>
    %101 = arith.mulf %96, %100 : vector<8x128xf32>
    %102 = arith.index_cast %c0_i32_27 : i32 to index
    %c0_56 = arith.constant 0 : index
    %c0_57 = arith.constant 0 : index
    %103 = vector.load %arg9[%102, %c0_56, %c0_57] : memref<8x8x128xf32, #tpu.memory_space<vmem>>, vector<1x8x128xf32>
    %104 = vector.shape_cast %103 : vector<1x8x128xf32> to vector<8x128xf32>
    %105 = vector.shape_cast %70 : vector<8x128xf32> to vector<1x8x128xf32>
    tpu.vector_store %arg9[%102, %c0_56, %c0_57], %105 {strides = array<i32>} : memref<8x8x128xf32, #tpu.memory_space<vmem>>, vector<1x8x128xf32>,
    %106 = arith.index_cast %25 : i32 to index
    %c0_58 = arith.constant 0 : index
    %c0_59 = arith.constant 0 : index
    %107 = vector.load %arg10[%106, %c0_58, %c0_59] : memref<8x8x128xf32, #tpu.memory_space<vmem>>, vector<1x8x128xf32>
    %108 = vector.shape_cast %107 : vector<1x8x128xf32> to vector<8x128xf32>
    %109 = vector.shape_cast %101 : vector<8x128xf32> to vector<1x8x128xf32>
    tpu.vector_store %arg10[%106, %c0_58, %c0_59], %109 {strides = array<i32>} : memref<8x8x128xf32, #tpu.memory_space<vmem>>, vector<1x8x128xf32>,
    %c1_i32 = arith.constant 1 : i32
    %c7_i32_60 = arith.constant 7 : i32
    %110 = arith.subi %c7_i32_60, %c1_i32 : i32
    %111 = arith.index_cast %c1_i32 : i32 to index
    %c0_61 = arith.constant 0 : index
    %c0_62 = arith.constant 0 : index
    %112 = vector.load %arg11[%111, %c0_61, %c0_62] : memref<8x8x512xf32, #tpu.memory_space<vmem>>, vector<1x8x512xf32>
    %113 = vector.shape_cast %112 : vector<1x8x512xf32> to vector<8x512xf32>
    %114 = arith.truncf %70 : vector<8x128xf32> to vector<8x128xbf16>
    %c0_63 = arith.constant 0 : index
    %c0_64 = arith.constant 0 : index
    %115 = vector.load %arg5[%c0_63, %c0_64] : memref<128x512xbf16, #tpu.memory_space<vmem>>, vector<128x512xbf16>
    %cst_65 = arith.constant dense<0.000000e+00> : vector<8x512xf32>
    %116 = tpu.matmul %114, %115, %cst_65 {dimension_numbers = #tpu.dot_dimension_numbers<[1], [0], [0], [1], [0, 0, 1, 1], [], []>} : vector<8x128xbf16>, vector<128x512xbf16>, vector<8x512xf32> -> vector<8x512xf32>
    %117 = arith.addf %113, %116 : vector<8x512xf32>
    %118 = arith.index_cast %110 : i32 to index
    %c0_66 = arith.constant 0 : index
    %c0_67 = arith.constant 0 : index
    %119 = vector.load %arg12[%118, %c0_66, %c0_67] : memref<8x8x512xf32, #tpu.memory_space<vmem>>, vector<1x8x512xf32>
    %120 = vector.shape_cast %119 : vector<1x8x512xf32> to vector<8x512xf32>
    %121 = arith.truncf %101 : vector<8x128xf32> to vector<8x128xbf16>
    %c0_68 = arith.constant 0 : index
    %c0_69 = arith.constant 0 : index
    %122 = vector.load %arg6[%c0_68, %c0_69] : memref<128x512xbf16, #tpu.memory_space<vmem>>, vector<128x512xbf16>
    %cst_70 = arith.constant dense<0.000000e+00> : vector<8x512xf32>
    %123 = tpu.matmul %121, %122, %cst_70 {dimension_numbers = #tpu.dot_dimension_numbers<[1], [0], [0], [1], [0, 0, 1, 1], [], []>} : vector<8x128xbf16>, vector<128x512xbf16>, vector<8x512xf32> -> vector<8x512xf32>
    %124 = arith.addf %120, %123 : vector<8x512xf32>
    %125 = vector.extract_strided_slice %117 {offsets = [0, 0], sizes = [8, 128], strides = [1, 1]} : vector<8x512xf32> to vector<8x128xf32>
    %cst_71 = arith.constant 5.000000e-01 : f32
    %126 = vector.broadcast %cst_71 : f32 to vector<8x128xf32>
    %127 = arith.mulf %126, %125 : vector<8x128xf32>
    %128 = math.tanh %127 : vector<8x128xf32>
    %cst_72 = arith.constant 5.000000e-01 : f32
    %129 = vector.broadcast %cst_72 : f32 to vector<8x128xf32>
    %130 = arith.mulf %129, %128 : vector<8x128xf32>
    %cst_73 = arith.constant 5.000000e-01 : f32
    %131 = vector.broadcast %cst_73 : f32 to vector<8x128xf32>
    %132 = arith.addf %130, %131 : vector<8x128xf32>
    %133 = vector.extract_strided_slice %117 {offsets = [0, 128], sizes = [8, 128], strides = [1, 1]} : vector<8x512xf32> to vector<8x128xf32>
    %cst_74 = arith.constant 5.000000e-01 : f32
    %134 = vector.broadcast %cst_74 : f32 to vector<8x128xf32>
    %135 = arith.mulf %134, %133 : vector<8x128xf32>
    %136 = math.tanh %135 : vector<8x128xf32>
    %cst_75 = arith.constant 5.000000e-01 : f32
    %137 = vector.broadcast %cst_75 : f32 to vector<8x128xf32>
    %138 = arith.mulf %137, %136 : vector<8x128xf32>
    %cst_76 = arith.constant 5.000000e-01 : f32
    %139 = vector.broadcast %cst_76 : f32 to vector<8x128xf32>
    %140 = arith.addf %138, %139 : vector<8x128xf32>
    %141 = vector.extract_strided_slice %117 {offsets = [0, 256], sizes = [8, 128], strides = [1, 1]} : vector<8x512xf32> to vector<8x128xf32>
    %142 = math.tanh %141 : vector<8x128xf32>
    %143 = vector.extract_strided_slice %117 {offsets = [0, 384], sizes = [8, 128], strides = [1, 1]} : vector<8x512xf32> to vector<8x128xf32>
    %cst_77 = arith.constant 5.000000e-01 : f32
    %144 = vector.broadcast %cst_77 : f32 to vector<8x128xf32>
    %145 = arith.mulf %144, %143 : vector<8x128xf32>
    %146 = math.tanh %145 : vector<8x128xf32>
    %cst_78 = arith.constant 5.000000e-01 : f32
    %147 = vector.broadcast %cst_78 : f32 to vector<8x128xf32>
    %148 = arith.mulf %147, %146 : vector<8x128xf32>
    %cst_79 = arith.constant 5.000000e-01 : f32
    %149 = vector.broadcast %cst_79 : f32 to vector<8x128xf32>
    %150 = arith.addf %148, %149 : vector<8x128xf32>
    %151 = arith.mulf %140, %68 : vector<8x128xf32>
    %152 = arith.mulf %132, %142 : vector<8x128xf32>
    %153 = arith.addf %151, %152 : vector<8x128xf32>
    %154 = math.tanh %153 : vector<8x128xf32>
    %155 = arith.mulf %150, %154 : vector<8x128xf32>
    %156 = vector.extract_strided_slice %124 {offsets = [0, 0], sizes = [8, 128], strides = [1, 1]} : vector<8x512xf32> to vector<8x128xf32>
    %cst_80 = arith.constant 5.000000e-01 : f32
    %157 = vector.broadcast %cst_80 : f32 to vector<8x128xf32>
    %158 = arith.mulf %157, %156 : vector<8x128xf32>
    %159 = math.tanh %158 : vector<8x128xf32>
    %cst_81 = arith.constant 5.000000e-01 : f32
    %160 = vector.broadcast %cst_81 : f32 to vector<8x128xf32>
    %161 = arith.mulf %160, %159 : vector<8x128xf32>
    %cst_82 = arith.constant 5.000000e-01 : f32
    %162 = vector.broadcast %cst_82 : f32 to vector<8x128xf32>
    %163 = arith.addf %161, %162 : vector<8x128xf32>
    %164 = vector.extract_strided_slice %124 {offsets = [0, 128], sizes = [8, 128], strides = [1, 1]} : vector<8x512xf32> to vector<8x128xf32>
    %cst_83 = arith.constant 5.000000e-01 : f32
    %165 = vector.broadcast %cst_83 : f32 to vector<8x128xf32>
    %166 = arith.mulf %165, %164 : vector<8x128xf32>
    %167 = math.tanh %166 : vector<8x128xf32>
    %cst_84 = arith.constant 5.000000e-01 : f32
    %168 = vector.broadcast %cst_84 : f32 to vector<8x128xf32>
    %169 = arith.mulf %168, %167 : vector<8x128xf32>
    %cst_85 = arith.constant 5.000000e-01 : f32
    %170 = vector.broadcast %cst_85 : f32 to vector<8x128xf32>
    %171 = arith.addf %169, %170 : vector<8x128xf32>
    %172 = vector.extract_strided_slice %124 {offsets = [0, 256], sizes = [8, 128], strides = [1, 1]} : vector<8x512xf32> to vector<8x128xf32>
    %173 = math.tanh %172 : vector<8x128xf32>
    %174 = vector.extract_strided_slice %124 {offsets = [0, 384], sizes = [8, 128], strides = [1, 1]} : vector<8x512xf32> to vector<8x128xf32>
    %cst_86 = arith.constant 5.000000e-01 : f32
    %175 = vector.broadcast %cst_86 : f32 to vector<8x128xf32>
    %176 = arith.mulf %175, %174 : vector<8x128xf32>
    %177 = math.tanh %176 : vector<8x128xf32>
    %cst_87 = arith.constant 5.000000e-01 : f32
    %178 = vector.broadcast %cst_87 : f32 to vector<8x128xf32>
    %179 = arith.mulf %178, %177 : vector<8x128xf32>
    %cst_88 = arith.constant 5.000000e-01 : f32
    %180 = vector.broadcast %cst_88 : f32 to vector<8x128xf32>
    %181 = arith.addf %179, %180 : vector<8x128xf32>
    %182 = arith.mulf %171, %99 : vector<8x128xf32>
    %183 = arith.mulf %163, %173 : vector<8x128xf32>
    %184 = arith.addf %182, %183 : vector<8x128xf32>
    %185 = math.tanh %184 : vector<8x128xf32>
    %186 = arith.mulf %181, %185 : vector<8x128xf32>
    %187 = arith.index_cast %c1_i32 : i32 to index
    %c0_89 = arith.constant 0 : index
    %c0_90 = arith.constant 0 : index
    %188 = vector.load %arg9[%187, %c0_89, %c0_90] : memref<8x8x128xf32, #tpu.memory_space<vmem>>, vector<1x8x128xf32>
    %189 = vector.shape_cast %188 : vector<1x8x128xf32> to vector<8x128xf32>
    %190 = vector.shape_cast %155 : vector<8x128xf32> to vector<1x8x128xf32>
    tpu.vector_store %arg9[%187, %c0_89, %c0_90], %190 {strides = array<i32>} : memref<8x8x128xf32, #tpu.memory_space<vmem>>, vector<1x8x128xf32>,
    %191 = arith.index_cast %110 : i32 to index
    %c0_91 = arith.constant 0 : index
    %c0_92 = arith.constant 0 : index
    %192 = vector.load %arg10[%191, %c0_91, %c0_92] : memref<8x8x128xf32, #tpu.memory_space<vmem>>, vector<1x8x128xf32>
    %193 = vector.shape_cast %192 : vector<1x8x128xf32> to vector<8x128xf32>
    %194 = vector.shape_cast %186 : vector<8x128xf32> to vector<1x8x128xf32>
    tpu.vector_store %arg10[%191, %c0_91, %c0_92], %194 {strides = array<i32>} : memref<8x8x128xf32, #tpu.memory_space<vmem>>, vector<1x8x128xf32>,
    %c2_i32 = arith.constant 2 : i32
    %c7_i32_93 = arith.constant 7 : i32
    %195 = arith.subi %c7_i32_93, %c2_i32 : i32
    %196 = arith.index_cast %c2_i32 : i32 to index
    %c0_94 = arith.constant 0 : index
    %c0_95 = arith.constant 0 : index
    %197 = vector.load %arg11[%196, %c0_94, %c0_95] : memref<8x8x512xf32, #tpu.memory_space<vmem>>, vector<1x8x512xf32>
    %198 = vector.shape_cast %197 : vector<1x8x512xf32> to vector<8x512xf32>
    %199 = arith.truncf %155 : vector<8x128xf32> to vector<8x128xbf16>
    %c0_96 = arith.constant 0 : index
    %c0_97 = arith.constant 0 : index
    %200 = vector.load %arg5[%c0_96, %c0_97] : memref<128x512xbf16, #tpu.memory_space<vmem>>, vector<128x512xbf16>
    %cst_98 = arith.constant dense<0.000000e+00> : vector<8x512xf32>
    %201 = tpu.matmul %199, %200, %cst_98 {dimension_numbers = #tpu.dot_dimension_numbers<[1], [0], [0], [1], [0, 0, 1, 1], [], []>} : vector<8x128xbf16>, vector<128x512xbf16>, vector<8x512xf32> -> vector<8x512xf32>
    %202 = arith.addf %198, %201 : vector<8x512xf32>
    %203 = arith.index_cast %195 : i32 to index
    %c0_99 = arith.constant 0 : index
    %c0_100 = arith.constant 0 : index
    %204 = vector.load %arg12[%203, %c0_99, %c0_100] : memref<8x8x512xf32, #tpu.memory_space<vmem>>, vector<1x8x512xf32>
    %205 = vector.shape_cast %204 : vector<1x8x512xf32> to vector<8x512xf32>
    %206 = arith.truncf %186 : vector<8x128xf32> to vector<8x128xbf16>
    %c0_101 = arith.constant 0 : index
    %c0_102 = arith.constant 0 : index
    %207 = vector.load %arg6[%c0_101, %c0_102] : memref<128x512xbf16, #tpu.memory_space<vmem>>, vector<128x512xbf16>
    %cst_103 = arith.constant dense<0.000000e+00> : vector<8x512xf32>
    %208 = tpu.matmul %206, %207, %cst_103 {dimension_numbers = #tpu.dot_dimension_numbers<[1], [0], [0], [1], [0, 0, 1, 1], [], []>} : vector<8x128xbf16>, vector<128x512xbf16>, vector<8x512xf32> -> vector<8x512xf32>
    %209 = arith.addf %205, %208 : vector<8x512xf32>
    %210 = vector.extract_strided_slice %202 {offsets = [0, 0], sizes = [8, 128], strides = [1, 1]} : vector<8x512xf32> to vector<8x128xf32>
    %cst_104 = arith.constant 5.000000e-01 : f32
    %211 = vector.broadcast %cst_104 : f32 to vector<8x128xf32>
    %212 = arith.mulf %211, %210 : vector<8x128xf32>
    %213 = math.tanh %212 : vector<8x128xf32>
    %cst_105 = arith.constant 5.000000e-01 : f32
    %214 = vector.broadcast %cst_105 : f32 to vector<8x128xf32>
    %215 = arith.mulf %214, %213 : vector<8x128xf32>
    %cst_106 = arith.constant 5.000000e-01 : f32
    %216 = vector.broadcast %cst_106 : f32 to vector<8x128xf32>
    %217 = arith.addf %215, %216 : vector<8x128xf32>
    %218 = vector.extract_strided_slice %202 {offsets = [0, 128], sizes = [8, 128], strides = [1, 1]} : vector<8x512xf32> to vector<8x128xf32>
    %cst_107 = arith.constant 5.000000e-01 : f32
    %219 = vector.broadcast %cst_107 : f32 to vector<8x128xf32>
    %220 = arith.mulf %219, %218 : vector<8x128xf32>
    %221 = math.tanh %220 : vector<8x128xf32>
    %cst_108 = arith.constant 5.000000e-01 : f32
    %222 = vector.broadcast %cst_108 : f32 to vector<8x128xf32>
    %223 = arith.mulf %222, %221 : vector<8x128xf32>
    %cst_109 = arith.constant 5.000000e-01 : f32
    %224 = vector.broadcast %cst_109 : f32 to vector<8x128xf32>
    %225 = arith.addf %223, %224 : vector<8x128xf32>
    %226 = vector.extract_strided_slice %202 {offsets = [0, 256], sizes = [8, 128], strides = [1, 1]} : vector<8x512xf32> to vector<8x128xf32>
    %227 = math.tanh %226 : vector<8x128xf32>
    %228 = vector.extract_strided_slice %202 {offsets = [0, 384], sizes = [8, 128], strides = [1, 1]} : vector<8x512xf32> to vector<8x128xf32>
    %cst_110 = arith.constant 5.000000e-01 : f32
    %229 = vector.broadcast %cst_110 : f32 to vector<8x128xf32>
    %230 = arith.mulf %229, %228 : vector<8x128xf32>
    %231 = math.tanh %230 : vector<8x128xf32>
    %cst_111 = arith.constant 5.000000e-01 : f32
    %232 = vector.broadcast %cst_111 : f32 to vector<8x128xf32>
    %233 = arith.mulf %232, %231 : vector<8x128xf32>
    %cst_112 = arith.constant 5.000000e-01 : f32
    %234 = vector.broadcast %cst_112 : f32 to vector<8x128xf32>
    %235 = arith.addf %233, %234 : vector<8x128xf32>
    %236 = arith.mulf %225, %153 : vector<8x128xf32>
    %237 = arith.mulf %217, %227 : vector<8x128xf32>
    %238 = arith.addf %236, %237 : vector<8x128xf32>
    %239 = math.tanh %238 : vector<8x128xf32>
    %240 = arith.mulf %235, %239 : vector<8x128xf32>
    %241 = vector.extract_strided_slice %209 {offsets = [0, 0], sizes = [8, 128], strides = [1, 1]} : vector<8x512xf32> to vector<8x128xf32>
    %cst_113 = arith.constant 5.000000e-01 : f32
    %242 = vector.broadcast %cst_113 : f32 to vector<8x128xf32>
    %243 = arith.mulf %242, %241 : vector<8x128xf32>
    %244 = math.tanh %243 : vector<8x128xf32>
    %cst_114 = arith.constant 5.000000e-01 : f32
    %245 = vector.broadcast %cst_114 : f32 to vector<8x128xf32>
    %246 = arith.mulf %245, %244 : vector<8x128xf32>
    %cst_115 = arith.constant 5.000000e-01 : f32
    %247 = vector.broadcast %cst_115 : f32 to vector<8x128xf32>
    %248 = arith.addf %246, %247 : vector<8x128xf32>
    %249 = vector.extract_strided_slice %209 {offsets = [0, 128], sizes = [8, 128], strides = [1, 1]} : vector<8x512xf32> to vector<8x128xf32>
    %cst_116 = arith.constant 5.000000e-01 : f32
    %250 = vector.broadcast %cst_116 : f32 to vector<8x128xf32>
    %251 = arith.mulf %250, %249 : vector<8x128xf32>
    %252 = math.tanh %251 : vector<8x128xf32>
    %cst_117 = arith.constant 5.000000e-01 : f32
    %253 = vector.broadcast %cst_117 : f32 to vector<8x128xf32>
    %254 = arith.mulf %253, %252 : vector<8x128xf32>
    %cst_118 = arith.constant 5.000000e-01 : f32
    %255 = vector.broadcast %cst_118 : f32 to vector<8x128xf32>
    %256 = arith.addf %254, %255 : vector<8x128xf32>
    %257 = vector.extract_strided_slice %209 {offsets = [0, 256], sizes = [8, 128], strides = [1, 1]} : vector<8x512xf32> to vector<8x128xf32>
    %258 = math.tanh %257 : vector<8x128xf32>
    %259 = vector.extract_strided_slice %209 {offsets = [0, 384], sizes = [8, 128], strides = [1, 1]} : vector<8x512xf32> to vector<8x128xf32>
    %cst_119 = arith.constant 5.000000e-01 : f32
    %260 = vector.broadcast %cst_119 : f32 to vector<8x128xf32>
    %261 = arith.mulf %260, %259 : vector<8x128xf32>
    %262 = math.tanh %261 : vector<8x128xf32>
    %cst_120 = arith.constant 5.000000e-01 : f32
    %263 = vector.broadcast %cst_120 : f32 to vector<8x128xf32>
    %264 = arith.mulf %263, %262 : vector<8x128xf32>
    %cst_121 = arith.constant 5.000000e-01 : f32
    %265 = vector.broadcast %cst_121 : f32 to vector<8x128xf32>
    %266 = arith.addf %264, %265 : vector<8x128xf32>
    %267 = arith.mulf %256, %184 : vector<8x128xf32>
    %268 = arith.mulf %248, %258 : vector<8x128xf32>
    %269 = arith.addf %267, %268 : vector<8x128xf32>
    %270 = math.tanh %269 : vector<8x128xf32>
    %271 = arith.mulf %266, %270 : vector<8x128xf32>
    %272 = arith.index_cast %c2_i32 : i32 to index
    %c0_122 = arith.constant 0 : index
    %c0_123 = arith.constant 0 : index
    %273 = vector.load %arg9[%272, %c0_122, %c0_123] : memref<8x8x128xf32, #tpu.memory_space<vmem>>, vector<1x8x128xf32>
    %274 = vector.shape_cast %273 : vector<1x8x128xf32> to vector<8x128xf32>
    %275 = vector.shape_cast %240 : vector<8x128xf32> to vector<1x8x128xf32>
    tpu.vector_store %arg9[%272, %c0_122, %c0_123], %275 {strides = array<i32>} : memref<8x8x128xf32, #tpu.memory_space<vmem>>, vector<1x8x128xf32>,
    %276 = arith.index_cast %195 : i32 to index
    %c0_124 = arith.constant 0 : index
    %c0_125 = arith.constant 0 : index
    %277 = vector.load %arg10[%276, %c0_124, %c0_125] : memref<8x8x128xf32, #tpu.memory_space<vmem>>, vector<1x8x128xf32>
    %278 = vector.shape_cast %277 : vector<1x8x128xf32> to vector<8x128xf32>
    %279 = vector.shape_cast %271 : vector<8x128xf32> to vector<1x8x128xf32>
    tpu.vector_store %arg10[%276, %c0_124, %c0_125], %279 {strides = array<i32>} : memref<8x8x128xf32, #tpu.memory_space<vmem>>, vector<1x8x128xf32>,
    %c3_i32 = arith.constant 3 : i32
    %c7_i32_126 = arith.constant 7 : i32
    %280 = arith.subi %c7_i32_126, %c3_i32 : i32
    %281 = arith.index_cast %c3_i32 : i32 to index
    %c0_127 = arith.constant 0 : index
    %c0_128 = arith.constant 0 : index
    %282 = vector.load %arg11[%281, %c0_127, %c0_128] : memref<8x8x512xf32, #tpu.memory_space<vmem>>, vector<1x8x512xf32>
    %283 = vector.shape_cast %282 : vector<1x8x512xf32> to vector<8x512xf32>
    %284 = arith.truncf %240 : vector<8x128xf32> to vector<8x128xbf16>
    %c0_129 = arith.constant 0 : index
    %c0_130 = arith.constant 0 : index
    %285 = vector.load %arg5[%c0_129, %c0_130] : memref<128x512xbf16, #tpu.memory_space<vmem>>, vector<128x512xbf16>
    %cst_131 = arith.constant dense<0.000000e+00> : vector<8x512xf32>
    %286 = tpu.matmul %284, %285, %cst_131 {dimension_numbers = #tpu.dot_dimension_numbers<[1], [0], [0], [1], [0, 0, 1, 1], [], []>} : vector<8x128xbf16>, vector<128x512xbf16>, vector<8x512xf32> -> vector<8x512xf32>
    %287 = arith.addf %283, %286 : vector<8x512xf32>
    %288 = arith.index_cast %280 : i32 to index
    %c0_132 = arith.constant 0 : index
    %c0_133 = arith.constant 0 : index
    %289 = vector.load %arg12[%288, %c0_132, %c0_133] : memref<8x8x512xf32, #tpu.memory_space<vmem>>, vector<1x8x512xf32>
    %290 = vector.shape_cast %289 : vector<1x8x512xf32> to vector<8x512xf32>
    %291 = arith.truncf %271 : vector<8x128xf32> to vector<8x128xbf16>
    %c0_134 = arith.constant 0 : index
    %c0_135 = arith.constant 0 : index
    %292 = vector.load %arg6[%c0_134, %c0_135] : memref<128x512xbf16, #tpu.memory_space<vmem>>, vector<128x512xbf16>
    %cst_136 = arith.constant dense<0.000000e+00> : vector<8x512xf32>
    %293 = tpu.matmul %291, %292, %cst_136 {dimension_numbers = #tpu.dot_dimension_numbers<[1], [0], [0], [1], [0, 0, 1, 1], [], []>} : vector<8x128xbf16>, vector<128x512xbf16>, vector<8x512xf32> -> vector<8x512xf32>
    %294 = arith.addf %290, %293 : vector<8x512xf32>
    %295 = vector.extract_strided_slice %287 {offsets = [0, 0], sizes = [8, 128], strides = [1, 1]} : vector<8x512xf32> to vector<8x128xf32>
    %cst_137 = arith.constant 5.000000e-01 : f32
    %296 = vector.broadcast %cst_137 : f32 to vector<8x128xf32>
    %297 = arith.mulf %296, %295 : vector<8x128xf32>
    %298 = math.tanh %297 : vector<8x128xf32>
    %cst_138 = arith.constant 5.000000e-01 : f32
    %299 = vector.broadcast %cst_138 : f32 to vector<8x128xf32>
    %300 = arith.mulf %299, %298 : vector<8x128xf32>
    %cst_139 = arith.constant 5.000000e-01 : f32
    %301 = vector.broadcast %cst_139 : f32 to vector<8x128xf32>
    %302 = arith.addf %300, %301 : vector<8x128xf32>
    %303 = vector.extract_strided_slice %287 {offsets = [0, 128], sizes = [8, 128], strides = [1, 1]} : vector<8x512xf32> to vector<8x128xf32>
    %cst_140 = arith.constant 5.000000e-01 : f32
    %304 = vector.broadcast %cst_140 : f32 to vector<8x128xf32>
    %305 = arith.mulf %304, %303 : vector<8x128xf32>
    %306 = math.tanh %305 : vector<8x128xf32>
    %cst_141 = arith.constant 5.000000e-01 : f32
    %307 = vector.broadcast %cst_141 : f32 to vector<8x128xf32>
    %308 = arith.mulf %307, %306 : vector<8x128xf32>
    %cst_142 = arith.constant 5.000000e-01 : f32
    %309 = vector.broadcast %cst_142 : f32 to vector<8x128xf32>
    %310 = arith.addf %308, %309 : vector<8x128xf32>
    %311 = vector.extract_strided_slice %287 {offsets = [0, 256], sizes = [8, 128], strides = [1, 1]} : vector<8x512xf32> to vector<8x128xf32>
    %312 = math.tanh %311 : vector<8x128xf32>
    %313 = vector.extract_strided_slice %287 {offsets = [0, 384], sizes = [8, 128], strides = [1, 1]} : vector<8x512xf32> to vector<8x128xf32>
    %cst_143 = arith.constant 5.000000e-01 : f32
    %314 = vector.broadcast %cst_143 : f32 to vector<8x128xf32>
    %315 = arith.mulf %314, %313 : vector<8x128xf32>
    %316 = math.tanh %315 : vector<8x128xf32>
    %cst_144 = arith.constant 5.000000e-01 : f32
    %317 = vector.broadcast %cst_144 : f32 to vector<8x128xf32>
    %318 = arith.mulf %317, %316 : vector<8x128xf32>
    %cst_145 = arith.constant 5.000000e-01 : f32
    %319 = vector.broadcast %cst_145 : f32 to vector<8x128xf32>
    %320 = arith.addf %318, %319 : vector<8x128xf32>
    %321 = arith.mulf %310, %238 : vector<8x128xf32>
    %322 = arith.mulf %302, %312 : vector<8x128xf32>
    %323 = arith.addf %321, %322 : vector<8x128xf32>
    %324 = math.tanh %323 : vector<8x128xf32>
    %325 = arith.mulf %320, %324 : vector<8x128xf32>
    %326 = vector.extract_strided_slice %294 {offsets = [0, 0], sizes = [8, 128], strides = [1, 1]} : vector<8x512xf32> to vector<8x128xf32>
    %cst_146 = arith.constant 5.000000e-01 : f32
    %327 = vector.broadcast %cst_146 : f32 to vector<8x128xf32>
    %328 = arith.mulf %327, %326 : vector<8x128xf32>
    %329 = math.tanh %328 : vector<8x128xf32>
    %cst_147 = arith.constant 5.000000e-01 : f32
    %330 = vector.broadcast %cst_147 : f32 to vector<8x128xf32>
    %331 = arith.mulf %330, %329 : vector<8x128xf32>
    %cst_148 = arith.constant 5.000000e-01 : f32
    %332 = vector.broadcast %cst_148 : f32 to vector<8x128xf32>
    %333 = arith.addf %331, %332 : vector<8x128xf32>
    %334 = vector.extract_strided_slice %294 {offsets = [0, 128], sizes = [8, 128], strides = [1, 1]} : vector<8x512xf32> to vector<8x128xf32>
    %cst_149 = arith.constant 5.000000e-01 : f32
    %335 = vector.broadcast %cst_149 : f32 to vector<8x128xf32>
    %336 = arith.mulf %335, %334 : vector<8x128xf32>
    %337 = math.tanh %336 : vector<8x128xf32>
    %cst_150 = arith.constant 5.000000e-01 : f32
    %338 = vector.broadcast %cst_150 : f32 to vector<8x128xf32>
    %339 = arith.mulf %338, %337 : vector<8x128xf32>
    %cst_151 = arith.constant 5.000000e-01 : f32
    %340 = vector.broadcast %cst_151 : f32 to vector<8x128xf32>
    %341 = arith.addf %339, %340 : vector<8x128xf32>
    %342 = vector.extract_strided_slice %294 {offsets = [0, 256], sizes = [8, 128], strides = [1, 1]} : vector<8x512xf32> to vector<8x128xf32>
    %343 = math.tanh %342 : vector<8x128xf32>
    %344 = vector.extract_strided_slice %294 {offsets = [0, 384], sizes = [8, 128], strides = [1, 1]} : vector<8x512xf32> to vector<8x128xf32>
    %cst_152 = arith.constant 5.000000e-01 : f32
    %345 = vector.broadcast %cst_152 : f32 to vector<8x128xf32>
    %346 = arith.mulf %345, %344 : vector<8x128xf32>
    %347 = math.tanh %346 : vector<8x128xf32>
    %cst_153 = arith.constant 5.000000e-01 : f32
    %348 = vector.broadcast %cst_153 : f32 to vector<8x128xf32>
    %349 = arith.mulf %348, %347 : vector<8x128xf32>
    %cst_154 = arith.constant 5.000000e-01 : f32
    %350 = vector.broadcast %cst_154 : f32 to vector<8x128xf32>
    %351 = arith.addf %349, %350 : vector<8x128xf32>
    %352 = arith.mulf %341, %269 : vector<8x128xf32>
    %353 = arith.mulf %333, %343 : vector<8x128xf32>
    %354 = arith.addf %352, %353 : vector<8x128xf32>
    %355 = math.tanh %354 : vector<8x128xf32>
    %356 = arith.mulf %351, %355 : vector<8x128xf32>
    %357 = arith.index_cast %c3_i32 : i32 to index
    %c0_155 = arith.constant 0 : index
    %c0_156 = arith.constant 0 : index
    %358 = vector.load %arg9[%357, %c0_155, %c0_156] : memref<8x8x128xf32, #tpu.memory_space<vmem>>, vector<1x8x128xf32>
    %359 = vector.shape_cast %358 : vector<1x8x128xf32> to vector<8x128xf32>
    %360 = vector.shape_cast %325 : vector<8x128xf32> to vector<1x8x128xf32>
    tpu.vector_store %arg9[%357, %c0_155, %c0_156], %360 {strides = array<i32>} : memref<8x8x128xf32, #tpu.memory_space<vmem>>, vector<1x8x128xf32>,
    %361 = arith.index_cast %280 : i32 to index
    %c0_157 = arith.constant 0 : index
    %c0_158 = arith.constant 0 : index
    %362 = vector.load %arg10[%361, %c0_157, %c0_158] : memref<8x8x128xf32, #tpu.memory_space<vmem>>, vector<1x8x128xf32>
    %363 = vector.shape_cast %362 : vector<1x8x128xf32> to vector<8x128xf32>
    %364 = vector.shape_cast %356 : vector<8x128xf32> to vector<1x8x128xf32>
    tpu.vector_store %arg10[%361, %c0_157, %c0_158], %364 {strides = array<i32>} : memref<8x8x128xf32, #tpu.memory_space<vmem>>, vector<1x8x128xf32>,
    %c4_i32 = arith.constant 4 : i32
    %c7_i32_159 = arith.constant 7 : i32
    %365 = arith.subi %c7_i32_159, %c4_i32 : i32
    %366 = arith.index_cast %c4_i32 : i32 to index
    %c0_160 = arith.constant 0 : index
    %c0_161 = arith.constant 0 : index
    %367 = vector.load %arg11[%366, %c0_160, %c0_161] : memref<8x8x512xf32, #tpu.memory_space<vmem>>, vector<1x8x512xf32>
    %368 = vector.shape_cast %367 : vector<1x8x512xf32> to vector<8x512xf32>
    %369 = arith.truncf %325 : vector<8x128xf32> to vector<8x128xbf16>
    %c0_162 = arith.constant 0 : index
    %c0_163 = arith.constant 0 : index
    %370 = vector.load %arg5[%c0_162, %c0_163] : memref<128x512xbf16, #tpu.memory_space<vmem>>, vector<128x512xbf16>
    %cst_164 = arith.constant dense<0.000000e+00> : vector<8x512xf32>
    %371 = tpu.matmul %369, %370, %cst_164 {dimension_numbers = #tpu.dot_dimension_numbers<[1], [0], [0], [1], [0, 0, 1, 1], [], []>} : vector<8x128xbf16>, vector<128x512xbf16>, vector<8x512xf32> -> vector<8x512xf32>
    %372 = arith.addf %368, %371 : vector<8x512xf32>
    %373 = arith.index_cast %365 : i32 to index
    %c0_165 = arith.constant 0 : index
    %c0_166 = arith.constant 0 : index
    %374 = vector.load %arg12[%373, %c0_165, %c0_166] : memref<8x8x512xf32, #tpu.memory_space<vmem>>, vector<1x8x512xf32>
    %375 = vector.shape_cast %374 : vector<1x8x512xf32> to vector<8x512xf32>
    %376 = arith.truncf %356 : vector<8x128xf32> to vector<8x128xbf16>
    %c0_167 = arith.constant 0 : index
    %c0_168 = arith.constant 0 : index
    %377 = vector.load %arg6[%c0_167, %c0_168] : memref<128x512xbf16, #tpu.memory_space<vmem>>, vector<128x512xbf16>
    %cst_169 = arith.constant dense<0.000000e+00> : vector<8x512xf32>
    %378 = tpu.matmul %376, %377, %cst_169 {dimension_numbers = #tpu.dot_dimension_numbers<[1], [0], [0], [1], [0, 0, 1, 1], [], []>} : vector<8x128xbf16>, vector<128x512xbf16>, vector<8x512xf32> -> vector<8x512xf32>
    %379 = arith.addf %375, %378 : vector<8x512xf32>
    %380 = vector.extract_strided_slice %372 {offsets = [0, 0], sizes = [8, 128], strides = [1, 1]} : vector<8x512xf32> to vector<8x128xf32>
    %cst_170 = arith.constant 5.000000e-01 : f32
    %381 = vector.broadcast %cst_170 : f32 to vector<8x128xf32>
    %382 = arith.mulf %381, %380 : vector<8x128xf32>
    %383 = math.tanh %382 : vector<8x128xf32>
    %cst_171 = arith.constant 5.000000e-01 : f32
    %384 = vector.broadcast %cst_171 : f32 to vector<8x128xf32>
    %385 = arith.mulf %384, %383 : vector<8x128xf32>
    %cst_172 = arith.constant 5.000000e-01 : f32
    %386 = vector.broadcast %cst_172 : f32 to vector<8x128xf32>
    %387 = arith.addf %385, %386 : vector<8x128xf32>
    %388 = vector.extract_strided_slice %372 {offsets = [0, 128], sizes = [8, 128], strides = [1, 1]} : vector<8x512xf32> to vector<8x128xf32>
    %cst_173 = arith.constant 5.000000e-01 : f32
    %389 = vector.broadcast %cst_173 : f32 to vector<8x128xf32>
    %390 = arith.mulf %389, %388 : vector<8x128xf32>
    %391 = math.tanh %390 : vector<8x128xf32>
    %cst_174 = arith.constant 5.000000e-01 : f32
    %392 = vector.broadcast %cst_174 : f32 to vector<8x128xf32>
    %393 = arith.mulf %392, %391 : vector<8x128xf32>
    %cst_175 = arith.constant 5.000000e-01 : f32
    %394 = vector.broadcast %cst_175 : f32 to vector<8x128xf32>
    %395 = arith.addf %393, %394 : vector<8x128xf32>
    %396 = vector.extract_strided_slice %372 {offsets = [0, 256], sizes = [8, 128], strides = [1, 1]} : vector<8x512xf32> to vector<8x128xf32>
    %397 = math.tanh %396 : vector<8x128xf32>
    %398 = vector.extract_strided_slice %372 {offsets = [0, 384], sizes = [8, 128], strides = [1, 1]} : vector<8x512xf32> to vector<8x128xf32>
    %cst_176 = arith.constant 5.000000e-01 : f32
    %399 = vector.broadcast %cst_176 : f32 to vector<8x128xf32>
    %400 = arith.mulf %399, %398 : vector<8x128xf32>
    %401 = math.tanh %400 : vector<8x128xf32>
    %cst_177 = arith.constant 5.000000e-01 : f32
    %402 = vector.broadcast %cst_177 : f32 to vector<8x128xf32>
    %403 = arith.mulf %402, %401 : vector<8x128xf32>
    %cst_178 = arith.constant 5.000000e-01 : f32
    %404 = vector.broadcast %cst_178 : f32 to vector<8x128xf32>
    %405 = arith.addf %403, %404 : vector<8x128xf32>
    %406 = arith.mulf %395, %323 : vector<8x128xf32>
    %407 = arith.mulf %387, %397 : vector<8x128xf32>
    %408 = arith.addf %406, %407 : vector<8x128xf32>
    %409 = math.tanh %408 : vector<8x128xf32>
    %410 = arith.mulf %405, %409 : vector<8x128xf32>
    %411 = vector.extract_strided_slice %379 {offsets = [0, 0], sizes = [8, 128], strides = [1, 1]} : vector<8x512xf32> to vector<8x128xf32>
    %cst_179 = arith.constant 5.000000e-01 : f32
    %412 = vector.broadcast %cst_179 : f32 to vector<8x128xf32>
    %413 = arith.mulf %412, %411 : vector<8x128xf32>
    %414 = math.tanh %413 : vector<8x128xf32>
    %cst_180 = arith.constant 5.000000e-01 : f32
    %415 = vector.broadcast %cst_180 : f32 to vector<8x128xf32>
    %416 = arith.mulf %415, %414 : vector<8x128xf32>
    %cst_181 = arith.constant 5.000000e-01 : f32
    %417 = vector.broadcast %cst_181 : f32 to vector<8x128xf32>
    %418 = arith.addf %416, %417 : vector<8x128xf32>
    %419 = vector.extract_strided_slice %379 {offsets = [0, 128], sizes = [8, 128], strides = [1, 1]} : vector<8x512xf32> to vector<8x128xf32>
    %cst_182 = arith.constant 5.000000e-01 : f32
    %420 = vector.broadcast %cst_182 : f32 to vector<8x128xf32>
    %421 = arith.mulf %420, %419 : vector<8x128xf32>
    %422 = math.tanh %421 : vector<8x128xf32>
    %cst_183 = arith.constant 5.000000e-01 : f32
    %423 = vector.broadcast %cst_183 : f32 to vector<8x128xf32>
    %424 = arith.mulf %423, %422 : vector<8x128xf32>
    %cst_184 = arith.constant 5.000000e-01 : f32
    %425 = vector.broadcast %cst_184 : f32 to vector<8x128xf32>
    %426 = arith.addf %424, %425 : vector<8x128xf32>
    %427 = vector.extract_strided_slice %379 {offsets = [0, 256], sizes = [8, 128], strides = [1, 1]} : vector<8x512xf32> to vector<8x128xf32>
    %428 = math.tanh %427 : vector<8x128xf32>
    %429 = vector.extract_strided_slice %379 {offsets = [0, 384], sizes = [8, 128], strides = [1, 1]} : vector<8x512xf32> to vector<8x128xf32>
    %cst_185 = arith.constant 5.000000e-01 : f32
    %430 = vector.broadcast %cst_185 : f32 to vector<8x128xf32>
    %431 = arith.mulf %430, %429 : vector<8x128xf32>
    %432 = math.tanh %431 : vector<8x128xf32>
    %cst_186 = arith.constant 5.000000e-01 : f32
    %433 = vector.broadcast %cst_186 : f32 to vector<8x128xf32>
    %434 = arith.mulf %433, %432 : vector<8x128xf32>
    %cst_187 = arith.constant 5.000000e-01 : f32
    %435 = vector.broadcast %cst_187 : f32 to vector<8x128xf32>
    %436 = arith.addf %434, %435 : vector<8x128xf32>
    %437 = arith.mulf %426, %354 : vector<8x128xf32>
    %438 = arith.mulf %418, %428 : vector<8x128xf32>
    %439 = arith.addf %437, %438 : vector<8x128xf32>
    %440 = math.tanh %439 : vector<8x128xf32>
    %441 = arith.mulf %436, %440 : vector<8x128xf32>
    %442 = arith.index_cast %c4_i32 : i32 to index
    %c0_188 = arith.constant 0 : index
    %c0_189 = arith.constant 0 : index
    %443 = vector.load %arg9[%442, %c0_188, %c0_189] : memref<8x8x128xf32, #tpu.memory_space<vmem>>, vector<1x8x128xf32>
    %444 = vector.shape_cast %443 : vector<1x8x128xf32> to vector<8x128xf32>
    %445 = vector.shape_cast %410 : vector<8x128xf32> to vector<1x8x128xf32>
    tpu.vector_store %arg9[%442, %c0_188, %c0_189], %445 {strides = array<i32>} : memref<8x8x128xf32, #tpu.memory_space<vmem>>, vector<1x8x128xf32>,
    %446 = arith.index_cast %365 : i32 to index
    %c0_190 = arith.constant 0 : index
    %c0_191 = arith.constant 0 : index
    %447 = vector.load %arg10[%446, %c0_190, %c0_191] : memref<8x8x128xf32, #tpu.memory_space<vmem>>, vector<1x8x128xf32>
    %448 = vector.shape_cast %447 : vector<1x8x128xf32> to vector<8x128xf32>
    %449 = vector.shape_cast %441 : vector<8x128xf32> to vector<1x8x128xf32>
    tpu.vector_store %arg10[%446, %c0_190, %c0_191], %449 {strides = array<i32>} : memref<8x8x128xf32, #tpu.memory_space<vmem>>, vector<1x8x128xf32>,
    %c5_i32 = arith.constant 5 : i32
    %c7_i32_192 = arith.constant 7 : i32
    %450 = arith.subi %c7_i32_192, %c5_i32 : i32
    %451 = arith.index_cast %c5_i32 : i32 to index
    %c0_193 = arith.constant 0 : index
    %c0_194 = arith.constant 0 : index
    %452 = vector.load %arg11[%451, %c0_193, %c0_194] : memref<8x8x512xf32, #tpu.memory_space<vmem>>, vector<1x8x512xf32>
    %453 = vector.shape_cast %452 : vector<1x8x512xf32> to vector<8x512xf32>
    %454 = arith.truncf %410 : vector<8x128xf32> to vector<8x128xbf16>
    %c0_195 = arith.constant 0 : index
    %c0_196 = arith.constant 0 : index
    %455 = vector.load %arg5[%c0_195, %c0_196] : memref<128x512xbf16, #tpu.memory_space<vmem>>, vector<128x512xbf16>
    %cst_197 = arith.constant dense<0.000000e+00> : vector<8x512xf32>
    %456 = tpu.matmul %454, %455, %cst_197 {dimension_numbers = #tpu.dot_dimension_numbers<[1], [0], [0], [1], [0, 0, 1, 1], [], []>} : vector<8x128xbf16>, vector<128x512xbf16>, vector<8x512xf32> -> vector<8x512xf32>
    %457 = arith.addf %453, %456 : vector<8x512xf32>
    %458 = arith.index_cast %450 : i32 to index
    %c0_198 = arith.constant 0 : index
    %c0_199 = arith.constant 0 : index
    %459 = vector.load %arg12[%458, %c0_198, %c0_199] : memref<8x8x512xf32, #tpu.memory_space<vmem>>, vector<1x8x512xf32>
    %460 = vector.shape_cast %459 : vector<1x8x512xf32> to vector<8x512xf32>
    %461 = arith.truncf %441 : vector<8x128xf32> to vector<8x128xbf16>
    %c0_200 = arith.constant 0 : index
    %c0_201 = arith.constant 0 : index
    %462 = vector.load %arg6[%c0_200, %c0_201] : memref<128x512xbf16, #tpu.memory_space<vmem>>, vector<128x512xbf16>
    %cst_202 = arith.constant dense<0.000000e+00> : vector<8x512xf32>
    %463 = tpu.matmul %461, %462, %cst_202 {dimension_numbers = #tpu.dot_dimension_numbers<[1], [0], [0], [1], [0, 0, 1, 1], [], []>} : vector<8x128xbf16>, vector<128x512xbf16>, vector<8x512xf32> -> vector<8x512xf32>
    %464 = arith.addf %460, %463 : vector<8x512xf32>
    %465 = vector.extract_strided_slice %457 {offsets = [0, 0], sizes = [8, 128], strides = [1, 1]} : vector<8x512xf32> to vector<8x128xf32>
    %cst_203 = arith.constant 5.000000e-01 : f32
    %466 = vector.broadcast %cst_203 : f32 to vector<8x128xf32>
    %467 = arith.mulf %466, %465 : vector<8x128xf32>
    %468 = math.tanh %467 : vector<8x128xf32>
    %cst_204 = arith.constant 5.000000e-01 : f32
    %469 = vector.broadcast %cst_204 : f32 to vector<8x128xf32>
    %470 = arith.mulf %469, %468 : vector<8x128xf32>
    %cst_205 = arith.constant 5.000000e-01 : f32
    %471 = vector.broadcast %cst_205 : f32 to vector<8x128xf32>
    %472 = arith.addf %470, %471 : vector<8x128xf32>
    %473 = vector.extract_strided_slice %457 {offsets = [0, 128], sizes = [8, 128], strides = [1, 1]} : vector<8x512xf32> to vector<8x128xf32>
    %cst_206 = arith.constant 5.000000e-01 : f32
    %474 = vector.broadcast %cst_206 : f32 to vector<8x128xf32>
    %475 = arith.mulf %474, %473 : vector<8x128xf32>
    %476 = math.tanh %475 : vector<8x128xf32>
    %cst_207 = arith.constant 5.000000e-01 : f32
    %477 = vector.broadcast %cst_207 : f32 to vector<8x128xf32>
    %478 = arith.mulf %477, %476 : vector<8x128xf32>
    %cst_208 = arith.constant 5.000000e-01 : f32
    %479 = vector.broadcast %cst_208 : f32 to vector<8x128xf32>
    %480 = arith.addf %478, %479 : vector<8x128xf32>
    %481 = vector.extract_strided_slice %457 {offsets = [0, 256], sizes = [8, 128], strides = [1, 1]} : vector<8x512xf32> to vector<8x128xf32>
    %482 = math.tanh %481 : vector<8x128xf32>
    %483 = vector.extract_strided_slice %457 {offsets = [0, 384], sizes = [8, 128], strides = [1, 1]} : vector<8x512xf32> to vector<8x128xf32>
    %cst_209 = arith.constant 5.000000e-01 : f32
    %484 = vector.broadcast %cst_209 : f32 to vector<8x128xf32>
    %485 = arith.mulf %484, %483 : vector<8x128xf32>
    %486 = math.tanh %485 : vector<8x128xf32>
    %cst_210 = arith.constant 5.000000e-01 : f32
    %487 = vector.broadcast %cst_210 : f32 to vector<8x128xf32>
    %488 = arith.mulf %487, %486 : vector<8x128xf32>
    %cst_211 = arith.constant 5.000000e-01 : f32
    %489 = vector.broadcast %cst_211 : f32 to vector<8x128xf32>
    %490 = arith.addf %488, %489 : vector<8x128xf32>
    %491 = arith.mulf %480, %408 : vector<8x128xf32>
    %492 = arith.mulf %472, %482 : vector<8x128xf32>
    %493 = arith.addf %491, %492 : vector<8x128xf32>
    %494 = math.tanh %493 : vector<8x128xf32>
    %495 = arith.mulf %490, %494 : vector<8x128xf32>
    %496 = vector.extract_strided_slice %464 {offsets = [0, 0], sizes = [8, 128], strides = [1, 1]} : vector<8x512xf32> to vector<8x128xf32>
    %cst_212 = arith.constant 5.000000e-01 : f32
    %497 = vector.broadcast %cst_212 : f32 to vector<8x128xf32>
    %498 = arith.mulf %497, %496 : vector<8x128xf32>
    %499 = math.tanh %498 : vector<8x128xf32>
    %cst_213 = arith.constant 5.000000e-01 : f32
    %500 = vector.broadcast %cst_213 : f32 to vector<8x128xf32>
    %501 = arith.mulf %500, %499 : vector<8x128xf32>
    %cst_214 = arith.constant 5.000000e-01 : f32
    %502 = vector.broadcast %cst_214 : f32 to vector<8x128xf32>
    %503 = arith.addf %501, %502 : vector<8x128xf32>
    %504 = vector.extract_strided_slice %464 {offsets = [0, 128], sizes = [8, 128], strides = [1, 1]} : vector<8x512xf32> to vector<8x128xf32>
    %cst_215 = arith.constant 5.000000e-01 : f32
    %505 = vector.broadcast %cst_215 : f32 to vector<8x128xf32>
    %506 = arith.mulf %505, %504 : vector<8x128xf32>
    %507 = math.tanh %506 : vector<8x128xf32>
    %cst_216 = arith.constant 5.000000e-01 : f32
    %508 = vector.broadcast %cst_216 : f32 to vector<8x128xf32>
    %509 = arith.mulf %508, %507 : vector<8x128xf32>
    %cst_217 = arith.constant 5.000000e-01 : f32
    %510 = vector.broadcast %cst_217 : f32 to vector<8x128xf32>
    %511 = arith.addf %509, %510 : vector<8x128xf32>
    %512 = vector.extract_strided_slice %464 {offsets = [0, 256], sizes = [8, 128], strides = [1, 1]} : vector<8x512xf32> to vector<8x128xf32>
    %513 = math.tanh %512 : vector<8x128xf32>
    %514 = vector.extract_strided_slice %464 {offsets = [0, 384], sizes = [8, 128], strides = [1, 1]} : vector<8x512xf32> to vector<8x128xf32>
    %cst_218 = arith.constant 5.000000e-01 : f32
    %515 = vector.broadcast %cst_218 : f32 to vector<8x128xf32>
    %516 = arith.mulf %515, %514 : vector<8x128xf32>
    %517 = math.tanh %516 : vector<8x128xf32>
    %cst_219 = arith.constant 5.000000e-01 : f32
    %518 = vector.broadcast %cst_219 : f32 to vector<8x128xf32>
    %519 = arith.mulf %518, %517 : vector<8x128xf32>
    %cst_220 = arith.constant 5.000000e-01 : f32
    %520 = vector.broadcast %cst_220 : f32 to vector<8x128xf32>
    %521 = arith.addf %519, %520 : vector<8x128xf32>
    %522 = arith.mulf %511, %439 : vector<8x128xf32>
    %523 = arith.mulf %503, %513 : vector<8x128xf32>
    %524 = arith.addf %522, %523 : vector<8x128xf32>
    %525 = math.tanh %524 : vector<8x128xf32>
    %526 = arith.mulf %521, %525 : vector<8x128xf32>
    %527 = arith.index_cast %c5_i32 : i32 to index
    %c0_221 = arith.constant 0 : index
    %c0_222 = arith.constant 0 : index
    %528 = vector.load %arg9[%527, %c0_221, %c0_222] : memref<8x8x128xf32, #tpu.memory_space<vmem>>, vector<1x8x128xf32>
    %529 = vector.shape_cast %528 : vector<1x8x128xf32> to vector<8x128xf32>
    %530 = vector.shape_cast %495 : vector<8x128xf32> to vector<1x8x128xf32>
    tpu.vector_store %arg9[%527, %c0_221, %c0_222], %530 {strides = array<i32>} : memref<8x8x128xf32, #tpu.memory_space<vmem>>, vector<1x8x128xf32>,
    %531 = arith.index_cast %450 : i32 to index
    %c0_223 = arith.constant 0 : index
    %c0_224 = arith.constant 0 : index
    %532 = vector.load %arg10[%531, %c0_223, %c0_224] : memref<8x8x128xf32, #tpu.memory_space<vmem>>, vector<1x8x128xf32>
    %533 = vector.shape_cast %532 : vector<1x8x128xf32> to vector<8x128xf32>
    %534 = vector.shape_cast %526 : vector<8x128xf32> to vector<1x8x128xf32>
    tpu.vector_store %arg10[%531, %c0_223, %c0_224], %534 {strides = array<i32>} : memref<8x8x128xf32, #tpu.memory_space<vmem>>, vector<1x8x128xf32>,
    %c6_i32 = arith.constant 6 : i32
    %c7_i32_225 = arith.constant 7 : i32
    %535 = arith.subi %c7_i32_225, %c6_i32 : i32
    %536 = arith.index_cast %c6_i32 : i32 to index
    %c0_226 = arith.constant 0 : index
    %c0_227 = arith.constant 0 : index
    %537 = vector.load %arg11[%536, %c0_226, %c0_227] : memref<8x8x512xf32, #tpu.memory_space<vmem>>, vector<1x8x512xf32>
    %538 = vector.shape_cast %537 : vector<1x8x512xf32> to vector<8x512xf32>
    %539 = arith.truncf %495 : vector<8x128xf32> to vector<8x128xbf16>
    %c0_228 = arith.constant 0 : index
    %c0_229 = arith.constant 0 : index
    %540 = vector.load %arg5[%c0_228, %c0_229] : memref<128x512xbf16, #tpu.memory_space<vmem>>, vector<128x512xbf16>
    %cst_230 = arith.constant dense<0.000000e+00> : vector<8x512xf32>
    %541 = tpu.matmul %539, %540, %cst_230 {dimension_numbers = #tpu.dot_dimension_numbers<[1], [0], [0], [1], [0, 0, 1, 1], [], []>} : vector<8x128xbf16>, vector<128x512xbf16>, vector<8x512xf32> -> vector<8x512xf32>
    %542 = arith.addf %538, %541 : vector<8x512xf32>
    %543 = arith.index_cast %535 : i32 to index
    %c0_231 = arith.constant 0 : index
    %c0_232 = arith.constant 0 : index
    %544 = vector.load %arg12[%543, %c0_231, %c0_232] : memref<8x8x512xf32, #tpu.memory_space<vmem>>, vector<1x8x512xf32>
    %545 = vector.shape_cast %544 : vector<1x8x512xf32> to vector<8x512xf32>
    %546 = arith.truncf %526 : vector<8x128xf32> to vector<8x128xbf16>
    %c0_233 = arith.constant 0 : index
    %c0_234 = arith.constant 0 : index
    %547 = vector.load %arg6[%c0_233, %c0_234] : memref<128x512xbf16, #tpu.memory_space<vmem>>, vector<128x512xbf16>
    %cst_235 = arith.constant dense<0.000000e+00> : vector<8x512xf32>
    %548 = tpu.matmul %546, %547, %cst_235 {dimension_numbers = #tpu.dot_dimension_numbers<[1], [0], [0], [1], [0, 0, 1, 1], [], []>} : vector<8x128xbf16>, vector<128x512xbf16>, vector<8x512xf32> -> vector<8x512xf32>
    %549 = arith.addf %545, %548 : vector<8x512xf32>
    %550 = vector.extract_strided_slice %542 {offsets = [0, 0], sizes = [8, 128], strides = [1, 1]} : vector<8x512xf32> to vector<8x128xf32>
    %cst_236 = arith.constant 5.000000e-01 : f32
    %551 = vector.broadcast %cst_236 : f32 to vector<8x128xf32>
    %552 = arith.mulf %551, %550 : vector<8x128xf32>
    %553 = math.tanh %552 : vector<8x128xf32>
    %cst_237 = arith.constant 5.000000e-01 : f32
    %554 = vector.broadcast %cst_237 : f32 to vector<8x128xf32>
    %555 = arith.mulf %554, %553 : vector<8x128xf32>
    %cst_238 = arith.constant 5.000000e-01 : f32
    %556 = vector.broadcast %cst_238 : f32 to vector<8x128xf32>
    %557 = arith.addf %555, %556 : vector<8x128xf32>
    %558 = vector.extract_strided_slice %542 {offsets = [0, 128], sizes = [8, 128], strides = [1, 1]} : vector<8x512xf32> to vector<8x128xf32>
    %cst_239 = arith.constant 5.000000e-01 : f32
    %559 = vector.broadcast %cst_239 : f32 to vector<8x128xf32>
    %560 = arith.mulf %559, %558 : vector<8x128xf32>
    %561 = math.tanh %560 : vector<8x128xf32>
    %cst_240 = arith.constant 5.000000e-01 : f32
    %562 = vector.broadcast %cst_240 : f32 to vector<8x128xf32>
    %563 = arith.mulf %562, %561 : vector<8x128xf32>
    %cst_241 = arith.constant 5.000000e-01 : f32
    %564 = vector.broadcast %cst_241 : f32 to vector<8x128xf32>
    %565 = arith.addf %563, %564 : vector<8x128xf32>
    %566 = vector.extract_strided_slice %542 {offsets = [0, 256], sizes = [8, 128], strides = [1, 1]} : vector<8x512xf32> to vector<8x128xf32>
    %567 = math.tanh %566 : vector<8x128xf32>
    %568 = vector.extract_strided_slice %542 {offsets = [0, 384], sizes = [8, 128], strides = [1, 1]} : vector<8x512xf32> to vector<8x128xf32>
    %cst_242 = arith.constant 5.000000e-01 : f32
    %569 = vector.broadcast %cst_242 : f32 to vector<8x128xf32>
    %570 = arith.mulf %569, %568 : vector<8x128xf32>
    %571 = math.tanh %570 : vector<8x128xf32>
    %cst_243 = arith.constant 5.000000e-01 : f32
    %572 = vector.broadcast %cst_243 : f32 to vector<8x128xf32>
    %573 = arith.mulf %572, %571 : vector<8x128xf32>
    %cst_244 = arith.constant 5.000000e-01 : f32
    %574 = vector.broadcast %cst_244 : f32 to vector<8x128xf32>
    %575 = arith.addf %573, %574 : vector<8x128xf32>
    %576 = arith.mulf %565, %493 : vector<8x128xf32>
    %577 = arith.mulf %557, %567 : vector<8x128xf32>
    %578 = arith.addf %576, %577 : vector<8x128xf32>
    %579 = math.tanh %578 : vector<8x128xf32>
    %580 = arith.mulf %575, %579 : vector<8x128xf32>
    %581 = vector.extract_strided_slice %549 {offsets = [0, 0], sizes = [8, 128], strides = [1, 1]} : vector<8x512xf32> to vector<8x128xf32>
    %cst_245 = arith.constant 5.000000e-01 : f32
    %582 = vector.broadcast %cst_245 : f32 to vector<8x128xf32>
    %583 = arith.mulf %582, %581 : vector<8x128xf32>
    %584 = math.tanh %583 : vector<8x128xf32>
    %cst_246 = arith.constant 5.000000e-01 : f32
    %585 = vector.broadcast %cst_246 : f32 to vector<8x128xf32>
    %586 = arith.mulf %585, %584 : vector<8x128xf32>
    %cst_247 = arith.constant 5.000000e-01 : f32
    %587 = vector.broadcast %cst_247 : f32 to vector<8x128xf32>
    %588 = arith.addf %586, %587 : vector<8x128xf32>
    %589 = vector.extract_strided_slice %549 {offsets = [0, 128], sizes = [8, 128], strides = [1, 1]} : vector<8x512xf32> to vector<8x128xf32>
    %cst_248 = arith.constant 5.000000e-01 : f32
    %590 = vector.broadcast %cst_248 : f32 to vector<8x128xf32>
    %591 = arith.mulf %590, %589 : vector<8x128xf32>
    %592 = math.tanh %591 : vector<8x128xf32>
    %cst_249 = arith.constant 5.000000e-01 : f32
    %593 = vector.broadcast %cst_249 : f32 to vector<8x128xf32>
    %594 = arith.mulf %593, %592 : vector<8x128xf32>
    %cst_250 = arith.constant 5.000000e-01 : f32
    %595 = vector.broadcast %cst_250 : f32 to vector<8x128xf32>
    %596 = arith.addf %594, %595 : vector<8x128xf32>
    %597 = vector.extract_strided_slice %549 {offsets = [0, 256], sizes = [8, 128], strides = [1, 1]} : vector<8x512xf32> to vector<8x128xf32>
    %598 = math.tanh %597 : vector<8x128xf32>
    %599 = vector.extract_strided_slice %549 {offsets = [0, 384], sizes = [8, 128], strides = [1, 1]} : vector<8x512xf32> to vector<8x128xf32>
    %cst_251 = arith.constant 5.000000e-01 : f32
    %600 = vector.broadcast %cst_251 : f32 to vector<8x128xf32>
    %601 = arith.mulf %600, %599 : vector<8x128xf32>
    %602 = math.tanh %601 : vector<8x128xf32>
    %cst_252 = arith.constant 5.000000e-01 : f32
    %603 = vector.broadcast %cst_252 : f32 to vector<8x128xf32>
    %604 = arith.mulf %603, %602 : vector<8x128xf32>
    %cst_253 = arith.constant 5.000000e-01 : f32
    %605 = vector.broadcast %cst_253 : f32 to vector<8x128xf32>
    %606 = arith.addf %604, %605 : vector<8x128xf32>
    %607 = arith.mulf %596, %524 : vector<8x128xf32>
    %608 = arith.mulf %588, %598 : vector<8x128xf32>
    %609 = arith.addf %607, %608 : vector<8x128xf32>
    %610 = math.tanh %609 : vector<8x128xf32>
    %611 = arith.mulf %606, %610 : vector<8x128xf32>
    %612 = arith.index_cast %c6_i32 : i32 to index
    %c0_254 = arith.constant 0 : index
    %c0_255 = arith.constant 0 : index
    %613 = vector.load %arg9[%612, %c0_254, %c0_255] : memref<8x8x128xf32, #tpu.memory_space<vmem>>, vector<1x8x128xf32>
    %614 = vector.shape_cast %613 : vector<1x8x128xf32> to vector<8x128xf32>
    %615 = vector.shape_cast %580 : vector<8x128xf32> to vector<1x8x128xf32>
    tpu.vector_store %arg9[%612, %c0_254, %c0_255], %615 {strides = array<i32>} : memref<8x8x128xf32, #tpu.memory_space<vmem>>, vector<1x8x128xf32>,
    %616 = arith.index_cast %535 : i32 to index
    %c0_256 = arith.constant 0 : index
    %c0_257 = arith.constant 0 : index
    %617 = vector.load %arg10[%616, %c0_256, %c0_257] : memref<8x8x128xf32, #tpu.memory_space<vmem>>, vector<1x8x128xf32>
    %618 = vector.shape_cast %617 : vector<1x8x128xf32> to vector<8x128xf32>
    %619 = vector.shape_cast %611 : vector<8x128xf32> to vector<1x8x128xf32>
    tpu.vector_store %arg10[%616, %c0_256, %c0_257], %619 {strides = array<i32>} : memref<8x8x128xf32, #tpu.memory_space<vmem>>, vector<1x8x128xf32>,
    %c7_i32_258 = arith.constant 7 : i32
    %c7_i32_259 = arith.constant 7 : i32
    %620 = arith.subi %c7_i32_259, %c7_i32_258 : i32
    %621 = arith.index_cast %c7_i32_258 : i32 to index
    %c0_260 = arith.constant 0 : index
    %c0_261 = arith.constant 0 : index
    %622 = vector.load %arg11[%621, %c0_260, %c0_261] : memref<8x8x512xf32, #tpu.memory_space<vmem>>, vector<1x8x512xf32>
    %623 = vector.shape_cast %622 : vector<1x8x512xf32> to vector<8x512xf32>
    %624 = arith.truncf %580 : vector<8x128xf32> to vector<8x128xbf16>
    %c0_262 = arith.constant 0 : index
    %c0_263 = arith.constant 0 : index
    %625 = vector.load %arg5[%c0_262, %c0_263] : memref<128x512xbf16, #tpu.memory_space<vmem>>, vector<128x512xbf16>
    %cst_264 = arith.constant dense<0.000000e+00> : vector<8x512xf32>
    %626 = tpu.matmul %624, %625, %cst_264 {dimension_numbers = #tpu.dot_dimension_numbers<[1], [0], [0], [1], [0, 0, 1, 1], [], []>} : vector<8x128xbf16>, vector<128x512xbf16>, vector<8x512xf32> -> vector<8x512xf32>
    %627 = arith.addf %623, %626 : vector<8x512xf32>
    %628 = arith.index_cast %620 : i32 to index
    %c0_265 = arith.constant 0 : index
    %c0_266 = arith.constant 0 : index
    %629 = vector.load %arg12[%628, %c0_265, %c0_266] : memref<8x8x512xf32, #tpu.memory_space<vmem>>, vector<1x8x512xf32>
    %630 = vector.shape_cast %629 : vector<1x8x512xf32> to vector<8x512xf32>
    %631 = arith.truncf %611 : vector<8x128xf32> to vector<8x128xbf16>
    %c0_267 = arith.constant 0 : index
    %c0_268 = arith.constant 0 : index
    %632 = vector.load %arg6[%c0_267, %c0_268] : memref<128x512xbf16, #tpu.memory_space<vmem>>, vector<128x512xbf16>
    %cst_269 = arith.constant dense<0.000000e+00> : vector<8x512xf32>
    %633 = tpu.matmul %631, %632, %cst_269 {dimension_numbers = #tpu.dot_dimension_numbers<[1], [0], [0], [1], [0, 0, 1, 1], [], []>} : vector<8x128xbf16>, vector<128x512xbf16>, vector<8x512xf32> -> vector<8x512xf32>
    %634 = arith.addf %630, %633 : vector<8x512xf32>
    %635 = vector.extract_strided_slice %627 {offsets = [0, 0], sizes = [8, 128], strides = [1, 1]} : vector<8x512xf32> to vector<8x128xf32>
    %cst_270 = arith.constant 5.000000e-01 : f32
    %636 = vector.broadcast %cst_270 : f32 to vector<8x128xf32>
    %637 = arith.mulf %636, %635 : vector<8x128xf32>
    %638 = math.tanh %637 : vector<8x128xf32>
    %cst_271 = arith.constant 5.000000e-01 : f32
    %639 = vector.broadcast %cst_271 : f32 to vector<8x128xf32>
    %640 = arith.mulf %639, %638 : vector<8x128xf32>
    %cst_272 = arith.constant 5.000000e-01 : f32
    %641 = vector.broadcast %cst_272 : f32 to vector<8x128xf32>
    %642 = arith.addf %640, %641 : vector<8x128xf32>
    %643 = vector.extract_strided_slice %627 {offsets = [0, 128], sizes = [8, 128], strides = [1, 1]} : vector<8x512xf32> to vector<8x128xf32>
    %cst_273 = arith.constant 5.000000e-01 : f32
    %644 = vector.broadcast %cst_273 : f32 to vector<8x128xf32>
    %645 = arith.mulf %644, %643 : vector<8x128xf32>
    %646 = math.tanh %645 : vector<8x128xf32>
    %cst_274 = arith.constant 5.000000e-01 : f32
    %647 = vector.broadcast %cst_274 : f32 to vector<8x128xf32>
    %648 = arith.mulf %647, %646 : vector<8x128xf32>
    %cst_275 = arith.constant 5.000000e-01 : f32
    %649 = vector.broadcast %cst_275 : f32 to vector<8x128xf32>
    %650 = arith.addf %648, %649 : vector<8x128xf32>
    %651 = vector.extract_strided_slice %627 {offsets = [0, 256], sizes = [8, 128], strides = [1, 1]} : vector<8x512xf32> to vector<8x128xf32>
    %652 = math.tanh %651 : vector<8x128xf32>
    %653 = vector.extract_strided_slice %627 {offsets = [0, 384], sizes = [8, 128], strides = [1, 1]} : vector<8x512xf32> to vector<8x128xf32>
    %cst_276 = arith.constant 5.000000e-01 : f32
    %654 = vector.broadcast %cst_276 : f32 to vector<8x128xf32>
    %655 = arith.mulf %654, %653 : vector<8x128xf32>
    %656 = math.tanh %655 : vector<8x128xf32>
    %cst_277 = arith.constant 5.000000e-01 : f32
    %657 = vector.broadcast %cst_277 : f32 to vector<8x128xf32>
    %658 = arith.mulf %657, %656 : vector<8x128xf32>
    %cst_278 = arith.constant 5.000000e-01 : f32
    %659 = vector.broadcast %cst_278 : f32 to vector<8x128xf32>
    %660 = arith.addf %658, %659 : vector<8x128xf32>
    %661 = arith.mulf %650, %578 : vector<8x128xf32>
    %662 = arith.mulf %642, %652 : vector<8x128xf32>
    %663 = arith.addf %661, %662 : vector<8x128xf32>
    %664 = math.tanh %663 : vector<8x128xf32>
    %665 = arith.mulf %660, %664 : vector<8x128xf32>
    %666 = vector.extract_strided_slice %634 {offsets = [0, 0], sizes = [8, 128], strides = [1, 1]} : vector<8x512xf32> to vector<8x128xf32>
    %cst_279 = arith.constant 5.000000e-01 : f32
    %667 = vector.broadcast %cst_279 : f32 to vector<8x128xf32>
    %668 = arith.mulf %667, %666 : vector<8x128xf32>
    %669 = math.tanh %668 : vector<8x128xf32>
    %cst_280 = arith.constant 5.000000e-01 : f32
    %670 = vector.broadcast %cst_280 : f32 to vector<8x128xf32>
    %671 = arith.mulf %670, %669 : vector<8x128xf32>
    %cst_281 = arith.constant 5.000000e-01 : f32
    %672 = vector.broadcast %cst_281 : f32 to vector<8x128xf32>
    %673 = arith.addf %671, %672 : vector<8x128xf32>
    %674 = vector.extract_strided_slice %634 {offsets = [0, 128], sizes = [8, 128], strides = [1, 1]} : vector<8x512xf32> to vector<8x128xf32>
    %cst_282 = arith.constant 5.000000e-01 : f32
    %675 = vector.broadcast %cst_282 : f32 to vector<8x128xf32>
    %676 = arith.mulf %675, %674 : vector<8x128xf32>
    %677 = math.tanh %676 : vector<8x128xf32>
    %cst_283 = arith.constant 5.000000e-01 : f32
    %678 = vector.broadcast %cst_283 : f32 to vector<8x128xf32>
    %679 = arith.mulf %678, %677 : vector<8x128xf32>
    %cst_284 = arith.constant 5.000000e-01 : f32
    %680 = vector.broadcast %cst_284 : f32 to vector<8x128xf32>
    %681 = arith.addf %679, %680 : vector<8x128xf32>
    %682 = vector.extract_strided_slice %634 {offsets = [0, 256], sizes = [8, 128], strides = [1, 1]} : vector<8x512xf32> to vector<8x128xf32>
    %683 = math.tanh %682 : vector<8x128xf32>
    %684 = vector.extract_strided_slice %634 {offsets = [0, 384], sizes = [8, 128], strides = [1, 1]} : vector<8x512xf32> to vector<8x128xf32>
    %cst_285 = arith.constant 5.000000e-01 : f32
    %685 = vector.broadcast %cst_285 : f32 to vector<8x128xf32>
    %686 = arith.mulf %685, %684 : vector<8x128xf32>
    %687 = math.tanh %686 : vector<8x128xf32>
    %cst_286 = arith.constant 5.000000e-01 : f32
    %688 = vector.broadcast %cst_286 : f32 to vector<8x128xf32>
    %689 = arith.mulf %688, %687 : vector<8x128xf32>
    %cst_287 = arith.constant 5.000000e-01 : f32
    %690 = vector.broadcast %cst_287 : f32 to vector<8x128xf32>
    %691 = arith.addf %689, %690 : vector<8x128xf32>
    %692 = arith.mulf %681, %609 : vector<8x128xf32>
    %693 = arith.mulf %673, %683 : vector<8x128xf32>
    %694 = arith.addf %692, %693 : vector<8x128xf32>
    %695 = math.tanh %694 : vector<8x128xf32>
    %696 = arith.mulf %691, %695 : vector<8x128xf32>
    %697 = arith.index_cast %c7_i32_258 : i32 to index
    %c0_288 = arith.constant 0 : index
    %c0_289 = arith.constant 0 : index
    %698 = vector.load %arg9[%697, %c0_288, %c0_289] : memref<8x8x128xf32, #tpu.memory_space<vmem>>, vector<1x8x128xf32>
    %699 = vector.shape_cast %698 : vector<1x8x128xf32> to vector<8x128xf32>
    %700 = vector.shape_cast %665 : vector<8x128xf32> to vector<1x8x128xf32>
    tpu.vector_store %arg9[%697, %c0_288, %c0_289], %700 {strides = array<i32>} : memref<8x8x128xf32, #tpu.memory_space<vmem>>, vector<1x8x128xf32>,
    %701 = arith.index_cast %620 : i32 to index
    %c0_290 = arith.constant 0 : index
    %c0_291 = arith.constant 0 : index
    %702 = vector.load %arg10[%701, %c0_290, %c0_291] : memref<8x8x128xf32, #tpu.memory_space<vmem>>, vector<1x8x128xf32>
    %703 = vector.shape_cast %702 : vector<1x8x128xf32> to vector<8x128xf32>
    %704 = vector.shape_cast %696 : vector<8x128xf32> to vector<1x8x128xf32>
    tpu.vector_store %arg10[%701, %c0_290, %c0_291], %704 {strides = array<i32>} : memref<8x8x128xf32, #tpu.memory_space<vmem>>, vector<1x8x128xf32>,
    %c8_i32 = arith.constant 8 : i32
    %c0_292 = arith.constant 0 : index
    %c0_293 = arith.constant 0 : index
    %705 = vector.load %arg13[%c0_292, %c0_293] : memref<8x128xf32, #tpu.memory_space<vmem>>, vector<8x128xf32>
    tpu.vector_store %arg13[%c0_292, %c0_293], %665 {strides = array<i32>} : memref<8x128xf32, #tpu.memory_space<vmem>>, vector<8x128xf32>,
    %c0_294 = arith.constant 0 : index
    %c0_295 = arith.constant 0 : index
    %706 = vector.load %arg14[%c0_294, %c0_295] : memref<8x128xf32, #tpu.memory_space<vmem>>, vector<8x128xf32>
    tpu.vector_store %arg14[%c0_294, %c0_295], %663 {strides = array<i32>} : memref<8x128xf32, #tpu.memory_space<vmem>>, vector<8x128xf32>,
    %c0_296 = arith.constant 0 : index
    %c0_297 = arith.constant 0 : index
    %707 = vector.load %arg15[%c0_296, %c0_297] : memref<8x128xf32, #tpu.memory_space<vmem>>, vector<8x128xf32>
    tpu.vector_store %arg15[%c0_296, %c0_297], %696 {strides = array<i32>} : memref<8x128xf32, #tpu.memory_space<vmem>>, vector<8x128xf32>,
    %c0_298 = arith.constant 0 : index
    %c0_299 = arith.constant 0 : index
    %708 = vector.load %arg16[%c0_298, %c0_299] : memref<8x128xf32, #tpu.memory_space<vmem>>, vector<8x128xf32>
    tpu.vector_store %arg16[%c0_298, %c0_299], %694 {strides = array<i32>} : memref<8x128xf32, #tpu.memory_space<vmem>>, vector<8x128xf32>,
    return
  }
  func.func @transform_0(%arg0: i32) -> (i32, i32) {
    %c0_i32 = arith.constant 0 : i32
    %c0_i32_0 = arith.constant 0 : i32
    return %arg0, %c0_i32 : i32, i32
  }
  func.func @transform_1(%arg0: i32) -> (i32, i32) {
    %c0_i32 = arith.constant 0 : i32
    %0 = arith.subi %c0_i32, %arg0 : i32
    %c0_i32_0 = arith.constant 0 : i32
    %c0_i32_1 = arith.constant 0 : i32
    return %0, %c0_i32_0 : i32, i32
  }
  func.func @transform_2(%arg0: i32) -> (i32, i32) {
    %c0_i32 = arith.constant 0 : i32
    %c0_i32_0 = arith.constant 0 : i32
    %c0_i32_1 = arith.constant 0 : i32
    return %c0_i32, %c0_i32_0 : i32, i32
  }
  func.func @transform_3(%arg0: i32) -> (i32, i32) {
    %c0_i32 = arith.constant 0 : i32
    %c0_i32_0 = arith.constant 0 : i32
    %c0_i32_1 = arith.constant 0 : i32
    return %c0_i32, %c0_i32_0 : i32, i32
  }
  func.func @transform_4(%arg0: i32) -> (i32, i32) {
    %c0_i32 = arith.constant 0 : i32
    %c0_i32_0 = arith.constant 0 : i32
    %c0_i32_1 = arith.constant 0 : i32
    return %c0_i32, %c0_i32_0 : i32, i32
  }
  func.func @transform_5(%arg0: i32) -> (i32, i32) {
    %c0_i32 = arith.constant 0 : i32
    %c0_i32_0 = arith.constant 0 : i32
    %c0_i32_1 = arith.constant 0 : i32
    return %c0_i32, %c0_i32_0 : i32, i32
  }
  func.func @transform_6(%arg0: i32) -> (i32, i32) {
    %c0_i32 = arith.constant 0 : i32
    %c0_i32_0 = arith.constant 0 : i32
    %c0_i32_1 = arith.constant 0 : i32
    return %c0_i32, %c0_i32_0 : i32, i32
  }
  func.func @transform_7(%arg0: i32) -> (i32, i32) {
    %c0_i32 = arith.constant 0 : i32
    %c0_i32_0 = arith.constant 0 : i32
    %c0_i32_1 = arith.constant 0 : i32
    return %c0_i32, %c0_i32_0 : i32, i32
  }
  func.func @transform_8(%arg0: i32) -> (i32, i32, i32) {
    %c0_i32 = arith.constant 0 : i32
    %c0_i32_0 = arith.constant 0 : i32
    %c0_i32_1 = arith.constant 0 : i32
    return %arg0, %c0_i32, %c0_i32_0 : i32, i32, i32
  }
  func.func @transform_9(%arg0: i32) -> (i32, i32, i32) {
    %c0_i32 = arith.constant 0 : i32
    %0 = arith.subi %c0_i32, %arg0 : i32
    %c0_i32_0 = arith.constant 0 : i32
    %c0_i32_1 = arith.constant 0 : i32
    %c0_i32_2 = arith.constant 0 : i32
    return %0, %c0_i32_0, %c0_i32_1 : i32, i32, i32
  }
}

</mosaic_0001>

<bundles_post_ra>
// kernel: bidirectional_lstm_forward.2
= control target key start
LH: loop header
LB: loop body
LE: loop exit
PB: predicated region body
PF: predicated region fallthrough
CT: control target
= control target key end

     0   :  { %15 = vsyncpa [#allocation9], 0  ;;  %s8563_s0 = inlined_call_operand.vmem [shape: f32[64,32], index: 0, kind: input, shape index: {}, may-alias: {0,1}]   ;;  %s8564_s1 = inlined_call_operand.vmem [shape: f32[64,32], index: 1, kind: input, shape index: {}, may-alias: {0,1}]   ;;  %s8565_s2 = inlined_call_operand.hbm [shape: bf16[32,512], index: 2, kind: input, shape index: {}]   ;;  %s8566_s3 = inlined_call_operand.hbm [shape: bf16[32,512], index: 3, kind: input, shape index: {}]   ;;  %s8567_s4 = inlined_call_operand.hbm [shape: bf16[128,512], index: 4, kind: input, shape index: {}]   ;;  %s8568_s5 = inlined_call_operand.hbm [shape: bf16[128,512], index: 5, kind: input, shape index: {}]   ;;  %s8569_s6 = inlined_call_operand.hbm [shape: f32[1,512], index: 6, kind: input, shape index: {}]   ;;  %s8570_s7 = inlined_call_operand.hbm [shape: f32[1,512], index: 7, kind: input, shape index: {}]   ;;  %s8571_s8 = inlined_call_operand.vmem [shape: f32[8,8,128], index: 8, kind: output, shape index: {0}]   ;;  %s8572_s9 = inlined_call_operand.vmem [shape: f32[8,8,128], index: 9, kind: output, shape index: {1}]  }
   0x1   :  { %16 = vsyncpa [#allocation11], 0 }
   0x2   :  { %17 = vsyncpa [#allocation14], 0 }
   0x3   :  { %18 = vsyncpa [#allocation17], 0  ;;  %s6883_s30 = smov [#allocation10]   ;;  %s6884_s11 = smov [#allocation13]  }
   0x4   :  { %s48_s10 = sshll.u32 %s6883_s30, 4  ;;  %s72_s12 = sshll.u32 %s6884_s11, 4  ;;  %s49_s10 = int_to_ptr.vmem [resolvable:$true] %s48_s10  ;;  %s6943_s12 = int_to_ptr.vmem [resolvable:$true] %s72_s12 }
   0x5   :  { %s6743_s15 = scalar_lea.hbm %s8566_s3, 1024 }
   0x6   :  { %p6744_p0 = scmp.ne.s32.totalorder %s8566_s3, %s6743_s15  ;;  %p6747_p1 = scmp.lt.u32.totalorder %s6743_s15, %s8566_s3 }
   0x8   :  { %p6749_p2 = pnand %p6747_p1, %p6744_p0 }
   0xa   :  { %6752 = shalt.err (!%p6749_p2)
}
   0xb   :  { %s6753_s20 = scalar_lea.vmem %s49_s10, 1024  ;;  %p6758_p4 = scmp.lt.s32.totalorder %s49_s10, %s49_s10 }
   0xc   :  { %p6754_p3 = scmp.ne.s32.totalorder %s49_s10, %s6753_s20  ;;  %p6759_p5 = scmp.lt.s32.totalorder %s6753_s20, %s6753_s20 }
   0xe   :  { %p6760_p6 = por %p6759_p5, %p6758_p4 }
  0x10   :  { %p6761_p7 = pnand %p6760_p6, %p6754_p3 }
  0x12   :  { %6764 = shalt.err (!%p6761_p7)
}
  0x13   :  { %s6885_s21 = smov 256   ;;  %s6886_s22 = smov 16  }
  0x14   :  { %54 = dma.hbm_to_vmem [thread:$0]  %s8566_s3, 1024, %s49_s10, [#allocation11], %s6885_s21, %s6885_s21, %s6886_s22  }
  0x15   :  { %s6765_s27 = scalar_lea.hbm %s8568_s5, 4096 }
  0x16   :  { %p6766_p8 = scmp.ne.s32.totalorder %s8568_s5, %s6765_s27  ;;  %p6769_p9 = scmp.lt.u32.totalorder %s6765_s27, %s8568_s5 }
  0x18   :  { %p6771_p10 = pnand %p6769_p9, %p6766_p8 }
  0x1a   :  { %6774 = shalt.err (!%p6771_p10)
}
  0x1b   :  { %s6775_s13 = scalar_lea.vmem %s6943_s12, 4096  ;;  %p6780_p12 = scmp.lt.s32.totalorder %s6943_s12, %s6943_s12 }
  0x1c   :  { %p6776_p11 = scmp.ne.s32.totalorder %s6943_s12, %s6775_s13  ;;  %p6781_p13 = scmp.lt.s32.totalorder %s6775_s13, %s6775_s13 }
  0x1e   :  { %p6782_p0 = por %p6781_p13, %p6780_p12 }
  0x20   :  { %p6783_p1 = pnand %p6782_p0, %p6776_p11 }
  0x22   :  { %6786 = shalt.err (!%p6783_p1)
}
  0x23   :  { %78 = dma.hbm_to_vmem [thread:$0]  %s8568_s5, 4096, %s6943_s12, [#allocation14], %s6885_s21, %s6885_s21, %s6886_s22  }
  0x24   :  { %s6887_s14 = smov [#allocation8]   ;;  %s6888_s16 = smov [#allocation12]  }
  0x25   :  { %s36_s15 = sshll.u32 %s6887_s14, 4  ;;  %s60_s17 = sshll.u32 %s6888_s16, 4  ;;  %s37_s15 = int_to_ptr.vmem [resolvable:$true] %s36_s15  ;;  %s6980_s17 = int_to_ptr.vmem [resolvable:$true] %s60_s17 }
  0x26   :  { %s6787_s20 = scalar_lea.hbm %s8565_s2, 1024 }
  0x27   :  { %p6788_p2 = scmp.ne.s32.totalorder %s8565_s2, %s6787_s20  ;;  %p6791_p3 = scmp.lt.u32.totalorder %s6787_s20, %s8565_s2 }
  0x29   :  { %p6793_p4 = pnand %p6791_p3, %p6788_p2 }
  0x2b   :  { %6796 = shalt.err (!%p6793_p4)
}
  0x2c   :  { %s6797_s5 = scalar_lea.vmem %s37_s15, 1024  ;;  %p6802_p6 = scmp.lt.s32.totalorder %s37_s15, %s37_s15 }
  0x2d   :  { %p6798_p5 = scmp.ne.s32.totalorder %s37_s15, %s6797_s5  ;;  %p6803_p7 = scmp.lt.s32.totalorder %s6797_s5, %s6797_s5 }
  0x2f   :  { %p6804_p8 = por %p6803_p7, %p6802_p6 }
  0x31   :  { %p6805_p9 = pnand %p6804_p8, %p6798_p5 }
  0x33   :  { %6808 = shalt.err (!%p6805_p9)
}
  0x34   :  { %42 = dma.hbm_to_vmem [thread:$0]  %s8565_s2, 1024, %s37_s15, [#allocation9], %s6885_s21, %s6885_s21, %s6886_s22  }
  0x35   :  { %s6809_s30 = scalar_lea.hbm %s8567_s4, 4096 }
  0x36   :  { %p6810_p10 = scmp.ne.s32.totalorder %s8567_s4, %s6809_s30  ;;  %p6813_p11 = scmp.lt.u32.totalorder %s6809_s30, %s8567_s4 }
  0x38   :  { %p6815_p12 = pnand %p6813_p11, %p6810_p10 }
  0x3a   :  { %6818 = shalt.err (!%p6815_p12)
}
  0x3b   :  { %s6819_s14 = scalar_lea.vmem %s6980_s17, 4096  ;;  %p6824_p0 = scmp.lt.s32.totalorder %s6980_s17, %s6980_s17 }
  0x3c   :  { %p6820_p13 = scmp.ne.s32.totalorder %s6980_s17, %s6819_s14  ;;  %p6825_p1 = scmp.lt.s32.totalorder %s6819_s14, %s6819_s14 }
  0x3e   :  { %p6826_p2 = por %p6825_p1, %p6824_p0 }
  0x40   :  { %p6827_p3 = pnand %p6826_p2, %p6820_p13 }
  0x42   :  { %6830 = shalt.err (!%p6827_p3)
}
  0x43   :  { %66 = dma.hbm_to_vmem [thread:$0]  %s8567_s4, 4096, %s6980_s17, [#allocation11], %s6885_s21, %s6885_s21, %s6886_s22  }
  0x44   :  { %s6889_s16 = smov [#allocation15]   ;;  %s6890_s19 = smov [#allocation16]  }
  0x45   :  { %s85_s18 = sshll.u32 %s6889_s16, 4  ;;  %s95_s20 = sshll.u32 %s6890_s19, 4  ;;  %s86_s18 = int_to_ptr.vmem [resolvable:$true] %s85_s18  ;;  %s96_s20 = int_to_ptr.vmem [resolvable:$true] %s95_s20 }
  0x46   :  { %s6831_s25 = scalar_lea.hbm %s8569_s6, 64 }
  0x47   :  { %p6832_p4 = scmp.ne.s32.totalorder %s8569_s6, %s6831_s25  ;;  %p6835_p5 = scmp.lt.u32.totalorder %s6831_s25, %s8569_s6 }
  0x49   :  { %p6837_p6 = pnand %p6835_p5, %p6832_p4 }
  0x4b   :  { %6840 = shalt.err (!%p6837_p6)
}
  0x4c   :  { %s6841_s4 = scalar_lea.vmem %s86_s18, 64  ;;  %p6846_p8 = scmp.lt.s32.totalorder %s86_s18, %s86_s18 }
  0x4d   :  { %p6842_p7 = scmp.ne.s32.totalorder %s86_s18, %s6841_s4  ;;  %p6847_p9 = scmp.lt.s32.totalorder %s6841_s4, %s6841_s4 }
  0x4f   :  { %p6848_p10 = por %p6847_p9, %p6846_p8 }
  0x51   :  { %p6849_p11 = pnand %p6848_p10, %p6842_p7 }
  0x53   :  { %6852 = shalt.err (!%p6849_p11)
}
  0x54   :  { %88 = dma.hbm_to_vmem [thread:$0]  %s8569_s6, 64, %s86_s18, [#allocation14]  }
  0x55   :  { %s6853_s29 = scalar_lea.hbm %s8570_s7, 64 }
  0x56   :  { %p6854_p12 = scmp.ne.s32.totalorder %s8570_s7, %s6853_s29  ;;  %p6857_p13 = scmp.lt.u32.totalorder %s6853_s29, %s8570_s7 }
  0x58   :  { %p6859_p0 = pnand %p6857_p13, %p6854_p12 }
  0x5a   :  { %6862 = shalt.err (!%p6859_p0)
}
  0x5b   :  { %s6863_s10 = scalar_lea.vmem %s96_s20, 64  ;;  %p6868_p2 = scmp.lt.s32.totalorder %s96_s20, %s96_s20 }
  0x5c   :  { %p6864_p1 = scmp.ne.s32.totalorder %s96_s20, %s6863_s10  ;;  %p6869_p3 = scmp.lt.s32.totalorder %s6863_s10, %s6863_s10 }
  0x5e   :  { %p6870_p4 = por %p6869_p3, %p6868_p2 }
  0x60   :  { %p6871_p5 = pnand %p6870_p4, %p6864_p1 }
  0x62   :  { %6874 = shalt.err (!%p6871_p5)
}
  0x63   :  { %98 = dma.hbm_to_vmem [thread:$0]  %s8570_s7, 64, %s96_s20, [#allocation17]  }
  0x64   :  { %6875 = dma.done.wait [#allocation9], 1024  }
  0x65   :  { %6876 = vsyncadd [#allocation9], 4294966272 }
  0x66   :  { %6877 = dma.done.wait [#allocation11], 5120  }
  0x67   :  { %6878 = vsyncadd [#allocation11], 4294962176 }
  0x68   :  { %6879 = dma.done.wait [#allocation14], 4160  }
  0x69   :  { %6880 = vsyncadd [#allocation14], 4294963136 }
  0x6a   :  { %6881 = dma.done.wait [#allocation17], 64  }
  0x6b   :  { %6882 = vsyncadd [#allocation17], 4294967232  ;;  %v8573_v0 = vmov 0   ;;  %v6175_v1 = vld [vmem:[#allocation8 + $0x4] ss:$16 sps:$4 sm:$0xff]   ;;  %v155_v10 = vld [vmem:[%s8563_s0 + $0x8] sm:$0xff] }
  0x6c   :  { %281 = vmatprep.mubr.bf16.mxu0 %v8573_v0  ;;  %354 = vmatprep.mubr.bf16.mxu1 %v8573_v0  ;;  %v6177_v2 = vld [vmem:[#allocation8 + $0xc] ss:$16 sps:$4 sm:$0xff]   ;;  %v6179_v3 = vld [vmem:[#allocation8] ss:$16 sps:$4 sm:$0xff]   ;;  %v6180_v4 = vld [vmem:[#allocation8 + $0x8] ss:$16 sps:$4 sm:$0xff]  }
  0x6d   :  { %249 = vmatprep.subr.bf16.mxu0 %v6175_v1  ;;  %322 = vmatprep.subr.bf16.mxu1 %v6177_v2  ;;  %v6181_v5 = vld [vmem:[#allocation8 + $0x24] ss:$16 sps:$4 sm:$0xff]   ;;  %v6183_v6 = vld [vmem:[#allocation8 + $0x2c] ss:$16 sps:$4 sm:$0xff]   ;;  %v6185_v7 = vld [vmem:[#allocation8 + $0x20] ss:$16 sps:$4 sm:$0xff]  }
  0x6e   :  { %250 = vmatpush1.bf16.msra.mxu0 %v6179_v3  ;;  %323 = vmatpush1.bf16.msra.mxu1 %v6180_v4  ;;  %v6186_v8 = vld [vmem:[#allocation8 + $0x28] ss:$16 sps:$4 sm:$0xff]   ;;  %v154_v9 = vld [vmem:[%s8563_s0] sm:$0xff]  ;;  %vm236_vm0 = vcmask 261120   ;;  %v6192_v14 = vld [vmem:[#allocation10 + $0xc] ss:$16 sps:$4 sm:$0xff]  }
  0x6f   :  { %251 = vmatprep.subr.bf16.mxu0 %v6181_v5  ;;  %324 = vmatprep.subr.bf16.mxu1 %v6183_v6  ;;  %v162_v11 = vpack.c.bf16 %v155_v10, %v154_v9  ;;  %v6189_v12 = vld [vmem:[#allocation10 + $0x4] ss:$16 sps:$4 sm:$0xff]   ;;  %v6187_v13 = vld [vmem:[#allocation10] ss:$16 sps:$4 sm:$0xff]   ;;  %v6190_v15 = vld [vmem:[#allocation10 + $0x8] ss:$16 sps:$4 sm:$0xff]  }
  0x70   :  { %v156_v16 = vld [vmem:[%s8563_s0 + $0x10] sm:$0xff]  ;;  %v157_v18 = vld [vmem:[%s8563_s0 + $0x18] sm:$0xff]  ;;  %v158_v25 = vld [vmem:[%s8563_s0 + $0x20] sm:$0xff] }
  0x71   :  { %v6195_v17 = vld [vmem:[#allocation10 + $0x24] ss:$16 sps:$4 sm:$0xff]   ;;  %v6193_v19 = vld [vmem:[#allocation10 + $0x20] ss:$16 sps:$4 sm:$0xff]   ;;  %v6198_v20 = vld [vmem:[#allocation10 + $0x2c] ss:$16 sps:$4 sm:$0xff]   ;;  %v163_v23 = vpack.c.bf16 %v157_v18, %v156_v16 }
  0x72   :  { %252 = vmatpush1.bf16.msra.mxu0 %v6185_v7  ;;  %325 = vmatpush1.bf16.msra.mxu1 %v6186_v8  ;;  %v6196_v21 = vld [vmem:[#allocation10 + $0x28] ss:$16 sps:$4 sm:$0xff]   ;;  %v7059_v22 = vld [vmem:[#allocation12 + $0x4] ss:$16 sps:$4 sm:$0xff]   ;;  %v7061_v24 = vld [vmem:[#allocation12 + $0xc] ss:$16 sps:$4 sm:$0xff]  }
  0x73   :  { %521 = vmatprep.subr.bf16.mxu0 %v6189_v12  ;;  %594 = vmatprep.subr.bf16.mxu1 %v6192_v14  ;;  %v159_v26 = vld [vmem:[%s8563_s0 + $0x28] sm:$0xff]  ;;  %v160_v28 = vld [vmem:[%s8563_s0 + $0x30] sm:$0xff]  ;;  %v161_v29 = vld [vmem:[%s8563_s0 + $0x38] sm:$0xff]  ;;  %v6892_v18 = vmov 0.0|0.0  }
  0x74   :  { %v164_v27 = vpack.c.bf16 %v159_v26, %v158_v25  ;;  %v165_v30 = vpack.c.bf16 %v161_v29, %v160_v28  ;;  %v427_v31 = vld [vmem:[%s8564_s1] sm:$0xff]  ;;  %v428_v32 = vld [vmem:[%s8564_s1 + $0x8] sm:$0xff]  ;;  %v429_v41 = vld [vmem:[%s8564_s1 + $0x10] sm:$0xff] }
  0x75   :  { %5615 = vmatmul.mubr.msk.bf16.vlgmr.msra.gmra.mrb[0].mxu0 %vm236_vm0, %v162_v11  ;;  %5619 = vmatmul.mubr.msk.bf16.vlgmr.msra.gmra.mrb[0].mxu1 %vm236_vm0, %v162_v11  ;;  %v7095_v33 = vld [vmem:[#allocation12] ss:$16 sps:$4 sm:$0xff]   ;;  %v7097_v34 = vld [vmem:[#allocation12 + $0x8] ss:$16 sps:$4 sm:$0xff]   ;;  %v435_v35 = vpack.c.bf16 %v428_v32, %v427_v31  ;;  %v7099_v36 = vld [vmem:[#allocation12 + $0x24] ss:$16 sps:$4 sm:$0xff]  }
  0x76   :  { %522 = vmatpush1.bf16.msra.mxu0 %v6187_v13  ;;  %291 = vmatprep.mubr.bf16.mxu0 %v8573_v0  ;;  %v7101_v37 = vld [vmem:[#allocation12 + $0x2c] ss:$16 sps:$4 sm:$0xff]   ;;  %v7103_v38 = vld [vmem:[#allocation12 + $0x20] ss:$16 sps:$4 sm:$0xff]   ;;  %v7105_v39 = vld [vmem:[#allocation12 + $0x28] ss:$16 sps:$4 sm:$0xff]  }
  0x77   :  { %364 = vmatprep.mubr.bf16.mxu1 %v8573_v0  ;;  %595 = vmatpush1.bf16.msra.mxu1 %v6190_v15  ;;  %v7109_v40 = vld [vmem:[#allocation12 + $0x44] ss:$16 sps:$4 sm:$0xff]   ;;  %v430_v42 = vld [vmem:[%s8564_s1 + $0x18] sm:$0xff]  ;;  %v7125_v44 = vld [vmem:[#allocation12 + $0x40] ss:$16 sps:$4 sm:$0xff]  }
  0x78   :  { %523 = vmatprep.subr.bf16.mxu0 %v6195_v17  ;;  %596 = vmatprep.subr.bf16.mxu1 %v6198_v20  ;;  %v7121_v43 = vld [vmem:[#allocation12 + $0x4c] ss:$16 sps:$4 sm:$0xff]   ;;  %v7127_v45 = vld [vmem:[#allocation12 + $0x48] ss:$16 sps:$4 sm:$0xff]   ;;  %v436_v46 = vpack.c.bf16 %v430_v42, %v429_v41  ;;  %v7131_v47 = vld [vmem:[#allocation12 + $0x64] ss:$16 sps:$4 sm:$0xff]  }
  0x79   :  { %v7135_v48 = vld [vmem:[#allocation12 + $0x6c] ss:$16 sps:$4 sm:$0xff]   ;;  %v7137_v49 = vld [vmem:[#allocation12 + $0x60] ss:$16 sps:$4 sm:$0xff]   ;;  %v7139_v50 = vld [vmem:[#allocation12 + $0x68] ss:$16 sps:$4 sm:$0xff]  }
  0x7a   :  { %524 = vmatpush1.bf16.msra.mxu0 %v6193_v19  ;;  %v7143_v51 = vld [vmem:[#allocation12 + $0x84] ss:$16 sps:$4 sm:$0xff]   ;;  %v432_v53 = vld [vmem:[%s8564_s1 + $0x28] sm:$0xff]  ;;  %v7159_v55 = vld [vmem:[#allocation12 + $0x80] ss:$16 sps:$4 sm:$0xff]  }
  0x7b   :  { %597 = vmatpush1.bf16.msra.mxu1 %v6196_v21  ;;  %900 = vmatprep.subr.bf16.mxu0 %v7059_v22  ;;  %v431_v52 = vld [vmem:[%s8564_s1 + $0x20] sm:$0xff]  ;;  %v7155_v54 = vld [vmem:[#allocation12 + $0x8c] ss:$16 sps:$4 sm:$0xff]   ;;  %v7161_v56 = vld [vmem:[#allocation12 + $0x88] ss:$16 sps:$4 sm:$0xff]  }
  0x7c   :  { %941 = vmatprep.subr.bf16.mxu1 %v7061_v24  ;;  %v437_v57 = vpack.c.bf16 %v432_v53, %v431_v52  ;;  %v7165_v58 = vld [vmem:[#allocation12 + $0xa4] ss:$16 sps:$4 sm:$0xff]   ;;  %v7169_v59 = vld [vmem:[#allocation12 + $0xac] ss:$16 sps:$4 sm:$0xff]   ;;  %v7171_v60 = vld [vmem:[#allocation12 + $0xa0] ss:$16 sps:$4 sm:$0xff]  }
  0x7d   :  { %5616 = vmatmul.mubr.msk.bf16.gmra.mrb[4].mxu0 %vm236_vm0, %v163_v23  ;;  %5620 = vmatmul.mubr.msk.bf16.gmra.mrb[4].mxu1 %vm236_vm0, %v163_v23  ;;  %v7173_v61 = vld [vmem:[#allocation12 + $0xa8] ss:$16 sps:$4 sm:$0xff]   ;;  %v433_v62 = vld [vmem:[%s8564_s1 + $0x30] sm:$0xff]  ;;  %v7185_v2 = vld [vmem:[#allocation12 + $0xcc] ss:$16 sps:$4 sm:$0xff]  }
  0x7e   :  { %301 = vmatprep.mubr.bf16.mxu0 %v8573_v0  ;;  %374 = vmatprep.mubr.bf16.mxu1 %v8573_v0  ;;  %v434_v63 = vld [vmem:[%s8564_s1 + $0x38] sm:$0xff]  ;;  %v7183_v1 = vld [vmem:[#allocation12 + $0xc4] ss:$16 sps:$4 sm:$0xff]   ;;  %v7193_v3 = vld [vmem:[#allocation12 + $0xc0] ss:$16 sps:$4 sm:$0xff]  }
  0x7f   :  { %v7195_v4 = vld [vmem:[#allocation12 + $0xc8] ss:$16 sps:$4 sm:$0xff]   ;;  %v438_v5 = vpack.c.bf16 %v434_v63, %v433_v62  ;;  %v7197_v6 = vld [vmem:[#allocation12 + $0xe4] ss:$16 sps:$4 sm:$0xff]   ;;  %v7199_v7 = vld [vmem:[#allocation12 + $0xec] ss:$16 sps:$4 sm:$0xff]  }
  0x80   :  { %v7205_v8 = vld [vmem:[#allocation12 + $0xe0] ss:$16 sps:$4 sm:$0xff]   ;;  %v7207_v9 = vld [vmem:[#allocation12 + $0xe8] ss:$16 sps:$4 sm:$0xff]   ;;  %v7211_v10 = vld [vmem:[#allocation13 + $0x4] ss:$16 sps:$4 sm:$0xff]  }
  0x81   :  { %v7213_v11 = vld [vmem:[#allocation13 + $0xc] ss:$16 sps:$4 sm:$0xff]   ;;  %v7221_v12 = vld [vmem:[#allocation13] ss:$16 sps:$4 sm:$0xff]   ;;  %v7223_v13 = vld [vmem:[#allocation13 + $0x8] ss:$16 sps:$4 sm:$0xff]  }
  0x82   :  { %v7225_v14 = vld [vmem:[#allocation13 + $0x24] ss:$16 sps:$4 sm:$0xff]   ;;  %v7227_v15 = vld [vmem:[#allocation13 + $0x2c] ss:$16 sps:$4 sm:$0xff]   ;;  %v7233_v16 = vld [vmem:[#allocation13 + $0x20] ss:$16 sps:$4 sm:$0xff]  }
  0x83   :  { %v7235_v17 = vld [vmem:[#allocation13 + $0x28] ss:$16 sps:$4 sm:$0xff]   ;;  %v7237_v19 = vld [vmem:[#allocation13 + $0x44] ss:$16 sps:$4 sm:$0xff]   ;;  %v7239_v20 = vld [vmem:[#allocation13 + $0x4c] ss:$16 sps:$4 sm:$0xff]  }
  0x84   :  { %v7245_v21 = vld [vmem:[#allocation13 + $0x40] ss:$16 sps:$4 sm:$0xff]   ;;  %v7247_v23 = vld [vmem:[#allocation13 + $0x48] ss:$16 sps:$4 sm:$0xff]   ;;  %v7251_v25 = vld [vmem:[#allocation13 + $0x64] ss:$16 sps:$4 sm:$0xff]  }
  0x85   :  { %5617 = vmatmul.mubr.msk.bf16.gmra.mrb[8].mxu0 %vm236_vm0, %v164_v27  ;;  %5621 = vmatmul.mubr.msk.bf16.gmra.mrb[8].mxu1 %vm236_vm0, %v164_v27  ;;  %v7253_v26 = vld [vmem:[#allocation13 + $0x6c] ss:$16 sps:$4 sm:$0xff]   ;;  %v7259_v27 = vld [vmem:[#allocation13 + $0x60] ss:$16 sps:$4 sm:$0xff]   ;;  %v7261_v28 = vld [vmem:[#allocation13 + $0x68] ss:$16 sps:$4 sm:$0xff]  }
  0x86   :  { %311 = vmatprep.mubr.bf16.mxu0 %v8573_v0  ;;  %384 = vmatprep.mubr.bf16.mxu1 %v8573_v0  ;;  %v7263_v29 = vld [vmem:[#allocation13 + $0x84] ss:$16 sps:$4 sm:$0xff]   ;;  %v7271_v31 = vld [vmem:[#allocation13 + $0x80] ss:$16 sps:$4 sm:$0xff]   ;;  %v7273_v32 = vld [vmem:[#allocation13 + $0x88] ss:$16 sps:$4 sm:$0xff]  }
  0x87   :  { %v7277_v41 = vld [vmem:[#allocation13 + $0xac] ss:$16 sps:$4 sm:$0xff]   ;;  %v7283_v42 = vld [vmem:[#allocation13 + $0xa0] ss:$16 sps:$4 sm:$0xff]   ;;  %v7287_v52 = vld [vmem:[#allocation13 + $0xc4] ss:$16 sps:$4 sm:$0xff]  }
  0x88   :  { %v7289_v53 = vld [vmem:[#allocation13 + $0xcc] ss:$16 sps:$4 sm:$0xff]   ;;  %v7297_v62 = vld [vmem:[#allocation13 + $0xc8] ss:$16 sps:$4 sm:$0xff]   ;;  %v7299_v63 = vld [vmem:[#allocation13 + $0xe4] ss:$16 sps:$4 sm:$0xff]  }
  0x89   :  { %8606 = vst [vmem:[#allocation23_spill] sm:$0xff] %v7299_v63 }
  0x8d   :  { %5618 = vmatmul.mubr.msk.bf16.gmra.mrb[12].mxu0 %vm236_vm0, %v165_v30  ;;  %5622 = vmatmul.mubr.msk.bf16.gmra.mrb[12].mxu1 %vm236_vm0, %v165_v30  ;;  %v7265_v30 = vld [vmem:[#allocation13 + $0x8c] ss:$16 sps:$4 sm:$0xff]  }
  0x8e   :  { %553 = vmatprep.mubr.bf16.mxu0 %v8573_v0  ;;  %626 = vmatprep.mubr.bf16.mxu1 %v8573_v0 }
  0x95   :  { %5631 = vmatmul.mubr.msk.bf16.vlgmr.msra.gmra.mrb[16].mxu0 %vm236_vm0, %v435_v35  ;;  %5635 = vmatmul.mubr.msk.bf16.vlgmr.msra.gmra.mrb[16].mxu1 %vm236_vm0, %v435_v35  ;;  %v7275_v35 = vld [vmem:[#allocation13 + $0xa4] ss:$16 sps:$4 sm:$0xff]  }
  0x96   :  { %901 = vmatpush1.bf16.msra.mxu0 %v7095_v33  ;;  %942 = vmatpush1.bf16.msra.mxu1 %v7097_v34  ;;  %8605 = vst [vmem:[#allocation22_spill] sm:$0xff] %v7275_v35 }
  0x97   :  { %902 = vmatprep.subr.bf16.mxu0 %v7099_v36  ;;  %943 = vmatprep.subr.bf16.mxu1 %v7101_v37 }
  0x98   :  { %563 = vmatprep.mubr.bf16.mxu0 %v8573_v0  ;;  %636 = vmatprep.mubr.bf16.mxu1 %v8573_v0 }
  0x9a   :  { %903 = vmatpush1.bf16.msra.mxu0 %v7103_v38  ;;  %944 = vmatpush1.bf16.msra.mxu1 %v7105_v39 }
  0x9b   :  { %904 = vmatprep.subr.bf16.mxu0 %v7109_v40  ;;  %945 = vmatprep.subr.bf16.mxu1 %v7121_v43 }
  0x9d   :  { %5632 = vmatmul.mubr.msk.bf16.gmra.mrb[20].mxu0 %vm236_vm0, %v436_v46  ;;  %5636 = vmatmul.mubr.msk.bf16.gmra.mrb[20].mxu1 %vm236_vm0, %v436_v46  ;;  %v7285_v46 = vld [vmem:[#allocation13 + $0xa8] ss:$16 sps:$4 sm:$0xff]  }
  0x9e   :  { %905 = vmatpush1.bf16.msra.mxu0 %v7125_v44  ;;  %946 = vmatpush1.bf16.msra.mxu1 %v7127_v45 }
  0x9f   :  { %906 = vmatprep.subr.bf16.mxu0 %v7131_v47  ;;  %947 = vmatprep.subr.bf16.mxu1 %v7135_v48 }
  0xa0   :  { %573 = vmatprep.mubr.bf16.mxu0 %v8573_v0  ;;  %646 = vmatprep.mubr.bf16.mxu1 %v8573_v0 }
  0xa2   :  { %907 = vmatpush1.bf16.msra.mxu0 %v7137_v49  ;;  %948 = vmatpush1.bf16.msra.mxu1 %v7139_v50 }
  0xa3   :  { %908 = vmatprep.subr.bf16.mxu0 %v7143_v51  ;;  %949 = vmatprep.subr.bf16.mxu1 %v7155_v54 }
  0xa5   :  { %5633 = vmatmul.mubr.msk.bf16.gmra.mrb[24].mxu0 %vm236_vm0, %v437_v57  ;;  %5637 = vmatmul.mubr.msk.bf16.gmra.mrb[24].mxu1 %vm236_vm0, %v437_v57  ;;  %v7295_v57 = vld [vmem:[#allocation13 + $0xc0] ss:$16 sps:$4 sm:$0xff]  }
  0xa6   :  { %909 = vmatpush1.bf16.msra.mxu0 %v7159_v55  ;;  %950 = vmatpush1.bf16.msra.mxu1 %v7161_v56 }
  0xa7   :  { %910 = vmatprep.subr.bf16.mxu0 %v7165_v58  ;;  %951 = vmatprep.subr.bf16.mxu1 %v7169_v59 }
  0xa8   :  { %583 = vmatprep.mubr.bf16.mxu0 %v8573_v0  ;;  %656 = vmatprep.mubr.bf16.mxu1 %v8573_v0 }
  0xaa   :  { %911 = vmatpush1.bf16.msra.mxu0 %v7171_v60  ;;  %952 = vmatpush1.bf16.msra.mxu1 %v7173_v61 }
  0xab   :  { %912 = vmatprep.subr.bf16.mxu0 %v7183_v1  ;;  %953 = vmatprep.subr.bf16.mxu1 %v7185_v2 }
  0xad   :  { %5634 = vmatmul.mubr.msk.bf16.gmra.mrb[28].mxu0 %vm236_vm0, %v438_v5  ;;  %5638 = vmatmul.mubr.msk.bf16.gmra.mrb[28].mxu1 %vm236_vm0, %v438_v5  ;;  %v7301_v5 = vld [vmem:[#allocation13 + $0xec] ss:$16 sps:$4 sm:$0xff]  }
  0xae   :  { %913 = vmatpush1.bf16.msra.mxu0 %v7193_v3  ;;  %954 = vmatpush1.bf16.msra.mxu1 %v7195_v4 }
  0xaf   :  { %914 = vmatprep.subr.bf16.mxu0 %v7197_v6  ;;  %955 = vmatprep.subr.bf16.mxu1 %v7199_v7 }
  0xb0   :  { %932 = vmatprep.mubr.bf16.mxu0 %v8573_v0  ;;  %973 = vmatprep.mubr.bf16.mxu1 %v8573_v0 }
  0xb2   :  { %915 = vmatpush1.bf16.msra.mxu0 %v7205_v8  ;;  %956 = vmatpush1.bf16.msra.mxu1 %v7207_v9 }
  0xb3   :  { %1184 = vmatprep.subr.bf16.mxu0 %v7211_v10  ;;  %1225 = vmatprep.subr.bf16.mxu1 %v7213_v11 }
  0xb5   :  { %933 = vmatmul.mubr.bf16.vlgmr.msra.gmra.mrb[32].mxu0 %v6892_v18  ;;  %974 = vmatmul.mubr.bf16.vlgmr.msra.gmra.mrb[32].mxu1 %v6892_v18 }
  0xb6   :  { %1185 = vmatpush1.bf16.msra.mxu0 %v7221_v12  ;;  %1226 = vmatpush1.bf16.msra.mxu1 %v7223_v13 }
  0xb7   :  { %1186 = vmatprep.subr.bf16.mxu0 %v7225_v14  ;;  %1227 = vmatprep.subr.bf16.mxu1 %v7227_v15 }
  0xb8   :  { %1216 = vmatprep.mubr.bf16.mxu0 %v8573_v0  ;;  %1257 = vmatprep.mubr.bf16.mxu1 %v8573_v0  ;;  %v7307_v0 = vld [vmem:[#allocation13 + $0xe0] ss:$16 sps:$4 sm:$0xff]  }
  0xba   :  { %1187 = vmatpush1.bf16.msra.mxu0 %v7233_v16  ;;  %1228 = vmatpush1.bf16.msra.mxu1 %v7235_v17 }
  0xbb   :  { %1188 = vmatprep.subr.bf16.mxu0 %v7237_v19  ;;  %1229 = vmatprep.subr.bf16.mxu1 %v7239_v20 }
  0xbe   :  { %1189 = vmatpush1.bf16.msra.mxu0 %v7245_v21  ;;  %1230 = vmatpush1.bf16.msra.mxu1 %v7247_v23 }
  0xbf   :  { %1190 = vmatprep.subr.bf16.mxu0 %v7251_v25  ;;  %1231 = vmatprep.subr.bf16.mxu1 %v7253_v26 }
  0xc2   :  { %1191 = vmatpush1.bf16.msra.mxu0 %v7259_v27  ;;  %1232 = vmatpush1.bf16.msra.mxu1 %v7261_v28 }
  0xc3   :  { %1192 = vmatprep.subr.bf16.mxu0 %v7263_v29  ;;  %1233 = vmatprep.subr.bf16.mxu1 %v7265_v30 }
  0xc6   :  { %1193 = vmatpush1.bf16.msra.mxu0 %v7271_v31  ;;  %1234 = vmatpush1.bf16.msra.mxu1 %v7273_v32 }
  0xc7   :  { %1194 = vmatprep.subr.bf16.mxu0 %v7275_v35  ;;  %1235 = vmatprep.subr.bf16.mxu1 %v7277_v41  ;;  %v7309_v35 = vld [vmem:[#allocation13 + $0xe8] ss:$16 sps:$4 sm:$0xff]  }
  0xca   :  { %1195 = vmatpush1.bf16.msra.mxu0 %v7283_v42  ;;  %1236 = vmatpush1.bf16.msra.mxu1 %v7285_v46 }
  0xcb   :  { %1196 = vmatprep.subr.bf16.mxu0 %v7287_v52  ;;  %1237 = vmatprep.subr.bf16.mxu1 %v7289_v53 }
  0xce   :  { %1197 = vmatpush1.bf16.msra.mxu0 %v7295_v57  ;;  %1238 = vmatpush1.bf16.msra.mxu1 %v7297_v62 }
  0xcf   :  { %1198 = vmatprep.subr.bf16.mxu0 %v7299_v63  ;;  %1239 = vmatprep.subr.bf16.mxu1 %v7301_v5  ;;  %v8607_v63 = vmov 0  }
  0xd2   :  { %1199 = vmatpush1.bf16.msra.mxu0 %v7307_v0  ;;  %1240 = vmatpush1.bf16.msra.mxu1 %v7309_v35 }
  0xd3   :  { %1507 = vmatprep.subr.bf16.mxu0 %v7059_v22  ;;  %1548 = vmatprep.subr.bf16.mxu1 %v7061_v24  ;;  %v176_v22 = vlaneseq }
  0xd5   :  { %1217 = vmatmul.mubr.bf16.vlgmr.msra.gmra.mrb[36].mxu0 %v6892_v18  ;;  %1258 = vmatmul.mubr.bf16.vlgmr.msra.gmra.mrb[36].mxu1 %v6892_v18  ;;  %v7353_v24 = vshrl.u32 %v176_v22, 7 }
  0xd6   :  { %1508 = vmatpush1.bf16.msra.mxu0 %v7095_v33  ;;  %1549 = vmatpush1.bf16.msra.mxu1 %v7097_v34 }
  0xd7   :  { %1509 = vmatprep.subr.bf16.mxu0 %v7099_v36  ;;  %1550 = vmatprep.subr.bf16.mxu1 %v7101_v37  ;;  %v8579_v33 = vsub.s32 2, %v7353_v24  ;;  %v8577_v34 = vsub.s32 3, %v7353_v24  ;;  %v8580_v36 = vsub.s32 0, %v7353_v24  ;;  %v174_v37 = vld [vmem:[#allocation15] sm:$0xf] }
  0xd8   :  { %1539 = vmatprep.mubr.bf16.mxu0 %v8607_v63  ;;  %1580 = vmatprep.mubr.bf16.mxu1 %v8607_v63 }
  0xda   :  { %1510 = vmatpush1.bf16.msra.mxu0 %v7103_v38  ;;  %1551 = vmatpush1.bf16.msra.mxu1 %v7105_v39  ;;  %v8578_v38 = vsub.s32 1, %v7353_v24  ;;  %v7361_v39 = vrot.slane %v174_v37, %v8579_v33 }
  0xdb   :  { %1511 = vmatprep.subr.bf16.mxu0 %v7109_v40  ;;  %1552 = vmatprep.subr.bf16.mxu1 %v7121_v43 }
  0xde   :  { %1512 = vmatpush1.bf16.msra.mxu0 %v7125_v44  ;;  %1553 = vmatpush1.bf16.msra.mxu1 %v7127_v45  ;;  %v7369_v44 = vrot.slane %v174_v37, %v8577_v34  ;;  %v7373_v45 = vrot.slane %v174_v37, %v8580_v36 }
  0xdf   :  { %1513 = vmatprep.subr.bf16.mxu0 %v7131_v47  ;;  %1554 = vmatprep.subr.bf16.mxu1 %v7135_v48 }
  0xe2   :  { %1514 = vmatpush1.bf16.msra.mxu0 %v7137_v49  ;;  %1555 = vmatpush1.bf16.msra.mxu1 %v7139_v50  ;;  %v7381_v49 = vrot.slane %v174_v37, %v8578_v38 }
  0xe3   :  { %1515 = vmatprep.subr.bf16.mxu0 %v7143_v51  ;;  %1556 = vmatprep.subr.bf16.mxu1 %v7155_v54 }
  0xe6   :  { %1516 = vmatpush1.bf16.msra.mxu0 %v7159_v55  ;;  %1557 = vmatpush1.bf16.msra.mxu1 %v7161_v56 }
  0xe7   :  { %1517 = vmatprep.subr.bf16.mxu0 %v7165_v58  ;;  %1558 = vmatprep.subr.bf16.mxu1 %v7169_v59 }
  0xea   :  { %1518 = vmatpush1.bf16.msra.mxu0 %v7171_v60  ;;  %1559 = vmatpush1.bf16.msra.mxu1 %v7173_v61 }
  0xeb   :  { %1519 = vmatprep.subr.bf16.mxu0 %v7183_v1  ;;  %1560 = vmatprep.subr.bf16.mxu1 %v7185_v2 }
  0xee   :  { %1520 = vmatpush1.bf16.msra.mxu0 %v7193_v3  ;;  %1561 = vmatpush1.bf16.msra.mxu1 %v7195_v4 }
  0xef   :  { %1521 = vmatprep.subr.bf16.mxu0 %v7197_v6  ;;  %1562 = vmatprep.subr.bf16.mxu1 %v7199_v7 }
  0xf2   :  { %1522 = vmatpush1.bf16.msra.mxu0 %v7205_v8  ;;  %1563 = vmatpush1.bf16.msra.mxu1 %v7207_v9 }
  0xf3   :  { %1791 = vmatprep.subr.bf16.mxu0 %v7211_v10  ;;  %1832 = vmatprep.subr.bf16.mxu1 %v7213_v11 }
 0x148   :  { %v7363_v40 = vpop.f32.mrb[0].mxu0  ;;  %v7365_v43 = vpop.f32.mrb[0].mxu1 }
 0x149   :  { %v7375_v47 = vpop.f32.mrb[1].mxu0  ;;  %v7377_v48 = vpop.f32.mrb[1].mxu1 }
 0x14a   :  { %v287_v50 = vpop.f32.mrb[2].mxu0  ;;  %v360_v51 = vpop.f32.mrb[2].mxu1 }
 0x14b   :  { %v7384_v54 = vadd.f32 %v287_v50, %v7373_v45  ;;  %v289_v55 = vpop.f32.mrb[3].mxu0  ;;  %v7387_v56 = vadd.f32 %v360_v51, %v7361_v39  ;;  %v362_v58 = vpop.f32.mrb[3].mxu1 }
 0x14c   :  { %v7390_v59 = vadd.f32 %v289_v55, %v7381_v49  ;;  %v7393_v60 = vadd.f32 %v362_v58, %v7369_v44 }
 0x150   :  { %v293_v61 = vpop.f32.mrb[4].mxu0  ;;  %v366_v1 = vpop.f32.mrb[4].mxu1 }
 0x151   :  { %v7396_v2 = vadd.f32 %v293_v61, %v7373_v45  ;;  %v295_v3 = vpop.f32.mrb[5].mxu0  ;;  %v7399_v4 = vadd.f32 %v366_v1, %v7361_v39  ;;  %v368_v6 = vpop.f32.mrb[5].mxu1 }
 0x152   :  { %v7402_v7 = vadd.f32 %v295_v3, %v7381_v49  ;;  %v297_v8 = vpop.f32.mrb[6].mxu0  ;;  %v7405_v9 = vadd.f32 %v368_v6, %v7369_v44  ;;  %v370_v10 = vpop.f32.mrb[6].mxu1 }
 0x153   :  { %8608 = vst [vmem:[#allocation24_spill] sm:$0xff] %v7396_v2  ;;  %8609 = vst [vmem:[#allocation25_spill] sm:$0xff] %v7399_v4  ;;  %v7408_v11 = vadd.f32 %v297_v8, %v7373_v45  ;;  %v299_v18 = vpop.f32.mrb[7].mxu0  ;;  %v7411_v22 = vadd.f32 %v370_v10, %v7361_v39  ;;  %v372_v37 = vpop.f32.mrb[7].mxu1 }
 0x154   :  { %8610 = vst [vmem:[#allocation26_spill] sm:$0xff] %v7402_v7  ;;  %8611 = vst [vmem:[#allocation27_spill] sm:$0xff] %v7405_v9  ;;  %v7414_v50 = vadd.f32 %v299_v18, %v7381_v49  ;;  %v7417_v51 = vadd.f32 %v372_v37, %v7369_v44 }
 0x155   :  { %8612 = vst [vmem:[#allocation28_spill] sm:$0xff] %v7408_v11  ;;  %8613 = vst [vmem:[#allocation29_spill] sm:$0xff] %v7411_v22 }
 0x156   :  { %8614 = vst [vmem:[#allocation30_spill] sm:$0xff] %v7414_v50  ;;  %8615 = vst [vmem:[#allocation31_spill] sm:$0xff] %v7417_v51 }
 0x158   :  { %v303_v55 = vpop.f32.mrb[8].mxu0  ;;  %v376_v58 = vpop.f32.mrb[8].mxu1 }
 0x159   :  { %v7420_v61 = vadd.f32 %v303_v55, %v7373_v45  ;;  %v305_v1 = vpop.f32.mrb[9].mxu0  ;;  %v7423_v3 = vadd.f32 %v376_v58, %v7361_v39  ;;  %v378_v6 = vpop.f32.mrb[9].mxu1 }
 0x15a   :  { %v7426_v8 = vadd.f32 %v305_v1, %v7381_v49  ;;  %v307_v10 = vpop.f32.mrb[10].mxu0  ;;  %v7429_v18 = vadd.f32 %v378_v6, %v7369_v44  ;;  %v380_v34 = vpop.f32.mrb[10].mxu1 }
 0x15b   :  { %8616 = vst [vmem:[#allocation32_spill] sm:$0xff] %v7420_v61  ;;  %8617 = vst [vmem:[#allocation33_spill] sm:$0xff] %v7423_v3  ;;  %v7432_v37 = vadd.f32 %v307_v10, %v7373_v45  ;;  %v309_v38 = vpop.f32.mrb[11].mxu0  ;;  %v7435_v55 = vadd.f32 %v380_v34, %v7361_v39  ;;  %v382_v33 = vpop.f32.mrb[11].mxu1 }
 0x15c   :  { %8618 = vst [vmem:[#allocation34_spill] sm:$0xff] %v7426_v8  ;;  %8619 = vst [vmem:[#allocation35_spill] sm:$0xff] %v7429_v18  ;;  %v7438_v58 = vadd.f32 %v309_v38, %v7381_v49  ;;  %v7441_v36 = vadd.f32 %v382_v33, %v7369_v44  ;;  %v447_v33 = vld [vmem:[#allocation16] sm:$0xf] }
 0x15d   :  { %8620 = vst [vmem:[#allocation36_spill] sm:$0xff] %v7432_v37  ;;  %8621 = vst [vmem:[#allocation37_spill] sm:$0xff] %v7435_v55 }
 0x15e   :  { %8622 = vst [vmem:[#allocation38_spill] sm:$0xff] %v7438_v58  ;;  %8623 = vst [vmem:[#allocation39_spill] sm:$0xff] %v7441_v36 }
 0x160   :  { %v313_v1 = vpop.f32.mrb[12].mxu0  ;;  %v386_v8 = vpop.f32.mrb[12].mxu1 }
 0x161   :  { %v7444_v6 = vadd.f32 %v313_v1, %v7373_v45  ;;  %v315_v18 = vpop.f32.mrb[13].mxu0  ;;  %v7447_v10 = vadd.f32 %v386_v8, %v7361_v39  ;;  %v388_v37 = vpop.f32.mrb[13].mxu1 }
 0x162   :  { %v7450_v34 = vadd.f32 %v315_v18, %v7381_v49  ;;  %v317_v55 = vpop.f32.mrb[14].mxu0  ;;  %v7453_v38 = vadd.f32 %v388_v37, %v7369_v44  ;;  %v390_v58 = vpop.f32.mrb[14].mxu1 }
 0x163   :  { %8624 = vst [vmem:[#allocation40_spill] sm:$0xff] %v7444_v6  ;;  %8625 = vst [vmem:[#allocation41_spill] sm:$0xff] %v7447_v10  ;;  %v7456_v36 = vadd.f32 %v317_v55, %v7373_v45  ;;  %v319_v3 = vpop.f32.mrb[15].mxu0  ;;  %v7459_v1 = vadd.f32 %v390_v58, %v7361_v39  ;;  %v392_v6 = vpop.f32.mrb[15].mxu1  ;;  %v8634_v55 = vsub.s32 1, %v7353_v24  ;;  %v8635_v58 = vsub.s32 3, %v7353_v24 }
 0x164   :  { %8626 = vst [vmem:[#allocation42_spill] sm:$0xff] %v7450_v34  ;;  %8627 = vst [vmem:[#allocation43_spill] sm:$0xff] %v7453_v38  ;;  %v7462_v8 = vadd.f32 %v319_v3, %v7381_v49  ;;  %v7465_v18 = vadd.f32 %v392_v6, %v7369_v44  ;;  %v8632_v34 = vsub.s32 0, %v7353_v24  ;;  %v8633_v38 = vsub.s32 2, %v7353_v24 }
 0x165   :  { %8628 = vst [vmem:[#allocation44_spill] sm:$0xff] %v7456_v36  ;;  %8629 = vst [vmem:[#allocation45_spill] sm:$0xff] %v7459_v1  ;;  %v7477_v36 = vrot.slane %v447_v33, %v8634_v55  ;;  %v7481_v1 = vrot.slane %v447_v33, %v8635_v58 }
 0x166   :  { %8630 = vst [vmem:[#allocation46_spill] sm:$0xff] %v7462_v8  ;;  %8631 = vst [vmem:[#allocation47_spill] sm:$0xff] %v7465_v18  ;;  %v7469_v37 = vrot.slane %v447_v33, %v8632_v34  ;;  %v7473_v10 = vrot.slane %v447_v33, %v8633_v38 }
 0x168   :  { %v555_v3 = vpop.f32.mrb[16].mxu0  ;;  %v628_v8 = vpop.f32.mrb[16].mxu1 }
 0x169   :  { %v7484_v6 = vadd.f32 %v555_v3, %v7469_v37  ;;  %v557_v18 = vpop.f32.mrb[17].mxu0  ;;  %v7487_v34 = vadd.f32 %v628_v8, %v7473_v10  ;;  %v630_v61 = vpop.f32.mrb[17].mxu1 }
 0x16a   :  { %v7490_v38 = vadd.f32 %v557_v18, %v7477_v36  ;;  %v559_v51 = vpop.f32.mrb[18].mxu0  ;;  %v7493_v55 = vadd.f32 %v630_v61, %v7481_v1  ;;  %v632_v24 = vpop.f32.mrb[18].mxu1 }
 0x16b   :  { %8636 = vst [vmem:[#allocation48_spill] sm:$0xff] %v7484_v6  ;;  %8637 = vst [vmem:[#allocation49_spill] sm:$0xff] %v7487_v34  ;;  %v7496_v33 = vadd.f32 %v559_v51, %v7469_v37  ;;  %v561_v58 = vpop.f32.mrb[19].mxu0  ;;  %v7499_v3 = vadd.f32 %v632_v24, %v7473_v10  ;;  %v634_v6 = vpop.f32.mrb[19].mxu1 }
 0x16c   :  { %8638 = vst [vmem:[#allocation50_spill] sm:$0xff] %v7490_v38  ;;  %8639 = vst [vmem:[#allocation51_spill] sm:$0xff] %v7493_v55  ;;  %v7502_v8 = vadd.f32 %v561_v58, %v7477_v36  ;;  %v7505_v34 = vadd.f32 %v634_v6, %v7481_v1 }
 0x16d   :  { %8640 = vst [vmem:[#allocation52_spill] sm:$0xff] %v7496_v33  ;;  %8641 = vst [vmem:[#allocation53_spill] sm:$0xff] %v7499_v3 }
 0x16e   :  { %8642 = vst [vmem:[#allocation54_spill] sm:$0xff] %v7502_v8  ;;  %8643 = vst [vmem:[#allocation55_spill] sm:$0xff] %v7505_v34 }
 0x170   :  { %v565_v18 = vpop.f32.mrb[20].mxu0  ;;  %v638_v38 = vpop.f32.mrb[20].mxu1 }
 0x171   :  { %v7508_v61 = vadd.f32 %v565_v18, %v7469_v37  ;;  %v567_v55 = vpop.f32.mrb[21].mxu0  ;;  %v7511_v51 = vadd.f32 %v638_v38, %v7473_v10  ;;  %v640_v33 = vpop.f32.mrb[21].mxu1 }
 0x172   :  { %v7514_v24 = vadd.f32 %v567_v55, %v7477_v36  ;;  %v569_v3 = vpop.f32.mrb[22].mxu0  ;;  %v7517_v58 = vadd.f32 %v640_v33, %v7481_v1  ;;  %v642_v8 = vpop.f32.mrb[22].mxu1 }
 0x173   :  { %8644 = vst [vmem:[#allocation56_spill] sm:$0xff] %v7508_v61  ;;  %8645 = vst [vmem:[#allocation57_spill] sm:$0xff] %v7511_v51  ;;  %v7520_v6 = vadd.f32 %v569_v3, %v7469_v37  ;;  %v571_v34 = vpop.f32.mrb[23].mxu0  ;;  %v7523_v18 = vadd.f32 %v642_v8, %v7473_v10  ;;  %v644_v61 = vpop.f32.mrb[23].mxu1 }
 0x174   :  { %8646 = vst [vmem:[#allocation58_spill] sm:$0xff] %v7514_v24  ;;  %8647 = vst [vmem:[#allocation59_spill] sm:$0xff] %v7517_v58  ;;  %v7526_v38 = vadd.f32 %v571_v34, %v7477_v36  ;;  %v7529_v51 = vadd.f32 %v644_v61, %v7481_v1 }
 0x175   :  { %8648 = vst [vmem:[#allocation60_spill] sm:$0xff] %v7520_v6  ;;  %8649 = vst [vmem:[#allocation61_spill] sm:$0xff] %v7523_v18 }
 0x176   :  { %8650 = vst [vmem:[#allocation62_spill] sm:$0xff] %v7526_v38  ;;  %8651 = vst [vmem:[#allocation63_spill] sm:$0xff] %v7529_v51 }
 0x178   :  { %v575_v55 = vpop.f32.mrb[24].mxu0  ;;  %v648_v24 = vpop.f32.mrb[24].mxu1 }
 0x179   :  { %v7532_v33 = vadd.f32 %v575_v55, %v7469_v37  ;;  %v577_v58 = vpop.f32.mrb[25].mxu0  ;;  %v7535_v3 = vadd.f32 %v648_v24, %v7473_v10  ;;  %v650_v6 = vpop.f32.mrb[25].mxu1 }
 0x17a   :  { %v7538_v8 = vadd.f32 %v577_v58, %v7477_v36  ;;  %v579_v18 = vpop.f32.mrb[26].mxu0  ;;  %v7541_v34 = vadd.f32 %v650_v6, %v7481_v1  ;;  %v652_v38 = vpop.f32.mrb[26].mxu1 }
 0x17b   :  { %8652 = vst [vmem:[#allocation64_spill] sm:$0xff] %v7532_v33  ;;  %8653 = vst [vmem:[#allocation65_spill] sm:$0xff] %v7535_v3  ;;  %v7544_v61 = vadd.f32 %v579_v18, %v7469_v37  ;;  %v581_v51 = vpop.f32.mrb[27].mxu0  ;;  %v7547_v55 = vadd.f32 %v652_v38, %v7473_v10  ;;  %v654_v33 = vpop.f32.mrb[27].mxu1 }
 0x17c   :  { %8654 = vst [vmem:[#allocation66_spill] sm:$0xff] %v7538_v8  ;;  %8655 = vst [vmem:[#allocation67_spill] sm:$0xff] %v7541_v34  ;;  %v7550_v24 = vadd.f32 %v581_v51, %v7477_v36  ;;  %v7553_v3 = vadd.f32 %v654_v33, %v7481_v1 }
 0x17d   :  { %8656 = vst [vmem:[#allocation68_spill] sm:$0xff] %v7544_v61  ;;  %8657 = vst [vmem:[#allocation69_spill] sm:$0xff] %v7547_v55 }
 0x17e   :  { %8658 = vst [vmem:[#allocation70_spill] sm:$0xff] %v7550_v24  ;;  %8659 = vst [vmem:[#allocation71_spill] sm:$0xff] %v7553_v3  ;;  %v284_v24 = vadd.f32 %v7363_v40, %v7373_v45 }
 0x180   :  { %v585_v58 = vpop.f32.mrb[28].mxu0  ;;  %v658_v8 = vpop.f32.mrb[28].mxu1 }
 0x181   :  { %v7556_v6 = vadd.f32 %v585_v58, %v7469_v37  ;;  %v587_v34 = vpop.f32.mrb[29].mxu0  ;;  %v7559_v18 = vadd.f32 %v658_v8, %v7473_v10  ;;  %v660_v50 = vpop.f32.mrb[29].mxu1  ;;  %v357_v58 = vadd.f32 %v7365_v43, %v7361_v39  ;;  %v286_v8 = vadd.f32 %v7375_v47, %v7381_v49 }
 0x182   :  { %v7562_v38 = vadd.f32 %v587_v34, %v7477_v36  ;;  %v589_v22 = vpop.f32.mrb[30].mxu0  ;;  %v7565_v51 = vadd.f32 %v660_v50, %v7481_v1  ;;  %v662_v11 = vpop.f32.mrb[30].mxu1  ;;  %v359_v34 = vadd.f32 %v7377_v48, %v7369_v44 }
 0x183   :  { %8660 = vst [vmem:[#allocation72_spill] sm:$0xff] %v7556_v6  ;;  %8661 = vst [vmem:[#allocation73_spill] sm:$0xff] %v7559_v18  ;;  %v591_v33 = vpop.f32.mrb[31].mxu0  ;;  %v664_v3 = vpop.f32.mrb[31].mxu1 }
 0x184   :  { %8662 = vst [vmem:[#allocation74_spill] sm:$0xff] %v7562_v38  ;;  %8663 = vst [vmem:[#allocation75_spill] sm:$0xff] %v7565_v51 }
 0x188   :  { %v934_v55 = vpop.f32.mrb[32].mxu0  ;;  %v975_v61 = vpop.f32.mrb[32].mxu1 }
 0x189   :  { %v982_v9 = vadd.f32 %v934_v55, %v284_v24  ;;  %v984_v50 = vadd.f32 %v975_v61, %v357_v58  ;;  %v936_v7 = vpop.f32.mrb[33].mxu0  ;;  %v977_v4 = vpop.f32.mrb[33].mxu1  ;;  %v665_v58 = vadd.f32 %v664_v3, %v7481_v1 }
 0x18a   :  { %v983_v2 = vadd.f32 %v936_v7, %v286_v8  ;;  %v985_v51 = vadd.f32 %v977_v4, %v359_v34  ;;  %v938_v38 = vpop.f32.mrb[34].mxu0  ;;  %v979_v18 = vpop.f32.mrb[34].mxu1 }
 0x18b   :  { %v1270_v40 = vmul.f32 0.5, %v982_v9  ;;  %v939_v45 = vpop.f32.mrb[35].mxu0  ;;  %v980_v6 = vpop.f32.mrb[35].mxu1  ;;  %v663_v18 = vadd.f32 %v662_v11, %v7473_v10 }
 0x18c   :  { %v1274_v39 = vmul.f32 0.5, %v983_v2  ;;  %v1279_v43 = vmul.f32 0.5, %v985_v51  ;;  %v590_v6 = vadd.f32 %v589_v22, %v7469_v37  ;;  %v592_v51 = vadd.f32 %v591_v33, %v7477_v36 }
 0x18d   :  { %6583 = vtanh.f32 %v1270_v40 }
 0x18e   :  { %6585 = vtanh.f32 %v1274_v39 }
 0x18f   :  { %6587 = vtanh.f32 %v984_v50 }
 0x190   :  { %6589 = vtanh.f32 %v1279_v43 }
 0x197   :  { %v6584_v47 = vpop.eup %6583 }
 0x198   :  { %v6586_v44 = vpop.eup %6585  ;;  %v1272_v48 = vmul.f32 0.5, %v6584_v47 }
 0x199   :  { %v1276_v49 = vmul.f32 0.5, %v6586_v44  ;;  %v6588_v55 = vpop.eup %6587 }
 0x19a   :  { %v1273_v61 = vadd.f32 0.5, %v1272_v48  ;;  %v6590_v9 = vpop.eup %6589 }
 0x19b   :  { %v1277_v24 = vadd.f32 0.5, %v1276_v49  ;;  %v1281_v2 = vmul.f32 0.5, %v6590_v9  ;;  %v7667_v9 = vld [vmem:[#allocation12 + $0x68] ss:$16 sps:$4 sm:$0xff]  }
 0x19c   :  { %v1284_v7 = vmul.f32 %v6588_v55, %v1273_v61 }
 0x19d   :  { %v1283_v4 = vmul.f32 0.0, %v1277_v24  ;;  %v1282_v43 = vadd.f32 0.5, %v1281_v2  ;;  %v7661_v24 = vld [vmem:[#allocation12 + $0x64] ss:$16 sps:$4 sm:$0xff]  }
 0x19e   :  { %v7673_v2 = vld [vmem:[#allocation12 + $0x84] ss:$16 sps:$4 sm:$0xff]  }
 0x19f   :  { %v7575_v38 = vadd.f32 %v1284_v7, %v1283_v4  ;;  %v7663_v7 = vld [vmem:[#allocation12 + $0x6c] ss:$16 sps:$4 sm:$0xff]   ;;  %v7665_v4 = vld [vmem:[#allocation12 + $0x60] ss:$16 sps:$4 sm:$0xff]  }
 0x1a1   :  { %6591 = vtanh.f32 %v7575_v38 }
 0x1a8   :  { %v1218_v8 = vpop.f32.mrb[36].mxu0  ;;  %v1259_v34 = vpop.f32.mrb[36].mxu1 }
 0x1a9   :  { %v1266_v50 = vadd.f32 %v1218_v8, %v590_v6  ;;  %v1268_v40 = vadd.f32 %v1259_v34, %v663_v18  ;;  %v1220_v45 = vpop.f32.mrb[37].mxu0  ;;  %v1261_v39 = vpop.f32.mrb[37].mxu1  ;;  %v7675_v6 = vld [vmem:[#allocation12 + $0x8c] ss:$16 sps:$4 sm:$0xff]   ;;  %v7677_v18 = vld [vmem:[#allocation12 + $0x80] ss:$16 sps:$4 sm:$0xff]  }
 0x1aa   :  { %v1267_v47 = vadd.f32 %v1220_v45, %v592_v51  ;;  %v1269_v44 = vadd.f32 %v1261_v39, %v665_v58  ;;  %v1222_v48 = vpop.f32.mrb[38].mxu0  ;;  %v1263_v49 = vpop.f32.mrb[38].mxu1  ;;  %v7679_v51 = vld [vmem:[#allocation12 + $0x88] ss:$16 sps:$4 sm:$0xff]   ;;  %v7685_v58 = vld [vmem:[#allocation12 + $0xa4] ss:$16 sps:$4 sm:$0xff]  }
 0x1ab   :  { %v6592_v61 = vpop.eup %6591  ;;  %v1288_v55 = vmul.f32 0.5, %v1266_v50  ;;  %v1223_v22 = vpop.f32.mrb[39].mxu0  ;;  %v7687_v8 = vld [vmem:[#allocation12 + $0xac] ss:$16 sps:$4 sm:$0xff]   ;;  %v7689_v34 = vld [vmem:[#allocation12 + $0xa0] ss:$16 sps:$4 sm:$0xff]  }
 0x1ac   :  { %v1264_v37 = vpop.f32.mrb[39].mxu1  ;;  %v1287_v11 = vmul.f32 %v6592_v61, %v1282_v43  ;;  %v1292_v10 = vmul.f32 0.5, %v1267_v47  ;;  %v1297_v1 = vmul.f32 0.5, %v1269_v44  ;;  %v7691_v50 = vld [vmem:[#allocation12 + $0xa8] ss:$16 sps:$4 sm:$0xff]  }
 0x1ad   :  { %6593 = vtanh.f32 %v1288_v55  ;;  %v7699_v45 = vld [vmem:[#allocation12 + $0xcc] ss:$16 sps:$4 sm:$0xff]   ;;  %v7701_v39 = vld [vmem:[#allocation12 + $0xc0] ss:$16 sps:$4 sm:$0xff]   ;;  %v7703_v43 = vld [vmem:[#allocation12 + $0xc8] ss:$16 sps:$4 sm:$0xff]  }
 0x1ae   :  { %1306 = vst [vmem:[%s8571_s8] sm:$0xff] %v1287_v11  ;;  %6595 = vtanh.f32 %v1292_v10  ;;  %v1314_v36 = vpack.c.bf16 %v1287_v11, %v1287_v11  ;;  %v7709_v47 = vld [vmem:[#allocation12 + $0xe4] ss:$16 sps:$4 sm:$0xff]   ;;  %v7711_v44 = vld [vmem:[#allocation12 + $0xec] ss:$16 sps:$4 sm:$0xff]   ;;  %v7713_v48 = vld [vmem:[#allocation12 + $0xe0] ss:$16 sps:$4 sm:$0xff]  }
 0x1af   :  { %6597 = vtanh.f32 %v1268_v40  ;;  %v7697_v40 = vld [vmem:[#allocation12 + $0xc4] ss:$16 sps:$4 sm:$0xff]   ;;  %v7715_v49 = vld [vmem:[#allocation12 + $0xe8] ss:$16 sps:$4 sm:$0xff]   ;;  %v7723_v55 = vld [vmem:[#allocation13 + $0xc] ss:$16 sps:$4 sm:$0xff]  }
 0x1b0   :  { %1540 = vmatmul.mubr.bf16.vlgmr.msra.gmra.mrb[40].mxu0 %v1314_v36  ;;  %1581 = vmatmul.mubr.bf16.vlgmr.msra.gmra.mrb[40].mxu1 %v1314_v36  ;;  %6599 = vtanh.f32 %v1297_v1  ;;  %v7721_v61 = vld [vmem:[#allocation13 + $0x4] ss:$16 sps:$4 sm:$0xff]  }
 0x1b1   :  { %1792 = vmatpush1.bf16.msra.mxu0 %v7221_v12  ;;  %1833 = vmatpush1.bf16.msra.mxu1 %v7223_v13 }
 0x1b2   :  { %1793 = vmatprep.subr.bf16.mxu0 %v7225_v14  ;;  %1834 = vmatprep.subr.bf16.mxu1 %v7227_v15 }
 0x1b3   :  { %1823 = vmatprep.mubr.bf16.mxu0 %v8607_v63  ;;  %1864 = vmatprep.mubr.bf16.mxu1 %v8607_v63 }
 0x1b5   :  { %1794 = vmatpush1.bf16.msra.mxu0 %v7233_v16  ;;  %1835 = vmatpush1.bf16.msra.mxu1 %v7235_v17 }
 0x1b6   :  { %1795 = vmatprep.subr.bf16.mxu0 %v7237_v19  ;;  %1836 = vmatprep.subr.bf16.mxu1 %v7239_v20 }
 0x1b7   :  { %v6594_v12 = vpop.eup %6593 }
 0x1b8   :  { %v6596_v3 = vpop.eup %6595  ;;  %v1290_v13 = vmul.f32 0.5, %v6594_v12 }
 0x1b9   :  { %v1294_v33 = vmul.f32 0.5, %v6596_v3  ;;  %1796 = vmatpush1.bf16.msra.mxu0 %v7245_v21  ;;  %1837 = vmatpush1.bf16.msra.mxu1 %v7247_v23  ;;  %v6598_v15 = vpop.eup %6597  ;;  %v8664_v21 = vld [vmem:[#allocation22_spill] sm:$0xff] }
 0x1ba   :  { %v1291_v14 = vadd.f32 0.5, %v1290_v13  ;;  %1797 = vmatprep.subr.bf16.mxu0 %v7251_v25  ;;  %1838 = vmatprep.subr.bf16.mxu1 %v7253_v26  ;;  %v6600_v23 = vpop.eup %6599 }
 0x1bb   :  { %v1295_v16 = vadd.f32 0.5, %v1294_v33  ;;  %v1299_v25 = vmul.f32 0.5, %v6600_v23 }
 0x1bc   :  { %v1302_v17 = vmul.f32 %v6598_v15, %v1291_v14 }
 0x1bd   :  { %v1301_v19 = vmul.f32 0.0, %v1295_v16  ;;  %1798 = vmatpush1.bf16.msra.mxu0 %v7259_v27  ;;  %1839 = vmatpush1.bf16.msra.mxu1 %v7261_v28  ;;  %v1300_v26 = vadd.f32 0.5, %v1299_v25  ;;  %v8665_v27 = vld [vmem:[#allocation23_spill] sm:$0xff] }
 0x1be   :  { %1799 = vmatprep.subr.bf16.mxu0 %v7263_v29  ;;  %1840 = vmatprep.subr.bf16.mxu1 %v7265_v30 }
 0x1bf   :  { %v7603_v20 = vadd.f32 %v1302_v17, %v1301_v19 }
 0x1c1   :  { %6601 = vtanh.f32 %v7603_v20  ;;  %1800 = vmatpush1.bf16.msra.mxu0 %v7271_v31  ;;  %1841 = vmatpush1.bf16.msra.mxu1 %v7273_v32  ;;  %v7625_v31 = vld [vmem:[#allocation12 + $0x4] ss:$16 sps:$4 sm:$0xff]   ;;  %v7627_v32 = vld [vmem:[#allocation12 + $0xc] ss:$16 sps:$4 sm:$0xff]  }
 0x1c2   :  { %1801 = vmatprep.subr.bf16.mxu0 %v8664_v21  ;;  %1842 = vmatprep.subr.bf16.mxu1 %v7277_v41  ;;  %v7629_v41 = vld [vmem:[#allocation12] ss:$16 sps:$4 sm:$0xff]  }
 0x1c5   :  { %1802 = vmatpush1.bf16.msra.mxu0 %v7283_v42  ;;  %1843 = vmatpush1.bf16.msra.mxu1 %v7285_v46  ;;  %v7639_v42 = vld [vmem:[#allocation12 + $0x2c] ss:$16 sps:$4 sm:$0xff]   ;;  %v7641_v46 = vld [vmem:[#allocation12 + $0x20] ss:$16 sps:$4 sm:$0xff]  }
 0x1c6   :  { %1803 = vmatprep.subr.bf16.mxu0 %v7287_v52  ;;  %1844 = vmatprep.subr.bf16.mxu1 %v7289_v53  ;;  %v7643_v52 = vld [vmem:[#allocation12 + $0x28] ss:$16 sps:$4 sm:$0xff]   ;;  %v7649_v53 = vld [vmem:[#allocation12 + $0x44] ss:$16 sps:$4 sm:$0xff]  }
 0x1c9   :  { %1804 = vmatpush1.bf16.msra.mxu0 %v7295_v57  ;;  %1845 = vmatpush1.bf16.msra.mxu1 %v7297_v62  ;;  %v7651_v57 = vld [vmem:[#allocation12 + $0x4c] ss:$16 sps:$4 sm:$0xff]   ;;  %v7653_v62 = vld [vmem:[#allocation12 + $0x40] ss:$16 sps:$4 sm:$0xff]  }
 0x1ca   :  { %1805 = vmatprep.subr.bf16.mxu0 %v8665_v27  ;;  %1846 = vmatprep.subr.bf16.mxu1 %v7301_v5  ;;  %v7655_v5 = vld [vmem:[#allocation12 + $0x48] ss:$16 sps:$4 sm:$0xff]  }
 0x1cb   :  { %v6602_v28 = vpop.eup %6601 }
 0x1cc   :  { %v1305_v29 = vmul.f32 %v6602_v28, %v1300_v26 }
 0x1cd   :  { %1806 = vmatpush1.bf16.msra.mxu0 %v7307_v0  ;;  %1847 = vmatpush1.bf16.msra.mxu1 %v7309_v35  ;;  %v7631_v0 = vld [vmem:[#allocation12 + $0x8] ss:$16 sps:$4 sm:$0xff]   ;;  %v7637_v35 = vld [vmem:[#allocation12 + $0x24] ss:$16 sps:$4 sm:$0xff]  }
 0x1ce   :  { %5703 = vst [vmem:[%s8572_s9 + $0x38] sm:$0xff] %v1305_v29  ;;  %v1598_v30 = vpack.c.bf16 %v1305_v29, %v1305_v29  ;;  %2115 = vmatprep.subr.bf16.mxu0 %v7625_v31  ;;  %2156 = vmatprep.subr.bf16.mxu1 %v7627_v32 }
 0x1d0   :  { %1824 = vmatmul.mubr.bf16.vlgmr.msra.gmra.mrb[44].mxu0 %v1598_v30  ;;  %1865 = vmatmul.mubr.bf16.vlgmr.msra.gmra.mrb[44].mxu1 %v1598_v30 }
 0x1d1   :  { %2147 = vmatprep.mubr.bf16.mxu0 %v8607_v63  ;;  %2188 = vmatprep.mubr.bf16.mxu1 %v8607_v63 }
 0x1d2   :  { %2116 = vmatpush1.bf16.msra.mxu0 %v7629_v41  ;;  %2157 = vmatpush1.bf16.msra.mxu1 %v7631_v0 }
 0x1d3   :  { %2117 = vmatprep.subr.bf16.mxu0 %v7637_v35  ;;  %2158 = vmatprep.subr.bf16.mxu1 %v7639_v42 }
 0x1d6   :  { %2118 = vmatpush1.bf16.msra.mxu0 %v7641_v46  ;;  %2159 = vmatpush1.bf16.msra.mxu1 %v7643_v52 }
 0x1d7   :  { %2119 = vmatprep.subr.bf16.mxu0 %v7649_v53  ;;  %2160 = vmatprep.subr.bf16.mxu1 %v7651_v57 }
 0x1da   :  { %2120 = vmatpush1.bf16.msra.mxu0 %v7653_v62  ;;  %2161 = vmatpush1.bf16.msra.mxu1 %v7655_v5 }
 0x1db   :  { %2121 = vmatprep.subr.bf16.mxu0 %v7661_v24  ;;  %2162 = vmatprep.subr.bf16.mxu1 %v7663_v7 }
 0x1de   :  { %2122 = vmatpush1.bf16.msra.mxu0 %v7665_v4  ;;  %2163 = vmatpush1.bf16.msra.mxu1 %v7667_v9 }
 0x1df   :  { %2123 = vmatprep.subr.bf16.mxu0 %v7673_v2  ;;  %2164 = vmatprep.subr.bf16.mxu1 %v7675_v6 }
 0x1e2   :  { %2124 = vmatpush1.bf16.msra.mxu0 %v7677_v18  ;;  %2165 = vmatpush1.bf16.msra.mxu1 %v7679_v51 }
 0x1e3   :  { %2125 = vmatprep.subr.bf16.mxu0 %v7685_v58  ;;  %2166 = vmatprep.subr.bf16.mxu1 %v7687_v8 }
 0x1e6   :  { %2126 = vmatpush1.bf16.msra.mxu0 %v7689_v34  ;;  %2167 = vmatpush1.bf16.msra.mxu1 %v7691_v50 }
 0x1e7   :  { %2127 = vmatprep.subr.bf16.mxu0 %v7697_v40  ;;  %2168 = vmatprep.subr.bf16.mxu1 %v7699_v45 }
 0x1ea   :  { %2128 = vmatpush1.bf16.msra.mxu0 %v7701_v39  ;;  %2169 = vmatpush1.bf16.msra.mxu1 %v7703_v43 }
 0x1eb   :  { %2129 = vmatprep.subr.bf16.mxu0 %v7709_v47  ;;  %2170 = vmatprep.subr.bf16.mxu1 %v7711_v44 }
 0x1ee   :  { %2130 = vmatpush1.bf16.msra.mxu0 %v7713_v48  ;;  %2171 = vmatpush1.bf16.msra.mxu1 %v7715_v49 }
 0x1ef   :  { %2399 = vmatprep.subr.bf16.mxu0 %v7721_v61  ;;  %2440 = vmatprep.subr.bf16.mxu1 %v7723_v55 }
 0x283   :  { %v1541_v22 = vpop.f32.mrb[40].mxu0  ;;  %v1582_v37 = vpop.f32.mrb[40].mxu1 }
 0x284   :  { %v1589_v11 = vadd.f32 %v1541_v22, %v7384_v54  ;;  %v1591_v10 = vadd.f32 %v1582_v37, %v7387_v56  ;;  %v1543_v36 = vpop.f32.mrb[41].mxu0  ;;  %v1584_v1 = vpop.f32.mrb[41].mxu1 }
 0x285   :  { %v1590_v12 = vadd.f32 %v1543_v36, %v7390_v59  ;;  %v1592_v3 = vadd.f32 %v1584_v1, %v7393_v60  ;;  %v1545_v13 = vpop.f32.mrb[42].mxu0  ;;  %v1586_v33 = vpop.f32.mrb[42].mxu1  ;;  %v8667_v36 = vld [vmem:[#allocation73_spill] sm:$0xff] }
 0x286   :  { %v1877_v14 = vmul.f32 0.5, %v1589_v11  ;;  %v1546_v15 = vpop.f32.mrb[43].mxu0  ;;  %v1587_v16 = vpop.f32.mrb[43].mxu1  ;;  %v8666_v11 = vld [vmem:[#allocation72_spill] sm:$0xff]  ;;  %v8668_v33 = vld [vmem:[#allocation74_spill] sm:$0xff] }
 0x287   :  { %v1881_v17 = vmul.f32 0.5, %v1590_v12  ;;  %v1886_v19 = vmul.f32 0.5, %v1592_v3  ;;  %v8669_v15 = vld [vmem:[#allocation75_spill] sm:$0xff] }
 0x288   :  { %6603 = vtanh.f32 %v1877_v14 }
 0x289   :  { %6605 = vtanh.f32 %v1881_v17 }
 0x28a   :  { %6607 = vtanh.f32 %v1591_v10 }
 0x28b   :  { %6609 = vtanh.f32 %v1886_v19 }
 0x292   :  { %v6604_v21 = vpop.eup %6603 }
 0x293   :  { %v6606_v54 = vpop.eup %6605  ;;  %v1879_v23 = vmul.f32 0.5, %v6604_v21 }
 0x294   :  { %v1883_v56 = vmul.f32 0.5, %v6606_v54  ;;  %v6608_v26 = vpop.eup %6607 }
 0x295   :  { %v1880_v25 = vadd.f32 0.5, %v1879_v23  ;;  %v6610_v29 = vpop.eup %6609 }
 0x296   :  { %v1884_v59 = vadd.f32 0.5, %v1883_v56  ;;  %v1888_v30 = vmul.f32 0.5, %v6610_v29  ;;  %v7748_v29 = vld [vmem:[#allocation13 + $0x2c] ss:$16 sps:$4 sm:$0xff]  }
 0x297   :  { %v1891_v27 = vmul.f32 %v6608_v26, %v1880_v25  ;;  %v7739_v26 = vld [vmem:[#allocation13] ss:$16 sps:$4 sm:$0xff]  }
 0x298   :  { %v1890_v60 = vmul.f32 %v1884_v59, %v7575_v38  ;;  %v1889_v13 = vadd.f32 0.5, %v1888_v30  ;;  %v7741_v59 = vld [vmem:[#allocation13 + $0x8] ss:$16 sps:$4 sm:$0xff]   ;;  %v7752_v30 = vld [vmem:[#allocation13 + $0x20] ss:$16 sps:$4 sm:$0xff]  }
 0x29a   :  { %v7732_v28 = vadd.f32 %v1891_v27, %v1890_v60  ;;  %v7746_v60 = vld [vmem:[#allocation13 + $0x24] ss:$16 sps:$4 sm:$0xff]  }
 0x29c   :  { %6611 = vtanh.f32 %v7732_v28 }
 0x2a3   :  { %v1825_v22 = vpop.f32.mrb[44].mxu0  ;;  %v1866_v37 = vpop.f32.mrb[44].mxu1 }
 0x2a4   :  { %v1873_v10 = vadd.f32 %v1825_v22, %v8666_v11  ;;  %v1875_v1 = vadd.f32 %v1866_v37, %v8667_v36  ;;  %v1827_v12 = vpop.f32.mrb[45].mxu0  ;;  %v1868_v3 = vpop.f32.mrb[45].mxu1  ;;  %v7754_v22 = vld [vmem:[#allocation13 + $0x28] ss:$16 sps:$4 sm:$0xff]   ;;  %v7758_v37 = vld [vmem:[#allocation13 + $0x44] ss:$16 sps:$4 sm:$0xff]  }
 0x2a5   :  { %v1874_v14 = vadd.f32 %v1827_v12, %v8668_v33  ;;  %v1876_v16 = vadd.f32 %v1868_v3, %v8669_v15  ;;  %v1829_v38 = vpop.f32.mrb[46].mxu0  ;;  %v1870_v17 = vpop.f32.mrb[46].mxu1  ;;  %v7760_v11 = vld [vmem:[#allocation13 + $0x4c] ss:$16 sps:$4 sm:$0xff]   ;;  %v7766_v36 = vld [vmem:[#allocation13 + $0x40] ss:$16 sps:$4 sm:$0xff]  }
 0x2a6   :  { %v6612_v19 = vpop.eup %6611  ;;  %v1895_v21 = vmul.f32 0.5, %v1873_v10  ;;  %v1830_v54 = vpop.f32.mrb[47].mxu0  ;;  %v7772_v12 = vld [vmem:[#allocation13 + $0x64] ss:$16 sps:$4 sm:$0xff]   ;;  %v7774_v3 = vld [vmem:[#allocation13 + $0x6c] ss:$16 sps:$4 sm:$0xff]  }
 0x2a7   :  { %v1871_v23 = vpop.f32.mrb[47].mxu1  ;;  %v1894_v56 = vmul.f32 %v6612_v19, %v1889_v13  ;;  %v1899_v25 = vmul.f32 0.5, %v1874_v14  ;;  %v1904_v10 = vmul.f32 0.5, %v1876_v16  ;;  %v7778_v16 = vld [vmem:[#allocation13 + $0x60] ss:$16 sps:$4 sm:$0xff]  }
 0x2a8   :  { %6613 = vtanh.f32 %v1895_v21  ;;  %v7780_v38 = vld [vmem:[#allocation13 + $0x68] ss:$16 sps:$4 sm:$0xff]   ;;  %v7784_v19 = vld [vmem:[#allocation13 + $0x84] ss:$16 sps:$4 sm:$0xff]   ;;  %v7786_v21 = vld [vmem:[#allocation13 + $0x8c] ss:$16 sps:$4 sm:$0xff]  }
 0x2a9   :  { %5768 = vst [vmem:[%s8571_s8 + $0x8] sm:$0xff] %v1894_v56  ;;  %6615 = vtanh.f32 %v1899_v25  ;;  %v1922_v27 = vpack.c.bf16 %v1894_v56, %v1894_v56 }
 0x2aa   :  { %6617 = vtanh.f32 %v1875_v1  ;;  %v7768_v1 = vld [vmem:[#allocation13 + $0x48] ss:$16 sps:$4 sm:$0xff]  }
 0x2ab   :  { %2148 = vmatmul.mubr.bf16.vlgmr.msra.gmra.mrb[48].mxu0 %v1922_v27  ;;  %2189 = vmatmul.mubr.bf16.vlgmr.msra.gmra.mrb[48].mxu1 %v1922_v27  ;;  %6619 = vtanh.f32 %v1904_v10  ;;  %v7791_v27 = vld [vmem:[#allocation13 + $0x80] ss:$16 sps:$4 sm:$0xff]   ;;  %v7793_v10 = vld [vmem:[#allocation13 + $0x88] ss:$16 sps:$4 sm:$0xff]  }
 0x2ac   :  { %2400 = vmatpush1.bf16.msra.mxu0 %v7739_v26  ;;  %2441 = vmatpush1.bf16.msra.mxu1 %v7741_v59  ;;  %8670 = vst [vmem:[#allocation22_spill] sm:$0xff] %v7791_v27  ;;  %8671 = vst [vmem:[#allocation23_spill] sm:$0xff] %v7793_v10 }
 0x2ad   :  { %2401 = vmatprep.subr.bf16.mxu0 %v7746_v60  ;;  %2442 = vmatprep.subr.bf16.mxu1 %v7748_v29 }
 0x2ae   :  { %2431 = vmatprep.mubr.bf16.mxu0 %v8607_v63  ;;  %2472 = vmatprep.mubr.bf16.mxu1 %v8607_v63 }
 0x2b0   :  { %2402 = vmatpush1.bf16.msra.mxu0 %v7752_v30  ;;  %2443 = vmatpush1.bf16.msra.mxu1 %v7754_v22 }
 0x2b1   :  { %2403 = vmatprep.subr.bf16.mxu0 %v7758_v37  ;;  %2444 = vmatprep.subr.bf16.mxu1 %v7760_v11 }
 0x2b2   :  { %v6614_v13 = vpop.eup %6613 }
 0x2b3   :  { %v6616_v33 = vpop.eup %6615  ;;  %v1897_v14 = vmul.f32 0.5, %v6614_v13  ;;  %v7797_v13 = vld [vmem:[#allocation13 + $0xa4] ss:$16 sps:$4 sm:$0xff]  }
 0x2b4   :  { %v1901_v15 = vmul.f32 0.5, %v6616_v33  ;;  %2404 = vmatpush1.bf16.msra.mxu0 %v7766_v36  ;;  %2445 = vmatpush1.bf16.msra.mxu1 %v7768_v1  ;;  %v6618_v54 = vpop.eup %6617  ;;  %8672 = vst [vmem:[#allocation72_spill] sm:$0xff] %v7797_v13  ;;  %v7799_v33 = vld [vmem:[#allocation13 + $0xac] ss:$16 sps:$4 sm:$0xff]  }
 0x2b5   :  { %v1898_v17 = vadd.f32 0.5, %v1897_v14  ;;  %2405 = vmatprep.subr.bf16.mxu0 %v7772_v12  ;;  %2446 = vmatprep.subr.bf16.mxu1 %v7774_v3  ;;  %8673 = vst [vmem:[#allocation73_spill] sm:$0xff] %v7799_v33 }
 0x2b6   :  { %v1902_v23 = vadd.f32 0.5, %v1901_v15  ;;  %v7808_v15 = vld [vmem:[#allocation13 + $0xa8] ss:$16 sps:$4 sm:$0xff]  }
 0x2b7   :  { %v1909_v56 = vmul.f32 %v6618_v54, %v1898_v17  ;;  %8675 = vst [vmem:[#allocation75_spill] sm:$0xff] %v7808_v15  ;;  %v7812_v17 = vld [vmem:[#allocation13 + $0xc4] ss:$16 sps:$4 sm:$0xff]   ;;  %v7814_v54 = vld [vmem:[#allocation13 + $0xcc] ss:$16 sps:$4 sm:$0xff]  }
 0x2b8   :  { %v1908_v25 = vmul.f32 %v1902_v23, %v7603_v20  ;;  %2406 = vmatpush1.bf16.msra.mxu0 %v7778_v16  ;;  %2447 = vmatpush1.bf16.msra.mxu1 %v7780_v38  ;;  %v7806_v20 = vld [vmem:[#allocation13 + $0xa0] ss:$16 sps:$4 sm:$0xff]   ;;  %8676 = vst [vmem:[#allocation76_spill] sm:$0xff] %v7812_v17  ;;  %v6620_v23 = vpop.eup %6619 }
 0x2b9   :  { %2407 = vmatprep.subr.bf16.mxu0 %v7784_v19  ;;  %2448 = vmatprep.subr.bf16.mxu1 %v7786_v21  ;;  %8674 = vst [vmem:[#allocation74_spill] sm:$0xff] %v7806_v20 }
 0x2ba   :  { %v7801_v14 = vadd.f32 %v1909_v56, %v1908_v25  ;;  %v7818_v56 = vld [vmem:[#allocation13 + $0xc0] ss:$16 sps:$4 sm:$0xff]   ;;  %v7820_v25 = vld [vmem:[#allocation13 + $0xc8] ss:$16 sps:$4 sm:$0xff]  }
 0x2bb   :  { %8677 = vst [vmem:[#allocation77_spill] sm:$0xff] %v7820_v25 }
 0x2bc   :  { %6621 = vtanh.f32 %v7801_v14  ;;  %2408 = vmatpush1.bf16.msra.mxu0 %v7791_v27  ;;  %2449 = vmatpush1.bf16.msra.mxu1 %v7793_v10  ;;  %v1906_v10 = vmul.f32 0.5, %v6620_v23 }
 0x2bd   :  { %2409 = vmatprep.subr.bf16.mxu0 %v7797_v13  ;;  %2450 = vmatprep.subr.bf16.mxu1 %v7799_v33  ;;  %v7824_v13 = vld [vmem:[#allocation13 + $0xe4] ss:$16 sps:$4 sm:$0xff]   ;;  %v7826_v33 = vld [vmem:[#allocation13 + $0xec] ss:$16 sps:$4 sm:$0xff]  }
 0x2be   :  { %v1907_v27 = vadd.f32 0.5, %v1906_v10  ;;  %v8683_v10 = vld [vmem:[#allocation69_spill] sm:$0xff] }
 0x2c0   :  { %2410 = vmatpush1.bf16.msra.mxu0 %v7806_v20  ;;  %2451 = vmatpush1.bf16.msra.mxu1 %v7808_v15  ;;  %v7830_v20 = vld [vmem:[#allocation13 + $0xe0] ss:$16 sps:$4 sm:$0xff]   ;;  %v7832_v15 = vld [vmem:[#allocation13 + $0xe8] ss:$16 sps:$4 sm:$0xff]  }
 0x2c1   :  { %2411 = vmatprep.subr.bf16.mxu0 %v7812_v17  ;;  %2452 = vmatprep.subr.bf16.mxu1 %v7814_v54 }
 0x2c4   :  { %2412 = vmatpush1.bf16.msra.mxu0 %v7818_v56  ;;  %2453 = vmatpush1.bf16.msra.mxu1 %v7820_v25 }
 0x2c5   :  { %2413 = vmatprep.subr.bf16.mxu0 %v7824_v13  ;;  %2454 = vmatprep.subr.bf16.mxu1 %v7826_v33 }
 0x2c6   :  { %v6622_v23 = vpop.eup %6621 }
 0x2c7   :  { %v1912_v17 = vmul.f32 %v6622_v23, %v1907_v27 }
 0x2c8   :  { %2414 = vmatpush1.bf16.msra.mxu0 %v7830_v20  ;;  %2455 = vmatpush1.bf16.msra.mxu1 %v7832_v15 }
 0x2c9   :  { %5769 = vst [vmem:[%s8572_s9 + $0x30] sm:$0xff] %v1912_v17  ;;  %v2206_v25 = vpack.c.bf16 %v1912_v17, %v1912_v17  ;;  %2723 = vmatprep.subr.bf16.mxu0 %v7625_v31  ;;  %2764 = vmatprep.subr.bf16.mxu1 %v7627_v32 }
 0x2cb   :  { %2432 = vmatmul.mubr.bf16.vlgmr.msra.gmra.mrb[52].mxu0 %v2206_v25  ;;  %2473 = vmatmul.mubr.bf16.vlgmr.msra.gmra.mrb[52].mxu1 %v2206_v25 }
 0x2cc   :  { %2724 = vmatpush1.bf16.msra.mxu0 %v7629_v41  ;;  %2765 = vmatpush1.bf16.msra.mxu1 %v7631_v0  ;;  %v8678_v41 = vld [vmem:[#allocation24_spill] sm:$0xff] }
 0x2cd   :  { %2725 = vmatprep.subr.bf16.mxu0 %v7637_v35  ;;  %2766 = vmatprep.subr.bf16.mxu1 %v7639_v42  ;;  %v8679_v35 = vld [vmem:[#allocation25_spill] sm:$0xff] }
 0x2ce   :  { %2755 = vmatprep.mubr.bf16.mxu0 %v8607_v63  ;;  %2796 = vmatprep.mubr.bf16.mxu1 %v8607_v63 }
 0x2d0   :  { %2726 = vmatpush1.bf16.msra.mxu0 %v7641_v46  ;;  %2767 = vmatpush1.bf16.msra.mxu1 %v7643_v52 }
 0x2d1   :  { %2727 = vmatprep.subr.bf16.mxu0 %v7649_v53  ;;  %2768 = vmatprep.subr.bf16.mxu1 %v7651_v57  ;;  %v8680_v53 = vld [vmem:[#allocation26_spill] sm:$0xff] }
 0x2d4   :  { %2728 = vmatpush1.bf16.msra.mxu0 %v7653_v62  ;;  %2769 = vmatpush1.bf16.msra.mxu1 %v7655_v5  ;;  %v8681_v62 = vld [vmem:[#allocation27_spill] sm:$0xff] }
 0x2d5   :  { %2729 = vmatprep.subr.bf16.mxu0 %v7661_v24  ;;  %2770 = vmatprep.subr.bf16.mxu1 %v7663_v7 }
 0x2d8   :  { %2730 = vmatpush1.bf16.msra.mxu0 %v7665_v4  ;;  %2771 = vmatpush1.bf16.msra.mxu1 %v7667_v9 }
 0x2d9   :  { %2731 = vmatprep.subr.bf16.mxu0 %v7673_v2  ;;  %2772 = vmatprep.subr.bf16.mxu1 %v7675_v6 }
 0x2dc   :  { %2732 = vmatpush1.bf16.msra.mxu0 %v7677_v18  ;;  %2773 = vmatpush1.bf16.msra.mxu1 %v7679_v51 }
 0x2dd   :  { %2733 = vmatprep.subr.bf16.mxu0 %v7685_v58  ;;  %2774 = vmatprep.subr.bf16.mxu1 %v7687_v8 }
 0x2e0   :  { %2734 = vmatpush1.bf16.msra.mxu0 %v7689_v34  ;;  %2775 = vmatpush1.bf16.msra.mxu1 %v7691_v50 }
 0x2e1   :  { %2735 = vmatprep.subr.bf16.mxu0 %v7697_v40  ;;  %2776 = vmatprep.subr.bf16.mxu1 %v7699_v45 }
 0x2e4   :  { %2736 = vmatpush1.bf16.msra.mxu0 %v7701_v39  ;;  %2777 = vmatpush1.bf16.msra.mxu1 %v7703_v43 }
 0x2e5   :  { %2737 = vmatprep.subr.bf16.mxu0 %v7709_v47  ;;  %2778 = vmatprep.subr.bf16.mxu1 %v7711_v44 }
 0x2e8   :  { %2738 = vmatpush1.bf16.msra.mxu0 %v7713_v48  ;;  %2779 = vmatpush1.bf16.msra.mxu1 %v7715_v49 }
 0x2e9   :  { %3007 = vmatprep.subr.bf16.mxu0 %v7721_v61  ;;  %3048 = vmatprep.subr.bf16.mxu1 %v7723_v55  ;;  %v8682_v55 = vld [vmem:[#allocation68_spill] sm:$0xff] }
 0x37e   :  { %v2149_v31 = vpop.f32.mrb[48].mxu0  ;;  %v2190_v32 = vpop.f32.mrb[48].mxu1 }
 0x37f   :  { %v2197_v0 = vadd.f32 %v2149_v31, %v8678_v41  ;;  %v2199_v42 = vadd.f32 %v2190_v32, %v8679_v35  ;;  %v2151_v46 = vpop.f32.mrb[49].mxu0  ;;  %v2192_v52 = vpop.f32.mrb[49].mxu1  ;;  %v8684_v32 = vld [vmem:[#allocation70_spill] sm:$0xff] }
 0x380   :  { %v2198_v57 = vadd.f32 %v2151_v46, %v8680_v53  ;;  %v2200_v5 = vadd.f32 %v2192_v52, %v8681_v62  ;;  %v2153_v24 = vpop.f32.mrb[50].mxu0  ;;  %v2194_v7 = vpop.f32.mrb[50].mxu1 }
 0x381   :  { %v2485_v4 = vmul.f32 0.5, %v2197_v0  ;;  %v2154_v9 = vpop.f32.mrb[51].mxu0  ;;  %v2195_v2 = vpop.f32.mrb[51].mxu1  ;;  %v8685_v0 = vld [vmem:[#allocation71_spill] sm:$0xff] }
 0x382   :  { %v2489_v6 = vmul.f32 0.5, %v2198_v57  ;;  %v2494_v18 = vmul.f32 0.5, %v2200_v5  ;;  %v8692_v2 = vld [vmem:[#allocation76_spill] sm:$0xff] }
 0x383   :  { %6623 = vtanh.f32 %v2485_v4 }
 0x384   :  { %6625 = vtanh.f32 %v2489_v6 }
 0x385   :  { %6627 = vtanh.f32 %v2199_v42 }
 0x386   :  { %6629 = vtanh.f32 %v2494_v18 }
 0x38d   :  { %v6624_v51 = vpop.eup %6623 }
 0x38e   :  { %v6626_v58 = vpop.eup %6625  ;;  %v2487_v8 = vmul.f32 0.5, %v6624_v51 }
 0x38f   :  { %v2491_v34 = vmul.f32 0.5, %v6626_v58  ;;  %v6628_v40 = vpop.eup %6627  ;;  %v7947_v58 = vld [vmem:[#allocation12 + $0x2c] ss:$16 sps:$4 sm:$0xff]  }
 0x390   :  { %v2488_v50 = vadd.f32 0.5, %v2487_v8  ;;  %v6630_v44 = vpop.eup %6629  ;;  %v7949_v8 = vld [vmem:[#allocation12 + $0x20] ss:$16 sps:$4 sm:$0xff]  }
 0x391   :  { %v2492_v45 = vadd.f32 0.5, %v2491_v34  ;;  %v2496_v48 = vmul.f32 0.5, %v6630_v44  ;;  %v7951_v34 = vld [vmem:[#allocation12 + $0x28] ss:$16 sps:$4 sm:$0xff]   ;;  %v7971_v44 = vld [vmem:[#allocation12 + $0x6c] ss:$16 sps:$4 sm:$0xff]  }
 0x392   :  { %v2499_v39 = vmul.f32 %v6628_v40, %v2488_v50  ;;  %v7957_v50 = vld [vmem:[#allocation12 + $0x44] ss:$16 sps:$4 sm:$0xff]   ;;  %v7959_v40 = vld [vmem:[#allocation12 + $0x4c] ss:$16 sps:$4 sm:$0xff]  }
 0x393   :  { %v2498_v43 = vmul.f32 %v2492_v45, %v7732_v28  ;;  %v2497_v31 = vadd.f32 0.5, %v2496_v48  ;;  %v7961_v45 = vld [vmem:[#allocation12 + $0x40] ss:$16 sps:$4 sm:$0xff]  }
 0x394   :  { %v7973_v48 = vld [vmem:[#allocation12 + $0x60] ss:$16 sps:$4 sm:$0xff]  }
 0x395   :  { %v7882_v47 = vadd.f32 %v2499_v39, %v2498_v43  ;;  %v7963_v39 = vld [vmem:[#allocation12 + $0x48] ss:$16 sps:$4 sm:$0xff]   ;;  %v7969_v43 = vld [vmem:[#allocation12 + $0x64] ss:$16 sps:$4 sm:$0xff]  }
 0x397   :  { %6631 = vtanh.f32 %v7882_v47 }
 0x39e   :  { %v2433_v49 = vpop.f32.mrb[52].mxu0  ;;  %v2474_v61 = vpop.f32.mrb[52].mxu1 }
 0x39f   :  { %v2481_v27 = vadd.f32 %v2433_v49, %v8682_v55  ;;  %v2483_v17 = vadd.f32 %v2474_v61, %v8683_v10  ;;  %v2435_v25 = vpop.f32.mrb[53].mxu0  ;;  %v2476_v23 = vpop.f32.mrb[53].mxu1  ;;  %v7975_v49 = vld [vmem:[#allocation12 + $0x68] ss:$16 sps:$4 sm:$0xff]   ;;  %v7981_v61 = vld [vmem:[#allocation12 + $0x84] ss:$16 sps:$4 sm:$0xff]  }
 0x3a0   :  { %v2482_v41 = vadd.f32 %v2435_v25, %v8684_v32  ;;  %v2484_v35 = vadd.f32 %v2476_v23, %v8685_v0  ;;  %v2437_v28 = vpop.f32.mrb[54].mxu0  ;;  %v2478_v42 = vpop.f32.mrb[54].mxu1  ;;  %v7983_v55 = vld [vmem:[#allocation12 + $0x8c] ss:$16 sps:$4 sm:$0xff]   ;;  %v7987_v10 = vld [vmem:[#allocation12 + $0x88] ss:$16 sps:$4 sm:$0xff]  }
 0x3a1   :  { %v6632_v46 = vpop.eup %6631  ;;  %v2503_v52 = vmul.f32 0.5, %v2481_v27  ;;  %v2438_v53 = vpop.f32.mrb[55].mxu0  ;;  %v7985_v27 = vld [vmem:[#allocation12 + $0x80] ss:$16 sps:$4 sm:$0xff]   ;;  %v7995_v25 = vld [vmem:[#allocation12 + $0xac] ss:$16 sps:$4 sm:$0xff]  }
 0x3a2   :  { %v2479_v57 = vpop.f32.mrb[55].mxu1  ;;  %v2502_v62 = vmul.f32 %v6632_v46, %v2497_v31  ;;  %v2507_v5 = vmul.f32 0.5, %v2482_v41  ;;  %v2512_v7 = vmul.f32 0.5, %v2484_v35  ;;  %v7997_v23 = vld [vmem:[#allocation12 + $0xa0] ss:$16 sps:$4 sm:$0xff]  }
 0x3a3   :  { %6633 = vtanh.f32 %v2503_v52  ;;  %v7999_v31 = vld [vmem:[#allocation12 + $0xa8] ss:$16 sps:$4 sm:$0xff]   ;;  %v8005_v32 = vld [vmem:[#allocation12 + $0xc4] ss:$16 sps:$4 sm:$0xff]   ;;  %v8007_v41 = vld [vmem:[#allocation12 + $0xcc] ss:$16 sps:$4 sm:$0xff]  }
 0x3a4   :  { %5834 = vst [vmem:[%s8571_s8 + $0x10] sm:$0xff] %v2502_v62  ;;  %6635 = vtanh.f32 %v2507_v5  ;;  %v2530_v24 = vpack.c.bf16 %v2502_v62, %v2502_v62  ;;  %v8009_v0 = vld [vmem:[#allocation12 + $0xc0] ss:$16 sps:$4 sm:$0xff]   ;;  %v8011_v35 = vld [vmem:[#allocation12 + $0xc8] ss:$16 sps:$4 sm:$0xff]  }
 0x3a5   :  { %6637 = vtanh.f32 %v2483_v17  ;;  %v7993_v17 = vld [vmem:[#allocation12 + $0xa4] ss:$16 sps:$4 sm:$0xff]   ;;  %v8019_v42 = vld [vmem:[#allocation12 + $0xec] ss:$16 sps:$4 sm:$0xff]   ;;  %v8021_v46 = vld [vmem:[#allocation12 + $0xe0] ss:$16 sps:$4 sm:$0xff]  }
 0x3a6   :  { %2756 = vmatmul.mubr.bf16.vlgmr.msra.gmra.mrb[56].mxu0 %v2530_v24  ;;  %2797 = vmatmul.mubr.bf16.vlgmr.msra.gmra.mrb[56].mxu1 %v2530_v24  ;;  %6639 = vtanh.f32 %v2512_v7  ;;  %v8017_v28 = vld [vmem:[#allocation12 + $0xe4] ss:$16 sps:$4 sm:$0xff]   ;;  %v8023_v52 = vld [vmem:[#allocation12 + $0xe8] ss:$16 sps:$4 sm:$0xff]   ;;  %v8031_v57 = vld [vmem:[#allocation13 + $0xc] ss:$16 sps:$4 sm:$0xff]  }
 0x3a7   :  { %3008 = vmatpush1.bf16.msra.mxu0 %v7739_v26  ;;  %3049 = vmatpush1.bf16.msra.mxu1 %v7741_v59  ;;  %v8029_v53 = vld [vmem:[#allocation13 + $0x4] ss:$16 sps:$4 sm:$0xff]   ;;  %v8694_v24 = vld [vmem:[#allocation28_spill] sm:$0xff] }
 0x3a8   :  { %3009 = vmatprep.subr.bf16.mxu0 %v7746_v60  ;;  %3050 = vmatprep.subr.bf16.mxu1 %v7748_v29 }
 0x3a9   :  { %3039 = vmatprep.mubr.bf16.mxu0 %v8607_v63  ;;  %3080 = vmatprep.mubr.bf16.mxu1 %v8607_v63 }
 0x3ab   :  { %3010 = vmatpush1.bf16.msra.mxu0 %v7752_v30  ;;  %3051 = vmatpush1.bf16.msra.mxu1 %v7754_v22 }
 0x3ac   :  { %3011 = vmatprep.subr.bf16.mxu0 %v7758_v37  ;;  %3052 = vmatprep.subr.bf16.mxu1 %v7760_v11 }
 0x3ad   :  { %v6634_v26 = vpop.eup %6633 }
 0x3ae   :  { %v6636_v4 = vpop.eup %6635  ;;  %v2505_v59 = vmul.f32 0.5, %v6634_v26  ;;  %v8695_v26 = vld [vmem:[#allocation29_spill] sm:$0xff] }
 0x3af   :  { %v2509_v9 = vmul.f32 0.5, %v6636_v4  ;;  %3012 = vmatpush1.bf16.msra.mxu0 %v7766_v36  ;;  %3053 = vmatpush1.bf16.msra.mxu1 %v7768_v1  ;;  %v6638_v29 = vpop.eup %6637  ;;  %v8686_v36 = vld [vmem:[#allocation22_spill] sm:$0xff]  ;;  %v8687_v1 = vld [vmem:[#allocation23_spill] sm:$0xff] }
 0x3b0   :  { %v2506_v60 = vadd.f32 0.5, %v2505_v59  ;;  %3013 = vmatprep.subr.bf16.mxu0 %v7772_v12  ;;  %3054 = vmatprep.subr.bf16.mxu1 %v7774_v3  ;;  %v8688_v12 = vld [vmem:[#allocation72_spill] sm:$0xff]  ;;  %v8689_v3 = vld [vmem:[#allocation73_spill] sm:$0xff] }
 0x3b1   :  { %v2510_v30 = vadd.f32 0.5, %v2509_v9 }
 0x3b2   :  { %v2517_v22 = vmul.f32 %v6638_v29, %v2506_v60  ;;  %v8696_v60 = vld [vmem:[#allocation30_spill] sm:$0xff] }
 0x3b3   :  { %v2516_v37 = vmul.f32 %v2510_v30, %v7801_v14  ;;  %3014 = vmatpush1.bf16.msra.mxu0 %v7778_v16  ;;  %3055 = vmatpush1.bf16.msra.mxu1 %v7780_v38  ;;  %v6640_v14 = vpop.eup %6639  ;;  %v8690_v16 = vld [vmem:[#allocation74_spill] sm:$0xff]  ;;  %v8691_v38 = vld [vmem:[#allocation75_spill] sm:$0xff] }
 0x3b4   :  { %3015 = vmatprep.subr.bf16.mxu0 %v7784_v19  ;;  %3056 = vmatprep.subr.bf16.mxu1 %v7786_v21  ;;  %v2514_v19 = vmul.f32 0.5, %v6640_v14  ;;  %v8693_v21 = vld [vmem:[#allocation77_spill] sm:$0xff]  ;;  %v8697_v30 = vld [vmem:[#allocation31_spill] sm:$0xff] }
 0x3b5   :  { %v7911_v11 = vadd.f32 %v2517_v22, %v2516_v37 }
 0x3b6   :  { %v2515_v6 = vadd.f32 0.5, %v2514_v19 }
 0x3b7   :  { %6641 = vtanh.f32 %v7911_v11  ;;  %3016 = vmatpush1.bf16.msra.mxu0 %v8686_v36  ;;  %3057 = vmatpush1.bf16.msra.mxu1 %v8687_v1 }
 0x3b8   :  { %3017 = vmatprep.subr.bf16.mxu0 %v8688_v12  ;;  %3058 = vmatprep.subr.bf16.mxu1 %v8689_v3 }
 0x3bb   :  { %3018 = vmatpush1.bf16.msra.mxu0 %v8690_v16  ;;  %3059 = vmatpush1.bf16.msra.mxu1 %v8691_v38 }
 0x3bc   :  { %3019 = vmatprep.subr.bf16.mxu0 %v8692_v2  ;;  %3060 = vmatprep.subr.bf16.mxu1 %v7814_v54 }
 0x3bf   :  { %3020 = vmatpush1.bf16.msra.mxu0 %v7818_v56  ;;  %3061 = vmatpush1.bf16.msra.mxu1 %v8693_v21  ;;  %v7937_v56 = vld [vmem:[#allocation12] ss:$16 sps:$4 sm:$0xff]  }
 0x3c0   :  { %3021 = vmatprep.subr.bf16.mxu0 %v7824_v13  ;;  %3062 = vmatprep.subr.bf16.mxu1 %v7826_v33  ;;  %v7933_v13 = vld [vmem:[#allocation12 + $0x4] ss:$16 sps:$4 sm:$0xff]   ;;  %v7935_v33 = vld [vmem:[#allocation12 + $0xc] ss:$16 sps:$4 sm:$0xff]  }
 0x3c1   :  { %v6642_v18 = vpop.eup %6641 }
 0x3c2   :  { %v2520_v51 = vmul.f32 %v6642_v18, %v2515_v6 }
 0x3c3   :  { %3022 = vmatpush1.bf16.msra.mxu0 %v7830_v20  ;;  %3063 = vmatpush1.bf16.msra.mxu1 %v7832_v15  ;;  %v7939_v20 = vld [vmem:[#allocation12 + $0x8] ss:$16 sps:$4 sm:$0xff]   ;;  %v7945_v15 = vld [vmem:[#allocation12 + $0x24] ss:$16 sps:$4 sm:$0xff]  }
 0x3c4   :  { %5835 = vst [vmem:[%s8572_s9 + $0x28] sm:$0xff] %v2520_v51  ;;  %v2814_v54 = vpack.c.bf16 %v2520_v51, %v2520_v51  ;;  %3331 = vmatprep.subr.bf16.mxu0 %v7933_v13  ;;  %3372 = vmatprep.subr.bf16.mxu1 %v7935_v33 }
 0x3c6   :  { %3040 = vmatmul.mubr.bf16.vlgmr.msra.gmra.mrb[60].mxu0 %v2814_v54  ;;  %3081 = vmatmul.mubr.bf16.vlgmr.msra.gmra.mrb[60].mxu1 %v2814_v54 }
 0x3c7   :  { %3363 = vmatprep.mubr.bf16.mxu0 %v8607_v63  ;;  %3404 = vmatprep.mubr.bf16.mxu1 %v8607_v63 }
 0x3c8   :  { %3332 = vmatpush1.bf16.msra.mxu0 %v7937_v56  ;;  %3373 = vmatpush1.bf16.msra.mxu1 %v7939_v20 }
 0x3c9   :  { %3333 = vmatprep.subr.bf16.mxu0 %v7945_v15  ;;  %3374 = vmatprep.subr.bf16.mxu1 %v7947_v58 }
 0x3cc   :  { %3334 = vmatpush1.bf16.msra.mxu0 %v7949_v8  ;;  %3375 = vmatpush1.bf16.msra.mxu1 %v7951_v34 }
 0x3cd   :  { %3335 = vmatprep.subr.bf16.mxu0 %v7957_v50  ;;  %3376 = vmatprep.subr.bf16.mxu1 %v7959_v40 }
 0x3d0   :  { %3336 = vmatpush1.bf16.msra.mxu0 %v7961_v45  ;;  %3377 = vmatpush1.bf16.msra.mxu1 %v7963_v39 }
 0x3d1   :  { %3337 = vmatprep.subr.bf16.mxu0 %v7969_v43  ;;  %3378 = vmatprep.subr.bf16.mxu1 %v7971_v44 }
 0x3d4   :  { %3338 = vmatpush1.bf16.msra.mxu0 %v7973_v48  ;;  %3379 = vmatpush1.bf16.msra.mxu1 %v7975_v49 }
 0x3d5   :  { %3339 = vmatprep.subr.bf16.mxu0 %v7981_v61  ;;  %3380 = vmatprep.subr.bf16.mxu1 %v7983_v55 }
 0x3d8   :  { %3340 = vmatpush1.bf16.msra.mxu0 %v7985_v27  ;;  %3381 = vmatpush1.bf16.msra.mxu1 %v7987_v10 }
 0x3d9   :  { %3341 = vmatprep.subr.bf16.mxu0 %v7993_v17  ;;  %3382 = vmatprep.subr.bf16.mxu1 %v7995_v25 }
 0x3dc   :  { %3342 = vmatpush1.bf16.msra.mxu0 %v7997_v23  ;;  %3383 = vmatpush1.bf16.msra.mxu1 %v7999_v31 }
 0x3dd   :  { %3343 = vmatprep.subr.bf16.mxu0 %v8005_v32  ;;  %3384 = vmatprep.subr.bf16.mxu1 %v8007_v41 }
 0x3e0   :  { %3344 = vmatpush1.bf16.msra.mxu0 %v8009_v0  ;;  %3385 = vmatpush1.bf16.msra.mxu1 %v8011_v35 }
 0x3e1   :  { %3345 = vmatprep.subr.bf16.mxu0 %v8017_v28  ;;  %3386 = vmatprep.subr.bf16.mxu1 %v8019_v42 }
 0x3e4   :  { %3346 = vmatpush1.bf16.msra.mxu0 %v8021_v46  ;;  %3387 = vmatpush1.bf16.msra.mxu1 %v8023_v52 }
 0x3e5   :  { %3615 = vmatprep.subr.bf16.mxu0 %v8029_v53  ;;  %3656 = vmatprep.subr.bf16.mxu1 %v8031_v57 }
 0x479   :  { %v2757_v62 = vpop.f32.mrb[56].mxu0  ;;  %v2798_v5 = vpop.f32.mrb[56].mxu1 }
 0x47a   :  { %v2805_v7 = vadd.f32 %v2757_v62, %v8694_v24  ;;  %v2807_v4 = vadd.f32 %v2798_v5, %v8695_v26  ;;  %v2759_v59 = vpop.f32.mrb[57].mxu0  ;;  %v2800_v9 = vpop.f32.mrb[57].mxu1 }
 0x47b   :  { %v2806_v29 = vadd.f32 %v2759_v59, %v8696_v60  ;;  %v2808_v22 = vadd.f32 %v2800_v9, %v8697_v30  ;;  %v2761_v37 = vpop.f32.mrb[58].mxu0  ;;  %v2802_v36 = vpop.f32.mrb[58].mxu1  ;;  %v8698_v59 = vld [vmem:[#allocation64_spill] sm:$0xff]  ;;  %v8699_v60 = vld [vmem:[#allocation65_spill] sm:$0xff] }
 0x47c   :  { %v3093_v1 = vmul.f32 0.5, %v2805_v7  ;;  %v2762_v12 = vpop.f32.mrb[59].mxu0  ;;  %v2803_v3 = vpop.f32.mrb[59].mxu1  ;;  %v8700_v36 = vld [vmem:[#allocation66_spill] sm:$0xff] }
 0x47d   :  { %v3097_v14 = vmul.f32 0.5, %v2806_v29  ;;  %v3102_v16 = vmul.f32 0.5, %v2808_v22  ;;  %v8701_v12 = vld [vmem:[#allocation67_spill] sm:$0xff] }
 0x47e   :  { %6643 = vtanh.f32 %v3093_v1 }
 0x47f   :  { %6645 = vtanh.f32 %v3097_v14 }
 0x480   :  { %6647 = vtanh.f32 %v2807_v4 }
 0x481   :  { %6649 = vtanh.f32 %v3102_v16 }
 0x488   :  { %v6644_v38 = vpop.eup %6643 }
 0x489   :  { %v6646_v19 = vpop.eup %6645  ;;  %v3095_v2 = vmul.f32 0.5, %v6644_v38 }
 0x48a   :  { %v3099_v21 = vmul.f32 0.5, %v6646_v19  ;;  %v6648_v18 = vpop.eup %6647 }
 0x48b   :  { %v3096_v6 = vadd.f32 0.5, %v3095_v2  ;;  %v6650_v24 = vpop.eup %6649 }
 0x48c   :  { %v3100_v51 = vadd.f32 0.5, %v3099_v21  ;;  %v3104_v7 = vmul.f32 0.5, %v6650_v24  ;;  %v8056_v24 = vld [vmem:[#allocation13 + $0x2c] ss:$16 sps:$4 sm:$0xff]  }
 0x48d   :  { %v3107_v54 = vmul.f32 %v6648_v18, %v3096_v6  ;;  %v8047_v18 = vld [vmem:[#allocation13] ss:$16 sps:$4 sm:$0xff]  }
 0x48e   :  { %v3106_v62 = vmul.f32 %v3100_v51, %v7882_v47  ;;  %v3105_v37 = vadd.f32 0.5, %v3104_v7  ;;  %v8049_v51 = vld [vmem:[#allocation13 + $0x8] ss:$16 sps:$4 sm:$0xff]   ;;  %v8060_v7 = vld [vmem:[#allocation13 + $0x20] ss:$16 sps:$4 sm:$0xff]  }
 0x490   :  { %v8040_v5 = vadd.f32 %v3107_v54, %v3106_v62  ;;  %v8054_v62 = vld [vmem:[#allocation13 + $0x24] ss:$16 sps:$4 sm:$0xff]  }
 0x492   :  { %6651 = vtanh.f32 %v8040_v5 }
 0x499   :  { %v3041_v26 = vpop.f32.mrb[60].mxu0  ;;  %v3082_v4 = vpop.f32.mrb[60].mxu1 }
 0x49a   :  { %v3089_v9 = vadd.f32 %v3041_v26, %v8698_v59  ;;  %v3091_v29 = vadd.f32 %v3082_v4, %v8699_v60  ;;  %v3043_v30 = vpop.f32.mrb[61].mxu0  ;;  %v3084_v22 = vpop.f32.mrb[61].mxu1  ;;  %v8062_v26 = vld [vmem:[#allocation13 + $0x28] ss:$16 sps:$4 sm:$0xff]   ;;  %v8066_v4 = vld [vmem:[#allocation13 + $0x44] ss:$16 sps:$4 sm:$0xff]  }
 0x49b   :  { %v3090_v1 = vadd.f32 %v3043_v30, %v8700_v36  ;;  %v3092_v3 = vadd.f32 %v3084_v22, %v8701_v12  ;;  %v3045_v47 = vpop.f32.mrb[62].mxu0  ;;  %v3086_v14 = vpop.f32.mrb[62].mxu1  ;;  %v8068_v59 = vld [vmem:[#allocation13 + $0x4c] ss:$16 sps:$4 sm:$0xff]   ;;  %v8074_v60 = vld [vmem:[#allocation13 + $0x40] ss:$16 sps:$4 sm:$0xff]  }
 0x49c   :  { %v6652_v16 = vpop.eup %6651  ;;  %v3111_v38 = vmul.f32 0.5, %v3089_v9  ;;  %v3046_v19 = vpop.f32.mrb[63].mxu0  ;;  %v8080_v30 = vld [vmem:[#allocation13 + $0x64] ss:$16 sps:$4 sm:$0xff]   ;;  %v8082_v22 = vld [vmem:[#allocation13 + $0x6c] ss:$16 sps:$4 sm:$0xff]  }
 0x49d   :  { %v3087_v2 = vpop.f32.mrb[63].mxu1  ;;  %v3110_v21 = vmul.f32 %v6652_v16, %v3105_v37  ;;  %v3115_v6 = vmul.f32 0.5, %v3090_v1  ;;  %v3120_v9 = vmul.f32 0.5, %v3092_v3  ;;  %v8086_v3 = vld [vmem:[#allocation13 + $0x60] ss:$16 sps:$4 sm:$0xff]  }
 0x49e   :  { %6653 = vtanh.f32 %v3111_v38  ;;  %v8088_v47 = vld [vmem:[#allocation13 + $0x68] ss:$16 sps:$4 sm:$0xff]   ;;  %v8092_v16 = vld [vmem:[#allocation13 + $0x84] ss:$16 sps:$4 sm:$0xff]   ;;  %v8094_v38 = vld [vmem:[#allocation13 + $0x8c] ss:$16 sps:$4 sm:$0xff]  }
 0x49f   :  { %5900 = vst [vmem:[%s8571_s8 + $0x18] sm:$0xff] %v3110_v21  ;;  %6655 = vtanh.f32 %v3115_v6  ;;  %v3138_v54 = vpack.c.bf16 %v3110_v21, %v3110_v21 }
 0x4a0   :  { %6657 = vtanh.f32 %v3091_v29  ;;  %v8076_v29 = vld [vmem:[#allocation13 + $0x48] ss:$16 sps:$4 sm:$0xff]  }
 0x4a1   :  { %3364 = vmatmul.mubr.bf16.vlgmr.msra.gmra.mrb[64].mxu0 %v3138_v54  ;;  %3405 = vmatmul.mubr.bf16.vlgmr.msra.gmra.mrb[64].mxu1 %v3138_v54  ;;  %6659 = vtanh.f32 %v3120_v9  ;;  %v8099_v54 = vld [vmem:[#allocation13 + $0x80] ss:$16 sps:$4 sm:$0xff]   ;;  %v8101_v9 = vld [vmem:[#allocation13 + $0x88] ss:$16 sps:$4 sm:$0xff]  }
 0x4a2   :  { %3616 = vmatpush1.bf16.msra.mxu0 %v8047_v18  ;;  %3657 = vmatpush1.bf16.msra.mxu1 %v8049_v51  ;;  %8702 = vst [vmem:[#allocation24_spill] sm:$0xff] %v8099_v54  ;;  %8703 = vst [vmem:[#allocation25_spill] sm:$0xff] %v8101_v9 }
 0x4a3   :  { %3617 = vmatprep.subr.bf16.mxu0 %v8054_v62  ;;  %3658 = vmatprep.subr.bf16.mxu1 %v8056_v24 }
 0x4a4   :  { %3647 = vmatprep.mubr.bf16.mxu0 %v8607_v63  ;;  %3688 = vmatprep.mubr.bf16.mxu1 %v8607_v63 }
 0x4a6   :  { %3618 = vmatpush1.bf16.msra.mxu0 %v8060_v7  ;;  %3659 = vmatpush1.bf16.msra.mxu1 %v8062_v26 }
 0x4a7   :  { %3619 = vmatprep.subr.bf16.mxu0 %v8066_v4  ;;  %3660 = vmatprep.subr.bf16.mxu1 %v8068_v59 }
 0x4a8   :  { %v6654_v37 = vpop.eup %6653 }
 0x4a9   :  { %v6656_v36 = vpop.eup %6655  ;;  %v3113_v1 = vmul.f32 0.5, %v6654_v37  ;;  %v8105_v37 = vld [vmem:[#allocation13 + $0xa4] ss:$16 sps:$4 sm:$0xff]  }
 0x4aa   :  { %v3117_v12 = vmul.f32 0.5, %v6656_v36  ;;  %3620 = vmatpush1.bf16.msra.mxu0 %v8074_v60  ;;  %3661 = vmatpush1.bf16.msra.mxu1 %v8076_v29  ;;  %v6658_v19 = vpop.eup %6657  ;;  %8704 = vst [vmem:[#allocation26_spill] sm:$0xff] %v8105_v37  ;;  %v8107_v36 = vld [vmem:[#allocation13 + $0xac] ss:$16 sps:$4 sm:$0xff]  }
 0x4ab   :  { %v3114_v14 = vadd.f32 0.5, %v3113_v1  ;;  %3621 = vmatprep.subr.bf16.mxu0 %v8080_v30  ;;  %3662 = vmatprep.subr.bf16.mxu1 %v8082_v22  ;;  %8705 = vst [vmem:[#allocation27_spill] sm:$0xff] %v8107_v36 }
 0x4ac   :  { %v3118_v2 = vadd.f32 0.5, %v3117_v12  ;;  %v8116_v12 = vld [vmem:[#allocation13 + $0xa8] ss:$16 sps:$4 sm:$0xff]  }
 0x4ad   :  { %v3125_v21 = vmul.f32 %v6658_v19, %v3114_v14  ;;  %8707 = vst [vmem:[#allocation69_spill] sm:$0xff] %v8116_v12  ;;  %v8120_v14 = vld [vmem:[#allocation13 + $0xc4] ss:$16 sps:$4 sm:$0xff]   ;;  %v8122_v19 = vld [vmem:[#allocation13 + $0xcc] ss:$16 sps:$4 sm:$0xff]  }
 0x4ae   :  { %v3124_v6 = vmul.f32 %v3118_v2, %v7911_v11  ;;  %3622 = vmatpush1.bf16.msra.mxu0 %v8086_v3  ;;  %3663 = vmatpush1.bf16.msra.mxu1 %v8088_v47  ;;  %v8114_v11 = vld [vmem:[#allocation13 + $0xa0] ss:$16 sps:$4 sm:$0xff]   ;;  %8708 = vst [vmem:[#allocation70_spill] sm:$0xff] %v8120_v14  ;;  %v6660_v2 = vpop.eup %6659 }
 0x4af   :  { %3623 = vmatprep.subr.bf16.mxu0 %v8092_v16  ;;  %3664 = vmatprep.subr.bf16.mxu1 %v8094_v38  ;;  %8706 = vst [vmem:[#allocation68_spill] sm:$0xff] %v8114_v11 }
 0x4b0   :  { %v8109_v1 = vadd.f32 %v3125_v21, %v3124_v6  ;;  %v8126_v21 = vld [vmem:[#allocation13 + $0xc0] ss:$16 sps:$4 sm:$0xff]   ;;  %v8128_v6 = vld [vmem:[#allocation13 + $0xc8] ss:$16 sps:$4 sm:$0xff]  }
 0x4b1   :  { %8709 = vst [vmem:[#allocation71_spill] sm:$0xff] %v8128_v6 }
 0x4b2   :  { %6661 = vtanh.f32 %v8109_v1  ;;  %3624 = vmatpush1.bf16.msra.mxu0 %v8099_v54  ;;  %3665 = vmatpush1.bf16.msra.mxu1 %v8101_v9  ;;  %v3122_v9 = vmul.f32 0.5, %v6660_v2 }
 0x4b3   :  { %3625 = vmatprep.subr.bf16.mxu0 %v8105_v37  ;;  %3666 = vmatprep.subr.bf16.mxu1 %v8107_v36  ;;  %v8132_v37 = vld [vmem:[#allocation13 + $0xe4] ss:$16 sps:$4 sm:$0xff]   ;;  %v8134_v36 = vld [vmem:[#allocation13 + $0xec] ss:$16 sps:$4 sm:$0xff]  }
 0x4b4   :  { %v3123_v54 = vadd.f32 0.5, %v3122_v9  ;;  %v8715_v9 = vld [vmem:[#allocation61_spill] sm:$0xff] }
 0x4b6   :  { %3626 = vmatpush1.bf16.msra.mxu0 %v8114_v11  ;;  %3667 = vmatpush1.bf16.msra.mxu1 %v8116_v12  ;;  %v8138_v11 = vld [vmem:[#allocation13 + $0xe0] ss:$16 sps:$4 sm:$0xff]   ;;  %v8140_v12 = vld [vmem:[#allocation13 + $0xe8] ss:$16 sps:$4 sm:$0xff]  }
 0x4b7   :  { %3627 = vmatprep.subr.bf16.mxu0 %v8120_v14  ;;  %3668 = vmatprep.subr.bf16.mxu1 %v8122_v19 }
 0x4ba   :  { %3628 = vmatpush1.bf16.msra.mxu0 %v8126_v21  ;;  %3669 = vmatpush1.bf16.msra.mxu1 %v8128_v6 }
 0x4bb   :  { %3629 = vmatprep.subr.bf16.mxu0 %v8132_v37  ;;  %3670 = vmatprep.subr.bf16.mxu1 %v8134_v36 }
 0x4bc   :  { %v6662_v2 = vpop.eup %6661 }
 0x4bd   :  { %v3128_v14 = vmul.f32 %v6662_v2, %v3123_v54 }
 0x4be   :  { %3630 = vmatpush1.bf16.msra.mxu0 %v8138_v11  ;;  %3671 = vmatpush1.bf16.msra.mxu1 %v8140_v12 }
 0x4bf   :  { %5901 = vst [vmem:[%s8572_s9 + $0x20] sm:$0xff] %v3128_v14  ;;  %v3422_v6 = vpack.c.bf16 %v3128_v14, %v3128_v14  ;;  %3939 = vmatprep.subr.bf16.mxu0 %v7933_v13  ;;  %3980 = vmatprep.subr.bf16.mxu1 %v7935_v33 }
 0x4c1   :  { %3648 = vmatmul.mubr.bf16.vlgmr.msra.gmra.mrb[68].mxu0 %v3422_v6  ;;  %3689 = vmatmul.mubr.bf16.vlgmr.msra.gmra.mrb[68].mxu1 %v3422_v6 }
 0x4c2   :  { %3940 = vmatpush1.bf16.msra.mxu0 %v7937_v56  ;;  %3981 = vmatpush1.bf16.msra.mxu1 %v7939_v20  ;;  %v8710_v56 = vld [vmem:[#allocation32_spill] sm:$0xff] }
 0x4c3   :  { %3941 = vmatprep.subr.bf16.mxu0 %v7945_v15  ;;  %3982 = vmatprep.subr.bf16.mxu1 %v7947_v58  ;;  %v8711_v15 = vld [vmem:[#allocation33_spill] sm:$0xff] }
 0x4c4   :  { %3971 = vmatprep.mubr.bf16.mxu0 %v8607_v63  ;;  %4012 = vmatprep.mubr.bf16.mxu1 %v8607_v63 }
 0x4c6   :  { %3942 = vmatpush1.bf16.msra.mxu0 %v7949_v8  ;;  %3983 = vmatpush1.bf16.msra.mxu1 %v7951_v34 }
 0x4c7   :  { %3943 = vmatprep.subr.bf16.mxu0 %v7957_v50  ;;  %3984 = vmatprep.subr.bf16.mxu1 %v7959_v40  ;;  %v8712_v50 = vld [vmem:[#allocation34_spill] sm:$0xff] }
 0x4ca   :  { %3944 = vmatpush1.bf16.msra.mxu0 %v7961_v45  ;;  %3985 = vmatpush1.bf16.msra.mxu1 %v7963_v39  ;;  %v8713_v45 = vld [vmem:[#allocation35_spill] sm:$0xff] }
 0x4cb   :  { %3945 = vmatprep.subr.bf16.mxu0 %v7969_v43  ;;  %3986 = vmatprep.subr.bf16.mxu1 %v7971_v44 }
 0x4ce   :  { %3946 = vmatpush1.bf16.msra.mxu0 %v7973_v48  ;;  %3987 = vmatpush1.bf16.msra.mxu1 %v7975_v49 }
 0x4cf   :  { %3947 = vmatprep.subr.bf16.mxu0 %v7981_v61  ;;  %3988 = vmatprep.subr.bf16.mxu1 %v7983_v55 }
 0x4d2   :  { %3948 = vmatpush1.bf16.msra.mxu0 %v7985_v27  ;;  %3989 = vmatpush1.bf16.msra.mxu1 %v7987_v10 }
 0x4d3   :  { %3949 = vmatprep.subr.bf16.mxu0 %v7993_v17  ;;  %3990 = vmatprep.subr.bf16.mxu1 %v7995_v25 }
 0x4d6   :  { %3950 = vmatpush1.bf16.msra.mxu0 %v7997_v23  ;;  %3991 = vmatpush1.bf16.msra.mxu1 %v7999_v31 }
 0x4d7   :  { %3951 = vmatprep.subr.bf16.mxu0 %v8005_v32  ;;  %3992 = vmatprep.subr.bf16.mxu1 %v8007_v41 }
 0x4da   :  { %3952 = vmatpush1.bf16.msra.mxu0 %v8009_v0  ;;  %3993 = vmatpush1.bf16.msra.mxu1 %v8011_v35 }
 0x4db   :  { %3953 = vmatprep.subr.bf16.mxu0 %v8017_v28  ;;  %3994 = vmatprep.subr.bf16.mxu1 %v8019_v42 }
 0x4de   :  { %3954 = vmatpush1.bf16.msra.mxu0 %v8021_v46  ;;  %3995 = vmatpush1.bf16.msra.mxu1 %v8023_v52 }
 0x4df   :  { %4223 = vmatprep.subr.bf16.mxu0 %v8029_v53  ;;  %4264 = vmatprep.subr.bf16.mxu1 %v8031_v57  ;;  %v8714_v57 = vld [vmem:[#allocation60_spill] sm:$0xff] }
 0x574   :  { %v3365_v13 = vpop.f32.mrb[64].mxu0  ;;  %v3406_v33 = vpop.f32.mrb[64].mxu1 }
 0x575   :  { %v3413_v20 = vadd.f32 %v3365_v13, %v8710_v56  ;;  %v3415_v58 = vadd.f32 %v3406_v33, %v8711_v15  ;;  %v3367_v8 = vpop.f32.mrb[65].mxu0  ;;  %v3408_v34 = vpop.f32.mrb[65].mxu1  ;;  %v8716_v33 = vld [vmem:[#allocation62_spill] sm:$0xff] }
 0x576   :  { %v3414_v40 = vadd.f32 %v3367_v8, %v8712_v50  ;;  %v3416_v39 = vadd.f32 %v3408_v34, %v8713_v45  ;;  %v3369_v43 = vpop.f32.mrb[66].mxu0  ;;  %v3410_v44 = vpop.f32.mrb[66].mxu1 }
 0x577   :  { %v3701_v48 = vmul.f32 0.5, %v3413_v20  ;;  %v3370_v49 = vpop.f32.mrb[67].mxu0  ;;  %v3411_v61 = vpop.f32.mrb[67].mxu1  ;;  %v8717_v20 = vld [vmem:[#allocation63_spill] sm:$0xff] }
 0x578   :  { %v3705_v55 = vmul.f32 0.5, %v3414_v40  ;;  %v3710_v27 = vmul.f32 0.5, %v3416_v39  ;;  %v8724_v61 = vld [vmem:[#allocation70_spill] sm:$0xff] }
 0x579   :  { %6663 = vtanh.f32 %v3701_v48 }
 0x57a   :  { %6665 = vtanh.f32 %v3705_v55 }
 0x57b   :  { %6667 = vtanh.f32 %v3415_v58 }
 0x57c   :  { %6669 = vtanh.f32 %v3710_v27 }
 0x583   :  { %v6664_v10 = vpop.eup %6663 }
 0x584   :  { %v6666_v17 = vpop.eup %6665  ;;  %v3703_v25 = vmul.f32 0.5, %v6664_v10 }
 0x585   :  { %v3707_v23 = vmul.f32 0.5, %v6666_v17  ;;  %v6668_v32 = vpop.eup %6667  ;;  %v8255_v17 = vld [vmem:[#allocation12 + $0x2c] ss:$16 sps:$4 sm:$0xff]  }
 0x586   :  { %v3704_v31 = vadd.f32 0.5, %v3703_v25  ;;  %v6670_v42 = vpop.eup %6669  ;;  %v8257_v25 = vld [vmem:[#allocation12 + $0x20] ss:$16 sps:$4 sm:$0xff]  }
 0x587   :  { %v3708_v41 = vadd.f32 0.5, %v3707_v23  ;;  %v3712_v46 = vmul.f32 0.5, %v6670_v42  ;;  %v8259_v23 = vld [vmem:[#allocation12 + $0x28] ss:$16 sps:$4 sm:$0xff]   ;;  %v8279_v42 = vld [vmem:[#allocation12 + $0x6c] ss:$16 sps:$4 sm:$0xff]  }
 0x588   :  { %v3715_v0 = vmul.f32 %v6668_v32, %v3704_v31  ;;  %v8265_v31 = vld [vmem:[#allocation12 + $0x44] ss:$16 sps:$4 sm:$0xff]   ;;  %v8267_v32 = vld [vmem:[#allocation12 + $0x4c] ss:$16 sps:$4 sm:$0xff]  }
 0x589   :  { %v3714_v35 = vmul.f32 %v3708_v41, %v8040_v5  ;;  %v3713_v13 = vadd.f32 0.5, %v3712_v46  ;;  %v8269_v41 = vld [vmem:[#allocation12 + $0x40] ss:$16 sps:$4 sm:$0xff]  }
 0x58a   :  { %v8281_v46 = vld [vmem:[#allocation12 + $0x60] ss:$16 sps:$4 sm:$0xff]  }
 0x58b   :  { %v8190_v28 = vadd.f32 %v3715_v0, %v3714_v35  ;;  %v8271_v0 = vld [vmem:[#allocation12 + $0x48] ss:$16 sps:$4 sm:$0xff]   ;;  %v8277_v35 = vld [vmem:[#allocation12 + $0x64] ss:$16 sps:$4 sm:$0xff]  }
 0x58d   :  { %6671 = vtanh.f32 %v8190_v28 }
 0x594   :  { %v3649_v52 = vpop.f32.mrb[68].mxu0  ;;  %v3690_v53 = vpop.f32.mrb[68].mxu1 }
 0x595   :  { %v3697_v54 = vadd.f32 %v3649_v52, %v8714_v57  ;;  %v3699_v14 = vadd.f32 %v3690_v53, %v8715_v9  ;;  %v3651_v6 = vpop.f32.mrb[69].mxu0  ;;  %v3692_v2 = vpop.f32.mrb[69].mxu1  ;;  %v8283_v52 = vld [vmem:[#allocation12 + $0x68] ss:$16 sps:$4 sm:$0xff]   ;;  %v8289_v53 = vld [vmem:[#allocation12 + $0x84] ss:$16 sps:$4 sm:$0xff]  }
 0x596   :  { %v3698_v56 = vadd.f32 %v3651_v6, %v8716_v33  ;;  %v3700_v15 = vadd.f32 %v3692_v2, %v8717_v20  ;;  %v3653_v5 = vpop.f32.mrb[70].mxu0  ;;  %v3694_v58 = vpop.f32.mrb[70].mxu1  ;;  %v8291_v57 = vld [vmem:[#allocation12 + $0x8c] ss:$16 sps:$4 sm:$0xff]   ;;  %v8295_v9 = vld [vmem:[#allocation12 + $0x88] ss:$16 sps:$4 sm:$0xff]  }
 0x597   :  { %v6672_v8 = vpop.eup %6671  ;;  %v3719_v34 = vmul.f32 0.5, %v3697_v54  ;;  %v3654_v50 = vpop.f32.mrb[71].mxu0  ;;  %v8293_v54 = vld [vmem:[#allocation12 + $0x80] ss:$16 sps:$4 sm:$0xff]   ;;  %v8303_v6 = vld [vmem:[#allocation12 + $0xac] ss:$16 sps:$4 sm:$0xff]  }
 0x598   :  { %v3695_v40 = vpop.f32.mrb[71].mxu1  ;;  %v3718_v45 = vmul.f32 %v6672_v8, %v3713_v13  ;;  %v3723_v39 = vmul.f32 0.5, %v3698_v56  ;;  %v3728_v44 = vmul.f32 0.5, %v3700_v15  ;;  %v8305_v2 = vld [vmem:[#allocation12 + $0xa0] ss:$16 sps:$4 sm:$0xff]  }
 0x599   :  { %6673 = vtanh.f32 %v3719_v34  ;;  %v8307_v13 = vld [vmem:[#allocation12 + $0xa8] ss:$16 sps:$4 sm:$0xff]   ;;  %v8313_v33 = vld [vmem:[#allocation12 + $0xc4] ss:$16 sps:$4 sm:$0xff]   ;;  %v8315_v56 = vld [vmem:[#allocation12 + $0xcc] ss:$16 sps:$4 sm:$0xff]  }
 0x59a   :  { %5966 = vst [vmem:[%s8571_s8 + $0x20] sm:$0xff] %v3718_v45  ;;  %6675 = vtanh.f32 %v3723_v39  ;;  %v3746_v43 = vpack.c.bf16 %v3718_v45, %v3718_v45  ;;  %v8317_v20 = vld [vmem:[#allocation12 + $0xc0] ss:$16 sps:$4 sm:$0xff]   ;;  %v8319_v15 = vld [vmem:[#allocation12 + $0xc8] ss:$16 sps:$4 sm:$0xff]  }
 0x59b   :  { %6677 = vtanh.f32 %v3699_v14  ;;  %v8301_v14 = vld [vmem:[#allocation12 + $0xa4] ss:$16 sps:$4 sm:$0xff]   ;;  %v8327_v58 = vld [vmem:[#allocation12 + $0xec] ss:$16 sps:$4 sm:$0xff]   ;;  %v8329_v8 = vld [vmem:[#allocation12 + $0xe0] ss:$16 sps:$4 sm:$0xff]  }
 0x59c   :  { %3972 = vmatmul.mubr.bf16.vlgmr.msra.gmra.mrb[72].mxu0 %v3746_v43  ;;  %4013 = vmatmul.mubr.bf16.vlgmr.msra.gmra.mrb[72].mxu1 %v3746_v43  ;;  %6679 = vtanh.f32 %v3728_v44  ;;  %v8325_v5 = vld [vmem:[#allocation12 + $0xe4] ss:$16 sps:$4 sm:$0xff]   ;;  %v8331_v34 = vld [vmem:[#allocation12 + $0xe8] ss:$16 sps:$4 sm:$0xff]   ;;  %v8339_v40 = vld [vmem:[#allocation13 + $0xc] ss:$16 sps:$4 sm:$0xff]  }
 0x59d   :  { %4224 = vmatpush1.bf16.msra.mxu0 %v8047_v18  ;;  %4265 = vmatpush1.bf16.msra.mxu1 %v8049_v51  ;;  %v8337_v50 = vld [vmem:[#allocation13 + $0x4] ss:$16 sps:$4 sm:$0xff]   ;;  %v8726_v43 = vld [vmem:[#allocation36_spill] sm:$0xff] }
 0x59e   :  { %4225 = vmatprep.subr.bf16.mxu0 %v8054_v62  ;;  %4266 = vmatprep.subr.bf16.mxu1 %v8056_v24 }
 0x59f   :  { %4255 = vmatprep.mubr.bf16.mxu0 %v8607_v63  ;;  %4296 = vmatprep.mubr.bf16.mxu1 %v8607_v63 }
 0x5a1   :  { %4226 = vmatpush1.bf16.msra.mxu0 %v8060_v7  ;;  %4267 = vmatpush1.bf16.msra.mxu1 %v8062_v26 }
 0x5a2   :  { %4227 = vmatprep.subr.bf16.mxu0 %v8066_v4  ;;  %4268 = vmatprep.subr.bf16.mxu1 %v8068_v59 }
 0x5a3   :  { %v6674_v18 = vpop.eup %6673 }
 0x5a4   :  { %v6676_v48 = vpop.eup %6675  ;;  %v3721_v51 = vmul.f32 0.5, %v6674_v18  ;;  %v8727_v18 = vld [vmem:[#allocation37_spill] sm:$0xff] }
 0x5a5   :  { %v3725_v49 = vmul.f32 0.5, %v6676_v48  ;;  %4228 = vmatpush1.bf16.msra.mxu0 %v8074_v60  ;;  %4269 = vmatpush1.bf16.msra.mxu1 %v8076_v29  ;;  %v6678_v24 = vpop.eup %6677  ;;  %v8718_v60 = vld [vmem:[#allocation24_spill] sm:$0xff]  ;;  %v8719_v29 = vld [vmem:[#allocation25_spill] sm:$0xff] }
 0x5a6   :  { %v3722_v62 = vadd.f32 0.5, %v3721_v51  ;;  %4229 = vmatprep.subr.bf16.mxu0 %v8080_v30  ;;  %4270 = vmatprep.subr.bf16.mxu1 %v8082_v22  ;;  %v8720_v30 = vld [vmem:[#allocation26_spill] sm:$0xff]  ;;  %v8721_v22 = vld [vmem:[#allocation27_spill] sm:$0xff] }
 0x5a7   :  { %v3726_v7 = vadd.f32 0.5, %v3725_v49 }
 0x5a8   :  { %v3733_v26 = vmul.f32 %v6678_v24, %v3722_v62  ;;  %v8728_v62 = vld [vmem:[#allocation38_spill] sm:$0xff] }
 0x5a9   :  { %v3732_v4 = vmul.f32 %v3726_v7, %v8109_v1  ;;  %4230 = vmatpush1.bf16.msra.mxu0 %v8086_v3  ;;  %4271 = vmatpush1.bf16.msra.mxu1 %v8088_v47  ;;  %v6680_v1 = vpop.eup %6679  ;;  %v8722_v3 = vld [vmem:[#allocation68_spill] sm:$0xff]  ;;  %v8723_v47 = vld [vmem:[#allocation69_spill] sm:$0xff]  ;;  %v8729_v7 = vld [vmem:[#allocation39_spill] sm:$0xff] }
 0x5aa   :  { %4231 = vmatprep.subr.bf16.mxu0 %v8092_v16  ;;  %4272 = vmatprep.subr.bf16.mxu1 %v8094_v38  ;;  %v3730_v16 = vmul.f32 0.5, %v6680_v1  ;;  %v8725_v38 = vld [vmem:[#allocation71_spill] sm:$0xff] }
 0x5ab   :  { %v8219_v59 = vadd.f32 %v3733_v26, %v3732_v4 }
 0x5ac   :  { %v3731_v55 = vadd.f32 0.5, %v3730_v16 }
 0x5ad   :  { %6681 = vtanh.f32 %v8219_v59  ;;  %4232 = vmatpush1.bf16.msra.mxu0 %v8718_v60  ;;  %4273 = vmatpush1.bf16.msra.mxu1 %v8719_v29 }
 0x5ae   :  { %4233 = vmatprep.subr.bf16.mxu0 %v8720_v30  ;;  %4274 = vmatprep.subr.bf16.mxu1 %v8721_v22 }
 0x5b1   :  { %4234 = vmatpush1.bf16.msra.mxu0 %v8722_v3  ;;  %4275 = vmatpush1.bf16.msra.mxu1 %v8723_v47 }
 0x5b2   :  { %4235 = vmatprep.subr.bf16.mxu0 %v8724_v61  ;;  %4276 = vmatprep.subr.bf16.mxu1 %v8122_v19 }
 0x5b5   :  { %4236 = vmatpush1.bf16.msra.mxu0 %v8126_v21  ;;  %4277 = vmatpush1.bf16.msra.mxu1 %v8725_v38  ;;  %v8245_v21 = vld [vmem:[#allocation12] ss:$16 sps:$4 sm:$0xff]  }
 0x5b6   :  { %4237 = vmatprep.subr.bf16.mxu0 %v8132_v37  ;;  %4278 = vmatprep.subr.bf16.mxu1 %v8134_v36  ;;  %v8241_v37 = vld [vmem:[#allocation12 + $0x4] ss:$16 sps:$4 sm:$0xff]   ;;  %v8243_v36 = vld [vmem:[#allocation12 + $0xc] ss:$16 sps:$4 sm:$0xff]  }
 0x5b7   :  { %v6682_v27 = vpop.eup %6681 }
 0x5b8   :  { %v3736_v10 = vmul.f32 %v6682_v27, %v3731_v55 }
 0x5b9   :  { %4238 = vmatpush1.bf16.msra.mxu0 %v8138_v11  ;;  %4279 = vmatpush1.bf16.msra.mxu1 %v8140_v12  ;;  %v8247_v11 = vld [vmem:[#allocation12 + $0x8] ss:$16 sps:$4 sm:$0xff]   ;;  %v8253_v12 = vld [vmem:[#allocation12 + $0x24] ss:$16 sps:$4 sm:$0xff]  }
 0x5ba   :  { %5967 = vst [vmem:[%s8572_s9 + $0x18] sm:$0xff] %v3736_v10  ;;  %v4030_v19 = vpack.c.bf16 %v3736_v10, %v3736_v10  ;;  %4547 = vmatprep.subr.bf16.mxu0 %v8241_v37  ;;  %4588 = vmatprep.subr.bf16.mxu1 %v8243_v36 }
 0x5bc   :  { %4256 = vmatmul.mubr.bf16.vlgmr.msra.gmra.mrb[76].mxu0 %v4030_v19  ;;  %4297 = vmatmul.mubr.bf16.vlgmr.msra.gmra.mrb[76].mxu1 %v4030_v19 }
 0x5bd   :  { %4579 = vmatprep.mubr.bf16.mxu0 %v8607_v63  ;;  %4620 = vmatprep.mubr.bf16.mxu1 %v8607_v63 }
 0x5be   :  { %4548 = vmatpush1.bf16.msra.mxu0 %v8245_v21  ;;  %4589 = vmatpush1.bf16.msra.mxu1 %v8247_v11 }
 0x5bf   :  { %4549 = vmatprep.subr.bf16.mxu0 %v8253_v12  ;;  %4590 = vmatprep.subr.bf16.mxu1 %v8255_v17 }
 0x5c2   :  { %4550 = vmatpush1.bf16.msra.mxu0 %v8257_v25  ;;  %4591 = vmatpush1.bf16.msra.mxu1 %v8259_v23 }
 0x5c3   :  { %4551 = vmatprep.subr.bf16.mxu0 %v8265_v31  ;;  %4592 = vmatprep.subr.bf16.mxu1 %v8267_v32 }
 0x5c6   :  { %4552 = vmatpush1.bf16.msra.mxu0 %v8269_v41  ;;  %4593 = vmatpush1.bf16.msra.mxu1 %v8271_v0 }
 0x5c7   :  { %4553 = vmatprep.subr.bf16.mxu0 %v8277_v35  ;;  %4594 = vmatprep.subr.bf16.mxu1 %v8279_v42 }
 0x5ca   :  { %4554 = vmatpush1.bf16.msra.mxu0 %v8281_v46  ;;  %4595 = vmatpush1.bf16.msra.mxu1 %v8283_v52 }
 0x5cb   :  { %4555 = vmatprep.subr.bf16.mxu0 %v8289_v53  ;;  %4596 = vmatprep.subr.bf16.mxu1 %v8291_v57 }
 0x5ce   :  { %4556 = vmatpush1.bf16.msra.mxu0 %v8293_v54  ;;  %4597 = vmatpush1.bf16.msra.mxu1 %v8295_v9 }
 0x5cf   :  { %4557 = vmatprep.subr.bf16.mxu0 %v8301_v14  ;;  %4598 = vmatprep.subr.bf16.mxu1 %v8303_v6 }
 0x5d2   :  { %4558 = vmatpush1.bf16.msra.mxu0 %v8305_v2  ;;  %4599 = vmatpush1.bf16.msra.mxu1 %v8307_v13 }
 0x5d3   :  { %4559 = vmatprep.subr.bf16.mxu0 %v8313_v33  ;;  %4600 = vmatprep.subr.bf16.mxu1 %v8315_v56 }
 0x5d6   :  { %4560 = vmatpush1.bf16.msra.mxu0 %v8317_v20  ;;  %4601 = vmatpush1.bf16.msra.mxu1 %v8319_v15 }
 0x5d7   :  { %4561 = vmatprep.subr.bf16.mxu0 %v8325_v5  ;;  %4602 = vmatprep.subr.bf16.mxu1 %v8327_v58 }
 0x5da   :  { %4562 = vmatpush1.bf16.msra.mxu0 %v8329_v8  ;;  %4603 = vmatpush1.bf16.msra.mxu1 %v8331_v34 }
 0x5db   :  { %4831 = vmatprep.subr.bf16.mxu0 %v8337_v50  ;;  %4872 = vmatprep.subr.bf16.mxu1 %v8339_v40 }
 0x66f   :  { %v3973_v45 = vpop.f32.mrb[72].mxu0  ;;  %v4014_v39 = vpop.f32.mrb[72].mxu1 }
 0x670   :  { %v4021_v44 = vadd.f32 %v3973_v45, %v8726_v43  ;;  %v4023_v48 = vadd.f32 %v4014_v39, %v8727_v18  ;;  %v3975_v51 = vpop.f32.mrb[73].mxu0  ;;  %v4016_v49 = vpop.f32.mrb[73].mxu1 }
 0x671   :  { %v4022_v24 = vadd.f32 %v3975_v51, %v8728_v62  ;;  %v4024_v26 = vadd.f32 %v4016_v49, %v8729_v7  ;;  %v3977_v4 = vpop.f32.mrb[74].mxu0  ;;  %v4018_v60 = vpop.f32.mrb[74].mxu1  ;;  %v8730_v51 = vld [vmem:[#allocation56_spill] sm:$0xff]  ;;  %v8731_v62 = vld [vmem:[#allocation57_spill] sm:$0xff] }
 0x672   :  { %v4309_v29 = vmul.f32 0.5, %v4021_v44  ;;  %v3978_v30 = vpop.f32.mrb[75].mxu0  ;;  %v4019_v22 = vpop.f32.mrb[75].mxu1  ;;  %v8732_v60 = vld [vmem:[#allocation58_spill] sm:$0xff] }
 0x673   :  { %v4313_v1 = vmul.f32 0.5, %v4022_v24  ;;  %v4318_v3 = vmul.f32 0.5, %v4024_v26  ;;  %v8733_v30 = vld [vmem:[#allocation59_spill] sm:$0xff] }
 0x674   :  { %6683 = vtanh.f32 %v4309_v29 }
 0x675   :  { %6685 = vtanh.f32 %v4313_v1 }
 0x676   :  { %6687 = vtanh.f32 %v4023_v48 }
 0x677   :  { %6689 = vtanh.f32 %v4318_v3 }
 0x67e   :  { %v6684_v47 = vpop.eup %6683 }
 0x67f   :  { %v6686_v16 = vpop.eup %6685  ;;  %v4311_v61 = vmul.f32 0.5, %v6684_v47 }
 0x680   :  { %v4315_v38 = vmul.f32 0.5, %v6686_v16  ;;  %v6688_v27 = vpop.eup %6687 }
 0x681   :  { %v4312_v55 = vadd.f32 0.5, %v4311_v61  ;;  %v6690_v43 = vpop.eup %6689 }
 0x682   :  { %v4316_v10 = vadd.f32 0.5, %v4315_v38  ;;  %v4320_v44 = vmul.f32 0.5, %v6690_v43  ;;  %v8364_v43 = vld [vmem:[#allocation13 + $0x2c] ss:$16 sps:$4 sm:$0xff]  }
 0x683   :  { %v4323_v19 = vmul.f32 %v6688_v27, %v4312_v55  ;;  %v8355_v27 = vld [vmem:[#allocation13] ss:$16 sps:$4 sm:$0xff]  }
 0x684   :  { %v4322_v45 = vmul.f32 %v4316_v10, %v8190_v28  ;;  %v4321_v4 = vadd.f32 0.5, %v4320_v44  ;;  %v8357_v10 = vld [vmem:[#allocation13 + $0x8] ss:$16 sps:$4 sm:$0xff]   ;;  %v8368_v44 = vld [vmem:[#allocation13 + $0x20] ss:$16 sps:$4 sm:$0xff]  }
 0x686   :  { %v8348_v39 = vadd.f32 %v4323_v19, %v4322_v45  ;;  %v8362_v45 = vld [vmem:[#allocation13 + $0x24] ss:$16 sps:$4 sm:$0xff]  }
 0x688   :  { %6691 = vtanh.f32 %v8348_v39 }
 0x68f   :  { %v4257_v18 = vpop.f32.mrb[76].mxu0  ;;  %v4298_v48 = vpop.f32.mrb[76].mxu1 }
 0x690   :  { %v4305_v49 = vadd.f32 %v4257_v18, %v8730_v51  ;;  %v4307_v24 = vadd.f32 %v4298_v48, %v8731_v62  ;;  %v4259_v7 = vpop.f32.mrb[77].mxu0  ;;  %v4300_v26 = vpop.f32.mrb[77].mxu1  ;;  %v8370_v18 = vld [vmem:[#allocation13 + $0x28] ss:$16 sps:$4 sm:$0xff]   ;;  %v8374_v48 = vld [vmem:[#allocation13 + $0x44] ss:$16 sps:$4 sm:$0xff]  }
 0x691   :  { %v4306_v29 = vadd.f32 %v4259_v7, %v8732_v60  ;;  %v4308_v22 = vadd.f32 %v4300_v26, %v8733_v30  ;;  %v4261_v28 = vpop.f32.mrb[78].mxu0  ;;  %v4302_v1 = vpop.f32.mrb[78].mxu1  ;;  %v8376_v51 = vld [vmem:[#allocation13 + $0x4c] ss:$16 sps:$4 sm:$0xff]   ;;  %v8382_v62 = vld [vmem:[#allocation13 + $0x40] ss:$16 sps:$4 sm:$0xff]  }
 0x692   :  { %v6692_v3 = vpop.eup %6691  ;;  %v4327_v47 = vmul.f32 0.5, %v4305_v49  ;;  %v4262_v16 = vpop.f32.mrb[79].mxu0  ;;  %v8388_v7 = vld [vmem:[#allocation13 + $0x64] ss:$16 sps:$4 sm:$0xff]   ;;  %v8390_v26 = vld [vmem:[#allocation13 + $0x6c] ss:$16 sps:$4 sm:$0xff]  }
 0x693   :  { %v4303_v61 = vpop.f32.mrb[79].mxu1  ;;  %v4326_v38 = vmul.f32 %v6692_v3, %v4321_v4  ;;  %v4331_v55 = vmul.f32 0.5, %v4306_v29  ;;  %v4336_v49 = vmul.f32 0.5, %v4308_v22  ;;  %v8394_v22 = vld [vmem:[#allocation13 + $0x60] ss:$16 sps:$4 sm:$0xff]  }
 0x694   :  { %6693 = vtanh.f32 %v4327_v47  ;;  %v8396_v28 = vld [vmem:[#allocation13 + $0x68] ss:$16 sps:$4 sm:$0xff]   ;;  %v8400_v3 = vld [vmem:[#allocation13 + $0x84] ss:$16 sps:$4 sm:$0xff]   ;;  %v8402_v47 = vld [vmem:[#allocation13 + $0x8c] ss:$16 sps:$4 sm:$0xff]  }
 0x695   :  { %6032 = vst [vmem:[%s8571_s8 + $0x28] sm:$0xff] %v4326_v38  ;;  %6695 = vtanh.f32 %v4331_v55  ;;  %v4354_v19 = vpack.c.bf16 %v4326_v38, %v4326_v38 }
 0x696   :  { %6697 = vtanh.f32 %v4307_v24  ;;  %v8384_v24 = vld [vmem:[#allocation13 + $0x48] ss:$16 sps:$4 sm:$0xff]  }
 0x697   :  { %4580 = vmatmul.mubr.bf16.vlgmr.msra.gmra.mrb[80].mxu0 %v4354_v19  ;;  %4621 = vmatmul.mubr.bf16.vlgmr.msra.gmra.mrb[80].mxu1 %v4354_v19  ;;  %6699 = vtanh.f32 %v4336_v49  ;;  %v8407_v19 = vld [vmem:[#allocation13 + $0x80] ss:$16 sps:$4 sm:$0xff]   ;;  %v8409_v49 = vld [vmem:[#allocation13 + $0x88] ss:$16 sps:$4 sm:$0xff]  }
 0x698   :  { %4832 = vmatpush1.bf16.msra.mxu0 %v8355_v27  ;;  %4873 = vmatpush1.bf16.msra.mxu1 %v8357_v10  ;;  %8734 = vst [vmem:[#allocation22_spill] sm:$0xff] %v8407_v19  ;;  %8735 = vst [vmem:[#allocation23_spill] sm:$0xff] %v8409_v49 }
 0x699   :  { %4833 = vmatprep.subr.bf16.mxu0 %v8362_v45  ;;  %4874 = vmatprep.subr.bf16.mxu1 %v8364_v43 }
 0x69a   :  { %4863 = vmatprep.mubr.bf16.mxu0 %v8607_v63  ;;  %4904 = vmatprep.mubr.bf16.mxu1 %v8607_v63 }
 0x69c   :  { %4834 = vmatpush1.bf16.msra.mxu0 %v8368_v44  ;;  %4875 = vmatpush1.bf16.msra.mxu1 %v8370_v18 }
 0x69d   :  { %4835 = vmatprep.subr.bf16.mxu0 %v8374_v48  ;;  %4876 = vmatprep.subr.bf16.mxu1 %v8376_v51 }
 0x69e   :  { %v6694_v4 = vpop.eup %6693 }
 0x69f   :  { %v6696_v60 = vpop.eup %6695  ;;  %v4329_v29 = vmul.f32 0.5, %v6694_v4  ;;  %v8413_v4 = vld [vmem:[#allocation13 + $0xa4] ss:$16 sps:$4 sm:$0xff]  }
 0x6a0   :  { %v4333_v30 = vmul.f32 0.5, %v6696_v60  ;;  %4836 = vmatpush1.bf16.msra.mxu0 %v8382_v62  ;;  %4877 = vmatpush1.bf16.msra.mxu1 %v8384_v24  ;;  %v6698_v16 = vpop.eup %6697  ;;  %8736 = vst [vmem:[#allocation72_spill] sm:$0xff] %v8413_v4  ;;  %v8415_v60 = vld [vmem:[#allocation13 + $0xac] ss:$16 sps:$4 sm:$0xff]  }
 0x6a1   :  { %v4330_v1 = vadd.f32 0.5, %v4329_v29  ;;  %4837 = vmatprep.subr.bf16.mxu0 %v8388_v7  ;;  %4878 = vmatprep.subr.bf16.mxu1 %v8390_v26  ;;  %8737 = vst [vmem:[#allocation73_spill] sm:$0xff] %v8415_v60 }
 0x6a2   :  { %v4334_v61 = vadd.f32 0.5, %v4333_v30  ;;  %v8424_v30 = vld [vmem:[#allocation13 + $0xa8] ss:$16 sps:$4 sm:$0xff]  }
 0x6a3   :  { %v4341_v38 = vmul.f32 %v6698_v16, %v4330_v1  ;;  %8739 = vst [vmem:[#allocation75_spill] sm:$0xff] %v8424_v30  ;;  %v8428_v1 = vld [vmem:[#allocation13 + $0xc4] ss:$16 sps:$4 sm:$0xff]   ;;  %v8430_v16 = vld [vmem:[#allocation13 + $0xcc] ss:$16 sps:$4 sm:$0xff]  }
 0x6a4   :  { %v4340_v55 = vmul.f32 %v4334_v61, %v8219_v59  ;;  %4838 = vmatpush1.bf16.msra.mxu0 %v8394_v22  ;;  %4879 = vmatpush1.bf16.msra.mxu1 %v8396_v28  ;;  %v8422_v59 = vld [vmem:[#allocation13 + $0xa0] ss:$16 sps:$4 sm:$0xff]   ;;  %8740 = vst [vmem:[#allocation76_spill] sm:$0xff] %v8428_v1  ;;  %v6700_v61 = vpop.eup %6699 }
 0x6a5   :  { %4839 = vmatprep.subr.bf16.mxu0 %v8400_v3  ;;  %4880 = vmatprep.subr.bf16.mxu1 %v8402_v47  ;;  %8738 = vst [vmem:[#allocation74_spill] sm:$0xff] %v8422_v59 }
 0x6a6   :  { %v8417_v29 = vadd.f32 %v4341_v38, %v4340_v55  ;;  %v8434_v38 = vld [vmem:[#allocation13 + $0xc0] ss:$16 sps:$4 sm:$0xff]   ;;  %v8436_v55 = vld [vmem:[#allocation13 + $0xc8] ss:$16 sps:$4 sm:$0xff]  }
 0x6a7   :  { %8741 = vst [vmem:[#allocation77_spill] sm:$0xff] %v8436_v55 }
 0x6a8   :  { %6701 = vtanh.f32 %v8417_v29  ;;  %4840 = vmatpush1.bf16.msra.mxu0 %v8407_v19  ;;  %4881 = vmatpush1.bf16.msra.mxu1 %v8409_v49  ;;  %v4338_v49 = vmul.f32 0.5, %v6700_v61 }
 0x6a9   :  { %4841 = vmatprep.subr.bf16.mxu0 %v8413_v4  ;;  %4882 = vmatprep.subr.bf16.mxu1 %v8415_v60  ;;  %v8440_v4 = vld [vmem:[#allocation13 + $0xe4] ss:$16 sps:$4 sm:$0xff]   ;;  %v8442_v60 = vld [vmem:[#allocation13 + $0xec] ss:$16 sps:$4 sm:$0xff]  }
 0x6aa   :  { %v4339_v19 = vadd.f32 0.5, %v4338_v49  ;;  %v8747_v49 = vld [vmem:[#allocation53_spill] sm:$0xff] }
 0x6ac   :  { %4842 = vmatpush1.bf16.msra.mxu0 %v8422_v59  ;;  %4883 = vmatpush1.bf16.msra.mxu1 %v8424_v30  ;;  %v8446_v59 = vld [vmem:[#allocation13 + $0xe0] ss:$16 sps:$4 sm:$0xff]   ;;  %v8448_v30 = vld [vmem:[#allocation13 + $0xe8] ss:$16 sps:$4 sm:$0xff]  }
 0x6ad   :  { %4843 = vmatprep.subr.bf16.mxu0 %v8428_v1  ;;  %4884 = vmatprep.subr.bf16.mxu1 %v8430_v16 }
 0x6b0   :  { %4844 = vmatpush1.bf16.msra.mxu0 %v8434_v38  ;;  %4885 = vmatpush1.bf16.msra.mxu1 %v8436_v55 }
 0x6b1   :  { %4845 = vmatprep.subr.bf16.mxu0 %v8440_v4  ;;  %4886 = vmatprep.subr.bf16.mxu1 %v8442_v60 }
 0x6b2   :  { %v6702_v61 = vpop.eup %6701 }
 0x6b3   :  { %v4344_v1 = vmul.f32 %v6702_v61, %v4339_v19 }
 0x6b4   :  { %4846 = vmatpush1.bf16.msra.mxu0 %v8446_v59  ;;  %4887 = vmatpush1.bf16.msra.mxu1 %v8448_v30 }
 0x6b5   :  { %6033 = vst [vmem:[%s8572_s9 + $0x10] sm:$0xff] %v4344_v1  ;;  %v4638_v55 = vpack.c.bf16 %v4344_v1, %v4344_v1  ;;  %5155 = vmatprep.subr.bf16.mxu0 %v8241_v37  ;;  %5196 = vmatprep.subr.bf16.mxu1 %v8243_v36 }
 0x6b7   :  { %4864 = vmatmul.mubr.bf16.vlgmr.msra.gmra.mrb[84].mxu0 %v4638_v55  ;;  %4905 = vmatmul.mubr.bf16.vlgmr.msra.gmra.mrb[84].mxu1 %v4638_v55 }
 0x6b8   :  { %5156 = vmatpush1.bf16.msra.mxu0 %v8245_v21  ;;  %5197 = vmatpush1.bf16.msra.mxu1 %v8247_v11  ;;  %v8742_v21 = vld [vmem:[#allocation40_spill] sm:$0xff] }
 0x6b9   :  { %5157 = vmatprep.subr.bf16.mxu0 %v8253_v12  ;;  %5198 = vmatprep.subr.bf16.mxu1 %v8255_v17  ;;  %v8743_v12 = vld [vmem:[#allocation41_spill] sm:$0xff] }
 0x6ba   :  { %5187 = vmatprep.mubr.bf16.mxu0 %v8607_v63  ;;  %5228 = vmatprep.mubr.bf16.mxu1 %v8607_v63 }
 0x6bc   :  { %5158 = vmatpush1.bf16.msra.mxu0 %v8257_v25  ;;  %5199 = vmatpush1.bf16.msra.mxu1 %v8259_v23 }
 0x6bd   :  { %5159 = vmatprep.subr.bf16.mxu0 %v8265_v31  ;;  %5200 = vmatprep.subr.bf16.mxu1 %v8267_v32  ;;  %v8744_v31 = vld [vmem:[#allocation42_spill] sm:$0xff] }
 0x6c0   :  { %5160 = vmatpush1.bf16.msra.mxu0 %v8269_v41  ;;  %5201 = vmatpush1.bf16.msra.mxu1 %v8271_v0  ;;  %v8745_v41 = vld [vmem:[#allocation43_spill] sm:$0xff] }
 0x6c1   :  { %5161 = vmatprep.subr.bf16.mxu0 %v8277_v35  ;;  %5202 = vmatprep.subr.bf16.mxu1 %v8279_v42 }
 0x6c4   :  { %5162 = vmatpush1.bf16.msra.mxu0 %v8281_v46  ;;  %5203 = vmatpush1.bf16.msra.mxu1 %v8283_v52 }
 0x6c5   :  { %5163 = vmatprep.subr.bf16.mxu0 %v8289_v53  ;;  %5204 = vmatprep.subr.bf16.mxu1 %v8291_v57 }
 0x6c8   :  { %5164 = vmatpush1.bf16.msra.mxu0 %v8293_v54  ;;  %5205 = vmatpush1.bf16.msra.mxu1 %v8295_v9 }
 0x6c9   :  { %5165 = vmatprep.subr.bf16.mxu0 %v8301_v14  ;;  %5206 = vmatprep.subr.bf16.mxu1 %v8303_v6 }
 0x6cc   :  { %5166 = vmatpush1.bf16.msra.mxu0 %v8305_v2  ;;  %5207 = vmatpush1.bf16.msra.mxu1 %v8307_v13 }
 0x6cd   :  { %5167 = vmatprep.subr.bf16.mxu0 %v8313_v33  ;;  %5208 = vmatprep.subr.bf16.mxu1 %v8315_v56 }
 0x6d0   :  { %5168 = vmatpush1.bf16.msra.mxu0 %v8317_v20  ;;  %5209 = vmatpush1.bf16.msra.mxu1 %v8319_v15 }
 0x6d1   :  { %5169 = vmatprep.subr.bf16.mxu0 %v8325_v5  ;;  %5210 = vmatprep.subr.bf16.mxu1 %v8327_v58 }
 0x6d4   :  { %5170 = vmatpush1.bf16.msra.mxu0 %v8329_v8  ;;  %5211 = vmatpush1.bf16.msra.mxu1 %v8331_v34 }
 0x6d5   :  { %5438 = vmatprep.subr.bf16.mxu0 %v8337_v50  ;;  %5479 = vmatprep.subr.bf16.mxu1 %v8339_v40  ;;  %v8746_v40 = vld [vmem:[#allocation52_spill] sm:$0xff] }
 0x76a   :  { %v4581_v37 = vpop.f32.mrb[80].mxu0  ;;  %v4622_v36 = vpop.f32.mrb[80].mxu1 }
 0x76b   :  { %v4629_v11 = vadd.f32 %v4581_v37, %v8742_v21  ;;  %v4631_v17 = vadd.f32 %v4622_v36, %v8743_v12  ;;  %v4583_v25 = vpop.f32.mrb[81].mxu0  ;;  %v4624_v23 = vpop.f32.mrb[81].mxu1  ;;  %v8748_v36 = vld [vmem:[#allocation54_spill] sm:$0xff] }
 0x76c   :  { %v4630_v32 = vadd.f32 %v4583_v25, %v8744_v31  ;;  %v4632_v0 = vadd.f32 %v4624_v23, %v8745_v41  ;;  %v4585_v35 = vpop.f32.mrb[82].mxu0  ;;  %v4626_v42 = vpop.f32.mrb[82].mxu1 }
 0x76d   :  { %v4917_v46 = vmul.f32 0.5, %v4629_v11  ;;  %v4586_v52 = vpop.f32.mrb[83].mxu0  ;;  %v4627_v53 = vpop.f32.mrb[83].mxu1  ;;  %v8749_v11 = vld [vmem:[#allocation55_spill] sm:$0xff] }
 0x76e   :  { %v4921_v57 = vmul.f32 0.5, %v4630_v32  ;;  %v4926_v54 = vmul.f32 0.5, %v4632_v0 }
 0x76f   :  { %6703 = vtanh.f32 %v4917_v46 }
 0x770   :  { %6705 = vtanh.f32 %v4921_v57 }
 0x771   :  { %6707 = vtanh.f32 %v4631_v17 }
 0x772   :  { %6709 = vtanh.f32 %v4926_v54 }
 0x779   :  { %v6704_v9 = vpop.eup %6703 }
 0x77a   :  { %v6706_v14 = vpop.eup %6705  ;;  %v4919_v6 = vmul.f32 0.5, %v6704_v9 }
 0x77b   :  { %v4923_v2 = vmul.f32 0.5, %v6706_v14  ;;  %v6708_v33 = vpop.eup %6707  ;;  %v8758_v14 = vld [vmem:[#allocation44_spill] sm:$0xff] }
 0x77c   :  { %v4920_v13 = vadd.f32 0.5, %v4919_v6  ;;  %v6710_v58 = vpop.eup %6709 }
 0x77d   :  { %v4924_v56 = vadd.f32 0.5, %v4923_v2  ;;  %v4928_v8 = vmul.f32 0.5, %v6710_v58 }
 0x77e   :  { %v4931_v20 = vmul.f32 %v6708_v33, %v4920_v13  ;;  %v8760_v33 = vld [vmem:[#allocation46_spill] sm:$0xff] }
 0x77f   :  { %v4930_v15 = vmul.f32 %v4924_v56, %v8348_v39  ;;  %v4929_v37 = vadd.f32 0.5, %v4928_v8 }
 0x781   :  { %v8498_v5 = vadd.f32 %v4931_v20, %v4930_v15 }
 0x783   :  { %6711 = vtanh.f32 %v8498_v5 }
 0x78a   :  { %v4865_v34 = vpop.f32.mrb[84].mxu0  ;;  %v4906_v50 = vpop.f32.mrb[84].mxu1 }
 0x78b   :  { %v4913_v19 = vadd.f32 %v4865_v34, %v8746_v40  ;;  %v4915_v1 = vadd.f32 %v4906_v50, %v8747_v49  ;;  %v4867_v55 = vpop.f32.mrb[85].mxu0  ;;  %v4908_v61 = vpop.f32.mrb[85].mxu1 }
 0x78c   :  { %v4914_v21 = vadd.f32 %v4867_v55, %v8748_v36  ;;  %v4916_v12 = vadd.f32 %v4908_v61, %v8749_v11  ;;  %v4869_v39 = vpop.f32.mrb[86].mxu0  ;;  %v4910_v17 = vpop.f32.mrb[86].mxu1 }
 0x78d   :  { %v6712_v25 = vpop.eup %6711  ;;  %v4935_v23 = vmul.f32 0.5, %v4913_v19  ;;  %v4870_v31 = vpop.f32.mrb[87].mxu0 }
 0x78e   :  { %v4911_v32 = vpop.f32.mrb[87].mxu1  ;;  %v4934_v41 = vmul.f32 %v6712_v25, %v4929_v37  ;;  %v4939_v0 = vmul.f32 0.5, %v4914_v21  ;;  %v4944_v42 = vmul.f32 0.5, %v4916_v12  ;;  %v8762_v31 = vld [vmem:[#allocation48_spill] sm:$0xff] }
 0x78f   :  { %6713 = vtanh.f32 %v4935_v23 }
 0x790   :  { %6098 = vst [vmem:[%s8571_s8 + $0x30] sm:$0xff] %v4934_v41  ;;  %6715 = vtanh.f32 %v4939_v0  ;;  %v4962_v35 = vpack.c.bf16 %v4934_v41, %v4934_v41  ;;  %v8763_v41 = vld [vmem:[#allocation49_spill] sm:$0xff] }
 0x791   :  { %6717 = vtanh.f32 %v4915_v1 }
 0x792   :  { %5188 = vmatmul.mubr.bf16.vlgmr.msra.gmra.mrb[88].mxu0 %v4962_v35  ;;  %5229 = vmatmul.mubr.bf16.vlgmr.msra.gmra.mrb[88].mxu1 %v4962_v35  ;;  %6719 = vtanh.f32 %v4944_v42 }
 0x793   :  { %5439 = vmatpush1.bf16.msra.mxu0 %v8355_v27  ;;  %5480 = vmatpush1.bf16.msra.mxu1 %v8357_v10 }
 0x794   :  { %5440 = vmatprep.subr.bf16.mxu0 %v8362_v45  ;;  %5481 = vmatprep.subr.bf16.mxu1 %v8364_v43 }
 0x795   :  { %5470 = vmatprep.mubr.bf16.mxu0 %v8607_v63  ;;  %5511 = vmatprep.mubr.bf16.mxu1 %v8607_v63 }
 0x797   :  { %5441 = vmatpush1.bf16.msra.mxu0 %v8368_v44  ;;  %5482 = vmatpush1.bf16.msra.mxu1 %v8370_v18 }
 0x798   :  { %5442 = vmatprep.subr.bf16.mxu0 %v8374_v48  ;;  %5483 = vmatprep.subr.bf16.mxu1 %v8376_v51  ;;  %v8750_v51 = vld [vmem:[#allocation22_spill] sm:$0xff] }
 0x799   :  { %v6714_v27 = vpop.eup %6713 }
 0x79a   :  { %v6716_v46 = vpop.eup %6715  ;;  %v4937_v10 = vmul.f32 0.5, %v6714_v27 }
 0x79b   :  { %v4941_v52 = vmul.f32 0.5, %v6716_v46  ;;  %5443 = vmatpush1.bf16.msra.mxu0 %v8382_v62  ;;  %5484 = vmatpush1.bf16.msra.mxu1 %v8384_v24  ;;  %v6718_v63 = vpop.eup %6717  ;;  %v8751_v62 = vld [vmem:[#allocation23_spill] sm:$0xff]  ;;  %v8752_v24 = vld [vmem:[#allocation72_spill] sm:$0xff]  ;;  %v8764_v46 = vld [vmem:[#allocation50_spill] sm:$0xff] }
 0x79c   :  { %v4938_v45 = vadd.f32 0.5, %v4937_v10  ;;  %5444 = vmatprep.subr.bf16.mxu0 %v8388_v7  ;;  %5485 = vmatprep.subr.bf16.mxu1 %v8390_v26  ;;  %v8753_v7 = vld [vmem:[#allocation73_spill] sm:$0xff]  ;;  %v6720_v26 = vpop.eup %6719 }
 0x79d   :  { %v4942_v43 = vadd.f32 0.5, %v4941_v52  ;;  %v8765_v52 = vld [vmem:[#allocation51_spill] sm:$0xff] }
 0x79e   :  { %v4949_v44 = vmul.f32 %v6718_v63, %v4938_v45 }
 0x79f   :  { %v4948_v18 = vmul.f32 %v4942_v43, %v8417_v29  ;;  %5445 = vmatpush1.bf16.msra.mxu0 %v8394_v22  ;;  %5486 = vmatpush1.bf16.msra.mxu1 %v8396_v28  ;;  %v8754_v22 = vld [vmem:[#allocation74_spill] sm:$0xff]  ;;  %v8755_v28 = vld [vmem:[#allocation75_spill] sm:$0xff]  ;;  %v8756_v29 = vld [vmem:[#allocation76_spill] sm:$0xff] }
 0x7a0   :  { %5446 = vmatprep.subr.bf16.mxu0 %v8400_v3  ;;  %5487 = vmatprep.subr.bf16.mxu1 %v8402_v47  ;;  %v4946_v3 = vmul.f32 0.5, %v6720_v26  ;;  %v8757_v47 = vld [vmem:[#allocation77_spill] sm:$0xff] }
 0x7a1   :  { %v8527_v48 = vadd.f32 %v4949_v44, %v4948_v18 }
 0x7a2   :  { %v4947_v53 = vadd.f32 0.5, %v4946_v3 }
 0x7a3   :  { %6721 = vtanh.f32 %v8527_v48  ;;  %5447 = vmatpush1.bf16.msra.mxu0 %v8750_v51  ;;  %5488 = vmatpush1.bf16.msra.mxu1 %v8751_v62 }
 0x7a4   :  { %5448 = vmatprep.subr.bf16.mxu0 %v8752_v24  ;;  %5489 = vmatprep.subr.bf16.mxu1 %v8753_v7 }
 0x7a7   :  { %5449 = vmatpush1.bf16.msra.mxu0 %v8754_v22  ;;  %5490 = vmatpush1.bf16.msra.mxu1 %v8755_v28 }
 0x7a8   :  { %5450 = vmatprep.subr.bf16.mxu0 %v8756_v29  ;;  %5491 = vmatprep.subr.bf16.mxu1 %v8430_v16 }
 0x7ab   :  { %5451 = vmatpush1.bf16.msra.mxu0 %v8434_v38  ;;  %5492 = vmatpush1.bf16.msra.mxu1 %v8757_v47 }
 0x7ac   :  { %5452 = vmatprep.subr.bf16.mxu0 %v8440_v4  ;;  %5493 = vmatprep.subr.bf16.mxu1 %v8442_v60  ;;  %v8759_v4 = vld [vmem:[#allocation45_spill] sm:$0xff] }
 0x7ad   :  { %v6722_v57 = vpop.eup %6721 }
 0x7ae   :  { %v4952_v54 = vmul.f32 %v6722_v57, %v4947_v53 }
 0x7af   :  { %5453 = vmatpush1.bf16.msra.mxu0 %v8446_v59  ;;  %5494 = vmatpush1.bf16.msra.mxu1 %v8448_v30  ;;  %v8761_v59 = vld [vmem:[#allocation47_spill] sm:$0xff] }
 0x7b0   :  { %6099 = vst [vmem:[%s8572_s9 + $0x8] sm:$0xff] %v4952_v54  ;;  %v5245_v16 = vpack.c.bf16 %v4952_v54, %v4952_v54 }
 0x7b2   :  { %5471 = vmatmul.mubr.bf16.vlgmr.msra.gmra.mrb[92].mxu0 %v5245_v16  ;;  %5512 = vmatmul.mubr.bf16.vlgmr.msra.gmra.mrb[92].mxu1 %v5245_v16 }
 0x865   :  { %v5189_v38 = vpop.f32.mrb[88].mxu0  ;;  %v5230_v9 = vpop.f32.mrb[88].mxu1 }
 0x866   :  { %v5237_v6 = vadd.f32 %v5189_v38, %v8758_v14  ;;  %v5239_v2 = vadd.f32 %v5230_v9, %v8759_v4  ;;  %v5191_v60 = vpop.f32.mrb[89].mxu0  ;;  %v5232_v13 = vpop.f32.mrb[89].mxu1 }
 0x867   :  { %v5238_v56 = vadd.f32 %v5191_v60, %v8760_v33  ;;  %v5240_v20 = vadd.f32 %v5232_v13, %v8761_v59  ;;  %v5193_v30 = vpop.f32.mrb[90].mxu0  ;;  %v5234_v15 = vpop.f32.mrb[90].mxu1 }
 0x868   :  { %v5524_v58 = vmul.f32 0.5, %v5237_v6  ;;  %v5194_v8 = vpop.f32.mrb[91].mxu0  ;;  %v5235_v34 = vpop.f32.mrb[91].mxu1 }
 0x869   :  { %v5528_v50 = vmul.f32 0.5, %v5238_v56  ;;  %v5533_v40 = vmul.f32 0.5, %v5240_v20 }
 0x86a   :  { %6723 = vtanh.f32 %v5524_v58 }
 0x86b   :  { %6725 = vtanh.f32 %v5528_v50 }
 0x86c   :  { %6727 = vtanh.f32 %v5239_v2 }
 0x86d   :  { %6729 = vtanh.f32 %v5533_v40 }
 0x874   :  { %v6724_v19 = vpop.eup %6723 }
 0x875   :  { %v6726_v49 = vpop.eup %6725  ;;  %v5526_v1 = vmul.f32 0.5, %v6724_v19 }
 0x876   :  { %v5530_v55 = vmul.f32 0.5, %v6726_v49  ;;  %v6728_v37 = vpop.eup %6727 }
 0x877   :  { %v5527_v61 = vadd.f32 0.5, %v5526_v1  ;;  %v6730_v39 = vpop.eup %6729 }
 0x878   :  { %v5531_v36 = vadd.f32 0.5, %v5530_v55  ;;  %v5535_v17 = vmul.f32 0.5, %v6730_v39 }
 0x879   :  { %v5538_v21 = vmul.f32 %v6728_v37, %v5527_v61 }
 0x87a   :  { %v5537_v11 = vmul.f32 %v5531_v36, %v8498_v5  ;;  %v5536_v27 = vadd.f32 0.5, %v5535_v17 }
 0x87c   :  { %v5539_v12 = vadd.f32 %v5538_v21, %v5537_v11 }
 0x87e   :  { %6731 = vtanh.f32 %v5539_v12 }
 0x885   :  { %v5472_v25 = vpop.f32.mrb[92].mxu0  ;;  %v5513_v23 = vpop.f32.mrb[92].mxu1 }
 0x886   :  { %v5520_v32 = vadd.f32 %v5472_v25, %v8762_v31  ;;  %v5522_v0 = vadd.f32 %v5513_v23, %v8763_v41  ;;  %v5474_v35 = vpop.f32.mrb[93].mxu0  ;;  %v5515_v42 = vpop.f32.mrb[93].mxu1 }
 0x887   :  { %v5521_v10 = vadd.f32 %v5474_v35, %v8764_v46  ;;  %v5523_v45 = vadd.f32 %v5515_v42, %v8765_v52  ;;  %v5476_v63 = vpop.f32.mrb[94].mxu0  ;;  %v5517_v43 = vpop.f32.mrb[94].mxu1 }
 0x888   :  { %v6732_v5 = vpop.eup %6731  ;;  %v5542_v44 = vmul.f32 0.5, %v5520_v32  ;;  %v5477_v18 = vpop.f32.mrb[95].mxu0 }
 0x889   :  { %v5518_v51 = vpop.f32.mrb[95].mxu1  ;;  %v5541_v62 = vmul.f32 %v6732_v5, %v5536_v27  ;;  %v5546_v24 = vmul.f32 0.5, %v5521_v10  ;;  %v5551_v7 = vmul.f32 0.5, %v5523_v45 }
 0x88a   :  { %6733 = vtanh.f32 %v5542_v44 }
 0x88b   :  { %6164 = vst [vmem:[%s8571_s8 + $0x38] sm:$0xff] %v5541_v62  ;;  %6735 = vtanh.f32 %v5546_v24 }
 0x88c   :  { %6737 = vtanh.f32 %v5522_v0 }
 0x88d   :  { %6739 = vtanh.f32 %v5551_v7 }
 0x894   :  { %v6734_v26 = vpop.eup %6733 }
 0x895   :  { %v6736_v22 = vpop.eup %6735  ;;  %v5544_v28 = vmul.f32 0.5, %v6734_v26 }
 0x896   :  { %v5548_v3 = vmul.f32 0.5, %v6736_v22  ;;  %v6738_v47 = vpop.eup %6737 }
 0x897   :  { %v5545_v29 = vadd.f32 0.5, %v5544_v28  ;;  %v6740_v38 = vpop.eup %6739 }
 0x898   :  { %v5549_v53 = vadd.f32 0.5, %v5548_v3  ;;  %v5553_v9 = vmul.f32 0.5, %v6740_v38 }
 0x899   :  { %v5556_v57 = vmul.f32 %v6738_v47, %v5545_v29 }
 0x89a   :  { %v5555_v54 = vmul.f32 %v5549_v53, %v8527_v48  ;;  %v5554_v14 = vadd.f32 0.5, %v5553_v9 }
 0x89c   :  { %v5557_v16 = vadd.f32 %v5556_v57, %v5555_v54 }
 0x89e   :  { %6741 = vtanh.f32 %v5557_v16 }
 0x8a8   :  { %v6742_v6 = vpop.eup %6741 }
 0x8a9   :  { %v5559_v4 = vmul.f32 %v6742_v6, %v5554_v14 }
 0x8ab   :  { %5562 = vst [vmem:[%s8572_s9] sm:$0xff] %v5559_v4 }
 0x8ac   :  { %5589 = vsyncpa [#allocation9], 1 }
 0x8ad   :  { %5590 = vsyncpa [#allocation11], 1 }
 0x8ae   :  { %5591 = vsyncpa [#allocation14], 1 }
 0x8af   :  { %5592 = vsyncpa [#allocation17], 1 }

// kernel: bidirectional_lstm_forward.3
= control target key start
LH: loop header
LB: loop body
LE: loop exit
PB: predicated region body
PF: predicated region fallthrough
CT: control target
= control target key end

     0   :  { %v10862_v1 = vmov 0   ;;  %s10848_s5 = inlined_call_operand.vmem [shape: bf16[128,512], index: 5, kind: input, shape index: {}]   ;;  %s10849_s4 = inlined_call_operand.vmem [shape: bf16[128,512], index: 4, kind: input, shape index: {}]   ;;  %s10850_s1 = inlined_call_operand.vmem [shape: f32[64,128], index: 1, kind: input, shape index: {}, may-alias: {1,3}]   ;;  %s10851_s7 = inlined_call_operand.vmem [shape: bf16[128,512], index: 7, kind: input, shape index: {}]   ;;  %s10852_s0 = inlined_call_operand.vmem [shape: f32[64,128], index: 0, kind: input, shape index: {}, may-alias: {0,2}]   ;;  %s10853_s6 = inlined_call_operand.vmem [shape: bf16[128,512], index: 6, kind: input, shape index: {}]   ;;  %s10854_s3 = inlined_call_operand.vmem [shape: f32[64,128], index: 3, kind: input, shape index: {}, may-alias: {1,3}]   ;;  %s10855_s8 = inlined_call_operand.vmem [shape: bf16[128,512], index: 8, kind: input, shape index: {}]   ;;  %s10856_s9 = inlined_call_operand.vmem [shape: bf16[128,512], index: 9, kind: input, shape index: {}]   ;;  %s10857_s2 = inlined_call_operand.vmem [shape: f32[64,128], index: 2, kind: input, shape index: {}, may-alias: {0,2}]   ;;  %s10858_s10 = inlined_call_operand.vmem [shape: f32[1,512], index: 10, kind: input, shape index: {}]   ;;  %s10859_s11 = inlined_call_operand.vmem [shape: f32[1,512], index: 11, kind: input, shape index: {}]   ;;  %s10860_s12 = inlined_call_operand.vmem [shape: f32[8,8,128], index: 12, kind: output, shape index: {0}]   ;;  %s10861_s13 = inlined_call_operand.vmem [shape: f32[8,8,128], index: 13, kind: output, shape index: {1}]  }
   0x1   :  { %v7312_v0 = vld [vmem:[%s10848_s5 + $0x4] ss:$16 sps:$4 sm:$0xff]   ;;  %390 = vmatprep.mubr.bf16.mxu0 %v10862_v1  ;;  %463 = vmatprep.mubr.bf16.mxu1 %v10862_v1  ;;  %v7314_v2 = vld [vmem:[%s10848_s5 + $0xc] ss:$16 sps:$4 sm:$0xff]   ;;  %v7316_v3 = vld [vmem:[%s10848_s5] ss:$16 sps:$4 sm:$0xff]  }
   0x2   :  { %358 = vmatprep.subr.bf16.mxu0 %v7312_v0  ;;  %v7317_v4 = vld [vmem:[%s10848_s5 + $0x8] ss:$16 sps:$4 sm:$0xff]   ;;  %431 = vmatprep.subr.bf16.mxu1 %v7314_v2  ;;  %v7318_v5 = vld [vmem:[%s10848_s5 + $0x24] ss:$16 sps:$4 sm:$0xff]   ;;  %v7320_v6 = vld [vmem:[%s10848_s5 + $0x2c] ss:$16 sps:$4 sm:$0xff]  }
   0x3   :  { %359 = vmatpush1.bf16.msra.mxu0 %v7316_v3  ;;  %432 = vmatpush1.bf16.msra.mxu1 %v7317_v4  ;;  %v7322_v7 = vld [vmem:[%s10848_s5 + $0x20] ss:$16 sps:$4 sm:$0xff]   ;;  %v7323_v8 = vld [vmem:[%s10848_s5 + $0x28] ss:$16 sps:$4 sm:$0xff]   ;;  %v7324_v9 = vld [vmem:[%s10848_s5 + $0x44] ss:$16 sps:$4 sm:$0xff]  }
   0x4   :  { %360 = vmatprep.subr.bf16.mxu0 %v7318_v5  ;;  %433 = vmatprep.subr.bf16.mxu1 %v7320_v6  ;;  %v7326_v10 = vld [vmem:[%s10848_s5 + $0x4c] ss:$16 sps:$4 sm:$0xff]   ;;  %v7328_v11 = vld [vmem:[%s10848_s5 + $0x40] ss:$16 sps:$4 sm:$0xff]   ;;  %v7329_v12 = vld [vmem:[%s10848_s5 + $0x48] ss:$16 sps:$4 sm:$0xff]  }
   0x5   :  { %v7330_v13 = vld [vmem:[%s10848_s5 + $0x64] ss:$16 sps:$4 sm:$0xff]   ;;  %v7332_v14 = vld [vmem:[%s10848_s5 + $0x6c] ss:$16 sps:$4 sm:$0xff]   ;;  %v7334_v15 = vld [vmem:[%s10848_s5 + $0x60] ss:$16 sps:$4 sm:$0xff]  }
   0x6   :  { %v7335_v16 = vld [vmem:[%s10848_s5 + $0x68] ss:$16 sps:$4 sm:$0xff]   ;;  %v7336_v17 = vld [vmem:[%s10848_s5 + $0x84] ss:$16 sps:$4 sm:$0xff]   ;;  %v7338_v18 = vld [vmem:[%s10848_s5 + $0x8c] ss:$16 sps:$4 sm:$0xff]  }
   0x7   :  { %361 = vmatpush1.bf16.msra.mxu0 %v7322_v7  ;;  %434 = vmatpush1.bf16.msra.mxu1 %v7323_v8  ;;  %v7340_v19 = vld [vmem:[%s10848_s5 + $0x80] ss:$16 sps:$4 sm:$0xff]   ;;  %v7341_v20 = vld [vmem:[%s10848_s5 + $0x88] ss:$16 sps:$4 sm:$0xff]   ;;  %v7342_v21 = vld [vmem:[%s10848_s5 + $0xa4] ss:$16 sps:$4 sm:$0xff]  }
   0x8   :  { %362 = vmatprep.subr.bf16.mxu0 %v7324_v9  ;;  %435 = vmatprep.subr.bf16.mxu1 %v7326_v10  ;;  %v7344_v22 = vld [vmem:[%s10848_s5 + $0xac] ss:$16 sps:$4 sm:$0xff]   ;;  %v7346_v23 = vld [vmem:[%s10848_s5 + $0xa0] ss:$16 sps:$4 sm:$0xff]   ;;  %v7347_v24 = vld [vmem:[%s10848_s5 + $0xa8] ss:$16 sps:$4 sm:$0xff]  }
   0x9   :  { %v7348_v25 = vld [vmem:[%s10848_s5 + $0xc4] ss:$16 sps:$4 sm:$0xff]   ;;  %v7350_v26 = vld [vmem:[%s10848_s5 + $0xcc] ss:$16 sps:$4 sm:$0xff]   ;;  %v7352_v27 = vld [vmem:[%s10848_s5 + $0xc0] ss:$16 sps:$4 sm:$0xff]  }
   0xa   :  { %v7353_v28 = vld [vmem:[%s10848_s5 + $0xc8] ss:$16 sps:$4 sm:$0xff]   ;;  %v7354_v29 = vld [vmem:[%s10848_s5 + $0xe4] ss:$16 sps:$4 sm:$0xff]   ;;  %v7356_v30 = vld [vmem:[%s10848_s5 + $0xec] ss:$16 sps:$4 sm:$0xff]  }
   0xb   :  { %363 = vmatpush1.bf16.msra.mxu0 %v7328_v11  ;;  %436 = vmatpush1.bf16.msra.mxu1 %v7329_v12  ;;  %v7358_v31 = vld [vmem:[%s10848_s5 + $0xe0] ss:$16 sps:$4 sm:$0xff]   ;;  %v7359_v32 = vld [vmem:[%s10848_s5 + $0xe8] ss:$16 sps:$4 sm:$0xff]   ;;  %v7362_v35 = vld [vmem:[%s10849_s4 + $0x4] ss:$16 sps:$4 sm:$0xff]  }
   0xc   :  { %364 = vmatprep.subr.bf16.mxu0 %v7330_v13  ;;  %437 = vmatprep.subr.bf16.mxu1 %v7332_v14  ;;  %v154_v33 = vld [vmem:[%s10850_s1] sm:$0xff]  ;;  %v155_v34 = vld [vmem:[%s10850_s1 + $0x8] sm:$0xff]  ;;  %v156_v44 = vld [vmem:[%s10850_s1 + $0x10] sm:$0xff] }
   0xd   :  { %v7365_v36 = vld [vmem:[%s10849_s4 + $0xc] ss:$16 sps:$4 sm:$0xff]   ;;  %v162_v37 = vpack.c.bf16 %v155_v34, %v154_v33  ;;  %v7360_v38 = vld [vmem:[%s10849_s4] ss:$16 sps:$4 sm:$0xff]   ;;  %v7363_v39 = vld [vmem:[%s10849_s4 + $0x8] ss:$16 sps:$4 sm:$0xff]  }
   0xe   :  { %v7368_v40 = vld [vmem:[%s10849_s4 + $0x24] ss:$16 sps:$4 sm:$0xff]   ;;  %v7371_v41 = vld [vmem:[%s10849_s4 + $0x2c] ss:$16 sps:$4 sm:$0xff]   ;;  %v7366_v42 = vld [vmem:[%s10849_s4 + $0x20] ss:$16 sps:$4 sm:$0xff]  }
   0xf   :  { %365 = vmatpush1.bf16.msra.mxu0 %v7334_v15  ;;  %438 = vmatpush1.bf16.msra.mxu1 %v7335_v16  ;;  %v7369_v43 = vld [vmem:[%s10849_s4 + $0x28] ss:$16 sps:$4 sm:$0xff]   ;;  %v7374_v46 = vld [vmem:[%s10849_s4 + $0x44] ss:$16 sps:$4 sm:$0xff]   ;;  %v7377_v47 = vld [vmem:[%s10849_s4 + $0x4c] ss:$16 sps:$4 sm:$0xff]  }
  0x10   :  { %366 = vmatprep.subr.bf16.mxu0 %v7336_v17  ;;  %439 = vmatprep.subr.bf16.mxu1 %v7338_v18  ;;  %v157_v45 = vld [vmem:[%s10850_s1 + $0x18] sm:$0xff]  ;;  %v7372_v49 = vld [vmem:[%s10849_s4 + $0x40] ss:$16 sps:$4 sm:$0xff]   ;;  %v7380_v51 = vld [vmem:[%s10849_s4 + $0x64] ss:$16 sps:$4 sm:$0xff]  }
  0x11   :  { %v163_v48 = vpack.c.bf16 %v157_v45, %v156_v44  ;;  %v7375_v50 = vld [vmem:[%s10849_s4 + $0x48] ss:$16 sps:$4 sm:$0xff]   ;;  %v7383_v52 = vld [vmem:[%s10849_s4 + $0x6c] ss:$16 sps:$4 sm:$0xff]   ;;  %v7378_v53 = vld [vmem:[%s10849_s4 + $0x60] ss:$16 sps:$4 sm:$0xff]  }
  0x12   :  { %v7381_v54 = vld [vmem:[%s10849_s4 + $0x68] ss:$16 sps:$4 sm:$0xff]   ;;  %v158_v55 = vld [vmem:[%s10850_s1 + $0x20] sm:$0xff]  ;;  %v7389_v58 = vld [vmem:[%s10849_s4 + $0x8c] ss:$16 sps:$4 sm:$0xff]  }
  0x13   :  { %367 = vmatpush1.bf16.msra.mxu0 %v7340_v19  ;;  %440 = vmatpush1.bf16.msra.mxu1 %v7341_v20  ;;  %v159_v56 = vld [vmem:[%s10850_s1 + $0x28] sm:$0xff]  ;;  %v7386_v57 = vld [vmem:[%s10849_s4 + $0x84] ss:$16 sps:$4 sm:$0xff]   ;;  %v7384_v60 = vld [vmem:[%s10849_s4 + $0x80] ss:$16 sps:$4 sm:$0xff]  }
  0x14   :  { %368 = vmatprep.subr.bf16.mxu0 %v7342_v21  ;;  %441 = vmatprep.subr.bf16.mxu1 %v7344_v22  ;;  %v164_v59 = vpack.c.bf16 %v159_v56, %v158_v55  ;;  %v7387_v61 = vld [vmem:[%s10849_s4 + $0x88] ss:$16 sps:$4 sm:$0xff]   ;;  %v7392_v62 = vld [vmem:[%s10849_s4 + $0xa4] ss:$16 sps:$4 sm:$0xff]   ;;  %v7395_v63 = vld [vmem:[%s10849_s4 + $0xac] ss:$16 sps:$4 sm:$0xff]  }
  0x15   :  { %v7390_v0 = vld [vmem:[%s10849_s4 + $0xa0] ss:$16 sps:$4 sm:$0xff]   ;;  %v7393_v2 = vld [vmem:[%s10849_s4 + $0xa8] ss:$16 sps:$4 sm:$0xff]   ;;  %v7398_v5 = vld [vmem:[%s10849_s4 + $0xc4] ss:$16 sps:$4 sm:$0xff]  }
  0x16   :  { %v160_v3 = vld [vmem:[%s10850_s1 + $0x30] sm:$0xff]  ;;  %v161_v4 = vld [vmem:[%s10850_s1 + $0x38] sm:$0xff]  ;;  %v110_v14 = vld [vmem:[%s10852_s0] sm:$0xff] }
  0x17   :  { %369 = vmatpush1.bf16.msra.mxu0 %v7346_v23  ;;  %442 = vmatpush1.bf16.msra.mxu1 %v7347_v24  ;;  %v7401_v6 = vld [vmem:[%s10849_s4 + $0xcc] ss:$16 sps:$4 sm:$0xff]   ;;  %v165_v7 = vpack.c.bf16 %v161_v4, %v160_v3  ;;  %v7396_v8 = vld [vmem:[%s10849_s4 + $0xc0] ss:$16 sps:$4 sm:$0xff]   ;;  %v7399_v9 = vld [vmem:[%s10849_s4 + $0xc8] ss:$16 sps:$4 sm:$0xff]  }
  0x18   :  { %370 = vmatprep.subr.bf16.mxu0 %v7348_v25  ;;  %443 = vmatprep.subr.bf16.mxu1 %v7350_v26  ;;  %v7404_v10 = vld [vmem:[%s10849_s4 + $0xe4] ss:$16 sps:$4 sm:$0xff]   ;;  %v7407_v11 = vld [vmem:[%s10849_s4 + $0xec] ss:$16 sps:$4 sm:$0xff]   ;;  %v7402_v12 = vld [vmem:[%s10849_s4 + $0xe0] ss:$16 sps:$4 sm:$0xff]  }
  0x19   :  { %v7405_v13 = vld [vmem:[%s10849_s4 + $0xe8] ss:$16 sps:$4 sm:$0xff]   ;;  %v7410_v16 = vld [vmem:[%s10851_s7 + $0x4] ss:$16 sps:$4 sm:$0xff]   ;;  %v7413_v17 = vld [vmem:[%s10851_s7 + $0xc] ss:$16 sps:$4 sm:$0xff]  }
  0x1a   :  { %v111_v15 = vld [vmem:[%s10852_s0 + $0x8] sm:$0xff]  ;;  %v7408_v19 = vld [vmem:[%s10851_s7] ss:$16 sps:$4 sm:$0xff]   ;;  %v7416_v21 = vld [vmem:[%s10851_s7 + $0x24] ss:$16 sps:$4 sm:$0xff]  }
  0x1b   :  { %371 = vmatpush1.bf16.msra.mxu0 %v7352_v27  ;;  %444 = vmatpush1.bf16.msra.mxu1 %v7353_v28  ;;  %v118_v18 = vpack.c.bf16 %v111_v15, %v110_v14  ;;  %v7411_v20 = vld [vmem:[%s10851_s7 + $0x8] ss:$16 sps:$4 sm:$0xff]   ;;  %v7419_v22 = vld [vmem:[%s10851_s7 + $0x2c] ss:$16 sps:$4 sm:$0xff]   ;;  %v7414_v23 = vld [vmem:[%s10851_s7 + $0x20] ss:$16 sps:$4 sm:$0xff]  }
  0x1c   :  { %372 = vmatprep.subr.bf16.mxu0 %v7354_v29  ;;  %445 = vmatprep.subr.bf16.mxu1 %v7356_v30  ;;  %v7417_v24 = vld [vmem:[%s10851_s7 + $0x28] ss:$16 sps:$4 sm:$0xff]   ;;  %v112_v25 = vld [vmem:[%s10852_s0 + $0x10] sm:$0xff]  ;;  %v7425_v28 = vld [vmem:[%s10851_s7 + $0x4c] ss:$16 sps:$4 sm:$0xff]  }
  0x1d   :  { %v113_v26 = vld [vmem:[%s10852_s0 + $0x18] sm:$0xff]  ;;  %v7422_v27 = vld [vmem:[%s10851_s7 + $0x44] ss:$16 sps:$4 sm:$0xff]   ;;  %v7420_v30 = vld [vmem:[%s10851_s7 + $0x40] ss:$16 sps:$4 sm:$0xff]  }
  0x1e   :  { %v119_v29 = vpack.c.bf16 %v113_v26, %v112_v25  ;;  %v7431_v33 = vld [vmem:[%s10851_s7 + $0x6c] ss:$16 sps:$4 sm:$0xff]   ;;  %v7426_v34 = vld [vmem:[%s10851_s7 + $0x60] ss:$16 sps:$4 sm:$0xff]  }
  0x1f   :  { %373 = vmatpush1.bf16.msra.mxu0 %v7358_v31  ;;  %446 = vmatpush1.bf16.msra.mxu1 %v7359_v32  ;;  %v7423_v31 = vld [vmem:[%s10851_s7 + $0x48] ss:$16 sps:$4 sm:$0xff]   ;;  %v7428_v32 = vld [vmem:[%s10851_s7 + $0x64] ss:$16 sps:$4 sm:$0xff]   ;;  %v7443_v44 = vld [vmem:[%s10851_s7 + $0xac] ss:$16 sps:$4 sm:$0xff]  }
  0x20   :  { %664 = vmatprep.subr.bf16.mxu0 %v7362_v35  ;;  %737 = vmatprep.subr.bf16.mxu1 %v7365_v36  ;;  %v7429_v35 = vld [vmem:[%s10851_s7 + $0x68] ss:$16 sps:$4 sm:$0xff]   ;;  %v114_v36 = vld [vmem:[%s10852_s0 + $0x20] sm:$0xff]  ;;  %v7455_v55 = vld [vmem:[%s10851_s7 + $0xec] ss:$16 sps:$4 sm:$0xff]  }
  0x21   :  { %v7438_v45 = vld [vmem:[%s10851_s7 + $0xa0] ss:$16 sps:$4 sm:$0xff]   ;;  %v7467_v3 = vld [vmem:[%s10853_s6 + $0x2c] ss:$16 sps:$4 sm:$0xff]  }
  0x22   :  { %391 = vmatmul.mubr.bf16.vlgmr.msra.gmra.mrb[0].mxu0 %v162_v37  ;;  %464 = vmatmul.mubr.bf16.vlgmr.msra.gmra.mrb[0].mxu1 %v162_v37  ;;  %v115_v37 = vld [vmem:[%s10852_s0 + $0x28] sm:$0xff]  ;;  %v7450_v56 = vld [vmem:[%s10851_s7 + $0xe0] ss:$16 sps:$4 sm:$0xff]  }
  0x23   :  { %665 = vmatpush1.bf16.msra.mxu0 %v7360_v38  ;;  %738 = vmatpush1.bf16.msra.mxu1 %v7363_v39  ;;  %v7434_v38 = vld [vmem:[%s10851_s7 + $0x84] ss:$16 sps:$4 sm:$0xff]   ;;  %v7437_v39 = vld [vmem:[%s10851_s7 + $0x8c] ss:$16 sps:$4 sm:$0xff]   ;;  %v7462_v4 = vld [vmem:[%s10853_s6 + $0x20] ss:$16 sps:$4 sm:$0xff]  }
  0x24   :  { %666 = vmatprep.subr.bf16.mxu0 %v7368_v40  ;;  %739 = vmatprep.subr.bf16.mxu1 %v7371_v41  ;;  %v120_v40 = vpack.c.bf16 %v115_v37, %v114_v36  ;;  %v7432_v41 = vld [vmem:[%s10851_s7 + $0x80] ss:$16 sps:$4 sm:$0xff]   ;;  %v7479_v14 = vld [vmem:[%s10853_s6 + $0x6c] ss:$16 sps:$4 sm:$0xff]  }
  0x25   :  { %400 = vmatprep.mubr.bf16.mxu0 %v10862_v1  ;;  %473 = vmatprep.mubr.bf16.mxu1 %v10862_v1  ;;  %v7474_v15 = vld [vmem:[%s10853_s6 + $0x60] ss:$16 sps:$4 sm:$0xff]   ;;  %v7491_v25 = vld [vmem:[%s10853_s6 + $0xac] ss:$16 sps:$4 sm:$0xff]  }
  0x26   :  { %v7486_v26 = vld [vmem:[%s10853_s6 + $0xa0] ss:$16 sps:$4 sm:$0xff]   ;;  %v7503_v36 = vld [vmem:[%s10853_s6 + $0xec] ss:$16 sps:$4 sm:$0xff]  }
  0x27   :  { %667 = vmatpush1.bf16.msra.mxu0 %v7366_v42  ;;  %740 = vmatpush1.bf16.msra.mxu1 %v7369_v43  ;;  %v7435_v42 = vld [vmem:[%s10851_s7 + $0x88] ss:$16 sps:$4 sm:$0xff]   ;;  %v7440_v43 = vld [vmem:[%s10851_s7 + $0xa4] ss:$16 sps:$4 sm:$0xff]   ;;  %v7498_v37 = vld [vmem:[%s10853_s6 + $0xe0] ss:$16 sps:$4 sm:$0xff]  }
  0x28   :  { %668 = vmatprep.subr.bf16.mxu0 %v7374_v46  ;;  %741 = vmatprep.subr.bf16.mxu1 %v7377_v47  ;;  %v7441_v46 = vld [vmem:[%s10851_s7 + $0xa8] ss:$16 sps:$4 sm:$0xff]   ;;  %v116_v47 = vld [vmem:[%s10852_s0 + $0x30] sm:$0xff] }
  0x2a   :  { %401 = vmatmul.mubr.bf16.gmra.mrb[4].mxu0 %v163_v48  ;;  %474 = vmatmul.mubr.bf16.gmra.mrb[4].mxu1 %v163_v48  ;;  %v117_v48 = vld [vmem:[%s10852_s0 + $0x38] sm:$0xff] }
  0x2b   :  { %669 = vmatpush1.bf16.msra.mxu0 %v7372_v49  ;;  %742 = vmatpush1.bf16.msra.mxu1 %v7375_v50  ;;  %v7446_v49 = vld [vmem:[%s10851_s7 + $0xc4] ss:$16 sps:$4 sm:$0xff]   ;;  %v7449_v50 = vld [vmem:[%s10851_s7 + $0xcc] ss:$16 sps:$4 sm:$0xff]  }
  0x2c   :  { %670 = vmatprep.subr.bf16.mxu0 %v7380_v51  ;;  %743 = vmatprep.subr.bf16.mxu1 %v7383_v52  ;;  %v121_v51 = vpack.c.bf16 %v117_v48, %v116_v47  ;;  %v7444_v52 = vld [vmem:[%s10851_s7 + $0xc0] ss:$16 sps:$4 sm:$0xff]   ;;  %v8638_v47 = vld [vmem:[%s10855_s8 + $0x2c] ss:$16 sps:$4 sm:$0xff]  }
  0x2d   :  { %410 = vmatprep.mubr.bf16.mxu0 %v10862_v1  ;;  %483 = vmatprep.mubr.bf16.mxu1 %v10862_v1  ;;  %v8643_v48 = vld [vmem:[%s10855_s8 + $0x20] ss:$16 sps:$4 sm:$0xff]  }
  0x2f   :  { %671 = vmatpush1.bf16.msra.mxu0 %v7378_v53  ;;  %744 = vmatpush1.bf16.msra.mxu1 %v7381_v54  ;;  %v7447_v53 = vld [vmem:[%s10851_s7 + $0xc8] ss:$16 sps:$4 sm:$0xff]   ;;  %v7452_v54 = vld [vmem:[%s10851_s7 + $0xe4] ss:$16 sps:$4 sm:$0xff]  }
  0x30   :  { %672 = vmatprep.subr.bf16.mxu0 %v7386_v57  ;;  %745 = vmatprep.subr.bf16.mxu1 %v7389_v58  ;;  %v7453_v57 = vld [vmem:[%s10851_s7 + $0xe8] ss:$16 sps:$4 sm:$0xff]   ;;  %v940_v58 = vld [vmem:[%s10854_s3] sm:$0xff] }
  0x32   :  { %411 = vmatmul.mubr.bf16.gmra.mrb[8].mxu0 %v164_v59  ;;  %484 = vmatmul.mubr.bf16.gmra.mrb[8].mxu1 %v164_v59  ;;  %v941_v59 = vld [vmem:[%s10854_s3 + $0x8] sm:$0xff] }
  0x33   :  { %673 = vmatpush1.bf16.msra.mxu0 %v7384_v60  ;;  %746 = vmatpush1.bf16.msra.mxu1 %v7387_v61  ;;  %v7458_v60 = vld [vmem:[%s10853_s6 + $0x4] ss:$16 sps:$4 sm:$0xff]   ;;  %v7461_v61 = vld [vmem:[%s10853_s6 + $0xc] ss:$16 sps:$4 sm:$0xff]  }
  0x34   :  { %674 = vmatprep.subr.bf16.mxu0 %v7392_v62  ;;  %747 = vmatprep.subr.bf16.mxu1 %v7395_v63  ;;  %v948_v62 = vpack.c.bf16 %v941_v59, %v940_v58  ;;  %v7456_v63 = vld [vmem:[%s10853_s6] ss:$16 sps:$4 sm:$0xff]   ;;  %v8694_v58 = vld [vmem:[%s10855_s8 + $0x6c] ss:$16 sps:$4 sm:$0xff]  }
  0x35   :  { %420 = vmatprep.mubr.bf16.mxu0 %v10862_v1  ;;  %493 = vmatprep.mubr.bf16.mxu1 %v10862_v1  ;;  %v8699_v59 = vld [vmem:[%s10855_s8 + $0x60] ss:$16 sps:$4 sm:$0xff]  }
  0x37   :  { %675 = vmatpush1.bf16.msra.mxu0 %v7390_v0  ;;  %748 = vmatpush1.bf16.msra.mxu1 %v7393_v2  ;;  %v7459_v0 = vld [vmem:[%s10853_s6 + $0x8] ss:$16 sps:$4 sm:$0xff]   ;;  %v7464_v2 = vld [vmem:[%s10853_s6 + $0x24] ss:$16 sps:$4 sm:$0xff]  }
  0x38   :  { %676 = vmatprep.subr.bf16.mxu0 %v7398_v5  ;;  %749 = vmatprep.subr.bf16.mxu1 %v7401_v6  ;;  %v7465_v5 = vld [vmem:[%s10853_s6 + $0x28] ss:$16 sps:$4 sm:$0xff]   ;;  %v942_v6 = vld [vmem:[%s10854_s3 + $0x10] sm:$0xff] }
  0x3a   :  { %421 = vmatmul.mubr.bf16.gmra.mrb[12].mxu0 %v165_v7  ;;  %494 = vmatmul.mubr.bf16.gmra.mrb[12].mxu1 %v165_v7  ;;  %v943_v7 = vld [vmem:[%s10854_s3 + $0x18] sm:$0xff] }
  0x3b   :  { %677 = vmatpush1.bf16.msra.mxu0 %v7396_v8  ;;  %750 = vmatpush1.bf16.msra.mxu1 %v7399_v9  ;;  %v7470_v8 = vld [vmem:[%s10853_s6 + $0x44] ss:$16 sps:$4 sm:$0xff]   ;;  %v7473_v9 = vld [vmem:[%s10853_s6 + $0x4c] ss:$16 sps:$4 sm:$0xff]  }
  0x3c   :  { %678 = vmatprep.subr.bf16.mxu0 %v7404_v10  ;;  %751 = vmatprep.subr.bf16.mxu1 %v7407_v11  ;;  %v949_v10 = vpack.c.bf16 %v943_v7, %v942_v6  ;;  %v7468_v11 = vld [vmem:[%s10853_s6 + $0x40] ss:$16 sps:$4 sm:$0xff]   ;;  %v8746_v6 = vld [vmem:[%s10855_s8 + $0xac] ss:$16 sps:$4 sm:$0xff]  }
  0x3d   :  { %696 = vmatprep.mubr.bf16.mxu0 %v10862_v1  ;;  %769 = vmatprep.mubr.bf16.mxu1 %v10862_v1  ;;  %v8755_v7 = vld [vmem:[%s10855_s8 + $0xa0] ss:$16 sps:$4 sm:$0xff]  }
  0x3f   :  { %679 = vmatpush1.bf16.msra.mxu0 %v7402_v12  ;;  %752 = vmatpush1.bf16.msra.mxu1 %v7405_v13  ;;  %v7471_v12 = vld [vmem:[%s10853_s6 + $0x48] ss:$16 sps:$4 sm:$0xff]   ;;  %v7476_v13 = vld [vmem:[%s10853_s6 + $0x64] ss:$16 sps:$4 sm:$0xff]  }
  0x40   :  { %1144 = vmatprep.subr.bf16.mxu0 %v7410_v16  ;;  %1217 = vmatprep.subr.bf16.mxu1 %v7413_v17  ;;  %v7477_v16 = vld [vmem:[%s10853_s6 + $0x68] ss:$16 sps:$4 sm:$0xff]   ;;  %v944_v17 = vld [vmem:[%s10854_s3 + $0x20] sm:$0xff] }
  0x42   :  { %697 = vmatmul.mubr.bf16.vlgmr.msra.gmra.mrb[0].mxu0 %v118_v18  ;;  %770 = vmatmul.mubr.bf16.vlgmr.msra.gmra.mrb[0].mxu1 %v118_v18  ;;  %v945_v18 = vld [vmem:[%s10854_s3 + $0x28] sm:$0xff] }
  0x43   :  { %1145 = vmatpush1.bf16.msra.mxu0 %v7408_v19  ;;  %1218 = vmatpush1.bf16.msra.mxu1 %v7411_v20  ;;  %v7482_v19 = vld [vmem:[%s10853_s6 + $0x84] ss:$16 sps:$4 sm:$0xff]   ;;  %v7485_v20 = vld [vmem:[%s10853_s6 + $0x8c] ss:$16 sps:$4 sm:$0xff]  }
  0x44   :  { %1146 = vmatprep.subr.bf16.mxu0 %v7416_v21  ;;  %1219 = vmatprep.subr.bf16.mxu1 %v7419_v22  ;;  %v950_v21 = vpack.c.bf16 %v945_v18, %v944_v17  ;;  %v7480_v22 = vld [vmem:[%s10853_s6 + $0x80] ss:$16 sps:$4 sm:$0xff]   ;;  %v8802_v17 = vld [vmem:[%s10855_s8 + $0xec] ss:$16 sps:$4 sm:$0xff]  }
  0x45   :  { %706 = vmatprep.mubr.bf16.mxu0 %v10862_v1  ;;  %779 = vmatprep.mubr.bf16.mxu1 %v10862_v1  ;;  %v8811_v18 = vld [vmem:[%s10855_s8 + $0xe0] ss:$16 sps:$4 sm:$0xff]  }
  0x47   :  { %1147 = vmatpush1.bf16.msra.mxu0 %v7414_v23  ;;  %1220 = vmatpush1.bf16.msra.mxu1 %v7417_v24  ;;  %v7483_v23 = vld [vmem:[%s10853_s6 + $0x88] ss:$16 sps:$4 sm:$0xff]   ;;  %v7488_v24 = vld [vmem:[%s10853_s6 + $0xa4] ss:$16 sps:$4 sm:$0xff]  }
  0x48   :  { %1148 = vmatprep.subr.bf16.mxu0 %v7422_v27  ;;  %1221 = vmatprep.subr.bf16.mxu1 %v7425_v28  ;;  %v7489_v27 = vld [vmem:[%s10853_s6 + $0xa8] ss:$16 sps:$4 sm:$0xff]   ;;  %v946_v28 = vld [vmem:[%s10854_s3 + $0x30] sm:$0xff] }
  0x4a   :  { %707 = vmatmul.mubr.bf16.gmra.mrb[4].mxu0 %v119_v29  ;;  %780 = vmatmul.mubr.bf16.gmra.mrb[4].mxu1 %v119_v29  ;;  %v947_v29 = vld [vmem:[%s10854_s3 + $0x38] sm:$0xff] }
  0x4b   :  { %1149 = vmatpush1.bf16.msra.mxu0 %v7420_v30  ;;  %1222 = vmatpush1.bf16.msra.mxu1 %v7423_v31  ;;  %v7494_v30 = vld [vmem:[%s10853_s6 + $0xc4] ss:$16 sps:$4 sm:$0xff]   ;;  %v7497_v31 = vld [vmem:[%s10853_s6 + $0xcc] ss:$16 sps:$4 sm:$0xff]  }
  0x4c   :  { %1150 = vmatprep.subr.bf16.mxu0 %v7428_v32  ;;  %1223 = vmatprep.subr.bf16.mxu1 %v7431_v33  ;;  %v951_v32 = vpack.c.bf16 %v947_v29, %v946_v28  ;;  %v7492_v33 = vld [vmem:[%s10853_s6 + $0xc0] ss:$16 sps:$4 sm:$0xff]   ;;  %v8049_v28 = vmov 0.0|0.0   ;;  %v8871_v29 = vld [vmem:[%s10856_s9 + $0x44] ss:$16 sps:$4 sm:$0xff]  }
  0x4d   :  { %716 = vmatprep.mubr.bf16.mxu0 %v10862_v1  ;;  %789 = vmatprep.mubr.bf16.mxu1 %v10862_v1 }
  0x4f   :  { %1151 = vmatpush1.bf16.msra.mxu0 %v7426_v34  ;;  %1224 = vmatpush1.bf16.msra.mxu1 %v7429_v35  ;;  %v7495_v34 = vld [vmem:[%s10853_s6 + $0xc8] ss:$16 sps:$4 sm:$0xff]   ;;  %v7500_v35 = vld [vmem:[%s10853_s6 + $0xe4] ss:$16 sps:$4 sm:$0xff]  }
  0x50   :  { %1152 = vmatprep.subr.bf16.mxu0 %v7434_v38  ;;  %1225 = vmatprep.subr.bf16.mxu1 %v7437_v39  ;;  %v7501_v38 = vld [vmem:[%s10853_s6 + $0xe8] ss:$16 sps:$4 sm:$0xff]   ;;  %v896_v39 = vld [vmem:[%s10857_s2] sm:$0xff] }
  0x52   :  { %717 = vmatmul.mubr.bf16.gmra.mrb[8].mxu0 %v120_v40  ;;  %790 = vmatmul.mubr.bf16.gmra.mrb[8].mxu1 %v120_v40  ;;  %v897_v40 = vld [vmem:[%s10857_s2 + $0x8] sm:$0xff] }
  0x53   :  { %1153 = vmatpush1.bf16.msra.mxu0 %v7432_v41  ;;  %1226 = vmatpush1.bf16.msra.mxu1 %v7435_v42  ;;  %v8609_v41 = vld [vmem:[%s10855_s8 + $0x4] ss:$16 sps:$4 sm:$0xff]   ;;  %v8614_v42 = vld [vmem:[%s10855_s8 + $0xc] ss:$16 sps:$4 sm:$0xff]  }
  0x54   :  { %1154 = vmatprep.subr.bf16.mxu0 %v7440_v43  ;;  %1227 = vmatprep.subr.bf16.mxu1 %v7443_v44  ;;  %v904_v43 = vpack.c.bf16 %v897_v40, %v896_v39  ;;  %v8621_v44 = vld [vmem:[%s10855_s8] ss:$16 sps:$4 sm:$0xff]   ;;  %v8940_v40 = vld [vmem:[%s10856_s9 + $0x88] ss:$16 sps:$4 sm:$0xff]  }
  0x55   :  { %726 = vmatprep.mubr.bf16.mxu0 %v10862_v1  ;;  %799 = vmatprep.mubr.bf16.mxu1 %v10862_v1  ;;  %v8935_v39 = vld [vmem:[%s10856_s9 + $0x80] ss:$16 sps:$4 sm:$0xff]  }
  0x57   :  { %1155 = vmatpush1.bf16.msra.mxu0 %v7438_v45  ;;  %1228 = vmatpush1.bf16.msra.mxu1 %v7441_v46  ;;  %v8626_v45 = vld [vmem:[%s10855_s8 + $0x8] ss:$16 sps:$4 sm:$0xff]   ;;  %v8631_v46 = vld [vmem:[%s10855_s8 + $0x24] ss:$16 sps:$4 sm:$0xff]  }
  0x58   :  { %1156 = vmatprep.subr.bf16.mxu0 %v7446_v49  ;;  %1229 = vmatprep.subr.bf16.mxu1 %v7449_v50  ;;  %v8648_v49 = vld [vmem:[%s10855_s8 + $0x28] ss:$16 sps:$4 sm:$0xff]   ;;  %v898_v50 = vld [vmem:[%s10857_s2 + $0x10] sm:$0xff] }
  0x5a   :  { %727 = vmatmul.mubr.bf16.gmra.mrb[12].mxu0 %v121_v51  ;;  %800 = vmatmul.mubr.bf16.gmra.mrb[12].mxu1 %v121_v51  ;;  %v899_v51 = vld [vmem:[%s10857_s2 + $0x18] sm:$0xff] }
  0x5b   :  { %1157 = vmatpush1.bf16.msra.mxu0 %v7444_v52  ;;  %1230 = vmatpush1.bf16.msra.mxu1 %v7447_v53  ;;  %v8661_v52 = vld [vmem:[%s10855_s8 + $0x44] ss:$16 sps:$4 sm:$0xff]   ;;  %v8668_v53 = vld [vmem:[%s10855_s8 + $0x4c] ss:$16 sps:$4 sm:$0xff]  }
  0x5c   :  { %1158 = vmatprep.subr.bf16.mxu0 %v7452_v54  ;;  %1231 = vmatprep.subr.bf16.mxu1 %v7455_v55  ;;  %v905_v54 = vpack.c.bf16 %v899_v51, %v898_v50  ;;  %v8675_v55 = vld [vmem:[%s10855_s8 + $0x40] ss:$16 sps:$4 sm:$0xff]   ;;  %v8950_v50 = vld [vmem:[%s10856_s9 + $0xac] ss:$16 sps:$4 sm:$0xff]  }
  0x5d   :  { %1176 = vmatprep.mubr.bf16.mxu0 %v10862_v1  ;;  %1249 = vmatprep.mubr.bf16.mxu1 %v10862_v1  ;;  %10894 = vst [vmem:[#allocation8_spill] sm:$0xff] %v8950_v50  ;;  %v8959_v51 = vld [vmem:[%s10856_s9 + $0xa0] ss:$16 sps:$4 sm:$0xff]  }
  0x5f   :  { %1159 = vmatpush1.bf16.msra.mxu0 %v7450_v56  ;;  %1232 = vmatpush1.bf16.msra.mxu1 %v7453_v57  ;;  %v8680_v56 = vld [vmem:[%s10855_s8 + $0x48] ss:$16 sps:$4 sm:$0xff]   ;;  %v8687_v57 = vld [vmem:[%s10855_s8 + $0x64] ss:$16 sps:$4 sm:$0xff]  }
  0x60   :  { %1450 = vmatprep.subr.bf16.mxu0 %v7458_v60  ;;  %1523 = vmatprep.subr.bf16.mxu1 %v7461_v61  ;;  %v8704_v60 = vld [vmem:[%s10855_s8 + $0x68] ss:$16 sps:$4 sm:$0xff]   ;;  %v900_v61 = vld [vmem:[%s10857_s2 + $0x20] sm:$0xff] }
  0x62   :  { %1177 = vmatmul.mubr.bf16.vlgmr.msra.gmra.mrb[16].mxu0 %v948_v62  ;;  %1250 = vmatmul.mubr.bf16.vlgmr.msra.gmra.mrb[16].mxu1 %v948_v62  ;;  %v901_v62 = vld [vmem:[%s10857_s2 + $0x28] sm:$0xff] }
  0x63   :  { %1451 = vmatpush1.bf16.msra.mxu0 %v7456_v63  ;;  %1524 = vmatpush1.bf16.msra.mxu1 %v7459_v0  ;;  %v8715_v63 = vld [vmem:[%s10855_s8 + $0x84] ss:$16 sps:$4 sm:$0xff]   ;;  %v8720_v0 = vld [vmem:[%s10855_s8 + $0x8c] ss:$16 sps:$4 sm:$0xff]  }
  0x64   :  { %1452 = vmatprep.subr.bf16.mxu0 %v7464_v2  ;;  %1525 = vmatprep.subr.bf16.mxu1 %v7467_v3  ;;  %v8731_v2 = vld [vmem:[%s10855_s8 + $0x80] ss:$16 sps:$4 sm:$0xff]   ;;  %v8736_v3 = vld [vmem:[%s10855_s8 + $0x88] ss:$16 sps:$4 sm:$0xff]  }
  0x65   :  { %1186 = vmatprep.mubr.bf16.mxu0 %v10862_v1  ;;  %1259 = vmatprep.mubr.bf16.mxu1 %v10862_v1 }
  0x67   :  { %1453 = vmatpush1.bf16.msra.mxu0 %v7462_v4  ;;  %1526 = vmatpush1.bf16.msra.mxu1 %v7465_v5  ;;  %v906_v4 = vpack.c.bf16 %v901_v62, %v900_v61  ;;  %v8741_v5 = vld [vmem:[%s10855_s8 + $0xa4] ss:$16 sps:$4 sm:$0xff]   ;;  %v8974_v62 = vld [vmem:[%s10856_s9 + $0xcc] ss:$16 sps:$4 sm:$0xff]  }
  0x68   :  { %1454 = vmatprep.subr.bf16.mxu0 %v7470_v8  ;;  %1527 = vmatprep.subr.bf16.mxu1 %v7473_v9  ;;  %v8760_v8 = vld [vmem:[%s10855_s8 + $0xa8] ss:$16 sps:$4 sm:$0xff]   ;;  %v902_v9 = vld [vmem:[%s10857_s2 + $0x30] sm:$0xff] }
  0x69   :  { %v8969_v61 = vld [vmem:[%s10856_s9 + $0xc4] ss:$16 sps:$4 sm:$0xff]  }
  0x6a   :  { %1187 = vmatmul.mubr.bf16.gmra.mrb[20].mxu0 %v949_v10  ;;  %1260 = vmatmul.mubr.bf16.gmra.mrb[20].mxu1 %v949_v10  ;;  %v903_v10 = vld [vmem:[%s10857_s2 + $0x38] sm:$0xff] }
  0x6b   :  { %1455 = vmatpush1.bf16.msra.mxu0 %v7468_v11  ;;  %1528 = vmatpush1.bf16.msra.mxu1 %v7471_v12  ;;  %v8771_v11 = vld [vmem:[%s10855_s8 + $0xc4] ss:$16 sps:$4 sm:$0xff]   ;;  %v8778_v12 = vld [vmem:[%s10855_s8 + $0xcc] ss:$16 sps:$4 sm:$0xff]  }
  0x6c   :  { %1456 = vmatprep.subr.bf16.mxu0 %v7476_v13  ;;  %1529 = vmatprep.subr.bf16.mxu1 %v7479_v14  ;;  %v8787_v13 = vld [vmem:[%s10855_s8 + $0xc0] ss:$16 sps:$4 sm:$0xff]   ;;  %v8792_v14 = vld [vmem:[%s10855_s8 + $0xc8] ss:$16 sps:$4 sm:$0xff]  }
  0x6d   :  { %1196 = vmatprep.mubr.bf16.mxu0 %v10862_v1  ;;  %1269 = vmatprep.mubr.bf16.mxu1 %v10862_v1 }
  0x6f   :  { %1457 = vmatpush1.bf16.msra.mxu0 %v7474_v15  ;;  %1530 = vmatpush1.bf16.msra.mxu1 %v7477_v16  ;;  %v907_v15 = vpack.c.bf16 %v903_v10, %v902_v9  ;;  %v8797_v16 = vld [vmem:[%s10855_s8 + $0xe4] ss:$16 sps:$4 sm:$0xff]   ;;  %v8988_v9 = vld [vmem:[%s10856_s9 + $0xc8] ss:$16 sps:$4 sm:$0xff]  }
  0x70   :  { %1458 = vmatprep.subr.bf16.mxu0 %v7482_v19  ;;  %1531 = vmatprep.subr.bf16.mxu1 %v7485_v20  ;;  %v8816_v19 = vld [vmem:[%s10855_s8 + $0xe8] ss:$16 sps:$4 sm:$0xff]   ;;  %v8821_v20 = vld [vmem:[%s10856_s9 + $0x4] ss:$16 sps:$4 sm:$0xff]  }
  0x71   :  { %v8993_v10 = vld [vmem:[%s10856_s9 + $0xe4] ss:$16 sps:$4 sm:$0xff]  }
  0x72   :  { %1197 = vmatmul.mubr.bf16.gmra.mrb[24].mxu0 %v950_v21  ;;  %1270 = vmatmul.mubr.bf16.gmra.mrb[24].mxu1 %v950_v21  ;;  %v8826_v21 = vld [vmem:[%s10856_s9 + $0xc] ss:$16 sps:$4 sm:$0xff]   ;;  %10895 = vst [vmem:[#allocation9_spill] sm:$0xff] %v8993_v10 }
  0x73   :  { %1459 = vmatpush1.bf16.msra.mxu0 %v7480_v22  ;;  %1532 = vmatpush1.bf16.msra.mxu1 %v7483_v23  ;;  %v8837_v22 = vld [vmem:[%s10856_s9] ss:$16 sps:$4 sm:$0xff]   ;;  %v8842_v23 = vld [vmem:[%s10856_s9 + $0x8] ss:$16 sps:$4 sm:$0xff]  }
  0x74   :  { %1460 = vmatprep.subr.bf16.mxu0 %v7488_v24  ;;  %1533 = vmatprep.subr.bf16.mxu1 %v7491_v25  ;;  %v8847_v24 = vld [vmem:[%s10856_s9 + $0x24] ss:$16 sps:$4 sm:$0xff]   ;;  %v8852_v25 = vld [vmem:[%s10856_s9 + $0x2c] ss:$16 sps:$4 sm:$0xff]  }
  0x75   :  { %1206 = vmatprep.mubr.bf16.mxu0 %v10862_v1  ;;  %1279 = vmatprep.mubr.bf16.mxu1 %v10862_v1 }
  0x77   :  { %1461 = vmatpush1.bf16.msra.mxu0 %v7486_v26  ;;  %1534 = vmatpush1.bf16.msra.mxu1 %v7489_v27  ;;  %v8861_v26 = vld [vmem:[%s10856_s9 + $0x20] ss:$16 sps:$4 sm:$0xff]   ;;  %v8866_v27 = vld [vmem:[%s10856_s9 + $0x28] ss:$16 sps:$4 sm:$0xff]  }
  0x78   :  { %1462 = vmatprep.subr.bf16.mxu0 %v7494_v30  ;;  %1535 = vmatprep.subr.bf16.mxu1 %v7497_v31  ;;  %v8876_v30 = vld [vmem:[%s10856_s9 + $0x4c] ss:$16 sps:$4 sm:$0xff]   ;;  %v8885_v31 = vld [vmem:[%s10856_s9 + $0x40] ss:$16 sps:$4 sm:$0xff]  }
  0x7a   :  { %1207 = vmatmul.mubr.bf16.gmra.mrb[28].mxu0 %v951_v32  ;;  %1280 = vmatmul.mubr.bf16.gmra.mrb[28].mxu1 %v951_v32  ;;  %v8890_v32 = vld [vmem:[%s10856_s9 + $0x48] ss:$16 sps:$4 sm:$0xff]  }
  0x7b   :  { %1463 = vmatpush1.bf16.msra.mxu0 %v7492_v33  ;;  %1536 = vmatpush1.bf16.msra.mxu1 %v7495_v34  ;;  %v8897_v33 = vld [vmem:[%s10856_s9 + $0x64] ss:$16 sps:$4 sm:$0xff]   ;;  %v8902_v34 = vld [vmem:[%s10856_s9 + $0x6c] ss:$16 sps:$4 sm:$0xff]  }
  0x7c   :  { %1464 = vmatprep.subr.bf16.mxu0 %v7500_v35  ;;  %1537 = vmatprep.subr.bf16.mxu1 %v7503_v36  ;;  %v8911_v35 = vld [vmem:[%s10856_s9 + $0x60] ss:$16 sps:$4 sm:$0xff]   ;;  %v8916_v36 = vld [vmem:[%s10856_s9 + $0x68] ss:$16 sps:$4 sm:$0xff]  }
  0x7d   :  { %1482 = vmatprep.mubr.bf16.mxu0 %v10862_v1  ;;  %1555 = vmatprep.mubr.bf16.mxu1 %v10862_v1 }
  0x7f   :  { %1465 = vmatpush1.bf16.msra.mxu0 %v7498_v37  ;;  %1538 = vmatpush1.bf16.msra.mxu1 %v7501_v38  ;;  %v8921_v37 = vld [vmem:[%s10856_s9 + $0x84] ss:$16 sps:$4 sm:$0xff]   ;;  %v8926_v38 = vld [vmem:[%s10856_s9 + $0x8c] ss:$16 sps:$4 sm:$0xff]  }
  0x80   :  { %1883 = vmatprep.subr.bf16.mxu0 %v8609_v41  ;;  %1924 = vmatprep.subr.bf16.mxu1 %v8614_v42 }
  0x82   :  { %1483 = vmatmul.mubr.bf16.vlgmr.msra.gmra.mrb[16].mxu0 %v904_v43  ;;  %1556 = vmatmul.mubr.bf16.vlgmr.msra.gmra.mrb[16].mxu1 %v904_v43  ;;  %v8945_v43 = vld [vmem:[%s10856_s9 + $0xa4] ss:$16 sps:$4 sm:$0xff]  }
  0x83   :  { %1884 = vmatpush1.bf16.msra.mxu0 %v8621_v44  ;;  %1925 = vmatpush1.bf16.msra.mxu1 %v8626_v45 }
  0x84   :  { %1885 = vmatprep.subr.bf16.mxu0 %v8631_v46  ;;  %1926 = vmatprep.subr.bf16.mxu1 %v8638_v47 }
  0x85   :  { %1492 = vmatprep.mubr.bf16.mxu0 %v10862_v1  ;;  %1565 = vmatprep.mubr.bf16.mxu1 %v10862_v1 }
  0x87   :  { %1886 = vmatpush1.bf16.msra.mxu0 %v8643_v48  ;;  %1927 = vmatpush1.bf16.msra.mxu1 %v8648_v49 }
  0x88   :  { %1887 = vmatprep.subr.bf16.mxu0 %v8661_v52  ;;  %1928 = vmatprep.subr.bf16.mxu1 %v8668_v53 }
  0x8a   :  { %1493 = vmatmul.mubr.bf16.gmra.mrb[20].mxu0 %v905_v54  ;;  %1566 = vmatmul.mubr.bf16.gmra.mrb[20].mxu1 %v905_v54  ;;  %v8964_v54 = vld [vmem:[%s10856_s9 + $0xa8] ss:$16 sps:$4 sm:$0xff]  }
  0x8b   :  { %1888 = vmatpush1.bf16.msra.mxu0 %v8675_v55  ;;  %1929 = vmatpush1.bf16.msra.mxu1 %v8680_v56 }
  0x8c   :  { %1889 = vmatprep.subr.bf16.mxu0 %v8687_v57  ;;  %1930 = vmatprep.subr.bf16.mxu1 %v8694_v58 }
  0x8d   :  { %1502 = vmatprep.mubr.bf16.mxu0 %v10862_v1  ;;  %1575 = vmatprep.mubr.bf16.mxu1 %v10862_v1 }
  0x8f   :  { %1890 = vmatpush1.bf16.msra.mxu0 %v8699_v59  ;;  %1931 = vmatpush1.bf16.msra.mxu1 %v8704_v60 }
  0x90   :  { %1891 = vmatprep.subr.bf16.mxu0 %v8715_v63  ;;  %1932 = vmatprep.subr.bf16.mxu1 %v8720_v0 }
  0x92   :  { %1503 = vmatmul.mubr.bf16.gmra.mrb[24].mxu0 %v906_v4  ;;  %1576 = vmatmul.mubr.bf16.gmra.mrb[24].mxu1 %v906_v4  ;;  %v8983_v4 = vld [vmem:[%s10856_s9 + $0xc0] ss:$16 sps:$4 sm:$0xff]  }
  0x93   :  { %1892 = vmatpush1.bf16.msra.mxu0 %v8731_v2  ;;  %1933 = vmatpush1.bf16.msra.mxu1 %v8736_v3 }
  0x94   :  { %1893 = vmatprep.subr.bf16.mxu0 %v8741_v5  ;;  %1934 = vmatprep.subr.bf16.mxu1 %v8746_v6 }
  0x95   :  { %1512 = vmatprep.mubr.bf16.mxu0 %v10862_v1  ;;  %1585 = vmatprep.mubr.bf16.mxu1 %v10862_v1 }
  0x97   :  { %1894 = vmatpush1.bf16.msra.mxu0 %v8755_v7  ;;  %1935 = vmatpush1.bf16.msra.mxu1 %v8760_v8 }
  0x98   :  { %1895 = vmatprep.subr.bf16.mxu0 %v8771_v11  ;;  %1936 = vmatprep.subr.bf16.mxu1 %v8778_v12 }
  0x9a   :  { %1513 = vmatmul.mubr.bf16.gmra.mrb[28].mxu0 %v907_v15  ;;  %1586 = vmatmul.mubr.bf16.gmra.mrb[28].mxu1 %v907_v15  ;;  %v8998_v15 = vld [vmem:[%s10856_s9 + $0xec] ss:$16 sps:$4 sm:$0xff]  }
  0x9b   :  { %1896 = vmatpush1.bf16.msra.mxu0 %v8787_v13  ;;  %1937 = vmatpush1.bf16.msra.mxu1 %v8792_v14 }
  0x9c   :  { %1897 = vmatprep.subr.bf16.mxu0 %v8797_v16  ;;  %1938 = vmatprep.subr.bf16.mxu1 %v8802_v17 }
  0x9d   :  { %1915 = vmatprep.mubr.bf16.mxu0 %v10862_v1  ;;  %1956 = vmatprep.mubr.bf16.mxu1 %v10862_v1 }
  0x9f   :  { %1898 = vmatpush1.bf16.msra.mxu0 %v8811_v18  ;;  %1939 = vmatpush1.bf16.msra.mxu1 %v8816_v19 }
  0xa0   :  { %2167 = vmatprep.subr.bf16.mxu0 %v8821_v20  ;;  %2208 = vmatprep.subr.bf16.mxu1 %v8826_v21 }
  0xa2   :  { %1916 = vmatmul.mubr.bf16.vlgmr.msra.gmra.mrb[32].mxu0 %v8049_v28  ;;  %1957 = vmatmul.mubr.bf16.vlgmr.msra.gmra.mrb[32].mxu1 %v8049_v28 }
  0xa3   :  { %2168 = vmatpush1.bf16.msra.mxu0 %v8837_v22  ;;  %2209 = vmatpush1.bf16.msra.mxu1 %v8842_v23 }
  0xa4   :  { %2169 = vmatprep.subr.bf16.mxu0 %v8847_v24  ;;  %2210 = vmatprep.subr.bf16.mxu1 %v8852_v25 }
  0xa5   :  { %2199 = vmatprep.mubr.bf16.mxu0 %v10862_v1  ;;  %2240 = vmatprep.mubr.bf16.mxu1 %v10862_v1  ;;  %v9007_v1 = vld [vmem:[%s10856_s9 + $0xe0] ss:$16 sps:$4 sm:$0xff]  }
  0xa7   :  { %2170 = vmatpush1.bf16.msra.mxu0 %v8861_v26  ;;  %2211 = vmatpush1.bf16.msra.mxu1 %v8866_v27 }
  0xa8   :  { %2171 = vmatprep.subr.bf16.mxu0 %v8871_v29  ;;  %2212 = vmatprep.subr.bf16.mxu1 %v8876_v30 }
  0xab   :  { %2172 = vmatpush1.bf16.msra.mxu0 %v8885_v31  ;;  %2213 = vmatpush1.bf16.msra.mxu1 %v8890_v32 }
  0xac   :  { %2173 = vmatprep.subr.bf16.mxu0 %v8897_v33  ;;  %2214 = vmatprep.subr.bf16.mxu1 %v8902_v34 }
  0xaf   :  { %2174 = vmatpush1.bf16.msra.mxu0 %v8911_v35  ;;  %2215 = vmatpush1.bf16.msra.mxu1 %v8916_v36 }
  0xb0   :  { %2175 = vmatprep.subr.bf16.mxu0 %v8921_v37  ;;  %2216 = vmatprep.subr.bf16.mxu1 %v8926_v38 }
  0xb3   :  { %2176 = vmatpush1.bf16.msra.mxu0 %v8935_v39  ;;  %2217 = vmatpush1.bf16.msra.mxu1 %v8940_v40 }
  0xb4   :  { %2177 = vmatprep.subr.bf16.mxu0 %v8945_v43  ;;  %2218 = vmatprep.subr.bf16.mxu1 %v8950_v50  ;;  %v9012_v50 = vld [vmem:[%s10856_s9 + $0xe8] ss:$16 sps:$4 sm:$0xff]  }
  0xb7   :  { %2178 = vmatpush1.bf16.msra.mxu0 %v8959_v51  ;;  %2219 = vmatpush1.bf16.msra.mxu1 %v8964_v54 }
  0xb8   :  { %2179 = vmatprep.subr.bf16.mxu0 %v8969_v61  ;;  %2220 = vmatprep.subr.bf16.mxu1 %v8974_v62 }
  0xbb   :  { %2180 = vmatpush1.bf16.msra.mxu0 %v8983_v4  ;;  %2221 = vmatpush1.bf16.msra.mxu1 %v8988_v9 }
  0xbc   :  { %2181 = vmatprep.subr.bf16.mxu0 %v8993_v10  ;;  %2222 = vmatprep.subr.bf16.mxu1 %v8998_v15  ;;  %v10896_v10 = vmov 0  }
  0xbf   :  { %2182 = vmatpush1.bf16.msra.mxu0 %v9007_v1  ;;  %2223 = vmatpush1.bf16.msra.mxu1 %v9012_v50 }
  0xc0   :  { %2490 = vmatprep.subr.bf16.mxu0 %v8609_v41  ;;  %2531 = vmatprep.subr.bf16.mxu1 %v8614_v42  ;;  %v812_v41 = vlaneseq }
  0xc2   :  { %2200 = vmatmul.mubr.bf16.vlgmr.msra.gmra.mrb[36].mxu0 %v8049_v28  ;;  %2241 = vmatmul.mubr.bf16.vlgmr.msra.gmra.mrb[36].mxu1 %v8049_v28  ;;  %v9056_v42 = vshrl.u32 %v812_v41, 7 }
  0xc3   :  { %2491 = vmatpush1.bf16.msra.mxu0 %v8621_v44  ;;  %2532 = vmatpush1.bf16.msra.mxu1 %v8626_v45 }
  0xc4   :  { %2492 = vmatprep.subr.bf16.mxu0 %v8631_v46  ;;  %2533 = vmatprep.subr.bf16.mxu1 %v8638_v47  ;;  %v10869_v44 = vsub.s32 0, %v9056_v42  ;;  %v10868_v45 = vsub.s32 2, %v9056_v42  ;;  %v810_v46 = vld [vmem:[%s10858_s10] sm:$0xf]  ;;  %v10867_v47 = vsub.s32 1, %v9056_v42 }
  0xc5   :  { %2522 = vmatprep.mubr.bf16.mxu0 %v10896_v10  ;;  %2563 = vmatprep.mubr.bf16.mxu1 %v10896_v10 }
  0xc7   :  { %2493 = vmatpush1.bf16.msra.mxu0 %v8643_v48  ;;  %2534 = vmatpush1.bf16.msra.mxu1 %v8648_v49  ;;  %v10866_v48 = vsub.s32 3, %v9056_v42 }
  0xc8   :  { %2494 = vmatprep.subr.bf16.mxu0 %v8661_v52  ;;  %2535 = vmatprep.subr.bf16.mxu1 %v8668_v53  ;;  %v9071_v53 = vrot.slane %v810_v46, %v10869_v44 }
  0xcb   :  { %2495 = vmatpush1.bf16.msra.mxu0 %v8675_v55  ;;  %2536 = vmatpush1.bf16.msra.mxu1 %v8680_v56  ;;  %v9075_v55 = vrot.slane %v810_v46, %v10868_v45 }
  0xcc   :  { %2496 = vmatprep.subr.bf16.mxu0 %v8687_v57  ;;  %2537 = vmatprep.subr.bf16.mxu1 %v8694_v58  ;;  %v9083_v58 = vrot.slane %v810_v46, %v10867_v47 }
  0xcf   :  { %2497 = vmatpush1.bf16.msra.mxu0 %v8699_v59  ;;  %2538 = vmatpush1.bf16.msra.mxu1 %v8704_v60  ;;  %v9087_v59 = vrot.slane %v810_v46, %v10866_v48 }
  0xd0   :  { %2498 = vmatprep.subr.bf16.mxu0 %v8715_v63  ;;  %2539 = vmatprep.subr.bf16.mxu1 %v8720_v0 }
  0xd3   :  { %2499 = vmatpush1.bf16.msra.mxu0 %v8731_v2  ;;  %2540 = vmatpush1.bf16.msra.mxu1 %v8736_v3 }
  0xd4   :  { %2500 = vmatprep.subr.bf16.mxu0 %v8741_v5  ;;  %2541 = vmatprep.subr.bf16.mxu1 %v8746_v6 }
  0xd7   :  { %2501 = vmatpush1.bf16.msra.mxu0 %v8755_v7  ;;  %2542 = vmatpush1.bf16.msra.mxu1 %v8760_v8 }
  0xd8   :  { %2502 = vmatprep.subr.bf16.mxu0 %v8771_v11  ;;  %2543 = vmatprep.subr.bf16.mxu1 %v8778_v12 }
  0xdb   :  { %2503 = vmatpush1.bf16.msra.mxu0 %v8787_v13  ;;  %2544 = vmatpush1.bf16.msra.mxu1 %v8792_v14 }
  0xdc   :  { %2504 = vmatprep.subr.bf16.mxu0 %v8797_v16  ;;  %2545 = vmatprep.subr.bf16.mxu1 %v8802_v17 }
  0xdf   :  { %2505 = vmatpush1.bf16.msra.mxu0 %v8811_v18  ;;  %2546 = vmatpush1.bf16.msra.mxu1 %v8816_v19 }
  0xe0   :  { %2774 = vmatprep.subr.bf16.mxu0 %v8821_v20  ;;  %2815 = vmatprep.subr.bf16.mxu1 %v8826_v21 }
 0x115   :  { %v9065_v49 = vpop.f32.mrb[0].mxu0  ;;  %v9067_v52 = vpop.f32.mrb[0].mxu1 }
 0x116   :  { %v9077_v56 = vpop.f32.mrb[1].mxu0  ;;  %v9079_v57 = vpop.f32.mrb[1].mxu1 }
 0x117   :  { %v702_v60 = vpop.f32.mrb[2].mxu0  ;;  %v775_v63 = vpop.f32.mrb[2].mxu1 }
 0x118   :  { %v9090_v0 = vadd.f32 %v9071_v53, %v702_v60  ;;  %v9093_v2 = vadd.f32 %v9075_v55, %v775_v63  ;;  %v704_v3 = vpop.f32.mrb[3].mxu0  ;;  %v777_v5 = vpop.f32.mrb[3].mxu1 }
 0x119   :  { %v9096_v6 = vadd.f32 %v9083_v58, %v704_v3  ;;  %v9099_v7 = vadd.f32 %v9087_v59, %v777_v5 }
 0x11d   :  { %v708_v8 = vpop.f32.mrb[4].mxu0  ;;  %v781_v11 = vpop.f32.mrb[4].mxu1 }
 0x11e   :  { %v9102_v12 = vadd.f32 %v9071_v53, %v708_v8  ;;  %v9105_v13 = vadd.f32 %v9075_v55, %v781_v11  ;;  %v710_v14 = vpop.f32.mrb[5].mxu0  ;;  %v783_v16 = vpop.f32.mrb[5].mxu1 }
 0x11f   :  { %v9108_v17 = vadd.f32 %v9083_v58, %v710_v14  ;;  %v9111_v18 = vadd.f32 %v9087_v59, %v783_v16  ;;  %v712_v19 = vpop.f32.mrb[6].mxu0  ;;  %v785_v20 = vpop.f32.mrb[6].mxu1 }
 0x120   :  { %10897 = vst [vmem:[#allocation10_spill] sm:$0xff] %v9102_v12  ;;  %10898 = vst [vmem:[#allocation11_spill] sm:$0xff] %v9105_v13  ;;  %v9114_v21 = vadd.f32 %v9071_v53, %v712_v19  ;;  %v9117_v28 = vadd.f32 %v9075_v55, %v785_v20  ;;  %v714_v41 = vpop.f32.mrb[7].mxu0  ;;  %v787_v46 = vpop.f32.mrb[7].mxu1 }
 0x121   :  { %10899 = vst [vmem:[#allocation12_spill] sm:$0xff] %v9108_v17  ;;  %10900 = vst [vmem:[#allocation13_spill] sm:$0xff] %v9111_v18  ;;  %v9120_v60 = vadd.f32 %v9083_v58, %v714_v41  ;;  %v9123_v63 = vadd.f32 %v9087_v59, %v787_v46 }
 0x122   :  { %10901 = vst [vmem:[#allocation14_spill] sm:$0xff] %v9114_v21  ;;  %10902 = vst [vmem:[#allocation15_spill] sm:$0xff] %v9117_v28 }
 0x123   :  { %10903 = vst [vmem:[#allocation16_spill] sm:$0xff] %v9120_v60  ;;  %10904 = vst [vmem:[#allocation17_spill] sm:$0xff] %v9123_v63 }
 0x125   :  { %v718_v3 = vpop.f32.mrb[8].mxu0  ;;  %v791_v5 = vpop.f32.mrb[8].mxu1 }
 0x126   :  { %v9126_v8 = vadd.f32 %v9071_v53, %v718_v3  ;;  %v9129_v11 = vadd.f32 %v9075_v55, %v791_v5  ;;  %v720_v14 = vpop.f32.mrb[9].mxu0  ;;  %v793_v16 = vpop.f32.mrb[9].mxu1 }
 0x127   :  { %v9132_v19 = vadd.f32 %v9083_v58, %v720_v14  ;;  %v9135_v20 = vadd.f32 %v9087_v59, %v793_v16  ;;  %v722_v41 = vpop.f32.mrb[10].mxu0  ;;  %v795_v48 = vpop.f32.mrb[10].mxu1 }
 0x128   :  { %10905 = vst [vmem:[#allocation18_spill] sm:$0xff] %v9126_v8  ;;  %10906 = vst [vmem:[#allocation19_spill] sm:$0xff] %v9129_v11  ;;  %v9138_v46 = vadd.f32 %v9071_v53, %v722_v41  ;;  %v9141_v47 = vadd.f32 %v9075_v55, %v795_v48  ;;  %v724_v3 = vpop.f32.mrb[11].mxu0  ;;  %v797_v45 = vpop.f32.mrb[11].mxu1 }
 0x129   :  { %10907 = vst [vmem:[#allocation20_spill] sm:$0xff] %v9132_v19  ;;  %10908 = vst [vmem:[#allocation21_spill] sm:$0xff] %v9135_v20  ;;  %v9144_v5 = vadd.f32 %v9083_v58, %v724_v3  ;;  %v9147_v44 = vadd.f32 %v9087_v59, %v797_v45 }
 0x12a   :  { %10909 = vst [vmem:[#allocation22_spill] sm:$0xff] %v9138_v46  ;;  %10910 = vst [vmem:[#allocation23_spill] sm:$0xff] %v9141_v47 }
 0x12b   :  { %10911 = vst [vmem:[#allocation24_spill] sm:$0xff] %v9144_v5  ;;  %10912 = vst [vmem:[#allocation25_spill] sm:$0xff] %v9147_v44 }
 0x12d   :  { %v728_v14 = vpop.f32.mrb[12].mxu0  ;;  %v801_v19 = vpop.f32.mrb[12].mxu1 }
 0x12e   :  { %v9150_v16 = vadd.f32 %v9071_v53, %v728_v14  ;;  %v9153_v20 = vadd.f32 %v9075_v55, %v801_v19  ;;  %v730_v41 = vpop.f32.mrb[13].mxu0  ;;  %v803_v46 = vpop.f32.mrb[13].mxu1 }
 0x12f   :  { %v9156_v48 = vadd.f32 %v9083_v58, %v730_v41  ;;  %v9159_v47 = vadd.f32 %v9087_v59, %v803_v46  ;;  %v732_v3 = vpop.f32.mrb[14].mxu0  ;;  %v805_v5 = vpop.f32.mrb[14].mxu1  ;;  %v1596_v46 = vld [vmem:[%s10859_s11] sm:$0xf]  ;;  %v10921_v41 = vsub.s32 0, %v9056_v42 }
 0x130   :  { %10913 = vst [vmem:[#allocation26_spill] sm:$0xff] %v9150_v16  ;;  %10914 = vst [vmem:[#allocation27_spill] sm:$0xff] %v9153_v20  ;;  %v9162_v45 = vadd.f32 %v9071_v53, %v732_v3  ;;  %v9165_v44 = vadd.f32 %v9075_v55, %v805_v5  ;;  %v734_v14 = vpop.f32.mrb[15].mxu0  ;;  %v807_v16 = vpop.f32.mrb[15].mxu1  ;;  %v10922_v3 = vsub.s32 2, %v9056_v42 }
 0x131   :  { %10915 = vst [vmem:[#allocation28_spill] sm:$0xff] %v9156_v48  ;;  %10916 = vst [vmem:[#allocation29_spill] sm:$0xff] %v9159_v47  ;;  %v9168_v19 = vadd.f32 %v9083_v58, %v734_v14  ;;  %v9171_v20 = vadd.f32 %v9087_v59, %v807_v16  ;;  %v9178_v47 = vrot.slane %v1596_v46, %v10921_v41  ;;  %v10924_v14 = vsub.s32 3, %v9056_v42 }
 0x132   :  { %10917 = vst [vmem:[#allocation30_spill] sm:$0xff] %v9162_v45  ;;  %10918 = vst [vmem:[#allocation31_spill] sm:$0xff] %v9165_v44  ;;  %v9182_v5 = vrot.slane %v1596_v46, %v10922_v3  ;;  %v10923_v44 = vsub.s32 1, %v9056_v42 }
 0x133   :  { %10919 = vst [vmem:[#allocation32_spill] sm:$0xff] %v9168_v19  ;;  %10920 = vst [vmem:[#allocation33_spill] sm:$0xff] %v9171_v20  ;;  %v9190_v16 = vrot.slane %v1596_v46, %v10924_v14 }
 0x134   :  { %v9186_v45 = vrot.slane %v1596_v46, %v10923_v44 }
 0x155   :  { %v1484_v20 = vpop.f32.mrb[16].mxu0  ;;  %v1557_v19 = vpop.f32.mrb[16].mxu1 }
 0x156   :  { %v9193_v48 = vadd.f32 %v9178_v47, %v1484_v20  ;;  %v9196_v41 = vadd.f32 %v9182_v5, %v1557_v19  ;;  %v1486_v11 = vpop.f32.mrb[17].mxu0  ;;  %v1559_v8 = vpop.f32.mrb[17].mxu1 }
 0x157   :  { %v9199_v3 = vadd.f32 %v9186_v45, %v1486_v11  ;;  %v9202_v44 = vadd.f32 %v9190_v16, %v1559_v8  ;;  %v1488_v63 = vpop.f32.mrb[18].mxu0  ;;  %v1561_v42 = vpop.f32.mrb[18].mxu1 }
 0x158   :  { %10925 = vst [vmem:[#allocation34_spill] sm:$0xff] %v9193_v48  ;;  %10926 = vst [vmem:[#allocation35_spill] sm:$0xff] %v9196_v41  ;;  %v9205_v46 = vadd.f32 %v9178_v47, %v1488_v63  ;;  %v9208_v14 = vadd.f32 %v9182_v5, %v1561_v42  ;;  %v1490_v20 = vpop.f32.mrb[19].mxu0  ;;  %v1563_v48 = vpop.f32.mrb[19].mxu1 }
 0x159   :  { %10927 = vst [vmem:[#allocation36_spill] sm:$0xff] %v9199_v3  ;;  %10928 = vst [vmem:[#allocation37_spill] sm:$0xff] %v9202_v44  ;;  %v9211_v19 = vadd.f32 %v9186_v45, %v1490_v20  ;;  %v9214_v41 = vadd.f32 %v9190_v16, %v1563_v48 }
 0x15a   :  { %10929 = vst [vmem:[#allocation38_spill] sm:$0xff] %v9205_v46  ;;  %10930 = vst [vmem:[#allocation39_spill] sm:$0xff] %v9208_v14 }
 0x15b   :  { %10931 = vst [vmem:[#allocation40_spill] sm:$0xff] %v9211_v19  ;;  %10932 = vst [vmem:[#allocation41_spill] sm:$0xff] %v9214_v41 }
 0x15d   :  { %v1494_v11 = vpop.f32.mrb[20].mxu0  ;;  %v1567_v3 = vpop.f32.mrb[20].mxu1 }
 0x15e   :  { %v9217_v8 = vadd.f32 %v9178_v47, %v1494_v11  ;;  %v9220_v44 = vadd.f32 %v9182_v5, %v1567_v3  ;;  %v1496_v63 = vpop.f32.mrb[21].mxu0  ;;  %v1569_v46 = vpop.f32.mrb[21].mxu1 }
 0x15f   :  { %v9223_v42 = vadd.f32 %v9186_v45, %v1496_v63  ;;  %v9226_v14 = vadd.f32 %v9190_v16, %v1569_v46  ;;  %v1498_v20 = vpop.f32.mrb[22].mxu0  ;;  %v1571_v19 = vpop.f32.mrb[22].mxu1 }
 0x160   :  { %10933 = vst [vmem:[#allocation42_spill] sm:$0xff] %v9217_v8  ;;  %10934 = vst [vmem:[#allocation43_spill] sm:$0xff] %v9220_v44  ;;  %v9229_v48 = vadd.f32 %v9178_v47, %v1498_v20  ;;  %v9232_v41 = vadd.f32 %v9182_v5, %v1571_v19  ;;  %v1500_v11 = vpop.f32.mrb[23].mxu0  ;;  %v1573_v8 = vpop.f32.mrb[23].mxu1 }
 0x161   :  { %10935 = vst [vmem:[#allocation44_spill] sm:$0xff] %v9223_v42  ;;  %10936 = vst [vmem:[#allocation45_spill] sm:$0xff] %v9226_v14  ;;  %v9235_v3 = vadd.f32 %v9186_v45, %v1500_v11  ;;  %v9238_v44 = vadd.f32 %v9190_v16, %v1573_v8 }
 0x162   :  { %10937 = vst [vmem:[#allocation46_spill] sm:$0xff] %v9229_v48  ;;  %10938 = vst [vmem:[#allocation47_spill] sm:$0xff] %v9232_v41 }
 0x163   :  { %10939 = vst [vmem:[#allocation48_spill] sm:$0xff] %v9235_v3  ;;  %10940 = vst [vmem:[#allocation49_spill] sm:$0xff] %v9238_v44 }
 0x165   :  { %v1504_v63 = vpop.f32.mrb[24].mxu0  ;;  %v1577_v42 = vpop.f32.mrb[24].mxu1 }
 0x166   :  { %v9241_v46 = vadd.f32 %v9178_v47, %v1504_v63  ;;  %v9244_v14 = vadd.f32 %v9182_v5, %v1577_v42  ;;  %v1506_v20 = vpop.f32.mrb[25].mxu0  ;;  %v1579_v48 = vpop.f32.mrb[25].mxu1 }
 0x167   :  { %v9247_v19 = vadd.f32 %v9186_v45, %v1506_v20  ;;  %v9250_v41 = vadd.f32 %v9190_v16, %v1579_v48  ;;  %v1508_v11 = vpop.f32.mrb[26].mxu0  ;;  %v1581_v3 = vpop.f32.mrb[26].mxu1 }
 0x168   :  { %10941 = vst [vmem:[#allocation50_spill] sm:$0xff] %v9241_v46  ;;  %10942 = vst [vmem:[#allocation51_spill] sm:$0xff] %v9244_v14  ;;  %v9253_v8 = vadd.f32 %v9178_v47, %v1508_v11  ;;  %v9256_v44 = vadd.f32 %v9182_v5, %v1581_v3  ;;  %v1510_v63 = vpop.f32.mrb[27].mxu0  ;;  %v1583_v46 = vpop.f32.mrb[27].mxu1 }
 0x169   :  { %10943 = vst [vmem:[#allocation52_spill] sm:$0xff] %v9247_v19  ;;  %10944 = vst [vmem:[#allocation53_spill] sm:$0xff] %v9250_v41  ;;  %v9259_v42 = vadd.f32 %v9186_v45, %v1510_v63  ;;  %v9262_v14 = vadd.f32 %v9190_v16, %v1583_v46 }
 0x16a   :  { %10945 = vst [vmem:[#allocation54_spill] sm:$0xff] %v9253_v8  ;;  %10946 = vst [vmem:[#allocation55_spill] sm:$0xff] %v9256_v44 }
 0x16b   :  { %10947 = vst [vmem:[#allocation56_spill] sm:$0xff] %v9259_v42  ;;  %10948 = vst [vmem:[#allocation57_spill] sm:$0xff] %v9262_v14  ;;  %v832_v42 = vadd.f32 %v9071_v53, %v9065_v49 }
 0x16d   :  { %v1514_v20 = vpop.f32.mrb[28].mxu0  ;;  %v1587_v19 = vpop.f32.mrb[28].mxu1 }
 0x16e   :  { %v9265_v48 = vadd.f32 %v9178_v47, %v1514_v20  ;;  %v9268_v41 = vadd.f32 %v9182_v5, %v1587_v19  ;;  %v1516_v11 = vpop.f32.mrb[29].mxu0  ;;  %v1589_v60 = vpop.f32.mrb[29].mxu1  ;;  %v834_v20 = vadd.f32 %v9075_v55, %v9067_v52  ;;  %v833_v19 = vadd.f32 %v9083_v58, %v9077_v56 }
 0x16f   :  { %v9271_v3 = vadd.f32 %v9186_v45, %v1516_v11  ;;  %v9274_v28 = vadd.f32 %v9190_v16, %v1589_v60  ;;  %v1518_v63 = vpop.f32.mrb[30].mxu0  ;;  %v1591_v21 = vpop.f32.mrb[30].mxu1  ;;  %v835_v11 = vadd.f32 %v9087_v59, %v9079_v57 }
 0x170   :  { %10949 = vst [vmem:[#allocation58_spill] sm:$0xff] %v9265_v48  ;;  %10950 = vst [vmem:[#allocation59_spill] sm:$0xff] %v9268_v41  ;;  %v1520_v46 = vpop.f32.mrb[31].mxu0  ;;  %v1593_v14 = vpop.f32.mrb[31].mxu1 }
 0x171   :  { %10951 = vst [vmem:[#allocation60_spill] sm:$0xff] %v9271_v3  ;;  %10952 = vst [vmem:[#allocation61_spill] sm:$0xff] %v9274_v28 }
 0x175   :  { %v1917_v44 = vpop.f32.mrb[32].mxu0  ;;  %v1958_v8 = vpop.f32.mrb[32].mxu1 }
 0x176   :  { %v1965_v60 = vadd.f32 %v1917_v44, %v832_v42  ;;  %v1967_v18 = vadd.f32 %v1958_v8, %v834_v20  ;;  %v1919_v17 = vpop.f32.mrb[33].mxu0  ;;  %v1960_v13 = vpop.f32.mrb[33].mxu1  ;;  %v1649_v20 = vadd.f32 %v9190_v16, %v1593_v14 }
 0x177   :  { %v1966_v12 = vadd.f32 %v1919_v17, %v833_v19  ;;  %v1968_v28 = vadd.f32 %v1960_v13, %v835_v11  ;;  %v1921_v3 = vpop.f32.mrb[34].mxu0  ;;  %v1962_v41 = vpop.f32.mrb[34].mxu1 }
 0x178   :  { %v2253_v49 = vmul.f32 0.5, %v1965_v60  ;;  %v1922_v53 = vpop.f32.mrb[35].mxu0  ;;  %v1963_v48 = vpop.f32.mrb[35].mxu1 }
 0x179   :  { %v2257_v52 = vmul.f32 0.5, %v1966_v12  ;;  %v2262_v55 = vmul.f32 0.5, %v1968_v28  ;;  %v1646_v48 = vadd.f32 %v9178_v47, %v1518_v63  ;;  %v1647_v28 = vadd.f32 %v9186_v45, %v1520_v46 }
 0x17a   :  { %7888 = vtanh.f32 %v2253_v49 }
 0x17b   :  { %7890 = vtanh.f32 %v2257_v52 }
 0x17c   :  { %7892 = vtanh.f32 %v1967_v18  ;;  %v1648_v18 = vadd.f32 %v9182_v5, %v1591_v21 }
 0x17d   :  { %7894 = vtanh.f32 %v2262_v55 }
 0x184   :  { %v7889_v56 = vpop.eup %7888 }
 0x185   :  { %v7891_v57 = vpop.eup %7890  ;;  %v2255_v58 = vmul.f32 0.5, %v7889_v56 }
 0x186   :  { %v2259_v59 = vmul.f32 0.5, %v7891_v57  ;;  %v7893_v8 = vpop.eup %7892 }
 0x187   :  { %v2256_v44 = vadd.f32 0.5, %v2255_v58  ;;  %v7895_v41 = vpop.eup %7894 }
 0x188   :  { %v2260_v42 = vadd.f32 0.5, %v2259_v59  ;;  %v2264_v12 = vmul.f32 0.5, %v7895_v41  ;;  %v9424_v41 = vld [vmem:[%s10855_s8 + $0x68] ss:$16 sps:$4 sm:$0xff]  }
 0x189   :  { %v2267_v17 = vmul.f32 %v7893_v8, %v2256_v44 }
 0x18a   :  { %v2266_v13 = vmul.f32 0.0, %v2260_v42  ;;  %v2265_v55 = vadd.f32 0.5, %v2264_v12  ;;  %v9409_v42 = vld [vmem:[%s10855_s8 + $0x64] ss:$16 sps:$4 sm:$0xff]  }
 0x18b   :  { %v9433_v12 = vld [vmem:[%s10855_s8 + $0x84] ss:$16 sps:$4 sm:$0xff]  }
 0x18c   :  { %v9284_v3 = vadd.f32 %v2267_v17, %v2266_v13  ;;  %v9414_v17 = vld [vmem:[%s10855_s8 + $0x6c] ss:$16 sps:$4 sm:$0xff]   ;;  %v9419_v13 = vld [vmem:[%s10855_s8 + $0x60] ss:$16 sps:$4 sm:$0xff]  }
 0x18e   :  { %7896 = vtanh.f32 %v9284_v3 }
 0x195   :  { %v2201_v19 = vpop.f32.mrb[36].mxu0  ;;  %v2242_v11 = vpop.f32.mrb[36].mxu1 }
 0x196   :  { %v2249_v60 = vadd.f32 %v2201_v19, %v1646_v48  ;;  %v2251_v49 = vadd.f32 %v2242_v11, %v1648_v18  ;;  %v2203_v53 = vpop.f32.mrb[37].mxu0  ;;  %v2244_v52 = vpop.f32.mrb[37].mxu1  ;;  %v9438_v48 = vld [vmem:[%s10855_s8 + $0x8c] ss:$16 sps:$4 sm:$0xff]   ;;  %v9443_v18 = vld [vmem:[%s10855_s8 + $0x80] ss:$16 sps:$4 sm:$0xff]  }
 0x197   :  { %v2250_v56 = vadd.f32 %v2203_v53, %v1647_v28  ;;  %v2252_v57 = vadd.f32 %v2244_v52, %v1649_v20  ;;  %v2205_v58 = vpop.f32.mrb[38].mxu0  ;;  %v2246_v59 = vpop.f32.mrb[38].mxu1  ;;  %v9448_v28 = vld [vmem:[%s10855_s8 + $0x88] ss:$16 sps:$4 sm:$0xff]   ;;  %v9457_v20 = vld [vmem:[%s10855_s8 + $0xa4] ss:$16 sps:$4 sm:$0xff]  }
 0x198   :  { %v7897_v44 = vpop.eup %7896  ;;  %v2271_v8 = vmul.f32 0.5, %v2249_v60  ;;  %v2206_v47 = vpop.f32.mrb[39].mxu0  ;;  %v9462_v19 = vld [vmem:[%s10855_s8 + $0xac] ss:$16 sps:$4 sm:$0xff]   ;;  %v9467_v11 = vld [vmem:[%s10855_s8 + $0xa0] ss:$16 sps:$4 sm:$0xff]  }
 0x199   :  { %v2247_v63 = vpop.f32.mrb[39].mxu1  ;;  %v2270_v21 = vmul.f32 %v7897_v44, %v2265_v55  ;;  %v2275_v5 = vmul.f32 0.5, %v2250_v56  ;;  %v2280_v16 = vmul.f32 0.5, %v2252_v57  ;;  %v9472_v60 = vld [vmem:[%s10855_s8 + $0xa8] ss:$16 sps:$4 sm:$0xff]  }
 0x19a   :  { %7898 = vtanh.f32 %v2271_v8  ;;  %v9486_v53 = vld [vmem:[%s10855_s8 + $0xcc] ss:$16 sps:$4 sm:$0xff]   ;;  %v9491_v52 = vld [vmem:[%s10855_s8 + $0xc0] ss:$16 sps:$4 sm:$0xff]   ;;  %v9496_v55 = vld [vmem:[%s10855_s8 + $0xc8] ss:$16 sps:$4 sm:$0xff]  }
 0x19b   :  { %2289 = vst [vmem:[%s10860_s12] sm:$0xff] %v2270_v21  ;;  %7900 = vtanh.f32 %v2275_v5  ;;  %v2297_v45 = vpack.c.bf16 %v2270_v21, %v2270_v21  ;;  %v9505_v56 = vld [vmem:[%s10855_s8 + $0xe4] ss:$16 sps:$4 sm:$0xff]   ;;  %v9510_v57 = vld [vmem:[%s10855_s8 + $0xec] ss:$16 sps:$4 sm:$0xff]   ;;  %v9515_v58 = vld [vmem:[%s10855_s8 + $0xe0] ss:$16 sps:$4 sm:$0xff]  }
 0x19c   :  { %7902 = vtanh.f32 %v2251_v49  ;;  %v9481_v49 = vld [vmem:[%s10855_s8 + $0xc4] ss:$16 sps:$4 sm:$0xff]   ;;  %v9520_v59 = vld [vmem:[%s10855_s8 + $0xe8] ss:$16 sps:$4 sm:$0xff]   ;;  %v9534_v8 = vld [vmem:[%s10856_s9 + $0xc] ss:$16 sps:$4 sm:$0xff]  }
 0x19d   :  { %2523 = vmatmul.mubr.bf16.vlgmr.msra.gmra.mrb[40].mxu0 %v2297_v45  ;;  %2564 = vmatmul.mubr.bf16.vlgmr.msra.gmra.mrb[40].mxu1 %v2297_v45  ;;  %7904 = vtanh.f32 %v2280_v16  ;;  %v9529_v44 = vld [vmem:[%s10856_s9 + $0x4] ss:$16 sps:$4 sm:$0xff]  }
 0x19e   :  { %2775 = vmatpush1.bf16.msra.mxu0 %v8837_v22  ;;  %2816 = vmatpush1.bf16.msra.mxu1 %v8842_v23 }
 0x19f   :  { %2776 = vmatprep.subr.bf16.mxu0 %v8847_v24  ;;  %2817 = vmatprep.subr.bf16.mxu1 %v8852_v25 }
 0x1a0   :  { %2806 = vmatprep.mubr.bf16.mxu0 %v10896_v10  ;;  %2847 = vmatprep.mubr.bf16.mxu1 %v10896_v10 }
 0x1a2   :  { %2777 = vmatpush1.bf16.msra.mxu0 %v8861_v26  ;;  %2818 = vmatpush1.bf16.msra.mxu1 %v8866_v27 }
 0x1a3   :  { %2778 = vmatprep.subr.bf16.mxu0 %v8871_v29  ;;  %2819 = vmatprep.subr.bf16.mxu1 %v8876_v30 }
 0x1a4   :  { %v7899_v22 = vpop.eup %7898 }
 0x1a5   :  { %v7901_v14 = vpop.eup %7900  ;;  %v2273_v23 = vmul.f32 0.5, %v7899_v22 }
 0x1a6   :  { %v2277_v46 = vmul.f32 0.5, %v7901_v14  ;;  %2779 = vmatpush1.bf16.msra.mxu0 %v8885_v31  ;;  %2820 = vmatpush1.bf16.msra.mxu1 %v8890_v32  ;;  %v7903_v25 = vpop.eup %7902  ;;  %v10953_v31 = vld [vmem:[#allocation8_spill] sm:$0xff] }
 0x1a7   :  { %v2274_v24 = vadd.f32 0.5, %v2273_v23  ;;  %2780 = vmatprep.subr.bf16.mxu0 %v8897_v33  ;;  %2821 = vmatprep.subr.bf16.mxu1 %v8902_v34  ;;  %v7905_v32 = vpop.eup %7904 }
 0x1a8   :  { %v2278_v26 = vadd.f32 0.5, %v2277_v46  ;;  %v2282_v33 = vmul.f32 0.5, %v7905_v32 }
 0x1a9   :  { %v2285_v27 = vmul.f32 %v7903_v25, %v2274_v24 }
 0x1aa   :  { %v2284_v29 = vmul.f32 0.0, %v2278_v26  ;;  %2781 = vmatpush1.bf16.msra.mxu0 %v8911_v35  ;;  %2822 = vmatpush1.bf16.msra.mxu1 %v8916_v36  ;;  %v2283_v34 = vadd.f32 0.5, %v2282_v33  ;;  %v10954_v35 = vld [vmem:[#allocation9_spill] sm:$0xff] }
 0x1ab   :  { %2782 = vmatprep.subr.bf16.mxu0 %v8921_v37  ;;  %2823 = vmatprep.subr.bf16.mxu1 %v8926_v38 }
 0x1ac   :  { %v9312_v30 = vadd.f32 %v2285_v27, %v2284_v29 }
 0x1ae   :  { %7906 = vtanh.f32 %v9312_v30  ;;  %2783 = vmatpush1.bf16.msra.mxu0 %v8935_v39  ;;  %2824 = vmatpush1.bf16.msra.mxu1 %v8940_v40  ;;  %v9337_v39 = vld [vmem:[%s10855_s8 + $0x4] ss:$16 sps:$4 sm:$0xff]   ;;  %v9347_v40 = vld [vmem:[%s10855_s8] ss:$16 sps:$4 sm:$0xff]  }
 0x1af   :  { %2784 = vmatprep.subr.bf16.mxu0 %v8945_v43  ;;  %2825 = vmatprep.subr.bf16.mxu1 %v10953_v31  ;;  %v9352_v43 = vld [vmem:[%s10855_s8 + $0x8] ss:$16 sps:$4 sm:$0xff]  }
 0x1b2   :  { %2785 = vmatpush1.bf16.msra.mxu0 %v8959_v51  ;;  %2826 = vmatpush1.bf16.msra.mxu1 %v8964_v54  ;;  %v9366_v51 = vld [vmem:[%s10855_s8 + $0x2c] ss:$16 sps:$4 sm:$0xff]   ;;  %v9371_v54 = vld [vmem:[%s10855_s8 + $0x20] ss:$16 sps:$4 sm:$0xff]  }
 0x1b3   :  { %2786 = vmatprep.subr.bf16.mxu0 %v8969_v61  ;;  %2827 = vmatprep.subr.bf16.mxu1 %v8974_v62  ;;  %v9376_v61 = vld [vmem:[%s10855_s8 + $0x28] ss:$16 sps:$4 sm:$0xff]   ;;  %v9385_v62 = vld [vmem:[%s10855_s8 + $0x44] ss:$16 sps:$4 sm:$0xff]  }
 0x1b6   :  { %2787 = vmatpush1.bf16.msra.mxu0 %v8983_v4  ;;  %2828 = vmatpush1.bf16.msra.mxu1 %v8988_v9  ;;  %v9390_v4 = vld [vmem:[%s10855_s8 + $0x4c] ss:$16 sps:$4 sm:$0xff]   ;;  %v9395_v9 = vld [vmem:[%s10855_s8 + $0x40] ss:$16 sps:$4 sm:$0xff]  }
 0x1b7   :  { %2788 = vmatprep.subr.bf16.mxu0 %v10954_v35  ;;  %2829 = vmatprep.subr.bf16.mxu1 %v8998_v15  ;;  %v9400_v15 = vld [vmem:[%s10855_s8 + $0x48] ss:$16 sps:$4 sm:$0xff]  }
 0x1b8   :  { %v7907_v36 = vpop.eup %7906 }
 0x1b9   :  { %v2288_v37 = vmul.f32 %v7907_v36, %v2283_v34 }
 0x1ba   :  { %2789 = vmatpush1.bf16.msra.mxu0 %v9007_v1  ;;  %2830 = vmatpush1.bf16.msra.mxu1 %v9012_v50  ;;  %v9342_v1 = vld [vmem:[%s10855_s8 + $0xc] ss:$16 sps:$4 sm:$0xff]   ;;  %v9361_v50 = vld [vmem:[%s10855_s8 + $0x24] ss:$16 sps:$4 sm:$0xff]  }
 0x1bb   :  { %6784 = vst [vmem:[%s10861_s13 + $0x38] sm:$0xff] %v2288_v37  ;;  %v2581_v38 = vpack.c.bf16 %v2288_v37, %v2288_v37  ;;  %3098 = vmatprep.subr.bf16.mxu0 %v9337_v39  ;;  %3139 = vmatprep.subr.bf16.mxu1 %v9342_v1 }
 0x1bd   :  { %2807 = vmatmul.mubr.bf16.vlgmr.msra.gmra.mrb[44].mxu0 %v2581_v38  ;;  %2848 = vmatmul.mubr.bf16.vlgmr.msra.gmra.mrb[44].mxu1 %v2581_v38 }
 0x1be   :  { %3130 = vmatprep.mubr.bf16.mxu0 %v10896_v10  ;;  %3171 = vmatprep.mubr.bf16.mxu1 %v10896_v10 }
 0x1bf   :  { %3099 = vmatpush1.bf16.msra.mxu0 %v9347_v40  ;;  %3140 = vmatpush1.bf16.msra.mxu1 %v9352_v43 }
 0x1c0   :  { %3100 = vmatprep.subr.bf16.mxu0 %v9361_v50  ;;  %3141 = vmatprep.subr.bf16.mxu1 %v9366_v51 }
 0x1c3   :  { %3101 = vmatpush1.bf16.msra.mxu0 %v9371_v54  ;;  %3142 = vmatpush1.bf16.msra.mxu1 %v9376_v61 }
 0x1c4   :  { %3102 = vmatprep.subr.bf16.mxu0 %v9385_v62  ;;  %3143 = vmatprep.subr.bf16.mxu1 %v9390_v4 }
 0x1c7   :  { %3103 = vmatpush1.bf16.msra.mxu0 %v9395_v9  ;;  %3144 = vmatpush1.bf16.msra.mxu1 %v9400_v15 }
 0x1c8   :  { %3104 = vmatprep.subr.bf16.mxu0 %v9409_v42  ;;  %3145 = vmatprep.subr.bf16.mxu1 %v9414_v17 }
 0x1cb   :  { %3105 = vmatpush1.bf16.msra.mxu0 %v9419_v13  ;;  %3146 = vmatpush1.bf16.msra.mxu1 %v9424_v41 }
 0x1cc   :  { %3106 = vmatprep.subr.bf16.mxu0 %v9433_v12  ;;  %3147 = vmatprep.subr.bf16.mxu1 %v9438_v48 }
 0x1cf   :  { %3107 = vmatpush1.bf16.msra.mxu0 %v9443_v18  ;;  %3148 = vmatpush1.bf16.msra.mxu1 %v9448_v28 }
 0x1d0   :  { %3108 = vmatprep.subr.bf16.mxu0 %v9457_v20  ;;  %3149 = vmatprep.subr.bf16.mxu1 %v9462_v19 }
 0x1d3   :  { %3109 = vmatpush1.bf16.msra.mxu0 %v9467_v11  ;;  %3150 = vmatpush1.bf16.msra.mxu1 %v9472_v60 }
 0x1d4   :  { %3110 = vmatprep.subr.bf16.mxu0 %v9481_v49  ;;  %3151 = vmatprep.subr.bf16.mxu1 %v9486_v53 }
 0x1d7   :  { %3111 = vmatpush1.bf16.msra.mxu0 %v9491_v52  ;;  %3152 = vmatpush1.bf16.msra.mxu1 %v9496_v55 }
 0x1d8   :  { %3112 = vmatprep.subr.bf16.mxu0 %v9505_v56  ;;  %3153 = vmatprep.subr.bf16.mxu1 %v9510_v57 }
 0x1db   :  { %3113 = vmatpush1.bf16.msra.mxu0 %v9515_v58  ;;  %3154 = vmatpush1.bf16.msra.mxu1 %v9520_v59 }
 0x1dc   :  { %3382 = vmatprep.subr.bf16.mxu0 %v9529_v44  ;;  %3423 = vmatprep.subr.bf16.mxu1 %v9534_v8 }
 0x270   :  { %v2524_v47 = vpop.f32.mrb[40].mxu0  ;;  %v2565_v63 = vpop.f32.mrb[40].mxu1 }
 0x271   :  { %v2572_v21 = vadd.f32 %v2524_v47, %v9090_v0  ;;  %v2574_v5 = vadd.f32 %v2565_v63, %v9093_v2  ;;  %v2526_v45 = vpop.f32.mrb[41].mxu0  ;;  %v2567_v16 = vpop.f32.mrb[41].mxu1 }
 0x272   :  { %v2573_v22 = vadd.f32 %v2526_v45, %v9096_v6  ;;  %v2575_v14 = vadd.f32 %v2567_v16, %v9099_v7  ;;  %v2528_v23 = vpop.f32.mrb[42].mxu0  ;;  %v2569_v46 = vpop.f32.mrb[42].mxu1  ;;  %v10956_v45 = vld [vmem:[#allocation59_spill] sm:$0xff] }
 0x273   :  { %v2860_v24 = vmul.f32 0.5, %v2572_v21  ;;  %v2529_v25 = vpop.f32.mrb[43].mxu0  ;;  %v2570_v26 = vpop.f32.mrb[43].mxu1  ;;  %v10955_v21 = vld [vmem:[#allocation58_spill] sm:$0xff]  ;;  %v10957_v46 = vld [vmem:[#allocation60_spill] sm:$0xff] }
 0x274   :  { %v2864_v27 = vmul.f32 0.5, %v2573_v22  ;;  %v2869_v29 = vmul.f32 0.5, %v2575_v14  ;;  %v10958_v25 = vld [vmem:[#allocation61_spill] sm:$0xff] }
 0x275   :  { %7908 = vtanh.f32 %v2860_v24 }
 0x276   :  { %7910 = vtanh.f32 %v2864_v27 }
 0x277   :  { %7912 = vtanh.f32 %v2574_v5 }
 0x278   :  { %7914 = vtanh.f32 %v2869_v29 }
 0x27f   :  { %v7909_v31 = vpop.eup %7908 }
 0x280   :  { %v7911_v0 = vpop.eup %7910  ;;  %v2862_v32 = vmul.f32 0.5, %v7909_v31 }
 0x281   :  { %v2866_v2 = vmul.f32 0.5, %v7911_v0  ;;  %v7913_v34 = vpop.eup %7912 }
 0x282   :  { %v2863_v33 = vadd.f32 0.5, %v2862_v32  ;;  %v7915_v37 = vpop.eup %7914 }
 0x283   :  { %v2867_v6 = vadd.f32 0.5, %v2866_v2  ;;  %v2871_v38 = vmul.f32 0.5, %v7915_v37  ;;  %v9571_v37 = vld [vmem:[%s10856_s9 + $0x2c] ss:$16 sps:$4 sm:$0xff]  }
 0x284   :  { %v2874_v35 = vmul.f32 %v7913_v34, %v2863_v33  ;;  %v9553_v34 = vld [vmem:[%s10856_s9] ss:$16 sps:$4 sm:$0xff]  }
 0x285   :  { %v2873_v7 = vmul.f32 %v2867_v6, %v9284_v3  ;;  %v2872_v23 = vadd.f32 0.5, %v2871_v38  ;;  %v9558_v6 = vld [vmem:[%s10856_s9 + $0x8] ss:$16 sps:$4 sm:$0xff]   ;;  %v9578_v38 = vld [vmem:[%s10856_s9 + $0x20] ss:$16 sps:$4 sm:$0xff]  }
 0x287   :  { %v9543_v36 = vadd.f32 %v2874_v35, %v2873_v7  ;;  %v9566_v7 = vld [vmem:[%s10856_s9 + $0x24] ss:$16 sps:$4 sm:$0xff]  }
 0x289   :  { %7916 = vtanh.f32 %v9543_v36 }
 0x290   :  { %v2808_v47 = vpop.f32.mrb[44].mxu0  ;;  %v2849_v63 = vpop.f32.mrb[44].mxu1 }
 0x291   :  { %v2856_v5 = vadd.f32 %v2808_v47, %v10955_v21  ;;  %v2858_v16 = vadd.f32 %v2849_v63, %v10956_v45  ;;  %v2810_v22 = vpop.f32.mrb[45].mxu0  ;;  %v2851_v14 = vpop.f32.mrb[45].mxu1  ;;  %v9583_v47 = vld [vmem:[%s10856_s9 + $0x28] ss:$16 sps:$4 sm:$0xff]   ;;  %v9590_v63 = vld [vmem:[%s10856_s9 + $0x44] ss:$16 sps:$4 sm:$0xff]  }
 0x292   :  { %v2857_v24 = vadd.f32 %v2810_v22, %v10957_v46  ;;  %v2859_v26 = vadd.f32 %v2851_v14, %v10958_v25  ;;  %v2812_v3 = vpop.f32.mrb[46].mxu0  ;;  %v2853_v27 = vpop.f32.mrb[46].mxu1  ;;  %v9595_v21 = vld [vmem:[%s10856_s9 + $0x4c] ss:$16 sps:$4 sm:$0xff]   ;;  %v9604_v45 = vld [vmem:[%s10856_s9 + $0x40] ss:$16 sps:$4 sm:$0xff]  }
 0x293   :  { %v7917_v29 = vpop.eup %7916  ;;  %v2878_v31 = vmul.f32 0.5, %v2856_v5  ;;  %v2813_v0 = vpop.f32.mrb[47].mxu0  ;;  %v9616_v22 = vld [vmem:[%s10856_s9 + $0x64] ss:$16 sps:$4 sm:$0xff]   ;;  %v9621_v14 = vld [vmem:[%s10856_s9 + $0x6c] ss:$16 sps:$4 sm:$0xff]  }
 0x294   :  { %v2854_v32 = vpop.f32.mrb[47].mxu1  ;;  %v2877_v2 = vmul.f32 %v7917_v29, %v2872_v23  ;;  %v2882_v33 = vmul.f32 0.5, %v2857_v24  ;;  %v2887_v5 = vmul.f32 0.5, %v2859_v26  ;;  %v9628_v26 = vld [vmem:[%s10856_s9 + $0x60] ss:$16 sps:$4 sm:$0xff]  }
 0x295   :  { %7918 = vtanh.f32 %v2878_v31  ;;  %v9633_v3 = vld [vmem:[%s10856_s9 + $0x68] ss:$16 sps:$4 sm:$0xff]   ;;  %v9640_v29 = vld [vmem:[%s10856_s9 + $0x84] ss:$16 sps:$4 sm:$0xff]   ;;  %v9645_v31 = vld [vmem:[%s10856_s9 + $0x8c] ss:$16 sps:$4 sm:$0xff]  }
 0x296   :  { %6849 = vst [vmem:[%s10860_s12 + $0x8] sm:$0xff] %v2877_v2  ;;  %7920 = vtanh.f32 %v2882_v33  ;;  %v2905_v35 = vpack.c.bf16 %v2877_v2, %v2877_v2 }
 0x297   :  { %7922 = vtanh.f32 %v2858_v16  ;;  %v9609_v16 = vld [vmem:[%s10856_s9 + $0x48] ss:$16 sps:$4 sm:$0xff]  }
 0x298   :  { %3131 = vmatmul.mubr.bf16.vlgmr.msra.gmra.mrb[48].mxu0 %v2905_v35  ;;  %3172 = vmatmul.mubr.bf16.vlgmr.msra.gmra.mrb[48].mxu1 %v2905_v35  ;;  %7924 = vtanh.f32 %v2887_v5  ;;  %v9653_v35 = vld [vmem:[%s10856_s9 + $0x80] ss:$16 sps:$4 sm:$0xff]   ;;  %v9658_v5 = vld [vmem:[%s10856_s9 + $0x88] ss:$16 sps:$4 sm:$0xff]  }
 0x299   :  { %3383 = vmatpush1.bf16.msra.mxu0 %v9553_v34  ;;  %3424 = vmatpush1.bf16.msra.mxu1 %v9558_v6  ;;  %10959 = vst [vmem:[#allocation8_spill] sm:$0xff] %v9658_v5 }
 0x29a   :  { %3384 = vmatprep.subr.bf16.mxu0 %v9566_v7  ;;  %3425 = vmatprep.subr.bf16.mxu1 %v9571_v37 }
 0x29b   :  { %3414 = vmatprep.mubr.bf16.mxu0 %v10896_v10  ;;  %3455 = vmatprep.mubr.bf16.mxu1 %v10896_v10 }
 0x29d   :  { %3385 = vmatpush1.bf16.msra.mxu0 %v9578_v38  ;;  %3426 = vmatpush1.bf16.msra.mxu1 %v9583_v47 }
 0x29e   :  { %3386 = vmatprep.subr.bf16.mxu0 %v9590_v63  ;;  %3427 = vmatprep.subr.bf16.mxu1 %v9595_v21 }
 0x29f   :  { %v7919_v23 = vpop.eup %7918 }
 0x2a0   :  { %v7921_v46 = vpop.eup %7920  ;;  %v2880_v24 = vmul.f32 0.5, %v7919_v23  ;;  %v9670_v23 = vld [vmem:[%s10856_s9 + $0xac] ss:$16 sps:$4 sm:$0xff]  }
 0x2a1   :  { %v2884_v25 = vmul.f32 0.5, %v7921_v46  ;;  %3387 = vmatpush1.bf16.msra.mxu0 %v9604_v45  ;;  %3428 = vmatpush1.bf16.msra.mxu1 %v9609_v16  ;;  %v7923_v0 = vpop.eup %7922  ;;  %10961 = vst [vmem:[#allocation58_spill] sm:$0xff] %v9670_v23 }
 0x2a2   :  { %v2881_v27 = vadd.f32 0.5, %v2880_v24  ;;  %3388 = vmatprep.subr.bf16.mxu0 %v9616_v22  ;;  %3429 = vmatprep.subr.bf16.mxu1 %v9621_v14  ;;  %v9680_v24 = vld [vmem:[%s10856_s9 + $0xa0] ss:$16 sps:$4 sm:$0xff]  }
 0x2a3   :  { %v2885_v32 = vadd.f32 0.5, %v2884_v25  ;;  %10962 = vst [vmem:[#allocation59_spill] sm:$0xff] %v9680_v24  ;;  %v9685_v25 = vld [vmem:[%s10856_s9 + $0xa8] ss:$16 sps:$4 sm:$0xff]  }
 0x2a4   :  { %v2892_v2 = vmul.f32 %v7923_v0, %v2881_v27  ;;  %10963 = vst [vmem:[#allocation60_spill] sm:$0xff] %v9685_v25  ;;  %v9692_v27 = vld [vmem:[%s10856_s9 + $0xc4] ss:$16 sps:$4 sm:$0xff]   ;;  %v9697_v0 = vld [vmem:[%s10856_s9 + $0xcc] ss:$16 sps:$4 sm:$0xff]  }
 0x2a5   :  { %v2891_v33 = vmul.f32 %v2885_v32, %v9312_v30  ;;  %3389 = vmatpush1.bf16.msra.mxu0 %v9628_v26  ;;  %3430 = vmatpush1.bf16.msra.mxu1 %v9633_v3  ;;  %v9665_v30 = vld [vmem:[%s10856_s9 + $0xa4] ss:$16 sps:$4 sm:$0xff]   ;;  %10964 = vst [vmem:[#allocation61_spill] sm:$0xff] %v9692_v27  ;;  %10965 = vst [vmem:[#allocation62_spill] sm:$0xff] %v9697_v0  ;;  %v7925_v32 = vpop.eup %7924 }
 0x2a6   :  { %3390 = vmatprep.subr.bf16.mxu0 %v9640_v29  ;;  %3431 = vmatprep.subr.bf16.mxu1 %v9645_v31  ;;  %10960 = vst [vmem:[#allocation9_spill] sm:$0xff] %v9665_v30 }
 0x2a7   :  { %v9672_v46 = vadd.f32 %v2892_v2, %v2891_v33  ;;  %v9704_v2 = vld [vmem:[%s10856_s9 + $0xc0] ss:$16 sps:$4 sm:$0xff]   ;;  %v9709_v33 = vld [vmem:[%s10856_s9 + $0xc8] ss:$16 sps:$4 sm:$0xff]  }
 0x2a8   :  { %10966 = vst [vmem:[#allocation63_spill] sm:$0xff] %v9709_v33 }
 0x2a9   :  { %7926 = vtanh.f32 %v9672_v46  ;;  %3391 = vmatpush1.bf16.msra.mxu0 %v9653_v35  ;;  %3432 = vmatpush1.bf16.msra.mxu1 %v9658_v5 }
 0x2aa   :  { %3392 = vmatprep.subr.bf16.mxu0 %v9665_v30  ;;  %3433 = vmatprep.subr.bf16.mxu1 %v9670_v23  ;;  %v2889_v23 = vmul.f32 0.5, %v7925_v32  ;;  %v9728_v32 = vld [vmem:[%s10856_s9 + $0xe0] ss:$16 sps:$4 sm:$0xff]  }
 0x2ad   :  { %3393 = vmatpush1.bf16.msra.mxu0 %v9680_v24  ;;  %3434 = vmatpush1.bf16.msra.mxu1 %v9685_v25  ;;  %v9716_v24 = vld [vmem:[%s10856_s9 + $0xe4] ss:$16 sps:$4 sm:$0xff]   ;;  %v9721_v25 = vld [vmem:[%s10856_s9 + $0xec] ss:$16 sps:$4 sm:$0xff]  }
 0x2ae   :  { %3394 = vmatprep.subr.bf16.mxu0 %v9692_v27  ;;  %3435 = vmatprep.subr.bf16.mxu1 %v9697_v0  ;;  %v9733_v0 = vld [vmem:[%s10856_s9 + $0xe8] ss:$16 sps:$4 sm:$0xff]   ;;  %v2890_v27 = vadd.f32 0.5, %v2889_v23 }
 0x2b1   :  { %3395 = vmatpush1.bf16.msra.mxu0 %v9704_v2  ;;  %3436 = vmatpush1.bf16.msra.mxu1 %v9709_v33 }
 0x2b2   :  { %3396 = vmatprep.subr.bf16.mxu0 %v9716_v24  ;;  %3437 = vmatprep.subr.bf16.mxu1 %v9721_v25 }
 0x2b3   :  { %v7927_v30 = vpop.eup %7926 }
 0x2b4   :  { %v2895_v5 = vmul.f32 %v7927_v30, %v2890_v27  ;;  %v10972_v30 = vld [vmem:[#allocation55_spill] sm:$0xff] }
 0x2b5   :  { %3397 = vmatpush1.bf16.msra.mxu0 %v9728_v32  ;;  %3438 = vmatpush1.bf16.msra.mxu1 %v9733_v0 }
 0x2b6   :  { %6850 = vst [vmem:[%s10861_s13 + $0x30] sm:$0xff] %v2895_v5  ;;  %v3189_v33 = vpack.c.bf16 %v2895_v5, %v2895_v5  ;;  %3706 = vmatprep.subr.bf16.mxu0 %v9337_v39  ;;  %3747 = vmatprep.subr.bf16.mxu1 %v9342_v1 }
 0x2b8   :  { %3415 = vmatmul.mubr.bf16.vlgmr.msra.gmra.mrb[52].mxu0 %v3189_v33  ;;  %3456 = vmatmul.mubr.bf16.vlgmr.msra.gmra.mrb[52].mxu1 %v3189_v33 }
 0x2b9   :  { %3707 = vmatpush1.bf16.msra.mxu0 %v9347_v40  ;;  %3748 = vmatpush1.bf16.msra.mxu1 %v9352_v43  ;;  %v10967_v40 = vld [vmem:[#allocation10_spill] sm:$0xff] }
 0x2ba   :  { %3708 = vmatprep.subr.bf16.mxu0 %v9361_v50  ;;  %3749 = vmatprep.subr.bf16.mxu1 %v9366_v51  ;;  %v10968_v50 = vld [vmem:[#allocation11_spill] sm:$0xff] }
 0x2bb   :  { %3738 = vmatprep.mubr.bf16.mxu0 %v10896_v10  ;;  %3779 = vmatprep.mubr.bf16.mxu1 %v10896_v10 }
 0x2bd   :  { %3709 = vmatpush1.bf16.msra.mxu0 %v9371_v54  ;;  %3750 = vmatpush1.bf16.msra.mxu1 %v9376_v61 }
 0x2be   :  { %3710 = vmatprep.subr.bf16.mxu0 %v9385_v62  ;;  %3751 = vmatprep.subr.bf16.mxu1 %v9390_v4  ;;  %v10969_v62 = vld [vmem:[#allocation12_spill] sm:$0xff] }
 0x2c1   :  { %3711 = vmatpush1.bf16.msra.mxu0 %v9395_v9  ;;  %3752 = vmatpush1.bf16.msra.mxu1 %v9400_v15  ;;  %v10970_v9 = vld [vmem:[#allocation13_spill] sm:$0xff] }
 0x2c2   :  { %3712 = vmatprep.subr.bf16.mxu0 %v9409_v42  ;;  %3753 = vmatprep.subr.bf16.mxu1 %v9414_v17 }
 0x2c5   :  { %3713 = vmatpush1.bf16.msra.mxu0 %v9419_v13  ;;  %3754 = vmatpush1.bf16.msra.mxu1 %v9424_v41 }
 0x2c6   :  { %3714 = vmatprep.subr.bf16.mxu0 %v9433_v12  ;;  %3755 = vmatprep.subr.bf16.mxu1 %v9438_v48 }
 0x2c9   :  { %3715 = vmatpush1.bf16.msra.mxu0 %v9443_v18  ;;  %3756 = vmatpush1.bf16.msra.mxu1 %v9448_v28 }
 0x2ca   :  { %3716 = vmatprep.subr.bf16.mxu0 %v9457_v20  ;;  %3757 = vmatprep.subr.bf16.mxu1 %v9462_v19 }
 0x2cd   :  { %3717 = vmatpush1.bf16.msra.mxu0 %v9467_v11  ;;  %3758 = vmatpush1.bf16.msra.mxu1 %v9472_v60 }
 0x2ce   :  { %3718 = vmatprep.subr.bf16.mxu0 %v9481_v49  ;;  %3759 = vmatprep.subr.bf16.mxu1 %v9486_v53 }
 0x2d1   :  { %3719 = vmatpush1.bf16.msra.mxu0 %v9491_v52  ;;  %3760 = vmatpush1.bf16.msra.mxu1 %v9496_v55 }
 0x2d2   :  { %3720 = vmatprep.subr.bf16.mxu0 %v9505_v56  ;;  %3761 = vmatprep.subr.bf16.mxu1 %v9510_v57 }
 0x2d5   :  { %3721 = vmatpush1.bf16.msra.mxu0 %v9515_v58  ;;  %3762 = vmatpush1.bf16.msra.mxu1 %v9520_v59 }
 0x2d6   :  { %3990 = vmatprep.subr.bf16.mxu0 %v9529_v44  ;;  %4031 = vmatprep.subr.bf16.mxu1 %v9534_v8  ;;  %v10971_v8 = vld [vmem:[#allocation54_spill] sm:$0xff] }
 0x36b   :  { %v3132_v39 = vpop.f32.mrb[48].mxu0  ;;  %v3173_v1 = vpop.f32.mrb[48].mxu1 }
 0x36c   :  { %v3180_v43 = vadd.f32 %v3132_v39, %v10967_v40  ;;  %v3182_v51 = vadd.f32 %v3173_v1, %v10968_v50  ;;  %v3134_v54 = vpop.f32.mrb[49].mxu0  ;;  %v3175_v61 = vpop.f32.mrb[49].mxu1  ;;  %v10973_v1 = vld [vmem:[#allocation56_spill] sm:$0xff] }
 0x36d   :  { %v3181_v4 = vadd.f32 %v3134_v54, %v10969_v62  ;;  %v3183_v15 = vadd.f32 %v3175_v61, %v10970_v9  ;;  %v3136_v42 = vpop.f32.mrb[50].mxu0  ;;  %v3177_v17 = vpop.f32.mrb[50].mxu1 }
 0x36e   :  { %v3468_v13 = vmul.f32 0.5, %v3180_v43  ;;  %v3137_v41 = vpop.f32.mrb[51].mxu0  ;;  %v3178_v12 = vpop.f32.mrb[51].mxu1  ;;  %v10974_v43 = vld [vmem:[#allocation57_spill] sm:$0xff] }
 0x36f   :  { %v3472_v48 = vmul.f32 0.5, %v3181_v4  ;;  %v3477_v18 = vmul.f32 0.5, %v3183_v15  ;;  %v10982_v12 = vld [vmem:[#allocation63_spill] sm:$0xff] }
 0x370   :  { %7928 = vtanh.f32 %v3468_v13 }
 0x371   :  { %7930 = vtanh.f32 %v3472_v48 }
 0x372   :  { %7932 = vtanh.f32 %v3182_v51 }
 0x373   :  { %7934 = vtanh.f32 %v3477_v18 }
 0x37a   :  { %v7929_v28 = vpop.eup %7928 }
 0x37b   :  { %v7931_v20 = vpop.eup %7930  ;;  %v3470_v19 = vmul.f32 0.5, %v7929_v28 }
 0x37c   :  { %v3474_v11 = vmul.f32 0.5, %v7931_v20  ;;  %v7933_v49 = vpop.eup %7932  ;;  %v9866_v20 = vld [vmem:[%s10855_s8 + $0x2c] ss:$16 sps:$4 sm:$0xff]  }
 0x37d   :  { %v3471_v60 = vadd.f32 0.5, %v3470_v19  ;;  %v7935_v57 = vpop.eup %7934  ;;  %v9871_v19 = vld [vmem:[%s10855_s8 + $0x20] ss:$16 sps:$4 sm:$0xff]  }
 0x37e   :  { %v3475_v53 = vadd.f32 0.5, %v3474_v11  ;;  %v3479_v58 = vmul.f32 0.5, %v7935_v57  ;;  %v9876_v11 = vld [vmem:[%s10855_s8 + $0x28] ss:$16 sps:$4 sm:$0xff]   ;;  %v9914_v57 = vld [vmem:[%s10855_s8 + $0x6c] ss:$16 sps:$4 sm:$0xff]  }
 0x37f   :  { %v3482_v52 = vmul.f32 %v7933_v49, %v3471_v60  ;;  %v9885_v60 = vld [vmem:[%s10855_s8 + $0x44] ss:$16 sps:$4 sm:$0xff]   ;;  %v9890_v49 = vld [vmem:[%s10855_s8 + $0x4c] ss:$16 sps:$4 sm:$0xff]  }
 0x380   :  { %v3481_v55 = vmul.f32 %v3475_v53, %v9543_v36  ;;  %v3480_v39 = vadd.f32 0.5, %v3479_v58  ;;  %v9895_v53 = vld [vmem:[%s10855_s8 + $0x40] ss:$16 sps:$4 sm:$0xff]  }
 0x381   :  { %v9919_v58 = vld [vmem:[%s10855_s8 + $0x60] ss:$16 sps:$4 sm:$0xff]  }
 0x382   :  { %v9783_v56 = vadd.f32 %v3482_v52, %v3481_v55  ;;  %v9900_v52 = vld [vmem:[%s10855_s8 + $0x48] ss:$16 sps:$4 sm:$0xff]   ;;  %v9909_v55 = vld [vmem:[%s10855_s8 + $0x64] ss:$16 sps:$4 sm:$0xff]  }
 0x384   :  { %7936 = vtanh.f32 %v9783_v56 }
 0x38b   :  { %v3416_v59 = vpop.f32.mrb[52].mxu0  ;;  %v3457_v44 = vpop.f32.mrb[52].mxu1 }
 0x38c   :  { %v3464_v5 = vadd.f32 %v3416_v59, %v10971_v8  ;;  %v3466_v23 = vadd.f32 %v3457_v44, %v10972_v30  ;;  %v3418_v27 = vpop.f32.mrb[53].mxu0  ;;  %v3459_v33 = vpop.f32.mrb[53].mxu1  ;;  %v9924_v59 = vld [vmem:[%s10855_s8 + $0x68] ss:$16 sps:$4 sm:$0xff]   ;;  %v9933_v44 = vld [vmem:[%s10855_s8 + $0x84] ss:$16 sps:$4 sm:$0xff]  }
 0x38d   :  { %v3465_v40 = vadd.f32 %v3418_v27, %v10973_v1  ;;  %v3467_v50 = vadd.f32 %v3459_v33, %v10974_v43  ;;  %v3420_v36 = vpop.f32.mrb[54].mxu0  ;;  %v3461_v51 = vpop.f32.mrb[54].mxu1  ;;  %v9938_v8 = vld [vmem:[%s10855_s8 + $0x8c] ss:$16 sps:$4 sm:$0xff]   ;;  %v9948_v30 = vld [vmem:[%s10855_s8 + $0x88] ss:$16 sps:$4 sm:$0xff]  }
 0x38e   :  { %v7937_v54 = vpop.eup %7936  ;;  %v3486_v61 = vmul.f32 0.5, %v3464_v5  ;;  %v3421_v62 = vpop.f32.mrb[55].mxu0  ;;  %v9943_v5 = vld [vmem:[%s10855_s8 + $0x80] ss:$16 sps:$4 sm:$0xff]   ;;  %v9962_v27 = vld [vmem:[%s10855_s8 + $0xac] ss:$16 sps:$4 sm:$0xff]  }
 0x38f   :  { %v3462_v4 = vpop.f32.mrb[55].mxu1  ;;  %v3485_v9 = vmul.f32 %v7937_v54, %v3480_v39  ;;  %v3490_v15 = vmul.f32 0.5, %v3465_v40  ;;  %v3495_v17 = vmul.f32 0.5, %v3467_v50  ;;  %v9967_v33 = vld [vmem:[%s10855_s8 + $0xa0] ss:$16 sps:$4 sm:$0xff]  }
 0x390   :  { %7938 = vtanh.f32 %v3486_v61  ;;  %v9972_v39 = vld [vmem:[%s10855_s8 + $0xa8] ss:$16 sps:$4 sm:$0xff]   ;;  %v9981_v1 = vld [vmem:[%s10855_s8 + $0xc4] ss:$16 sps:$4 sm:$0xff]   ;;  %v9986_v40 = vld [vmem:[%s10855_s8 + $0xcc] ss:$16 sps:$4 sm:$0xff]  }
 0x391   :  { %6915 = vst [vmem:[%s10860_s12 + $0x10] sm:$0xff] %v3485_v9  ;;  %7940 = vtanh.f32 %v3490_v15  ;;  %v3513_v42 = vpack.c.bf16 %v3485_v9, %v3485_v9  ;;  %v9991_v43 = vld [vmem:[%s10855_s8 + $0xc0] ss:$16 sps:$4 sm:$0xff]   ;;  %v9996_v50 = vld [vmem:[%s10855_s8 + $0xc8] ss:$16 sps:$4 sm:$0xff]  }
 0x392   :  { %7942 = vtanh.f32 %v3466_v23  ;;  %v9957_v23 = vld [vmem:[%s10855_s8 + $0xa4] ss:$16 sps:$4 sm:$0xff]   ;;  %v10010_v51 = vld [vmem:[%s10855_s8 + $0xec] ss:$16 sps:$4 sm:$0xff]   ;;  %v10015_v54 = vld [vmem:[%s10855_s8 + $0xe0] ss:$16 sps:$4 sm:$0xff]  }
 0x393   :  { %3739 = vmatmul.mubr.bf16.vlgmr.msra.gmra.mrb[56].mxu0 %v3513_v42  ;;  %3780 = vmatmul.mubr.bf16.vlgmr.msra.gmra.mrb[56].mxu1 %v3513_v42  ;;  %7944 = vtanh.f32 %v3495_v17  ;;  %v10005_v36 = vld [vmem:[%s10855_s8 + $0xe4] ss:$16 sps:$4 sm:$0xff]   ;;  %v10020_v61 = vld [vmem:[%s10855_s8 + $0xe8] ss:$16 sps:$4 sm:$0xff]   ;;  %v10034_v4 = vld [vmem:[%s10856_s9 + $0xc] ss:$16 sps:$4 sm:$0xff]  }
 0x394   :  { %3991 = vmatpush1.bf16.msra.mxu0 %v9553_v34  ;;  %4032 = vmatpush1.bf16.msra.mxu1 %v9558_v6  ;;  %v10029_v62 = vld [vmem:[%s10856_s9 + $0x4] ss:$16 sps:$4 sm:$0xff]  }
 0x395   :  { %3992 = vmatprep.subr.bf16.mxu0 %v9566_v7  ;;  %4033 = vmatprep.subr.bf16.mxu1 %v9571_v37  ;;  %v10983_v42 = vld [vmem:[#allocation14_spill] sm:$0xff] }
 0x396   :  { %4022 = vmatprep.mubr.bf16.mxu0 %v10896_v10  ;;  %4063 = vmatprep.mubr.bf16.mxu1 %v10896_v10 }
 0x398   :  { %3993 = vmatpush1.bf16.msra.mxu0 %v9578_v38  ;;  %4034 = vmatpush1.bf16.msra.mxu1 %v9583_v47 }
 0x399   :  { %3994 = vmatprep.subr.bf16.mxu0 %v9590_v63  ;;  %4035 = vmatprep.subr.bf16.mxu1 %v9595_v21 }
 0x39a   :  { %v7939_v34 = vpop.eup %7938 }
 0x39b   :  { %v7941_v13 = vpop.eup %7940  ;;  %v3488_v6 = vmul.f32 0.5, %v7939_v34  ;;  %v10984_v34 = vld [vmem:[#allocation15_spill] sm:$0xff] }
 0x39c   :  { %v3492_v41 = vmul.f32 0.5, %v7941_v13  ;;  %3995 = vmatpush1.bf16.msra.mxu0 %v9604_v45  ;;  %4036 = vmatpush1.bf16.msra.mxu1 %v9609_v16  ;;  %v7943_v37 = vpop.eup %7942  ;;  %v10975_v45 = vld [vmem:[#allocation8_spill] sm:$0xff]  ;;  %v10976_v16 = vld [vmem:[#allocation9_spill] sm:$0xff] }
 0x39d   :  { %v3489_v7 = vadd.f32 0.5, %v3488_v6  ;;  %3996 = vmatprep.subr.bf16.mxu0 %v9616_v22  ;;  %4037 = vmatprep.subr.bf16.mxu1 %v9621_v14  ;;  %v10977_v22 = vld [vmem:[#allocation58_spill] sm:$0xff]  ;;  %v7945_v14 = vpop.eup %7944 }
 0x39e   :  { %v3493_v38 = vadd.f32 0.5, %v3492_v41 }
 0x39f   :  { %v3500_v47 = vmul.f32 %v7943_v37, %v3489_v7  ;;  %v10985_v7 = vld [vmem:[#allocation16_spill] sm:$0xff] }
 0x3a0   :  { %v3499_v63 = vmul.f32 %v3493_v38, %v9672_v46  ;;  %3997 = vmatpush1.bf16.msra.mxu0 %v9628_v26  ;;  %4038 = vmatpush1.bf16.msra.mxu1 %v9633_v3  ;;  %v10978_v26 = vld [vmem:[#allocation59_spill] sm:$0xff]  ;;  %v10979_v3 = vld [vmem:[#allocation60_spill] sm:$0xff]  ;;  %v10980_v46 = vld [vmem:[#allocation61_spill] sm:$0xff] }
 0x3a1   :  { %3998 = vmatprep.subr.bf16.mxu0 %v9640_v29  ;;  %4039 = vmatprep.subr.bf16.mxu1 %v9645_v31  ;;  %v3497_v29 = vmul.f32 0.5, %v7945_v14  ;;  %v10981_v31 = vld [vmem:[#allocation62_spill] sm:$0xff]  ;;  %v10986_v38 = vld [vmem:[#allocation17_spill] sm:$0xff] }
 0x3a2   :  { %v9812_v21 = vadd.f32 %v3500_v47, %v3499_v63 }
 0x3a4   :  { %7946 = vtanh.f32 %v9812_v21  ;;  %3999 = vmatpush1.bf16.msra.mxu0 %v9653_v35  ;;  %4040 = vmatpush1.bf16.msra.mxu1 %v10975_v45  ;;  %v3498_v35 = vadd.f32 0.5, %v3497_v29 }
 0x3a5   :  { %4000 = vmatprep.subr.bf16.mxu0 %v10976_v16  ;;  %4041 = vmatprep.subr.bf16.mxu1 %v10977_v22 }
 0x3a8   :  { %4001 = vmatpush1.bf16.msra.mxu0 %v10978_v26  ;;  %4042 = vmatpush1.bf16.msra.mxu1 %v10979_v3 }
 0x3a9   :  { %4002 = vmatprep.subr.bf16.mxu0 %v10980_v46  ;;  %4043 = vmatprep.subr.bf16.mxu1 %v10981_v31 }
 0x3ac   :  { %4003 = vmatpush1.bf16.msra.mxu0 %v9704_v2  ;;  %4044 = vmatpush1.bf16.msra.mxu1 %v10982_v12  ;;  %v9852_v2 = vld [vmem:[%s10855_s8 + $0x8] ss:$16 sps:$4 sm:$0xff]  }
 0x3ad   :  { %4004 = vmatprep.subr.bf16.mxu0 %v9716_v24  ;;  %4045 = vmatprep.subr.bf16.mxu1 %v9721_v25  ;;  %v9837_v24 = vld [vmem:[%s10855_s8 + $0x4] ss:$16 sps:$4 sm:$0xff]   ;;  %v9842_v25 = vld [vmem:[%s10855_s8 + $0xc] ss:$16 sps:$4 sm:$0xff]  }
 0x3ae   :  { %v7947_v48 = vpop.eup %7946 }
 0x3af   :  { %v3503_v18 = vmul.f32 %v7947_v48, %v3498_v35 }
 0x3b0   :  { %4005 = vmatpush1.bf16.msra.mxu0 %v9728_v32  ;;  %4046 = vmatpush1.bf16.msra.mxu1 %v9733_v0  ;;  %v9847_v0 = vld [vmem:[%s10855_s8] ss:$16 sps:$4 sm:$0xff]   ;;  %v9861_v32 = vld [vmem:[%s10855_s8 + $0x24] ss:$16 sps:$4 sm:$0xff]  }
 0x3b1   :  { %6916 = vst [vmem:[%s10861_s13 + $0x28] sm:$0xff] %v3503_v18  ;;  %v3797_v28 = vpack.c.bf16 %v3503_v18, %v3503_v18  ;;  %4314 = vmatprep.subr.bf16.mxu0 %v9837_v24  ;;  %4355 = vmatprep.subr.bf16.mxu1 %v9842_v25 }
 0x3b3   :  { %4023 = vmatmul.mubr.bf16.vlgmr.msra.gmra.mrb[60].mxu0 %v3797_v28  ;;  %4064 = vmatmul.mubr.bf16.vlgmr.msra.gmra.mrb[60].mxu1 %v3797_v28 }
 0x3b4   :  { %4346 = vmatprep.mubr.bf16.mxu0 %v10896_v10  ;;  %4387 = vmatprep.mubr.bf16.mxu1 %v10896_v10 }
 0x3b5   :  { %4315 = vmatpush1.bf16.msra.mxu0 %v9847_v0  ;;  %4356 = vmatpush1.bf16.msra.mxu1 %v9852_v2 }
 0x3b6   :  { %4316 = vmatprep.subr.bf16.mxu0 %v9861_v32  ;;  %4357 = vmatprep.subr.bf16.mxu1 %v9866_v20 }
 0x3b9   :  { %4317 = vmatpush1.bf16.msra.mxu0 %v9871_v19  ;;  %4358 = vmatpush1.bf16.msra.mxu1 %v9876_v11 }
 0x3ba   :  { %4318 = vmatprep.subr.bf16.mxu0 %v9885_v60  ;;  %4359 = vmatprep.subr.bf16.mxu1 %v9890_v49 }
 0x3bd   :  { %4319 = vmatpush1.bf16.msra.mxu0 %v9895_v53  ;;  %4360 = vmatpush1.bf16.msra.mxu1 %v9900_v52 }
 0x3be   :  { %4320 = vmatprep.subr.bf16.mxu0 %v9909_v55  ;;  %4361 = vmatprep.subr.bf16.mxu1 %v9914_v57 }
 0x3c1   :  { %4321 = vmatpush1.bf16.msra.mxu0 %v9919_v58  ;;  %4362 = vmatpush1.bf16.msra.mxu1 %v9924_v59 }
 0x3c2   :  { %4322 = vmatprep.subr.bf16.mxu0 %v9933_v44  ;;  %4363 = vmatprep.subr.bf16.mxu1 %v9938_v8 }
 0x3c5   :  { %4323 = vmatpush1.bf16.msra.mxu0 %v9943_v5  ;;  %4364 = vmatpush1.bf16.msra.mxu1 %v9948_v30 }
 0x3c6   :  { %4324 = vmatprep.subr.bf16.mxu0 %v9957_v23  ;;  %4365 = vmatprep.subr.bf16.mxu1 %v9962_v27 }
 0x3c9   :  { %4325 = vmatpush1.bf16.msra.mxu0 %v9967_v33  ;;  %4366 = vmatpush1.bf16.msra.mxu1 %v9972_v39 }
 0x3ca   :  { %4326 = vmatprep.subr.bf16.mxu0 %v9981_v1  ;;  %4367 = vmatprep.subr.bf16.mxu1 %v9986_v40 }
 0x3cd   :  { %4327 = vmatpush1.bf16.msra.mxu0 %v9991_v43  ;;  %4368 = vmatpush1.bf16.msra.mxu1 %v9996_v50 }
 0x3ce   :  { %4328 = vmatprep.subr.bf16.mxu0 %v10005_v36  ;;  %4369 = vmatprep.subr.bf16.mxu1 %v10010_v51 }
 0x3d1   :  { %4329 = vmatpush1.bf16.msra.mxu0 %v10015_v54  ;;  %4370 = vmatpush1.bf16.msra.mxu1 %v10020_v61 }
 0x3d2   :  { %4598 = vmatprep.subr.bf16.mxu0 %v10029_v62  ;;  %4639 = vmatprep.subr.bf16.mxu1 %v10034_v4 }
 0x466   :  { %v3740_v9 = vpop.f32.mrb[56].mxu0  ;;  %v3781_v15 = vpop.f32.mrb[56].mxu1 }
 0x467   :  { %v3788_v17 = vadd.f32 %v3740_v9, %v10983_v42  ;;  %v3790_v13 = vadd.f32 %v3781_v15, %v10984_v34  ;;  %v3742_v6 = vpop.f32.mrb[57].mxu0  ;;  %v3783_v41 = vpop.f32.mrb[57].mxu1 }
 0x468   :  { %v3789_v37 = vadd.f32 %v3742_v6, %v10985_v7  ;;  %v3791_v47 = vadd.f32 %v3783_v41, %v10986_v38  ;;  %v3744_v63 = vpop.f32.mrb[58].mxu0  ;;  %v3785_v45 = vpop.f32.mrb[58].mxu1  ;;  %v10987_v6 = vld [vmem:[#allocation50_spill] sm:$0xff]  ;;  %v10988_v7 = vld [vmem:[#allocation51_spill] sm:$0xff] }
 0x469   :  { %v4076_v16 = vmul.f32 0.5, %v3788_v17  ;;  %v3745_v22 = vpop.f32.mrb[59].mxu0  ;;  %v3786_v14 = vpop.f32.mrb[59].mxu1  ;;  %v10989_v45 = vld [vmem:[#allocation52_spill] sm:$0xff] }
 0x46a   :  { %v4080_v26 = vmul.f32 0.5, %v3789_v37  ;;  %v4085_v3 = vmul.f32 0.5, %v3791_v47  ;;  %v10990_v22 = vld [vmem:[#allocation53_spill] sm:$0xff] }
 0x46b   :  { %7948 = vtanh.f32 %v4076_v16 }
 0x46c   :  { %7950 = vtanh.f32 %v4080_v26 }
 0x46d   :  { %7952 = vtanh.f32 %v3790_v13 }
 0x46e   :  { %7954 = vtanh.f32 %v4085_v3 }
 0x475   :  { %v7949_v29 = vpop.eup %7948 }
 0x476   :  { %v7951_v46 = vpop.eup %7950  ;;  %v4078_v31 = vmul.f32 0.5, %v7949_v29 }
 0x477   :  { %v4082_v12 = vmul.f32 0.5, %v7951_v46  ;;  %v7953_v48 = vpop.eup %7952 }
 0x478   :  { %v4079_v35 = vadd.f32 0.5, %v4078_v31  ;;  %v7955_v42 = vpop.eup %7954 }
 0x479   :  { %v4083_v18 = vadd.f32 0.5, %v4082_v12  ;;  %v4087_v17 = vmul.f32 0.5, %v7955_v42  ;;  %v10071_v42 = vld [vmem:[%s10856_s9 + $0x2c] ss:$16 sps:$4 sm:$0xff]  }
 0x47a   :  { %v4090_v28 = vmul.f32 %v7953_v48, %v4079_v35  ;;  %v10053_v48 = vld [vmem:[%s10856_s9] ss:$16 sps:$4 sm:$0xff]  }
 0x47b   :  { %v4089_v9 = vmul.f32 %v4083_v18, %v9783_v56  ;;  %v4088_v63 = vadd.f32 0.5, %v4087_v17  ;;  %v10058_v18 = vld [vmem:[%s10856_s9 + $0x8] ss:$16 sps:$4 sm:$0xff]   ;;  %v10078_v17 = vld [vmem:[%s10856_s9 + $0x20] ss:$16 sps:$4 sm:$0xff]  }
 0x47d   :  { %v10043_v15 = vadd.f32 %v4090_v28, %v4089_v9  ;;  %v10066_v9 = vld [vmem:[%s10856_s9 + $0x24] ss:$16 sps:$4 sm:$0xff]  }
 0x47f   :  { %7956 = vtanh.f32 %v10043_v15 }
 0x486   :  { %v4024_v34 = vpop.f32.mrb[60].mxu0  ;;  %v4065_v13 = vpop.f32.mrb[60].mxu1 }
 0x487   :  { %v4072_v41 = vadd.f32 %v4024_v34, %v10987_v6  ;;  %v4074_v37 = vadd.f32 %v4065_v13, %v10988_v7  ;;  %v4026_v38 = vpop.f32.mrb[61].mxu0  ;;  %v4067_v47 = vpop.f32.mrb[61].mxu1  ;;  %v10083_v34 = vld [vmem:[%s10856_s9 + $0x28] ss:$16 sps:$4 sm:$0xff]   ;;  %v10090_v13 = vld [vmem:[%s10856_s9 + $0x44] ss:$16 sps:$4 sm:$0xff]  }
 0x488   :  { %v4073_v16 = vadd.f32 %v4026_v38, %v10989_v45  ;;  %v4075_v14 = vadd.f32 %v4067_v47, %v10990_v22  ;;  %v4028_v56 = vpop.f32.mrb[62].mxu0  ;;  %v4069_v26 = vpop.f32.mrb[62].mxu1  ;;  %v10095_v6 = vld [vmem:[%s10856_s9 + $0x4c] ss:$16 sps:$4 sm:$0xff]   ;;  %v10104_v7 = vld [vmem:[%s10856_s9 + $0x40] ss:$16 sps:$4 sm:$0xff]  }
 0x489   :  { %v7957_v3 = vpop.eup %7956  ;;  %v4094_v29 = vmul.f32 0.5, %v4072_v41  ;;  %v4029_v46 = vpop.f32.mrb[63].mxu0  ;;  %v10116_v38 = vld [vmem:[%s10856_s9 + $0x64] ss:$16 sps:$4 sm:$0xff]   ;;  %v10121_v47 = vld [vmem:[%s10856_s9 + $0x6c] ss:$16 sps:$4 sm:$0xff]  }
 0x48a   :  { %v4070_v31 = vpop.f32.mrb[63].mxu1  ;;  %v4093_v12 = vmul.f32 %v7957_v3, %v4088_v63  ;;  %v4098_v35 = vmul.f32 0.5, %v4073_v16  ;;  %v4103_v41 = vmul.f32 0.5, %v4075_v14  ;;  %v10128_v14 = vld [vmem:[%s10856_s9 + $0x60] ss:$16 sps:$4 sm:$0xff]  }
 0x48b   :  { %7958 = vtanh.f32 %v4094_v29  ;;  %v10133_v56 = vld [vmem:[%s10856_s9 + $0x68] ss:$16 sps:$4 sm:$0xff]   ;;  %v10140_v3 = vld [vmem:[%s10856_s9 + $0x84] ss:$16 sps:$4 sm:$0xff]   ;;  %v10145_v29 = vld [vmem:[%s10856_s9 + $0x8c] ss:$16 sps:$4 sm:$0xff]  }
 0x48c   :  { %6981 = vst [vmem:[%s10860_s12 + $0x18] sm:$0xff] %v4093_v12  ;;  %7960 = vtanh.f32 %v4098_v35  ;;  %v4121_v28 = vpack.c.bf16 %v4093_v12, %v4093_v12 }
 0x48d   :  { %7962 = vtanh.f32 %v4074_v37  ;;  %v10109_v37 = vld [vmem:[%s10856_s9 + $0x48] ss:$16 sps:$4 sm:$0xff]  }
 0x48e   :  { %4347 = vmatmul.mubr.bf16.vlgmr.msra.gmra.mrb[64].mxu0 %v4121_v28  ;;  %4388 = vmatmul.mubr.bf16.vlgmr.msra.gmra.mrb[64].mxu1 %v4121_v28  ;;  %7964 = vtanh.f32 %v4103_v41  ;;  %v10153_v28 = vld [vmem:[%s10856_s9 + $0x80] ss:$16 sps:$4 sm:$0xff]   ;;  %v10158_v41 = vld [vmem:[%s10856_s9 + $0x88] ss:$16 sps:$4 sm:$0xff]  }
 0x48f   :  { %4599 = vmatpush1.bf16.msra.mxu0 %v10053_v48  ;;  %4640 = vmatpush1.bf16.msra.mxu1 %v10058_v18  ;;  %10991 = vst [vmem:[#allocation10_spill] sm:$0xff] %v10158_v41 }
 0x490   :  { %4600 = vmatprep.subr.bf16.mxu0 %v10066_v9  ;;  %4641 = vmatprep.subr.bf16.mxu1 %v10071_v42 }
 0x491   :  { %4630 = vmatprep.mubr.bf16.mxu0 %v10896_v10  ;;  %4671 = vmatprep.mubr.bf16.mxu1 %v10896_v10 }
 0x493   :  { %4601 = vmatpush1.bf16.msra.mxu0 %v10078_v17  ;;  %4642 = vmatpush1.bf16.msra.mxu1 %v10083_v34 }
 0x494   :  { %4602 = vmatprep.subr.bf16.mxu0 %v10090_v13  ;;  %4643 = vmatprep.subr.bf16.mxu1 %v10095_v6 }
 0x495   :  { %v7959_v63 = vpop.eup %7958 }
 0x496   :  { %v7961_v45 = vpop.eup %7960  ;;  %v4096_v16 = vmul.f32 0.5, %v7959_v63  ;;  %v10170_v63 = vld [vmem:[%s10856_s9 + $0xac] ss:$16 sps:$4 sm:$0xff]  }
 0x497   :  { %v4100_v22 = vmul.f32 0.5, %v7961_v45  ;;  %4603 = vmatpush1.bf16.msra.mxu0 %v10104_v7  ;;  %4644 = vmatpush1.bf16.msra.mxu1 %v10109_v37  ;;  %v7963_v46 = vpop.eup %7962  ;;  %10993 = vst [vmem:[#allocation12_spill] sm:$0xff] %v10170_v63 }
 0x498   :  { %v4097_v26 = vadd.f32 0.5, %v4096_v16  ;;  %4604 = vmatprep.subr.bf16.mxu0 %v10116_v38  ;;  %4645 = vmatprep.subr.bf16.mxu1 %v10121_v47  ;;  %v10180_v16 = vld [vmem:[%s10856_s9 + $0xa0] ss:$16 sps:$4 sm:$0xff]  }
 0x499   :  { %v4101_v31 = vadd.f32 0.5, %v4100_v22  ;;  %10994 = vst [vmem:[#allocation13_spill] sm:$0xff] %v10180_v16  ;;  %v10185_v22 = vld [vmem:[%s10856_s9 + $0xa8] ss:$16 sps:$4 sm:$0xff]  }
 0x49a   :  { %v4108_v12 = vmul.f32 %v7963_v46, %v4097_v26  ;;  %10995 = vst [vmem:[#allocation54_spill] sm:$0xff] %v10185_v22  ;;  %v10192_v26 = vld [vmem:[%s10856_s9 + $0xc4] ss:$16 sps:$4 sm:$0xff]   ;;  %v10197_v46 = vld [vmem:[%s10856_s9 + $0xcc] ss:$16 sps:$4 sm:$0xff]  }
 0x49b   :  { %v4107_v35 = vmul.f32 %v4101_v31, %v9812_v21  ;;  %4605 = vmatpush1.bf16.msra.mxu0 %v10128_v14  ;;  %4646 = vmatpush1.bf16.msra.mxu1 %v10133_v56  ;;  %v10165_v21 = vld [vmem:[%s10856_s9 + $0xa4] ss:$16 sps:$4 sm:$0xff]   ;;  %10996 = vst [vmem:[#allocation55_spill] sm:$0xff] %v10192_v26  ;;  %10997 = vst [vmem:[#allocation56_spill] sm:$0xff] %v10197_v46  ;;  %v7965_v31 = vpop.eup %7964 }
 0x49c   :  { %4606 = vmatprep.subr.bf16.mxu0 %v10140_v3  ;;  %4647 = vmatprep.subr.bf16.mxu1 %v10145_v29  ;;  %10992 = vst [vmem:[#allocation11_spill] sm:$0xff] %v10165_v21 }
 0x49d   :  { %v10172_v45 = vadd.f32 %v4108_v12, %v4107_v35  ;;  %v10204_v12 = vld [vmem:[%s10856_s9 + $0xc0] ss:$16 sps:$4 sm:$0xff]   ;;  %v10209_v35 = vld [vmem:[%s10856_s9 + $0xc8] ss:$16 sps:$4 sm:$0xff]  }
 0x49e   :  { %10998 = vst [vmem:[#allocation57_spill] sm:$0xff] %v10209_v35 }
 0x49f   :  { %7966 = vtanh.f32 %v10172_v45  ;;  %4607 = vmatpush1.bf16.msra.mxu0 %v10153_v28  ;;  %4648 = vmatpush1.bf16.msra.mxu1 %v10158_v41 }
 0x4a0   :  { %4608 = vmatprep.subr.bf16.mxu0 %v10165_v21  ;;  %4649 = vmatprep.subr.bf16.mxu1 %v10170_v63  ;;  %v4105_v63 = vmul.f32 0.5, %v7965_v31  ;;  %v10228_v31 = vld [vmem:[%s10856_s9 + $0xe0] ss:$16 sps:$4 sm:$0xff]  }
 0x4a3   :  { %4609 = vmatpush1.bf16.msra.mxu0 %v10180_v16  ;;  %4650 = vmatpush1.bf16.msra.mxu1 %v10185_v22  ;;  %v10216_v16 = vld [vmem:[%s10856_s9 + $0xe4] ss:$16 sps:$4 sm:$0xff]   ;;  %v10221_v22 = vld [vmem:[%s10856_s9 + $0xec] ss:$16 sps:$4 sm:$0xff]  }
 0x4a4   :  { %4610 = vmatprep.subr.bf16.mxu0 %v10192_v26  ;;  %4651 = vmatprep.subr.bf16.mxu1 %v10197_v46  ;;  %v10233_v46 = vld [vmem:[%s10856_s9 + $0xe8] ss:$16 sps:$4 sm:$0xff]   ;;  %v4106_v26 = vadd.f32 0.5, %v4105_v63 }
 0x4a7   :  { %4611 = vmatpush1.bf16.msra.mxu0 %v10204_v12  ;;  %4652 = vmatpush1.bf16.msra.mxu1 %v10209_v35 }
 0x4a8   :  { %4612 = vmatprep.subr.bf16.mxu0 %v10216_v16  ;;  %4653 = vmatprep.subr.bf16.mxu1 %v10221_v22 }
 0x4a9   :  { %v7967_v21 = vpop.eup %7966 }
 0x4aa   :  { %v4111_v41 = vmul.f32 %v7967_v21, %v4106_v26  ;;  %v11004_v21 = vld [vmem:[#allocation47_spill] sm:$0xff] }
 0x4ab   :  { %4613 = vmatpush1.bf16.msra.mxu0 %v10228_v31  ;;  %4654 = vmatpush1.bf16.msra.mxu1 %v10233_v46 }
 0x4ac   :  { %6982 = vst [vmem:[%s10861_s13 + $0x20] sm:$0xff] %v4111_v41  ;;  %v4405_v35 = vpack.c.bf16 %v4111_v41, %v4111_v41  ;;  %4922 = vmatprep.subr.bf16.mxu0 %v9837_v24  ;;  %4963 = vmatprep.subr.bf16.mxu1 %v9842_v25 }
 0x4ae   :  { %4631 = vmatmul.mubr.bf16.vlgmr.msra.gmra.mrb[68].mxu0 %v4405_v35  ;;  %4672 = vmatmul.mubr.bf16.vlgmr.msra.gmra.mrb[68].mxu1 %v4405_v35 }
 0x4af   :  { %4923 = vmatpush1.bf16.msra.mxu0 %v9847_v0  ;;  %4964 = vmatpush1.bf16.msra.mxu1 %v9852_v2  ;;  %v10999_v0 = vld [vmem:[#allocation18_spill] sm:$0xff] }
 0x4b0   :  { %4924 = vmatprep.subr.bf16.mxu0 %v9861_v32  ;;  %4965 = vmatprep.subr.bf16.mxu1 %v9866_v20  ;;  %v11000_v32 = vld [vmem:[#allocation19_spill] sm:$0xff] }
 0x4b1   :  { %4954 = vmatprep.mubr.bf16.mxu0 %v10896_v10  ;;  %4995 = vmatprep.mubr.bf16.mxu1 %v10896_v10 }
 0x4b3   :  { %4925 = vmatpush1.bf16.msra.mxu0 %v9871_v19  ;;  %4966 = vmatpush1.bf16.msra.mxu1 %v9876_v11 }
 0x4b4   :  { %4926 = vmatprep.subr.bf16.mxu0 %v9885_v60  ;;  %4967 = vmatprep.subr.bf16.mxu1 %v9890_v49  ;;  %v11001_v60 = vld [vmem:[#allocation20_spill] sm:$0xff] }
 0x4b7   :  { %4927 = vmatpush1.bf16.msra.mxu0 %v9895_v53  ;;  %4968 = vmatpush1.bf16.msra.mxu1 %v9900_v52  ;;  %v11002_v53 = vld [vmem:[#allocation21_spill] sm:$0xff] }
 0x4b8   :  { %4928 = vmatprep.subr.bf16.mxu0 %v9909_v55  ;;  %4969 = vmatprep.subr.bf16.mxu1 %v9914_v57 }
 0x4bb   :  { %4929 = vmatpush1.bf16.msra.mxu0 %v9919_v58  ;;  %4970 = vmatpush1.bf16.msra.mxu1 %v9924_v59 }
 0x4bc   :  { %4930 = vmatprep.subr.bf16.mxu0 %v9933_v44  ;;  %4971 = vmatprep.subr.bf16.mxu1 %v9938_v8 }
 0x4bf   :  { %4931 = vmatpush1.bf16.msra.mxu0 %v9943_v5  ;;  %4972 = vmatpush1.bf16.msra.mxu1 %v9948_v30 }
 0x4c0   :  { %4932 = vmatprep.subr.bf16.mxu0 %v9957_v23  ;;  %4973 = vmatprep.subr.bf16.mxu1 %v9962_v27 }
 0x4c3   :  { %4933 = vmatpush1.bf16.msra.mxu0 %v9967_v33  ;;  %4974 = vmatpush1.bf16.msra.mxu1 %v9972_v39 }
 0x4c4   :  { %4934 = vmatprep.subr.bf16.mxu0 %v9981_v1  ;;  %4975 = vmatprep.subr.bf16.mxu1 %v9986_v40 }
 0x4c7   :  { %4935 = vmatpush1.bf16.msra.mxu0 %v9991_v43  ;;  %4976 = vmatpush1.bf16.msra.mxu1 %v9996_v50 }
 0x4c8   :  { %4936 = vmatprep.subr.bf16.mxu0 %v10005_v36  ;;  %4977 = vmatprep.subr.bf16.mxu1 %v10010_v51 }
 0x4cb   :  { %4937 = vmatpush1.bf16.msra.mxu0 %v10015_v54  ;;  %4978 = vmatpush1.bf16.msra.mxu1 %v10020_v61 }
 0x4cc   :  { %5206 = vmatprep.subr.bf16.mxu0 %v10029_v62  ;;  %5247 = vmatprep.subr.bf16.mxu1 %v10034_v4  ;;  %v11003_v4 = vld [vmem:[#allocation46_spill] sm:$0xff] }
 0x561   :  { %v4348_v24 = vpop.f32.mrb[64].mxu0  ;;  %v4389_v25 = vpop.f32.mrb[64].mxu1 }
 0x562   :  { %v4396_v2 = vadd.f32 %v4348_v24, %v10999_v0  ;;  %v4398_v20 = vadd.f32 %v4389_v25, %v11000_v32  ;;  %v4350_v19 = vpop.f32.mrb[65].mxu0  ;;  %v4391_v11 = vpop.f32.mrb[65].mxu1  ;;  %v11005_v25 = vld [vmem:[#allocation48_spill] sm:$0xff] }
 0x563   :  { %v4397_v49 = vadd.f32 %v4350_v19, %v11001_v60  ;;  %v4399_v52 = vadd.f32 %v4391_v11, %v11002_v53  ;;  %v4352_v55 = vpop.f32.mrb[66].mxu0  ;;  %v4393_v57 = vpop.f32.mrb[66].mxu1 }
 0x564   :  { %v4684_v58 = vmul.f32 0.5, %v4396_v2  ;;  %v4353_v59 = vpop.f32.mrb[67].mxu0  ;;  %v4394_v44 = vpop.f32.mrb[67].mxu1  ;;  %v11006_v2 = vld [vmem:[#allocation49_spill] sm:$0xff] }
 0x565   :  { %v4688_v8 = vmul.f32 0.5, %v4397_v49  ;;  %v4693_v5 = vmul.f32 0.5, %v4399_v52  ;;  %v11014_v44 = vld [vmem:[#allocation57_spill] sm:$0xff] }
 0x566   :  { %7968 = vtanh.f32 %v4684_v58 }
 0x567   :  { %7970 = vtanh.f32 %v4688_v8 }
 0x568   :  { %7972 = vtanh.f32 %v4398_v20 }
 0x569   :  { %7974 = vtanh.f32 %v4693_v5 }
 0x570   :  { %v7969_v30 = vpop.eup %7968 }
 0x571   :  { %v7971_v23 = vpop.eup %7970  ;;  %v4686_v27 = vmul.f32 0.5, %v7969_v30 }
 0x572   :  { %v4690_v33 = vmul.f32 0.5, %v7971_v23  ;;  %v7973_v1 = vpop.eup %7972  ;;  %v10366_v23 = vld [vmem:[%s10855_s8 + $0x2c] ss:$16 sps:$4 sm:$0xff]  }
 0x573   :  { %v4687_v39 = vadd.f32 0.5, %v4686_v27  ;;  %v7975_v51 = vpop.eup %7974  ;;  %v10371_v27 = vld [vmem:[%s10855_s8 + $0x20] ss:$16 sps:$4 sm:$0xff]  }
 0x574   :  { %v4691_v40 = vadd.f32 0.5, %v4690_v33  ;;  %v4695_v54 = vmul.f32 0.5, %v7975_v51  ;;  %v10376_v33 = vld [vmem:[%s10855_s8 + $0x28] ss:$16 sps:$4 sm:$0xff]   ;;  %v10414_v51 = vld [vmem:[%s10855_s8 + $0x6c] ss:$16 sps:$4 sm:$0xff]  }
 0x575   :  { %v4698_v43 = vmul.f32 %v7973_v1, %v4687_v39  ;;  %v10385_v39 = vld [vmem:[%s10855_s8 + $0x44] ss:$16 sps:$4 sm:$0xff]   ;;  %v10390_v1 = vld [vmem:[%s10855_s8 + $0x4c] ss:$16 sps:$4 sm:$0xff]  }
 0x576   :  { %v4697_v50 = vmul.f32 %v4691_v40, %v10043_v15  ;;  %v4696_v24 = vadd.f32 0.5, %v4695_v54  ;;  %v10395_v40 = vld [vmem:[%s10855_s8 + $0x40] ss:$16 sps:$4 sm:$0xff]  }
 0x577   :  { %v10419_v54 = vld [vmem:[%s10855_s8 + $0x60] ss:$16 sps:$4 sm:$0xff]  }
 0x578   :  { %v10283_v36 = vadd.f32 %v4698_v43, %v4697_v50  ;;  %v10400_v43 = vld [vmem:[%s10855_s8 + $0x48] ss:$16 sps:$4 sm:$0xff]   ;;  %v10409_v50 = vld [vmem:[%s10855_s8 + $0x64] ss:$16 sps:$4 sm:$0xff]  }
 0x57a   :  { %7976 = vtanh.f32 %v10283_v36 }
 0x581   :  { %v4632_v61 = vpop.f32.mrb[68].mxu0  ;;  %v4673_v62 = vpop.f32.mrb[68].mxu1 }
 0x582   :  { %v4680_v41 = vadd.f32 %v4632_v61, %v11003_v4  ;;  %v4682_v63 = vadd.f32 %v4673_v62, %v11004_v21  ;;  %v4634_v26 = vpop.f32.mrb[69].mxu0  ;;  %v4675_v35 = vpop.f32.mrb[69].mxu1  ;;  %v10424_v61 = vld [vmem:[%s10855_s8 + $0x68] ss:$16 sps:$4 sm:$0xff]   ;;  %v10433_v62 = vld [vmem:[%s10855_s8 + $0x84] ss:$16 sps:$4 sm:$0xff]  }
 0x583   :  { %v4681_v0 = vadd.f32 %v4634_v26, %v11005_v25  ;;  %v4683_v32 = vadd.f32 %v4675_v35, %v11006_v2  ;;  %v4636_v15 = vpop.f32.mrb[70].mxu0  ;;  %v4677_v20 = vpop.f32.mrb[70].mxu1  ;;  %v10438_v4 = vld [vmem:[%s10855_s8 + $0x8c] ss:$16 sps:$4 sm:$0xff]   ;;  %v10448_v21 = vld [vmem:[%s10855_s8 + $0x88] ss:$16 sps:$4 sm:$0xff]  }
 0x584   :  { %v7977_v19 = vpop.eup %7976  ;;  %v4702_v11 = vmul.f32 0.5, %v4680_v41  ;;  %v4637_v60 = vpop.f32.mrb[71].mxu0  ;;  %v10443_v41 = vld [vmem:[%s10855_s8 + $0x80] ss:$16 sps:$4 sm:$0xff]   ;;  %v10462_v26 = vld [vmem:[%s10855_s8 + $0xac] ss:$16 sps:$4 sm:$0xff]  }
 0x585   :  { %v4678_v49 = vpop.f32.mrb[71].mxu1  ;;  %v4701_v53 = vmul.f32 %v7977_v19, %v4696_v24  ;;  %v4706_v52 = vmul.f32 0.5, %v4681_v0  ;;  %v4711_v57 = vmul.f32 0.5, %v4683_v32  ;;  %v10467_v35 = vld [vmem:[%s10855_s8 + $0xa0] ss:$16 sps:$4 sm:$0xff]  }
 0x586   :  { %7978 = vtanh.f32 %v4702_v11  ;;  %v10472_v24 = vld [vmem:[%s10855_s8 + $0xa8] ss:$16 sps:$4 sm:$0xff]   ;;  %v10481_v25 = vld [vmem:[%s10855_s8 + $0xc4] ss:$16 sps:$4 sm:$0xff]   ;;  %v10486_v0 = vld [vmem:[%s10855_s8 + $0xcc] ss:$16 sps:$4 sm:$0xff]  }
 0x587   :  { %7047 = vst [vmem:[%s10860_s12 + $0x20] sm:$0xff] %v4701_v53  ;;  %7980 = vtanh.f32 %v4706_v52  ;;  %v4729_v55 = vpack.c.bf16 %v4701_v53, %v4701_v53  ;;  %v10491_v2 = vld [vmem:[%s10855_s8 + $0xc0] ss:$16 sps:$4 sm:$0xff]   ;;  %v10496_v32 = vld [vmem:[%s10855_s8 + $0xc8] ss:$16 sps:$4 sm:$0xff]  }
 0x588   :  { %7982 = vtanh.f32 %v4682_v63  ;;  %v10457_v63 = vld [vmem:[%s10855_s8 + $0xa4] ss:$16 sps:$4 sm:$0xff]   ;;  %v10510_v20 = vld [vmem:[%s10855_s8 + $0xec] ss:$16 sps:$4 sm:$0xff]   ;;  %v10515_v19 = vld [vmem:[%s10855_s8 + $0xe0] ss:$16 sps:$4 sm:$0xff]  }
 0x589   :  { %4955 = vmatmul.mubr.bf16.vlgmr.msra.gmra.mrb[72].mxu0 %v4729_v55  ;;  %4996 = vmatmul.mubr.bf16.vlgmr.msra.gmra.mrb[72].mxu1 %v4729_v55  ;;  %7984 = vtanh.f32 %v4711_v57  ;;  %v10505_v15 = vld [vmem:[%s10855_s8 + $0xe4] ss:$16 sps:$4 sm:$0xff]   ;;  %v10520_v11 = vld [vmem:[%s10855_s8 + $0xe8] ss:$16 sps:$4 sm:$0xff]   ;;  %v10534_v49 = vld [vmem:[%s10856_s9 + $0xc] ss:$16 sps:$4 sm:$0xff]  }
 0x58a   :  { %5207 = vmatpush1.bf16.msra.mxu0 %v10053_v48  ;;  %5248 = vmatpush1.bf16.msra.mxu1 %v10058_v18  ;;  %v10529_v60 = vld [vmem:[%s10856_s9 + $0x4] ss:$16 sps:$4 sm:$0xff]  }
 0x58b   :  { %5208 = vmatprep.subr.bf16.mxu0 %v10066_v9  ;;  %5249 = vmatprep.subr.bf16.mxu1 %v10071_v42  ;;  %v11015_v55 = vld [vmem:[#allocation22_spill] sm:$0xff] }
 0x58c   :  { %5238 = vmatprep.mubr.bf16.mxu0 %v10896_v10  ;;  %5279 = vmatprep.mubr.bf16.mxu1 %v10896_v10 }
 0x58e   :  { %5209 = vmatpush1.bf16.msra.mxu0 %v10078_v17  ;;  %5250 = vmatpush1.bf16.msra.mxu1 %v10083_v34 }
 0x58f   :  { %5210 = vmatprep.subr.bf16.mxu0 %v10090_v13  ;;  %5251 = vmatprep.subr.bf16.mxu1 %v10095_v6 }
 0x590   :  { %v7979_v48 = vpop.eup %7978 }
 0x591   :  { %v7981_v58 = vpop.eup %7980  ;;  %v4704_v18 = vmul.f32 0.5, %v7979_v48  ;;  %v11016_v48 = vld [vmem:[#allocation23_spill] sm:$0xff] }
 0x592   :  { %v4708_v59 = vmul.f32 0.5, %v7981_v58  ;;  %5211 = vmatpush1.bf16.msra.mxu0 %v10104_v7  ;;  %5252 = vmatpush1.bf16.msra.mxu1 %v10109_v37  ;;  %v7983_v42 = vpop.eup %7982  ;;  %v11007_v7 = vld [vmem:[#allocation10_spill] sm:$0xff]  ;;  %v11008_v37 = vld [vmem:[#allocation11_spill] sm:$0xff] }
 0x593   :  { %v4705_v9 = vadd.f32 0.5, %v4704_v18  ;;  %5212 = vmatprep.subr.bf16.mxu0 %v10116_v38  ;;  %5253 = vmatprep.subr.bf16.mxu1 %v10121_v47  ;;  %v11009_v38 = vld [vmem:[#allocation12_spill] sm:$0xff]  ;;  %v7985_v47 = vpop.eup %7984 }
 0x594   :  { %v4709_v17 = vadd.f32 0.5, %v4708_v59 }
 0x595   :  { %v4716_v34 = vmul.f32 %v7983_v42, %v4705_v9  ;;  %v11017_v9 = vld [vmem:[#allocation24_spill] sm:$0xff] }
 0x596   :  { %v4715_v13 = vmul.f32 %v4709_v17, %v10172_v45  ;;  %5213 = vmatpush1.bf16.msra.mxu0 %v10128_v14  ;;  %5254 = vmatpush1.bf16.msra.mxu1 %v10133_v56  ;;  %v11010_v14 = vld [vmem:[#allocation13_spill] sm:$0xff]  ;;  %v11011_v56 = vld [vmem:[#allocation54_spill] sm:$0xff]  ;;  %v11012_v45 = vld [vmem:[#allocation55_spill] sm:$0xff] }
 0x597   :  { %5214 = vmatprep.subr.bf16.mxu0 %v10140_v3  ;;  %5255 = vmatprep.subr.bf16.mxu1 %v10145_v29  ;;  %v4713_v3 = vmul.f32 0.5, %v7985_v47  ;;  %v11013_v29 = vld [vmem:[#allocation56_spill] sm:$0xff]  ;;  %v11018_v17 = vld [vmem:[#allocation25_spill] sm:$0xff] }
 0x598   :  { %v10312_v6 = vadd.f32 %v4716_v34, %v4715_v13 }
 0x59a   :  { %7986 = vtanh.f32 %v10312_v6  ;;  %5215 = vmatpush1.bf16.msra.mxu0 %v10153_v28  ;;  %5256 = vmatpush1.bf16.msra.mxu1 %v11007_v7  ;;  %v4714_v28 = vadd.f32 0.5, %v4713_v3 }
 0x59b   :  { %5216 = vmatprep.subr.bf16.mxu0 %v11008_v37  ;;  %5257 = vmatprep.subr.bf16.mxu1 %v11009_v38 }
 0x59e   :  { %5217 = vmatpush1.bf16.msra.mxu0 %v11010_v14  ;;  %5258 = vmatpush1.bf16.msra.mxu1 %v11011_v56 }
 0x59f   :  { %5218 = vmatprep.subr.bf16.mxu0 %v11012_v45  ;;  %5259 = vmatprep.subr.bf16.mxu1 %v11013_v29 }
 0x5a2   :  { %5219 = vmatpush1.bf16.msra.mxu0 %v10204_v12  ;;  %5260 = vmatpush1.bf16.msra.mxu1 %v11014_v44  ;;  %v10352_v12 = vld [vmem:[%s10855_s8 + $0x8] ss:$16 sps:$4 sm:$0xff]  }
 0x5a3   :  { %5220 = vmatprep.subr.bf16.mxu0 %v10216_v16  ;;  %5261 = vmatprep.subr.bf16.mxu1 %v10221_v22  ;;  %v10337_v16 = vld [vmem:[%s10855_s8 + $0x4] ss:$16 sps:$4 sm:$0xff]   ;;  %v10342_v22 = vld [vmem:[%s10855_s8 + $0xc] ss:$16 sps:$4 sm:$0xff]  }
 0x5a4   :  { %v7987_v8 = vpop.eup %7986 }
 0x5a5   :  { %v4719_v5 = vmul.f32 %v7987_v8, %v4714_v28 }
 0x5a6   :  { %5221 = vmatpush1.bf16.msra.mxu0 %v10228_v31  ;;  %5262 = vmatpush1.bf16.msra.mxu1 %v10233_v46  ;;  %v10347_v46 = vld [vmem:[%s10855_s8] ss:$16 sps:$4 sm:$0xff]   ;;  %v10361_v31 = vld [vmem:[%s10855_s8 + $0x24] ss:$16 sps:$4 sm:$0xff]  }
 0x5a7   :  { %7048 = vst [vmem:[%s10861_s13 + $0x18] sm:$0xff] %v4719_v5  ;;  %v5013_v30 = vpack.c.bf16 %v4719_v5, %v4719_v5  ;;  %5530 = vmatprep.subr.bf16.mxu0 %v10337_v16  ;;  %5571 = vmatprep.subr.bf16.mxu1 %v10342_v22 }
 0x5a9   :  { %5239 = vmatmul.mubr.bf16.vlgmr.msra.gmra.mrb[76].mxu0 %v5013_v30  ;;  %5280 = vmatmul.mubr.bf16.vlgmr.msra.gmra.mrb[76].mxu1 %v5013_v30 }
 0x5aa   :  { %5562 = vmatprep.mubr.bf16.mxu0 %v10896_v10  ;;  %5603 = vmatprep.mubr.bf16.mxu1 %v10896_v10 }
 0x5ab   :  { %5531 = vmatpush1.bf16.msra.mxu0 %v10347_v46  ;;  %5572 = vmatpush1.bf16.msra.mxu1 %v10352_v12 }
 0x5ac   :  { %5532 = vmatprep.subr.bf16.mxu0 %v10361_v31  ;;  %5573 = vmatprep.subr.bf16.mxu1 %v10366_v23 }
 0x5af   :  { %5533 = vmatpush1.bf16.msra.mxu0 %v10371_v27  ;;  %5574 = vmatpush1.bf16.msra.mxu1 %v10376_v33 }
 0x5b0   :  { %5534 = vmatprep.subr.bf16.mxu0 %v10385_v39  ;;  %5575 = vmatprep.subr.bf16.mxu1 %v10390_v1 }
 0x5b3   :  { %5535 = vmatpush1.bf16.msra.mxu0 %v10395_v40  ;;  %5576 = vmatpush1.bf16.msra.mxu1 %v10400_v43 }
 0x5b4   :  { %5536 = vmatprep.subr.bf16.mxu0 %v10409_v50  ;;  %5577 = vmatprep.subr.bf16.mxu1 %v10414_v51 }
 0x5b7   :  { %5537 = vmatpush1.bf16.msra.mxu0 %v10419_v54  ;;  %5578 = vmatpush1.bf16.msra.mxu1 %v10424_v61 }
 0x5b8   :  { %5538 = vmatprep.subr.bf16.mxu0 %v10433_v62  ;;  %5579 = vmatprep.subr.bf16.mxu1 %v10438_v4 }
 0x5bb   :  { %5539 = vmatpush1.bf16.msra.mxu0 %v10443_v41  ;;  %5580 = vmatpush1.bf16.msra.mxu1 %v10448_v21 }
 0x5bc   :  { %5540 = vmatprep.subr.bf16.mxu0 %v10457_v63  ;;  %5581 = vmatprep.subr.bf16.mxu1 %v10462_v26 }
 0x5bf   :  { %5541 = vmatpush1.bf16.msra.mxu0 %v10467_v35  ;;  %5582 = vmatpush1.bf16.msra.mxu1 %v10472_v24 }
 0x5c0   :  { %5542 = vmatprep.subr.bf16.mxu0 %v10481_v25  ;;  %5583 = vmatprep.subr.bf16.mxu1 %v10486_v0 }
 0x5c3   :  { %5543 = vmatpush1.bf16.msra.mxu0 %v10491_v2  ;;  %5584 = vmatpush1.bf16.msra.mxu1 %v10496_v32 }
 0x5c4   :  { %5544 = vmatprep.subr.bf16.mxu0 %v10505_v15  ;;  %5585 = vmatprep.subr.bf16.mxu1 %v10510_v20 }
 0x5c7   :  { %5545 = vmatpush1.bf16.msra.mxu0 %v10515_v19  ;;  %5586 = vmatpush1.bf16.msra.mxu1 %v10520_v11 }
 0x5c8   :  { %5814 = vmatprep.subr.bf16.mxu0 %v10529_v60  ;;  %5855 = vmatprep.subr.bf16.mxu1 %v10534_v49 }
 0x65c   :  { %v4956_v53 = vpop.f32.mrb[72].mxu0  ;;  %v4997_v52 = vpop.f32.mrb[72].mxu1 }
 0x65d   :  { %v5004_v57 = vadd.f32 %v4956_v53, %v11015_v55  ;;  %v5006_v58 = vadd.f32 %v4997_v52, %v11016_v48  ;;  %v4958_v18 = vpop.f32.mrb[73].mxu0  ;;  %v4999_v59 = vpop.f32.mrb[73].mxu1 }
 0x65e   :  { %v5005_v42 = vadd.f32 %v4958_v18, %v11017_v9  ;;  %v5007_v34 = vadd.f32 %v4999_v59, %v11018_v17  ;;  %v4960_v13 = vpop.f32.mrb[74].mxu0  ;;  %v5001_v7 = vpop.f32.mrb[74].mxu1  ;;  %v11019_v18 = vld [vmem:[#allocation42_spill] sm:$0xff]  ;;  %v11020_v9 = vld [vmem:[#allocation43_spill] sm:$0xff] }
 0x65f   :  { %v5292_v37 = vmul.f32 0.5, %v5004_v57  ;;  %v4961_v38 = vpop.f32.mrb[75].mxu0  ;;  %v5002_v47 = vpop.f32.mrb[75].mxu1  ;;  %v11021_v7 = vld [vmem:[#allocation44_spill] sm:$0xff] }
 0x660   :  { %v5296_v14 = vmul.f32 0.5, %v5005_v42  ;;  %v5301_v56 = vmul.f32 0.5, %v5007_v34  ;;  %v11022_v38 = vld [vmem:[#allocation45_spill] sm:$0xff] }
 0x661   :  { %7988 = vtanh.f32 %v5292_v37 }
 0x662   :  { %7990 = vtanh.f32 %v5296_v14 }
 0x663   :  { %7992 = vtanh.f32 %v5006_v58 }
 0x664   :  { %7994 = vtanh.f32 %v5301_v56 }
 0x66b   :  { %v7989_v3 = vpop.eup %7988 }
 0x66c   :  { %v7991_v45 = vpop.eup %7990  ;;  %v5294_v29 = vmul.f32 0.5, %v7989_v3 }
 0x66d   :  { %v5298_v44 = vmul.f32 0.5, %v7991_v45  ;;  %v7993_v8 = vpop.eup %7992 }
 0x66e   :  { %v5295_v28 = vadd.f32 0.5, %v5294_v29  ;;  %v7995_v55 = vpop.eup %7994 }
 0x66f   :  { %v5299_v5 = vadd.f32 0.5, %v5298_v44  ;;  %v5303_v57 = vmul.f32 0.5, %v7995_v55  ;;  %v10571_v55 = vld [vmem:[%s10856_s9 + $0x2c] ss:$16 sps:$4 sm:$0xff]  }
 0x670   :  { %v5306_v30 = vmul.f32 %v7993_v8, %v5295_v28  ;;  %v10553_v8 = vld [vmem:[%s10856_s9] ss:$16 sps:$4 sm:$0xff]  }
 0x671   :  { %v5305_v53 = vmul.f32 %v5299_v5, %v10283_v36  ;;  %v5304_v13 = vadd.f32 0.5, %v5303_v57  ;;  %v10558_v5 = vld [vmem:[%s10856_s9 + $0x8] ss:$16 sps:$4 sm:$0xff]   ;;  %v10578_v57 = vld [vmem:[%s10856_s9 + $0x20] ss:$16 sps:$4 sm:$0xff]  }
 0x673   :  { %v10543_v52 = vadd.f32 %v5306_v30, %v5305_v53  ;;  %v10566_v53 = vld [vmem:[%s10856_s9 + $0x24] ss:$16 sps:$4 sm:$0xff]  }
 0x675   :  { %7996 = vtanh.f32 %v10543_v52 }
 0x67c   :  { %v5240_v48 = vpop.f32.mrb[76].mxu0  ;;  %v5281_v58 = vpop.f32.mrb[76].mxu1 }
 0x67d   :  { %v5288_v59 = vadd.f32 %v5240_v48, %v11019_v18  ;;  %v5290_v42 = vadd.f32 %v5281_v58, %v11020_v9  ;;  %v5242_v17 = vpop.f32.mrb[77].mxu0  ;;  %v5283_v34 = vpop.f32.mrb[77].mxu1  ;;  %v10583_v48 = vld [vmem:[%s10856_s9 + $0x28] ss:$16 sps:$4 sm:$0xff]   ;;  %v10590_v58 = vld [vmem:[%s10856_s9 + $0x44] ss:$16 sps:$4 sm:$0xff]  }
 0x67e   :  { %v5289_v37 = vadd.f32 %v5242_v17, %v11021_v7  ;;  %v5291_v47 = vadd.f32 %v5283_v34, %v11022_v38  ;;  %v5244_v36 = vpop.f32.mrb[78].mxu0  ;;  %v5285_v14 = vpop.f32.mrb[78].mxu1  ;;  %v10595_v18 = vld [vmem:[%s10856_s9 + $0x4c] ss:$16 sps:$4 sm:$0xff]   ;;  %v10604_v9 = vld [vmem:[%s10856_s9 + $0x40] ss:$16 sps:$4 sm:$0xff]  }
 0x67f   :  { %v7997_v56 = vpop.eup %7996  ;;  %v5310_v3 = vmul.f32 0.5, %v5288_v59  ;;  %v5245_v45 = vpop.f32.mrb[79].mxu0  ;;  %v10616_v17 = vld [vmem:[%s10856_s9 + $0x64] ss:$16 sps:$4 sm:$0xff]   ;;  %v10621_v34 = vld [vmem:[%s10856_s9 + $0x6c] ss:$16 sps:$4 sm:$0xff]  }
 0x680   :  { %v5286_v29 = vpop.f32.mrb[79].mxu1  ;;  %v5309_v44 = vmul.f32 %v7997_v56, %v5304_v13  ;;  %v5314_v28 = vmul.f32 0.5, %v5289_v37  ;;  %v5319_v59 = vmul.f32 0.5, %v5291_v47  ;;  %v10628_v47 = vld [vmem:[%s10856_s9 + $0x60] ss:$16 sps:$4 sm:$0xff]  }
 0x681   :  { %7998 = vtanh.f32 %v5310_v3  ;;  %v10633_v36 = vld [vmem:[%s10856_s9 + $0x68] ss:$16 sps:$4 sm:$0xff]   ;;  %v10640_v56 = vld [vmem:[%s10856_s9 + $0x84] ss:$16 sps:$4 sm:$0xff]   ;;  %v10645_v3 = vld [vmem:[%s10856_s9 + $0x8c] ss:$16 sps:$4 sm:$0xff]  }
 0x682   :  { %7113 = vst [vmem:[%s10860_s12 + $0x28] sm:$0xff] %v5309_v44  ;;  %8000 = vtanh.f32 %v5314_v28  ;;  %v5337_v30 = vpack.c.bf16 %v5309_v44, %v5309_v44 }
 0x683   :  { %8002 = vtanh.f32 %v5290_v42  ;;  %v10609_v42 = vld [vmem:[%s10856_s9 + $0x48] ss:$16 sps:$4 sm:$0xff]  }
 0x684   :  { %5563 = vmatmul.mubr.bf16.vlgmr.msra.gmra.mrb[80].mxu0 %v5337_v30  ;;  %5604 = vmatmul.mubr.bf16.vlgmr.msra.gmra.mrb[80].mxu1 %v5337_v30  ;;  %8004 = vtanh.f32 %v5319_v59  ;;  %v10653_v30 = vld [vmem:[%s10856_s9 + $0x80] ss:$16 sps:$4 sm:$0xff]   ;;  %v10658_v59 = vld [vmem:[%s10856_s9 + $0x88] ss:$16 sps:$4 sm:$0xff]  }
 0x685   :  { %5815 = vmatpush1.bf16.msra.mxu0 %v10553_v8  ;;  %5856 = vmatpush1.bf16.msra.mxu1 %v10558_v5  ;;  %11023 = vst [vmem:[#allocation8_spill] sm:$0xff] %v10658_v59 }
 0x686   :  { %5816 = vmatprep.subr.bf16.mxu0 %v10566_v53  ;;  %5857 = vmatprep.subr.bf16.mxu1 %v10571_v55 }
 0x687   :  { %5846 = vmatprep.mubr.bf16.mxu0 %v10896_v10  ;;  %5887 = vmatprep.mubr.bf16.mxu1 %v10896_v10 }
 0x689   :  { %5817 = vmatpush1.bf16.msra.mxu0 %v10578_v57  ;;  %5858 = vmatpush1.bf16.msra.mxu1 %v10583_v48 }
 0x68a   :  { %5818 = vmatprep.subr.bf16.mxu0 %v10590_v58  ;;  %5859 = vmatprep.subr.bf16.mxu1 %v10595_v18 }
 0x68b   :  { %v7999_v13 = vpop.eup %7998 }
 0x68c   :  { %v8001_v7 = vpop.eup %8000  ;;  %v5312_v37 = vmul.f32 0.5, %v7999_v13  ;;  %v10670_v13 = vld [vmem:[%s10856_s9 + $0xac] ss:$16 sps:$4 sm:$0xff]  }
 0x68d   :  { %v5316_v38 = vmul.f32 0.5, %v8001_v7  ;;  %5819 = vmatpush1.bf16.msra.mxu0 %v10604_v9  ;;  %5860 = vmatpush1.bf16.msra.mxu1 %v10609_v42  ;;  %v8003_v45 = vpop.eup %8002  ;;  %11025 = vst [vmem:[#allocation58_spill] sm:$0xff] %v10670_v13 }
 0x68e   :  { %v5313_v14 = vadd.f32 0.5, %v5312_v37  ;;  %5820 = vmatprep.subr.bf16.mxu0 %v10616_v17  ;;  %5861 = vmatprep.subr.bf16.mxu1 %v10621_v34  ;;  %v10680_v37 = vld [vmem:[%s10856_s9 + $0xa0] ss:$16 sps:$4 sm:$0xff]  }
 0x68f   :  { %v5317_v29 = vadd.f32 0.5, %v5316_v38  ;;  %11026 = vst [vmem:[#allocation59_spill] sm:$0xff] %v10680_v37  ;;  %v10685_v38 = vld [vmem:[%s10856_s9 + $0xa8] ss:$16 sps:$4 sm:$0xff]  }
 0x690   :  { %v5324_v44 = vmul.f32 %v8003_v45, %v5313_v14  ;;  %11027 = vst [vmem:[#allocation60_spill] sm:$0xff] %v10685_v38  ;;  %v10692_v14 = vld [vmem:[%s10856_s9 + $0xc4] ss:$16 sps:$4 sm:$0xff]   ;;  %v10697_v45 = vld [vmem:[%s10856_s9 + $0xcc] ss:$16 sps:$4 sm:$0xff]  }
 0x691   :  { %v5323_v28 = vmul.f32 %v5317_v29, %v10312_v6  ;;  %5821 = vmatpush1.bf16.msra.mxu0 %v10628_v47  ;;  %5862 = vmatpush1.bf16.msra.mxu1 %v10633_v36  ;;  %v10665_v6 = vld [vmem:[%s10856_s9 + $0xa4] ss:$16 sps:$4 sm:$0xff]   ;;  %11028 = vst [vmem:[#allocation61_spill] sm:$0xff] %v10692_v14  ;;  %11029 = vst [vmem:[#allocation62_spill] sm:$0xff] %v10697_v45  ;;  %v8005_v29 = vpop.eup %8004 }
 0x692   :  { %5822 = vmatprep.subr.bf16.mxu0 %v10640_v56  ;;  %5863 = vmatprep.subr.bf16.mxu1 %v10645_v3  ;;  %11024 = vst [vmem:[#allocation9_spill] sm:$0xff] %v10665_v6 }
 0x693   :  { %v10672_v7 = vadd.f32 %v5324_v44, %v5323_v28  ;;  %v10704_v44 = vld [vmem:[%s10856_s9 + $0xc0] ss:$16 sps:$4 sm:$0xff]   ;;  %v10709_v28 = vld [vmem:[%s10856_s9 + $0xc8] ss:$16 sps:$4 sm:$0xff]  }
 0x694   :  { %11030 = vst [vmem:[#allocation63_spill] sm:$0xff] %v10709_v28 }
 0x695   :  { %8006 = vtanh.f32 %v10672_v7  ;;  %5823 = vmatpush1.bf16.msra.mxu0 %v10653_v30  ;;  %5864 = vmatpush1.bf16.msra.mxu1 %v10658_v59 }
 0x696   :  { %5824 = vmatprep.subr.bf16.mxu0 %v10665_v6  ;;  %5865 = vmatprep.subr.bf16.mxu1 %v10670_v13  ;;  %v5321_v13 = vmul.f32 0.5, %v8005_v29  ;;  %v10728_v29 = vld [vmem:[%s10856_s9 + $0xe0] ss:$16 sps:$4 sm:$0xff]  }
 0x699   :  { %5825 = vmatpush1.bf16.msra.mxu0 %v10680_v37  ;;  %5866 = vmatpush1.bf16.msra.mxu1 %v10685_v38  ;;  %v10716_v37 = vld [vmem:[%s10856_s9 + $0xe4] ss:$16 sps:$4 sm:$0xff]   ;;  %v10721_v38 = vld [vmem:[%s10856_s9 + $0xec] ss:$16 sps:$4 sm:$0xff]  }
 0x69a   :  { %5826 = vmatprep.subr.bf16.mxu0 %v10692_v14  ;;  %5867 = vmatprep.subr.bf16.mxu1 %v10697_v45  ;;  %v10733_v45 = vld [vmem:[%s10856_s9 + $0xe8] ss:$16 sps:$4 sm:$0xff]   ;;  %v5322_v14 = vadd.f32 0.5, %v5321_v13 }
 0x69d   :  { %5827 = vmatpush1.bf16.msra.mxu0 %v10704_v44  ;;  %5868 = vmatpush1.bf16.msra.mxu1 %v10709_v28 }
 0x69e   :  { %5828 = vmatprep.subr.bf16.mxu0 %v10716_v37  ;;  %5869 = vmatprep.subr.bf16.mxu1 %v10721_v38 }
 0x69f   :  { %v8007_v6 = vpop.eup %8006 }
 0x6a0   :  { %v5327_v59 = vmul.f32 %v8007_v6, %v5322_v14  ;;  %v11036_v6 = vld [vmem:[#allocation39_spill] sm:$0xff] }
 0x6a1   :  { %5829 = vmatpush1.bf16.msra.mxu0 %v10728_v29  ;;  %5870 = vmatpush1.bf16.msra.mxu1 %v10733_v45 }
 0x6a2   :  { %7114 = vst [vmem:[%s10861_s13 + $0x10] sm:$0xff] %v5327_v59  ;;  %v5621_v28 = vpack.c.bf16 %v5327_v59, %v5327_v59  ;;  %6138 = vmatprep.subr.bf16.mxu0 %v10337_v16  ;;  %6179 = vmatprep.subr.bf16.mxu1 %v10342_v22 }
 0x6a4   :  { %5847 = vmatmul.mubr.bf16.vlgmr.msra.gmra.mrb[84].mxu0 %v5621_v28  ;;  %5888 = vmatmul.mubr.bf16.vlgmr.msra.gmra.mrb[84].mxu1 %v5621_v28 }
 0x6a5   :  { %6139 = vmatpush1.bf16.msra.mxu0 %v10347_v46  ;;  %6180 = vmatpush1.bf16.msra.mxu1 %v10352_v12  ;;  %v11031_v46 = vld [vmem:[#allocation26_spill] sm:$0xff] }
 0x6a6   :  { %6140 = vmatprep.subr.bf16.mxu0 %v10361_v31  ;;  %6181 = vmatprep.subr.bf16.mxu1 %v10366_v23  ;;  %v11032_v31 = vld [vmem:[#allocation27_spill] sm:$0xff] }
 0x6a7   :  { %6170 = vmatprep.mubr.bf16.mxu0 %v10896_v10  ;;  %6211 = vmatprep.mubr.bf16.mxu1 %v10896_v10 }
 0x6a9   :  { %6141 = vmatpush1.bf16.msra.mxu0 %v10371_v27  ;;  %6182 = vmatpush1.bf16.msra.mxu1 %v10376_v33 }
 0x6aa   :  { %6142 = vmatprep.subr.bf16.mxu0 %v10385_v39  ;;  %6183 = vmatprep.subr.bf16.mxu1 %v10390_v1  ;;  %v11033_v39 = vld [vmem:[#allocation28_spill] sm:$0xff] }
 0x6ad   :  { %6143 = vmatpush1.bf16.msra.mxu0 %v10395_v40  ;;  %6184 = vmatpush1.bf16.msra.mxu1 %v10400_v43  ;;  %v11034_v40 = vld [vmem:[#allocation29_spill] sm:$0xff] }
 0x6ae   :  { %6144 = vmatprep.subr.bf16.mxu0 %v10409_v50  ;;  %6185 = vmatprep.subr.bf16.mxu1 %v10414_v51 }
 0x6b1   :  { %6145 = vmatpush1.bf16.msra.mxu0 %v10419_v54  ;;  %6186 = vmatpush1.bf16.msra.mxu1 %v10424_v61 }
 0x6b2   :  { %6146 = vmatprep.subr.bf16.mxu0 %v10433_v62  ;;  %6187 = vmatprep.subr.bf16.mxu1 %v10438_v4 }
 0x6b5   :  { %6147 = vmatpush1.bf16.msra.mxu0 %v10443_v41  ;;  %6188 = vmatpush1.bf16.msra.mxu1 %v10448_v21 }
 0x6b6   :  { %6148 = vmatprep.subr.bf16.mxu0 %v10457_v63  ;;  %6189 = vmatprep.subr.bf16.mxu1 %v10462_v26 }
 0x6b9   :  { %6149 = vmatpush1.bf16.msra.mxu0 %v10467_v35  ;;  %6190 = vmatpush1.bf16.msra.mxu1 %v10472_v24 }
 0x6ba   :  { %6150 = vmatprep.subr.bf16.mxu0 %v10481_v25  ;;  %6191 = vmatprep.subr.bf16.mxu1 %v10486_v0 }
 0x6bd   :  { %6151 = vmatpush1.bf16.msra.mxu0 %v10491_v2  ;;  %6192 = vmatpush1.bf16.msra.mxu1 %v10496_v32 }
 0x6be   :  { %6152 = vmatprep.subr.bf16.mxu0 %v10505_v15  ;;  %6193 = vmatprep.subr.bf16.mxu1 %v10510_v20 }
 0x6c1   :  { %6153 = vmatpush1.bf16.msra.mxu0 %v10515_v19  ;;  %6194 = vmatpush1.bf16.msra.mxu1 %v10520_v11 }
 0x6c2   :  { %6421 = vmatprep.subr.bf16.mxu0 %v10529_v60  ;;  %6462 = vmatprep.subr.bf16.mxu1 %v10534_v49  ;;  %v11035_v49 = vld [vmem:[#allocation38_spill] sm:$0xff] }
 0x757   :  { %v5564_v16 = vpop.f32.mrb[80].mxu0  ;;  %v5605_v22 = vpop.f32.mrb[80].mxu1 }
 0x758   :  { %v5612_v12 = vadd.f32 %v5564_v16, %v11031_v46  ;;  %v5614_v23 = vadd.f32 %v5605_v22, %v11032_v31  ;;  %v5566_v27 = vpop.f32.mrb[81].mxu0  ;;  %v5607_v33 = vpop.f32.mrb[81].mxu1  ;;  %v11037_v22 = vld [vmem:[#allocation40_spill] sm:$0xff] }
 0x759   :  { %v5613_v1 = vadd.f32 %v5566_v27, %v11033_v39  ;;  %v5615_v43 = vadd.f32 %v5607_v33, %v11034_v40  ;;  %v5568_v50 = vpop.f32.mrb[82].mxu0  ;;  %v5609_v51 = vpop.f32.mrb[82].mxu1 }
 0x75a   :  { %v5900_v54 = vmul.f32 0.5, %v5612_v12  ;;  %v5569_v61 = vpop.f32.mrb[83].mxu0  ;;  %v5610_v62 = vpop.f32.mrb[83].mxu1  ;;  %v11038_v12 = vld [vmem:[#allocation41_spill] sm:$0xff] }
 0x75b   :  { %v5904_v4 = vmul.f32 0.5, %v5613_v1  ;;  %v5909_v41 = vmul.f32 0.5, %v5615_v43 }
 0x75c   :  { %8008 = vtanh.f32 %v5900_v54 }
 0x75d   :  { %8010 = vtanh.f32 %v5904_v4 }
 0x75e   :  { %8012 = vtanh.f32 %v5614_v23 }
 0x75f   :  { %8014 = vtanh.f32 %v5909_v41 }
 0x766   :  { %v8009_v21 = vpop.eup %8008 }
 0x767   :  { %v8011_v63 = vpop.eup %8010  ;;  %v5902_v26 = vmul.f32 0.5, %v8009_v21 }
 0x768   :  { %v5906_v35 = vmul.f32 0.5, %v8011_v63  ;;  %v8013_v25 = vpop.eup %8012  ;;  %v11047_v63 = vld [vmem:[#allocation30_spill] sm:$0xff] }
 0x769   :  { %v5903_v24 = vadd.f32 0.5, %v5902_v26  ;;  %v8015_v20 = vpop.eup %8014 }
 0x76a   :  { %v5907_v0 = vadd.f32 0.5, %v5906_v35  ;;  %v5911_v19 = vmul.f32 0.5, %v8015_v20 }
 0x76b   :  { %v5914_v2 = vmul.f32 %v8013_v25, %v5903_v24  ;;  %v11049_v25 = vld [vmem:[#allocation32_spill] sm:$0xff] }
 0x76c   :  { %v5913_v32 = vmul.f32 %v5907_v0, %v10543_v52  ;;  %v5912_v16 = vadd.f32 0.5, %v5911_v19 }
 0x76e   :  { %v10783_v15 = vadd.f32 %v5914_v2, %v5913_v32 }
 0x770   :  { %8016 = vtanh.f32 %v10783_v15 }
 0x777   :  { %v5848_v11 = vpop.f32.mrb[84].mxu0  ;;  %v5889_v60 = vpop.f32.mrb[84].mxu1 }
 0x778   :  { %v5896_v59 = vadd.f32 %v5848_v11, %v11035_v49  ;;  %v5898_v13 = vadd.f32 %v5889_v60, %v11036_v6  ;;  %v5850_v14 = vpop.f32.mrb[85].mxu0  ;;  %v5891_v28 = vpop.f32.mrb[85].mxu1 }
 0x779   :  { %v5897_v46 = vadd.f32 %v5850_v14, %v11037_v22  ;;  %v5899_v31 = vadd.f32 %v5891_v28, %v11038_v12  ;;  %v5852_v52 = vpop.f32.mrb[86].mxu0  ;;  %v5893_v23 = vpop.f32.mrb[86].mxu1 }
 0x77a   :  { %v8017_v27 = vpop.eup %8016  ;;  %v5918_v33 = vmul.f32 0.5, %v5896_v59  ;;  %v5853_v39 = vpop.f32.mrb[87].mxu0 }
 0x77b   :  { %v5894_v1 = vpop.f32.mrb[87].mxu1  ;;  %v5917_v40 = vmul.f32 %v8017_v27, %v5912_v16  ;;  %v5922_v43 = vmul.f32 0.5, %v5897_v46  ;;  %v5927_v51 = vmul.f32 0.5, %v5899_v31  ;;  %v11051_v39 = vld [vmem:[#allocation34_spill] sm:$0xff] }
 0x77c   :  { %8018 = vtanh.f32 %v5918_v33 }
 0x77d   :  { %7179 = vst [vmem:[%s10860_s12 + $0x30] sm:$0xff] %v5917_v40  ;;  %8020 = vtanh.f32 %v5922_v43  ;;  %v5945_v50 = vpack.c.bf16 %v5917_v40, %v5917_v40  ;;  %v11052_v40 = vld [vmem:[#allocation35_spill] sm:$0xff] }
 0x77e   :  { %8022 = vtanh.f32 %v5898_v13 }
 0x77f   :  { %6171 = vmatmul.mubr.bf16.vlgmr.msra.gmra.mrb[88].mxu0 %v5945_v50  ;;  %6212 = vmatmul.mubr.bf16.vlgmr.msra.gmra.mrb[88].mxu1 %v5945_v50  ;;  %8024 = vtanh.f32 %v5927_v51 }
 0x780   :  { %6422 = vmatpush1.bf16.msra.mxu0 %v10553_v8  ;;  %6463 = vmatpush1.bf16.msra.mxu1 %v10558_v5 }
 0x781   :  { %6423 = vmatprep.subr.bf16.mxu0 %v10566_v53  ;;  %6464 = vmatprep.subr.bf16.mxu1 %v10571_v55 }
 0x782   :  { %6453 = vmatprep.mubr.bf16.mxu0 %v10896_v10  ;;  %6494 = vmatprep.mubr.bf16.mxu1 %v10896_v10 }
 0x784   :  { %6424 = vmatpush1.bf16.msra.mxu0 %v10578_v57  ;;  %6465 = vmatpush1.bf16.msra.mxu1 %v10583_v48 }
 0x785   :  { %6425 = vmatprep.subr.bf16.mxu0 %v10590_v58  ;;  %6466 = vmatprep.subr.bf16.mxu1 %v10595_v18  ;;  %v11039_v18 = vld [vmem:[#allocation8_spill] sm:$0xff] }
 0x786   :  { %v8019_v8 = vpop.eup %8018 }
 0x787   :  { %v8021_v54 = vpop.eup %8020  ;;  %v5920_v5 = vmul.f32 0.5, %v8019_v8 }
 0x788   :  { %v5924_v61 = vmul.f32 0.5, %v8021_v54  ;;  %6426 = vmatpush1.bf16.msra.mxu0 %v10604_v9  ;;  %6467 = vmatpush1.bf16.msra.mxu1 %v10609_v42  ;;  %v8023_v10 = vpop.eup %8022  ;;  %v11040_v9 = vld [vmem:[#allocation9_spill] sm:$0xff]  ;;  %v11041_v42 = vld [vmem:[#allocation58_spill] sm:$0xff]  ;;  %v11053_v54 = vld [vmem:[#allocation36_spill] sm:$0xff] }
 0x789   :  { %v5921_v53 = vadd.f32 0.5, %v5920_v5  ;;  %6427 = vmatprep.subr.bf16.mxu0 %v10616_v17  ;;  %6468 = vmatprep.subr.bf16.mxu1 %v10621_v34  ;;  %v8025_v17 = vpop.eup %8024  ;;  %v11042_v34 = vld [vmem:[#allocation59_spill] sm:$0xff] }
 0x78a   :  { %v5925_v55 = vadd.f32 0.5, %v5924_v61  ;;  %v11054_v61 = vld [vmem:[#allocation37_spill] sm:$0xff] }
 0x78b   :  { %v5932_v57 = vmul.f32 %v8023_v10, %v5921_v53 }
 0x78c   :  { %v5931_v48 = vmul.f32 %v5925_v55, %v10672_v7  ;;  %6428 = vmatpush1.bf16.msra.mxu0 %v10628_v47  ;;  %6469 = vmatpush1.bf16.msra.mxu1 %v10633_v36  ;;  %v11043_v47 = vld [vmem:[#allocation60_spill] sm:$0xff]  ;;  %v5929_v36 = vmul.f32 0.5, %v8025_v17  ;;  %v11046_v7 = vld [vmem:[#allocation63_spill] sm:$0xff] }
 0x78d   :  { %6429 = vmatprep.subr.bf16.mxu0 %v10640_v56  ;;  %6470 = vmatprep.subr.bf16.mxu1 %v10645_v3  ;;  %v11044_v56 = vld [vmem:[#allocation61_spill] sm:$0xff]  ;;  %v11045_v3 = vld [vmem:[#allocation62_spill] sm:$0xff] }
 0x78e   :  { %v10812_v58 = vadd.f32 %v5932_v57, %v5931_v48 }
 0x790   :  { %8026 = vtanh.f32 %v10812_v58  ;;  %6430 = vmatpush1.bf16.msra.mxu0 %v10653_v30  ;;  %6471 = vmatpush1.bf16.msra.mxu1 %v11039_v18  ;;  %v5930_v30 = vadd.f32 0.5, %v5929_v36 }
 0x791   :  { %6431 = vmatprep.subr.bf16.mxu0 %v11040_v9  ;;  %6472 = vmatprep.subr.bf16.mxu1 %v11041_v42 }
 0x794   :  { %6432 = vmatpush1.bf16.msra.mxu0 %v11042_v34  ;;  %6473 = vmatpush1.bf16.msra.mxu1 %v11043_v47 }
 0x795   :  { %6433 = vmatprep.subr.bf16.mxu0 %v11044_v56  ;;  %6474 = vmatprep.subr.bf16.mxu1 %v11045_v3 }
 0x798   :  { %6434 = vmatpush1.bf16.msra.mxu0 %v10704_v44  ;;  %6475 = vmatpush1.bf16.msra.mxu1 %v11046_v7 }
 0x799   :  { %6435 = vmatprep.subr.bf16.mxu0 %v10716_v37  ;;  %6476 = vmatprep.subr.bf16.mxu1 %v10721_v38  ;;  %v11048_v37 = vld [vmem:[#allocation31_spill] sm:$0xff] }
 0x79a   :  { %v8027_v62 = vpop.eup %8026 }
 0x79b   :  { %v5935_v4 = vmul.f32 %v8027_v62, %v5930_v30 }
 0x79c   :  { %6436 = vmatpush1.bf16.msra.mxu0 %v10728_v29  ;;  %6477 = vmatpush1.bf16.msra.mxu1 %v10733_v45  ;;  %v11050_v29 = vld [vmem:[#allocation33_spill] sm:$0xff] }
 0x79d   :  { %7180 = vst [vmem:[%s10861_s13 + $0x8] sm:$0xff] %v5935_v4  ;;  %v6228_v41 = vpack.c.bf16 %v5935_v4, %v5935_v4 }
 0x79f   :  { %6454 = vmatmul.mubr.bf16.vlgmr.msra.gmra.mrb[92].mxu0 %v6228_v41  ;;  %6495 = vmatmul.mubr.bf16.vlgmr.msra.gmra.mrb[92].mxu1 %v6228_v41 }
 0x852   :  { %v6172_v44 = vpop.f32.mrb[88].mxu0  ;;  %v6213_v21 = vpop.f32.mrb[88].mxu1 }
 0x853   :  { %v6220_v26 = vadd.f32 %v6172_v44, %v11047_v63  ;;  %v6222_v35 = vadd.f32 %v6213_v21, %v11048_v37  ;;  %v6174_v38 = vpop.f32.mrb[89].mxu0  ;;  %v6215_v24 = vpop.f32.mrb[89].mxu1 }
 0x854   :  { %v6221_v0 = vadd.f32 %v6174_v38, %v11049_v25  ;;  %v6223_v2 = vadd.f32 %v6215_v24, %v11050_v29  ;;  %v6176_v45 = vpop.f32.mrb[90].mxu0  ;;  %v6217_v32 = vpop.f32.mrb[90].mxu1 }
 0x855   :  { %v6507_v20 = vmul.f32 0.5, %v6220_v26  ;;  %v6177_v19 = vpop.f32.mrb[91].mxu0  ;;  %v6218_v11 = vpop.f32.mrb[91].mxu1 }
 0x856   :  { %v6511_v60 = vmul.f32 0.5, %v6221_v0  ;;  %v6516_v49 = vmul.f32 0.5, %v6223_v2 }
 0x857   :  { %8028 = vtanh.f32 %v6507_v20 }
 0x858   :  { %8030 = vtanh.f32 %v6511_v60 }
 0x859   :  { %8032 = vtanh.f32 %v6222_v35 }
 0x85a   :  { %8034 = vtanh.f32 %v6516_v49 }
 0x861   :  { %v8029_v59 = vpop.eup %8028 }
 0x862   :  { %v8031_v6 = vpop.eup %8030  ;;  %v6509_v13 = vmul.f32 0.5, %v8029_v59 }
 0x863   :  { %v6513_v14 = vmul.f32 0.5, %v8031_v6  ;;  %v8033_v16 = vpop.eup %8032 }
 0x864   :  { %v6510_v28 = vadd.f32 0.5, %v6509_v13  ;;  %v8035_v52 = vpop.eup %8034 }
 0x865   :  { %v6514_v22 = vadd.f32 0.5, %v6513_v14  ;;  %v6518_v23 = vmul.f32 0.5, %v8035_v52 }
 0x866   :  { %v6521_v46 = vmul.f32 %v8033_v16, %v6510_v28 }
 0x867   :  { %v6520_v12 = vmul.f32 %v6514_v22, %v10783_v15  ;;  %v6519_v8 = vadd.f32 0.5, %v6518_v23 }
 0x869   :  { %v6522_v31 = vadd.f32 %v6521_v46, %v6520_v12 }
 0x86b   :  { %8036 = vtanh.f32 %v6522_v31 }
 0x872   :  { %v6455_v27 = vpop.f32.mrb[92].mxu0  ;;  %v6496_v33 = vpop.f32.mrb[92].mxu1 }
 0x873   :  { %v6503_v1 = vadd.f32 %v6455_v27, %v11051_v39  ;;  %v6505_v43 = vadd.f32 %v6496_v33, %v11052_v40  ;;  %v6457_v50 = vpop.f32.mrb[93].mxu0  ;;  %v6498_v51 = vpop.f32.mrb[93].mxu1 }
 0x874   :  { %v6504_v5 = vadd.f32 %v6457_v50, %v11053_v54  ;;  %v6506_v53 = vadd.f32 %v6498_v51, %v11054_v61  ;;  %v6459_v10 = vpop.f32.mrb[94].mxu0  ;;  %v6500_v55 = vpop.f32.mrb[94].mxu1 }
 0x875   :  { %v8037_v15 = vpop.eup %8036  ;;  %v6525_v57 = vmul.f32 0.5, %v6503_v1  ;;  %v6460_v48 = vpop.f32.mrb[95].mxu0 }
 0x876   :  { %v6501_v18 = vpop.f32.mrb[95].mxu1  ;;  %v6524_v9 = vmul.f32 %v8037_v15, %v6519_v8  ;;  %v6529_v42 = vmul.f32 0.5, %v6504_v5  ;;  %v6534_v17 = vmul.f32 0.5, %v6506_v53 }
 0x877   :  { %8038 = vtanh.f32 %v6525_v57 }
 0x878   :  { %7245 = vst [vmem:[%s10860_s12 + $0x38] sm:$0xff] %v6524_v9  ;;  %8040 = vtanh.f32 %v6529_v42 }
 0x879   :  { %8042 = vtanh.f32 %v6505_v43 }
 0x87a   :  { %8044 = vtanh.f32 %v6534_v17 }
 0x881   :  { %v8039_v34 = vpop.eup %8038 }
 0x882   :  { %v8041_v47 = vpop.eup %8040  ;;  %v6527_v36 = vmul.f32 0.5, %v8039_v34 }
 0x883   :  { %v6531_v56 = vmul.f32 0.5, %v8041_v47  ;;  %v8043_v7 = vpop.eup %8042 }
 0x884   :  { %v6528_v3 = vadd.f32 0.5, %v6527_v36  ;;  %v8045_v44 = vpop.eup %8044 }
 0x885   :  { %v6532_v30 = vadd.f32 0.5, %v6531_v56  ;;  %v6536_v21 = vmul.f32 0.5, %v8045_v44 }
 0x886   :  { %v6539_v62 = vmul.f32 %v8043_v7, %v6528_v3 }
 0x887   :  { %v6538_v4 = vmul.f32 %v6532_v30, %v10812_v58  ;;  %v6537_v63 = vadd.f32 0.5, %v6536_v21 }
 0x889   :  { %v6540_v41 = vadd.f32 %v6539_v62, %v6538_v4 }
 0x88b   :  { %8046 = vtanh.f32 %v6540_v41 }
 0x895   :  { %v8047_v26 = vpop.eup %8046 }
 0x896   :  { %v6542_v37 = vmul.f32 %v8047_v26, %v6537_v63 }
 0x898   :  { %6545 = vst [vmem:[%s10861_s13] sm:$0xff] %v6542_v37 }

</bundles_post_ra>
